<compile_context>
chip_gen: v7x
topology: tpu7x:2x2x1
jax: 0.10.0
libtpu: 0.0.40
codegen_flags: <defaults>
</compile_context>

<pallas_src>
import functools

import jax
import jax.numpy as jnp
from jax.experimental import pallas as pl
from jax.experimental.pallas import tpu as pltpu


def _vmem_spec():
    # Whole-array blocks resident in VMEM (all shapes here are tiny).
    return pl.BlockSpec(memory_space=pltpu.MemorySpace.VMEM)


# ----------------------------------------------------------------------------
# Fused standard_block [+ optional trailing MaxPool2d(2,2)]:
#   Conv2d(3x3, pad=1, bias=False) -> BatchNorm2d (batch stats) -> ReLU [-> pool]
# ----------------------------------------------------------------------------
def _block_kernel(x_ref, w_ref, gamma_ref, beta_ref, o_ref, xp_ref, patch_ref,
                  *, eps, pool):
    # x_ref     : (N, H, W, Cin)        activation, NHWC
    # w_ref     : (9*Cin, Cout)         conv weight, taps flattened (dy, dx, cin)
    # gamma_ref : (1, Cout)             BN weight (ones)
    # beta_ref  : (1, Cout)             BN bias   (zeros)
    # o_ref     : (N, Hout, Wout, Cout)
    # xp_ref    : VMEM scratch (N, H+2, W+2, Cin)   in-kernel zero padding
    # patch_ref : VMEM scratch (N, H, W, 9*Cin)     im2col patch matrix
    N, H, W, Cin = x_ref.shape
    Cout = w_ref.shape[1]

    # ---- in-kernel "same" padding (no extra HBM array / XLA pad op) --------
    xp_ref[...] = jnp.zeros(xp_ref.shape, xp_ref.dtype)
    xp_ref[:, pl.ds(1, H), pl.ds(1, W), :] = x_ref[...]
    xp = xp_ref[...]

    # ---- im2col once: single matmul with K = 9*Cin -------------------------
    for dy in range(3):
        for dx in range(3):
            t = dy * 3 + dx
            patch_ref[:, :, :, pl.ds(t * Cin, Cin)] = xp[:, dy:dy + H, dx:dx + W, :]
    patches = patch_ref[...].reshape(N * H * W, 9 * Cin)
    acc = jnp.dot(patches, w_ref[...], preferred_element_type=jnp.float32)

    # ---- BatchNorm (training-mode batch stats, biased var), one pass -------
    inv_cnt = 1.0 / float(N * H * W)
    s = jnp.sum(acc, axis=0, keepdims=True)
    ss = jnp.sum(acc * acc, axis=0, keepdims=True)
    mean = s * inv_cnt
    var = ss * inv_cnt - mean * mean
    scale = jax.lax.rsqrt(var + eps) * gamma_ref[...]
    y = jnp.maximum((acc - mean) * scale + beta_ref[...], 0.0)

    # ---- optional fused MaxPool2d(kernel=2, stride=2) ----------------------
    if pool:
        y = y.reshape(N, H // 2, 2, W, Cout)
        y = jnp.maximum(y[:, :, 0], y[:, :, 1])          # (N, H/2, W, Cout)
        y = y.reshape(N, H // 2, W // 2, 2, Cout)
        y = jnp.maximum(y[:, :, :, 0], y[:, :, :, 1])    # (N, H/2, W/2, Cout)
    else:
        y = y.reshape(N, H, W, Cout)

    o_ref[...] = y


def conv_bn_relu(x_nhwc, w9, gamma, beta, *, eps=1e-5, pool=False):
    N, H, W, Cin = x_nhwc.shape
    Cout = w9.shape[1]
    if pool:
        assert H % 2 == 0 and W % 2 == 0, "fused maxpool assumes even H, W"
        Hout, Wout = H // 2, W // 2
    else:
        Hout, Wout = H, W
    return pl.pallas_call(
        functools.partial(_block_kernel, eps=eps, pool=pool),
        out_shape=jax.ShapeDtypeStruct((N, Hout, Wout, Cout), jnp.float32),
        in_specs=[_vmem_spec()] * 4,
        out_specs=_vmem_spec(),
        scratch_shapes=[
            pltpu.VMEM((N, H + 2, W + 2, Cin), jnp.float32),   # padded input
            pltpu.VMEM((N, H, W, 9 * Cin), jnp.float32),       # im2col patches
        ],
    )(x_nhwc, w9, gamma, beta)


# ----------------------------------------------------------------------------
# Standalone MaxPool2d(2,2) — only used for an 'M' that does not directly
# follow a standard_block (e.g. leading or repeated 'M').
# ----------------------------------------------------------------------------
def _maxpool2x2_kernel(x_ref, o_ref):
    N, H, W, C = x_ref.shape
    x = x_ref[...]
    x = x.reshape(N, H // 2, 2, W, C)
    x = jnp.maximum(x[:, :, 0], x[:, :, 1])
    x = x.reshape(N, H // 2, W // 2, 2, C)
    x = jnp.maximum(x[:, :, :, 0], x[:, :, :, 1])
    o_ref[...] = x


def maxpool2x2(x_nhwc):
    N, H, W, C = x_nhwc.shape
    return pl.pallas_call(
        _maxpool2x2_kernel,
        out_shape=jax.ShapeDtypeStruct((N, H // 2, W // 2, C), jnp.float32),
        in_specs=[_vmem_spec()],
        out_specs=_vmem_spec(),
    )(x_nhwc)


# ----------------------------------------------------------------------------
# Global average pool over (H, W) + Linear head, fused.
# ----------------------------------------------------------------------------
def _gap_fc_kernel(x_ref, w_ref, b_ref, o_ref, *, inv_hw):
    # x_ref: (N, H, W, C), w_ref: (C, num_classes) pre-transposed, b_ref: (1, K)
    N, H, W, C = x_ref.shape
    pooled = jnp.sum(x_ref[...].reshape(N, H * W, C), axis=1) * inv_hw   # (N, C)
    o_ref[...] = (jnp.dot(pooled, w_ref[...], preferred_element_type=jnp.float32)
                  + b_ref[...])


def gap_fc(x_nhwc, w_cxk, b_1xk):
    N, H, W, _ = x_nhwc.shape
    K = w_cxk.shape[1]
    return pl.pallas_call(
        functools.partial(_gap_fc_kernel, inv_hw=1.0 / float(H * W)),
        out_shape=jax.ShapeDtypeStruct((N, K), jnp.float32),
        in_specs=[_vmem_spec()] * 3,
        out_specs=_vmem_spec(),
    )(x_nhwc, w_cxk, b_1xk)


# ----------------------------------------------------------------------------
# Parameter init (deterministic, mirrors PLAIN.__init__); all layout
# transposes are done once here, not per forward call.
# ----------------------------------------------------------------------------
def init_plain_params(key, conv_config, num_classes, in_channels=3):
    layers = []
    last_n = in_channels
    for n in conv_config:
        if n == 'M':
            layers.append(('pool', None))
        else:
            key, kw = jax.random.split(key)
            std = (2.0 / (3 * 3 * n)) ** 0.5          # normal_(0, sqrt(2/(k*k*out)))
            w = std * jax.random.normal(kw, (n, last_n, 3, 3), jnp.float32)
            # (Cout, Cin, 3, 3) -> (3, 3, Cin, Cout) -> (9*Cin, Cout)
            w9 = jnp.transpose(w, (2, 3, 1, 0)).reshape(9 * last_n, n)
            gamma = jnp.ones((1, n), jnp.float32)      # BN default weight = 1
            beta = jnp.zeros((1, n), jnp.float32)      # BN default bias = 0
            layers.append(('block', {'w9': w9, 'gamma': gamma, 'beta': beta}))
            last_n = n
    key, kw, kb = jax.random.split(key, 3)
    bound = 1.0 / (last_n ** 0.5)                      # torch Linear default init
    w_fc = jax.random.uniform(kw, (num_classes, last_n), jnp.float32, -bound, bound)
    b_fc = jax.random.uniform(kb, (num_classes,), jnp.float32, -bound, bound)
    return {'layers': layers,
            'fc': {'w_t': jnp.transpose(w_fc),          # (C, num_classes)
                   'b': b_fc.reshape(1, -1)}}


# ----------------------------------------------------------------------------
# Forward pass (matches PLAIN.forward)
# ----------------------------------------------------------------------------
def plain_forward(params, x_nchw, eps=1e-5):
    x = jnp.transpose(x_nchw, (0, 2, 3, 1)).astype(jnp.float32)  # NCHW -> NHWC
    layers = params['layers']
    i = 0
    while i < len(layers):
        kind, p = layers[i]
        if kind == 'pool':
            x = maxpool2x2(x)
            i += 1
        else:
            # standard_block returns (relu(bn(conv)), conv); the net keeps [0].
            # If the next config entry is 'M', fuse the maxpool into this kernel.
            fuse_pool = (i + 1 < len(layers) and layers[i + 1][0] == 'pool'
                         and x.shape[1] % 2 == 0 and x.shape[2] % 2 == 0)
            x = conv_bn_relu(x, p['w9'], p['gamma'], p['beta'],
                             eps=eps, pool=fuse_pool)
            i += 2 if fuse_pool else 1
    fc = params['fc']
    # x.mean(2).mean(2) in NCHW == mean over (H, W); then Linear.
    return gap_fc(x, fc['w_t'], fc['b'])


if __name__ == "__main__":
    root = jax.random.PRNGKey(0)
    k_params, k_x = jax.random.split(root)

    conv_config = [4, 'M', 8]       # two standard_blocks with a maxpool in between
    num_classes = 10
    params = init_plain_params(k_params, conv_config, num_classes, in_channels=3)

    x = jax.random.normal(k_x, (2, 3, 16, 16), jnp.float32)  # NCHW like PyTorch

    out = plain_forward(params, x)
    out = jax.block_until_ready(out)
    assert out.shape == (2, num_classes), out.shape
    assert bool(jnp.all(jnp.isfinite(out)))
    print("KERNEL_OK")
</pallas_src>

<mosaic_0001>
module attributes {stable_mosaic.version = 11 : i64} {
  func.func @_block_kernel(%arg0: memref<2x16x16x3xf32, #tpu.memory_space<vmem>>, %arg1: memref<27x4xf32, #tpu.memory_space<vmem>>, %arg2: memref<1x4xf32, #tpu.memory_space<vmem>>, %arg3: memref<1x4xf32, #tpu.memory_space<vmem>>, %arg4: memref<2x8x8x4xf32, #tpu.memory_space<vmem>>, %arg5: memref<2x18x18x3xf32, #tpu.memory_space<vmem>>, %arg6: memref<2x16x16x27xf32, #tpu.memory_space<vmem>>) attributes {dimension_semantics = [], scalar_prefetch = 0 : i64, scratch_operands = 2 : i64, tpu.core_type = #tpu.core_type<tc>} {
    %cst = arith.constant 0.000000e+00 : f32
    %0 = vector.broadcast %cst : f32 to vector<2x18x18x3xf32>
    %c0 = arith.constant 0 : index
    %c0_0 = arith.constant 0 : index
    %c0_1 = arith.constant 0 : index
    %c0_2 = arith.constant 0 : index
    %1 = vector.load %arg5[%c0, %c0_0, %c0_1, %c0_2] : memref<2x18x18x3xf32, #tpu.memory_space<vmem>>, vector<2x18x18x3xf32>
    tpu.vector_store %arg5[%c0, %c0_0, %c0_1, %c0_2], %0 {strides = array<i32>} : memref<2x18x18x3xf32, #tpu.memory_space<vmem>>, vector<2x18x18x3xf32>,
    %c0_3 = arith.constant 0 : index
    %c0_4 = arith.constant 0 : index
    %c0_5 = arith.constant 0 : index
    %c0_6 = arith.constant 0 : index
    %2 = vector.load %arg0[%c0_3, %c0_4, %c0_5, %c0_6] : memref<2x16x16x3xf32, #tpu.memory_space<vmem>>, vector<2x16x16x3xf32>
    %c0_7 = arith.constant 0 : index
    %c1 = arith.constant 1 : index
    %c1_8 = arith.constant 1 : index
    %c0_9 = arith.constant 0 : index
    %3 = vector.load %arg5[%c0_7, %c1, %c1_8, %c0_9] : memref<2x18x18x3xf32, #tpu.memory_space<vmem>>, vector<2x16x16x3xf32>
    tpu.vector_store %arg5[%c0_7, %c1, %c1_8, %c0_9], %2 {strides = array<i32>} : memref<2x18x18x3xf32, #tpu.memory_space<vmem>>, vector<2x16x16x3xf32>,
    %c0_10 = arith.constant 0 : index
    %c0_11 = arith.constant 0 : index
    %c0_12 = arith.constant 0 : index
    %c0_13 = arith.constant 0 : index
    %4 = vector.load %arg5[%c0_10, %c0_11, %c0_12, %c0_13] : memref<2x18x18x3xf32, #tpu.memory_space<vmem>>, vector<2x18x18x3xf32>
    %5 = vector.extract_strided_slice %4 {offsets = [0, 0, 0, 0], sizes = [2, 16, 16, 3], strides = [1, 1, 1, 1]} : vector<2x18x18x3xf32> to vector<2x16x16x3xf32>
    %c0_14 = arith.constant 0 : index
    %c0_15 = arith.constant 0 : index
    %c0_16 = arith.constant 0 : index
    %c0_17 = arith.constant 0 : index
    %6 = vector.load %arg6[%c0_14, %c0_15, %c0_16, %c0_17] : memref<2x16x16x27xf32, #tpu.memory_space<vmem>>, vector<2x16x16x3xf32>
    tpu.vector_store %arg6[%c0_14, %c0_15, %c0_16, %c0_17], %5 {strides = array<i32>} : memref<2x16x16x27xf32, #tpu.memory_space<vmem>>, vector<2x16x16x3xf32>,
    %7 = vector.extract_strided_slice %4 {offsets = [0, 0, 1, 0], sizes = [2, 16, 16, 3], strides = [1, 1, 1, 1]} : vector<2x18x18x3xf32> to vector<2x16x16x3xf32>
    %c0_18 = arith.constant 0 : index
    %c0_19 = arith.constant 0 : index
    %c0_20 = arith.constant 0 : index
    %c3 = arith.constant 3 : index
    %8 = vector.load %arg6[%c0_18, %c0_19, %c0_20, %c3] : memref<2x16x16x27xf32, #tpu.memory_space<vmem>>, vector<2x16x16x3xf32>
    tpu.vector_store %arg6[%c0_18, %c0_19, %c0_20, %c3], %7 {strides = array<i32>} : memref<2x16x16x27xf32, #tpu.memory_space<vmem>>, vector<2x16x16x3xf32>,
    %9 = vector.extract_strided_slice %4 {offsets = [0, 0, 2, 0], sizes = [2, 16, 16, 3], strides = [1, 1, 1, 1]} : vector<2x18x18x3xf32> to vector<2x16x16x3xf32>
    %c0_21 = arith.constant 0 : index
    %c0_22 = arith.constant 0 : index
    %c0_23 = arith.constant 0 : index
    %c6 = arith.constant 6 : index
    %10 = vector.load %arg6[%c0_21, %c0_22, %c0_23, %c6] : memref<2x16x16x27xf32, #tpu.memory_space<vmem>>, vector<2x16x16x3xf32>
    tpu.vector_store %arg6[%c0_21, %c0_22, %c0_23, %c6], %9 {strides = array<i32>} : memref<2x16x16x27xf32, #tpu.memory_space<vmem>>, vector<2x16x16x3xf32>,
    %11 = vector.extract_strided_slice %4 {offsets = [0, 1, 0, 0], sizes = [2, 16, 16, 3], strides = [1, 1, 1, 1]} : vector<2x18x18x3xf32> to vector<2x16x16x3xf32>
    %c0_24 = arith.constant 0 : index
    %c0_25 = arith.constant 0 : index
    %c0_26 = arith.constant 0 : index
    %c9 = arith.constant 9 : index
    %12 = vector.load %arg6[%c0_24, %c0_25, %c0_26, %c9] : memref<2x16x16x27xf32, #tpu.memory_space<vmem>>, vector<2x16x16x3xf32>
    tpu.vector_store %arg6[%c0_24, %c0_25, %c0_26, %c9], %11 {strides = array<i32>} : memref<2x16x16x27xf32, #tpu.memory_space<vmem>>, vector<2x16x16x3xf32>,
    %13 = vector.extract_strided_slice %4 {offsets = [0, 1, 1, 0], sizes = [2, 16, 16, 3], strides = [1, 1, 1, 1]} : vector<2x18x18x3xf32> to vector<2x16x16x3xf32>
    %c0_27 = arith.constant 0 : index
    %c0_28 = arith.constant 0 : index
    %c0_29 = arith.constant 0 : index
    %c12 = arith.constant 12 : index
    %14 = vector.load %arg6[%c0_27, %c0_28, %c0_29, %c12] : memref<2x16x16x27xf32, #tpu.memory_space<vmem>>, vector<2x16x16x3xf32>
    tpu.vector_store %arg6[%c0_27, %c0_28, %c0_29, %c12], %13 {strides = array<i32>} : memref<2x16x16x27xf32, #tpu.memory_space<vmem>>, vector<2x16x16x3xf32>,
    %15 = vector.extract_strided_slice %4 {offsets = [0, 1, 2, 0], sizes = [2, 16, 16, 3], strides = [1, 1, 1, 1]} : vector<2x18x18x3xf32> to vector<2x16x16x3xf32>
    %c0_30 = arith.constant 0 : index
    %c0_31 = arith.constant 0 : index
    %c0_32 = arith.constant 0 : index
    %c15 = arith.constant 15 : index
    %16 = vector.load %arg6[%c0_30, %c0_31, %c0_32, %c15] : memref<2x16x16x27xf32, #tpu.memory_space<vmem>>, vector<2x16x16x3xf32>
    tpu.vector_store %arg6[%c0_30, %c0_31, %c0_32, %c15], %15 {strides = array<i32>} : memref<2x16x16x27xf32, #tpu.memory_space<vmem>>, vector<2x16x16x3xf32>,
    %17 = vector.extract_strided_slice %4 {offsets = [0, 2, 0, 0], sizes = [2, 16, 16, 3], strides = [1, 1, 1, 1]} : vector<2x18x18x3xf32> to vector<2x16x16x3xf32>
    %c0_33 = arith.constant 0 : index
    %c0_34 = arith.constant 0 : index
    %c0_35 = arith.constant 0 : index
    %c18 = arith.constant 18 : index
    %18 = vector.load %arg6[%c0_33, %c0_34, %c0_35, %c18] : memref<2x16x16x27xf32, #tpu.memory_space<vmem>>, vector<2x16x16x3xf32>
    tpu.vector_store %arg6[%c0_33, %c0_34, %c0_35, %c18], %17 {strides = array<i32>} : memref<2x16x16x27xf32, #tpu.memory_space<vmem>>, vector<2x16x16x3xf32>,
    %19 = vector.extract_strided_slice %4 {offsets = [0, 2, 1, 0], sizes = [2, 16, 16, 3], strides = [1, 1, 1, 1]} : vector<2x18x18x3xf32> to vector<2x16x16x3xf32>
    %c0_36 = arith.constant 0 : index
    %c0_37 = arith.constant 0 : index
    %c0_38 = arith.constant 0 : index
    %c21 = arith.constant 21 : index
    %20 = vector.load %arg6[%c0_36, %c0_37, %c0_38, %c21] : memref<2x16x16x27xf32, #tpu.memory_space<vmem>>, vector<2x16x16x3xf32>
    tpu.vector_store %arg6[%c0_36, %c0_37, %c0_38, %c21], %19 {strides = array<i32>} : memref<2x16x16x27xf32, #tpu.memory_space<vmem>>, vector<2x16x16x3xf32>,
    %21 = vector.extract_strided_slice %4 {offsets = [0, 2, 2, 0], sizes = [2, 16, 16, 3], strides = [1, 1, 1, 1]} : vector<2x18x18x3xf32> to vector<2x16x16x3xf32>
    %c0_39 = arith.constant 0 : index
    %c0_40 = arith.constant 0 : index
    %c0_41 = arith.constant 0 : index
    %c24 = arith.constant 24 : index
    %22 = vector.load %arg6[%c0_39, %c0_40, %c0_41, %c24] : memref<2x16x16x27xf32, #tpu.memory_space<vmem>>, vector<2x16x16x3xf32>
    tpu.vector_store %arg6[%c0_39, %c0_40, %c0_41, %c24], %21 {strides = array<i32>} : memref<2x16x16x27xf32, #tpu.memory_space<vmem>>, vector<2x16x16x3xf32>,
    %c0_42 = arith.constant 0 : index
    %c0_43 = arith.constant 0 : index
    %c0_44 = arith.constant 0 : index
    %c0_45 = arith.constant 0 : index
    %23 = vector.load %arg6[%c0_42, %c0_43, %c0_44, %c0_45] : memref<2x16x16x27xf32, #tpu.memory_space<vmem>>, vector<2x16x16x27xf32>
    %24 = vector.shape_cast %23 : vector<2x16x16x27xf32> to vector<512x27xf32>
    %c0_46 = arith.constant 0 : index
    %c0_47 = arith.constant 0 : index
    %25 = vector.load %arg1[%c0_46, %c0_47] : memref<27x4xf32, #tpu.memory_space<vmem>>, vector<27x4xf32>
    %cst_48 = arith.constant dense<0.000000e+00> : vector<512x4xf32>
    %26 = tpu.matmul %24, %25, %cst_48 {dimension_numbers = #tpu.dot_dimension_numbers<[1], [0], [0], [1], [0, 0, 1, 1], [], []>} : vector<512x27xf32>, vector<27x4xf32>, vector<512x4xf32> -> vector<512x4xf32>
    %cst_49 = arith.constant dense<0.000000e+00> : vector<4xf32>
    %27 = vector.multi_reduction <add>, %26, %cst_49 [0] : vector<512x4xf32> to vector<4xf32>
    %28 = vector.shape_cast %27 : vector<4xf32> to vector<1x4xf32>
    %29 = arith.mulf %26, %26 : vector<512x4xf32>
    %cst_50 = arith.constant dense<0.000000e+00> : vector<4xf32>
    %30 = vector.multi_reduction <add>, %29, %cst_50 [0] : vector<512x4xf32> to vector<4xf32>
    %31 = vector.shape_cast %30 : vector<4xf32> to vector<1x4xf32>
    %cst_51 = arith.constant 0.001953125 : f32
    %32 = vector.broadcast %cst_51 : f32 to vector<1x4xf32>
    %33 = arith.mulf %28, %32 : vector<1x4xf32>
    %cst_52 = arith.constant 0.001953125 : f32
    %34 = vector.broadcast %cst_52 : f32 to vector<1x4xf32>
    %35 = arith.mulf %31, %34 : vector<1x4xf32>
    %36 = arith.mulf %33, %33 : vector<1x4xf32>
    %37 = arith.subf %35, %36 : vector<1x4xf32>
    %cst_53 = arith.constant 9.99999974E-6 : f32
    %38 = vector.broadcast %cst_53 : f32 to vector<1x4xf32>
    %39 = arith.addf %37, %38 : vector<1x4xf32>
    %40 = math.rsqrt %39 : vector<1x4xf32>
    %c0_54 = arith.constant 0 : index
    %c0_55 = arith.constant 0 : index
    %41 = vector.load %arg2[%c0_54, %c0_55] : memref<1x4xf32, #tpu.memory_space<vmem>>, vector<1x4xf32>
    %42 = arith.mulf %40, %41 : vector<1x4xf32>
    %43 = vector.broadcast %33 : vector<1x4xf32> to vector<512x4xf32>
    %44 = arith.subf %26, %43 : vector<512x4xf32>
    %45 = vector.broadcast %42 : vector<1x4xf32> to vector<512x4xf32>
    %46 = arith.mulf %44, %45 : vector<512x4xf32>
    %c0_56 = arith.constant 0 : index
    %c0_57 = arith.constant 0 : index
    %47 = vector.load %arg3[%c0_56, %c0_57] : memref<1x4xf32, #tpu.memory_space<vmem>>, vector<1x4xf32>
    %48 = vector.broadcast %47 : vector<1x4xf32> to vector<512x4xf32>
    %49 = arith.addf %46, %48 : vector<512x4xf32>
    %cst_58 = arith.constant 0.000000e+00 : f32
    %50 = vector.broadcast %cst_58 : f32 to vector<512x4xf32>
    %51 = arith.maximumf %49, %50 : vector<512x4xf32>
    %52 = vector.shape_cast %51 : vector<512x4xf32> to vector<2x8x2x16x4xf32>
    %53 = vector.extract_strided_slice %52 {offsets = [0, 0, 0, 0, 0], sizes = [2, 8, 1, 16, 4], strides = [1, 1, 1, 1, 1]} : vector<2x8x2x16x4xf32> to vector<2x8x1x16x4xf32>
    %54 = vector.shape_cast %53 : vector<2x8x1x16x4xf32> to vector<2x8x16x4xf32>
    %55 = vector.extract_strided_slice %52 {offsets = [0, 0, 1, 0, 0], sizes = [2, 8, 1, 16, 4], strides = [1, 1, 1, 1, 1]} : vector<2x8x2x16x4xf32> to vector<2x8x1x16x4xf32>
    %56 = vector.shape_cast %55 : vector<2x8x1x16x4xf32> to vector<2x8x16x4xf32>
    %57 = arith.maximumf %54, %56 : vector<2x8x16x4xf32>
    %58 = vector.shape_cast %57 : vector<2x8x16x4xf32> to vector<2x8x8x2x4xf32>
    %59 = vector.extract_strided_slice %58 {offsets = [0, 0, 0, 0, 0], sizes = [2, 8, 8, 1, 4], strides = [1, 1, 1, 1, 1]} : vector<2x8x8x2x4xf32> to vector<2x8x8x1x4xf32>
    %60 = vector.shape_cast %59 : vector<2x8x8x1x4xf32> to vector<2x8x8x4xf32>
    %61 = vector.extract_strided_slice %58 {offsets = [0, 0, 0, 1, 0], sizes = [2, 8, 8, 1, 4], strides = [1, 1, 1, 1, 1]} : vector<2x8x8x2x4xf32> to vector<2x8x8x1x4xf32>
    %62 = vector.shape_cast %61 : vector<2x8x8x1x4xf32> to vector<2x8x8x4xf32>
    %63 = arith.maximumf %60, %62 : vector<2x8x8x4xf32>
    %c0_59 = arith.constant 0 : index
    %c0_60 = arith.constant 0 : index
    %c0_61 = arith.constant 0 : index
    %c0_62 = arith.constant 0 : index
    %64 = vector.load %arg4[%c0_59, %c0_60, %c0_61, %c0_62] : memref<2x8x8x4xf32, #tpu.memory_space<vmem>>, vector<2x8x8x4xf32>
    tpu.vector_store %arg4[%c0_59, %c0_60, %c0_61, %c0_62], %63 {strides = array<i32>} : memref<2x8x8x4xf32, #tpu.memory_space<vmem>>, vector<2x8x8x4xf32>,
    return
  }
}

</mosaic_0001>

<bundles_post_ra>
// kernel: tpu_custom_call.1
= control target key start
LH: loop header
LB: loop body
LE: loop exit
PB: predicated region body
PF: predicated region fallthrough
CT: control target
= control target key end

     0   :  { %vm20_vm0 = vcmask 17408   ;;  %vm17_vm1 = vcmask 23552   ;;  %v7132_v0 = vmov 0.0   ;;  %s7133_s5 = smov 3   ;;  %vm816_vm2 = vcmask 40984   ;;  %s7134_s9 = smov 6   ;;  %s13597_s0 = inlined_call_operand.vmem [shape: f32[2,16,16,3], index: 0, kind: input, shape index: {}]   ;;  %s13598_s1 = inlined_call_operand.vmem [shape: f32[27,4], index: 1, kind: input, shape index: {}]   ;;  %s13599_s2 = inlined_call_operand.vmem [shape: f32[1,4], index: 2, kind: input, shape index: {}]   ;;  %s13600_s3 = inlined_call_operand.vmem [shape: f32[1,4], index: 3, kind: input, shape index: {}]   ;;  %s13601_s4 = inlined_call_operand.vmem [shape: f32[2,8,8,4], index: 4, kind: output, shape index: {}]  }
   0x1   :  { %21 = vst.msk [vmem:[#allocation2 + $0x10] sm:$0x3] %vm20_vm0, %v7132_v0  ;;  %24 = vst.msk [vmem:[#allocation2 + $0x28] sm:$0x3] %vm20_vm0, %v7132_v0  ;;  %v127_v1 = vld [vmem:[%s13597_s0] sm:$0xff]  ;;  %v128_v2 = vld [vmem:[%s13597_s0 + $0x8] sm:$0xff] }
   0x2   :  { %27 = vst.msk [vmem:[#allocation2 + $0x40] sm:$0x3] %vm20_vm0, %v7132_v0  ;;  %30 = vst.msk [vmem:[#allocation2 + $0x58] sm:$0x3] %vm20_vm0, %v7132_v0  ;;  %v129_v3 = vld [vmem:[%s13597_s0 + $0x10] sm:$0xff]  ;;  %v130_v4 = vld [vmem:[%s13597_s0 + $0x18] sm:$0xff] }
   0x3   :  { %33 = vst.msk [vmem:[#allocation2 + $0x70] sm:$0x3] %vm20_vm0, %v7132_v0  ;;  %36 = vst.msk [vmem:[#allocation2 + $0x88] sm:$0x3] %vm20_vm0, %v7132_v0  ;;  %v131_v5 = vld [vmem:[%s13597_s0 + $0x20] sm:$0xff]  ;;  %v132_v6 = vld [vmem:[%s13597_s0 + $0x28] sm:$0xff] }
   0x4   :  { %39 = vst.msk [vmem:[#allocation2 + $0xa0] sm:$0x3] %vm20_vm0, %v7132_v0  ;;  %42 = vst.msk [vmem:[#allocation2 + $0xb8] sm:$0x3] %vm20_vm0, %v7132_v0  ;;  %v133_v7 = vld [vmem:[%s13597_s0 + $0x30] sm:$0xff]  ;;  %v134_v8 = vld [vmem:[%s13597_s0 + $0x38] sm:$0xff] }
   0x5   :  { %45 = vst.msk [vmem:[#allocation2 + $0xd0] sm:$0x3] %vm20_vm0, %v7132_v0  ;;  %48 = vst.msk [vmem:[#allocation2 + $0xe8] sm:$0x3] %vm20_vm0, %v7132_v0  ;;  %v135_v9 = vld [vmem:[%s13597_s0 + $0x40] sm:$0xff]  ;;  %v136_v10 = vld [vmem:[%s13597_s0 + $0x48] sm:$0xff] }
   0x6   :  { %51 = vst.msk [vmem:[#allocation2 + $0x100] sm:$0x3] %vm20_vm0, %v7132_v0  ;;  %54 = vst.msk [vmem:[#allocation2 + $0x118] sm:$0x3] %vm20_vm0, %v7132_v0  ;;  %v137_v11 = vld [vmem:[%s13597_s0 + $0x50] sm:$0xff]  ;;  %v138_v12 = vld [vmem:[%s13597_s0 + $0x58] sm:$0xff] }
   0x7   :  { %57 = vst.msk [vmem:[#allocation2 + $0x130] sm:$0x3] %vm20_vm0, %v7132_v0  ;;  %60 = vst.msk [vmem:[#allocation2 + $0x148] sm:$0x3] %vm20_vm0, %v7132_v0  ;;  %v139_v13 = vld [vmem:[%s13597_s0 + $0x60] sm:$0xff]  ;;  %v140_v14 = vld [vmem:[%s13597_s0 + $0x68] sm:$0xff] }
   0x8   :  { %63 = vst.msk [vmem:[#allocation2 + $0x160] sm:$0x3] %vm20_vm0, %v7132_v0  ;;  %66 = vst.msk [vmem:[#allocation2 + $0x178] sm:$0x3] %vm20_vm0, %v7132_v0  ;;  %v141_v15 = vld [vmem:[%s13597_s0 + $0x70] sm:$0xff]  ;;  %v142_v16 = vld [vmem:[%s13597_s0 + $0x78] sm:$0xff] }
   0x9   :  { %69 = vst.msk [vmem:[#allocation2 + $0x190] sm:$0x3] %vm20_vm0, %v7132_v0  ;;  %72 = vst.msk [vmem:[#allocation2 + $0x1a8] sm:$0x3] %vm20_vm0, %v7132_v0  ;;  %v143_v17 = vld [vmem:[%s13597_s0 + $0x80] sm:$0xff]  ;;  %v144_v18 = vld [vmem:[%s13597_s0 + $0x88] sm:$0xff] }
   0xa   :  { %75 = vst.msk [vmem:[#allocation2 + $0x1c0] sm:$0x3] %vm20_vm0, %v7132_v0  ;;  %78 = vst.msk [vmem:[#allocation2 + $0x1d8] sm:$0x3] %vm20_vm0, %v7132_v0  ;;  %v145_v19 = vld [vmem:[%s13597_s0 + $0x90] sm:$0xff]  ;;  %v146_v20 = vld [vmem:[%s13597_s0 + $0x98] sm:$0xff] }
   0xb   :  { %81 = vst.msk [vmem:[#allocation2 + $0x1f0] sm:$0x3] %vm20_vm0, %v7132_v0  ;;  %84 = vst.msk [vmem:[#allocation2 + $0x208] sm:$0x3] %vm20_vm0, %v7132_v0  ;;  %v147_v21 = vld [vmem:[%s13597_s0 + $0xa0] sm:$0xff]  ;;  %v148_v47 = vld [vmem:[%s13597_s0 + $0xa8] sm:$0xff] }
   0xc   :  { %87 = vst.msk [vmem:[#allocation2 + $0x220] sm:$0x3] %vm20_vm0, %v7132_v0  ;;  %90 = vst.msk [vmem:[#allocation2 + $0x238] sm:$0x3] %vm20_vm0, %v7132_v0  ;;  %v7465_v22 = vld [vmem:[#allocation2 + $0x10] sm:$0x3] }
   0xd   :  { %93 = vst.msk [vmem:[#allocation2 + $0x250] sm:$0x3] %vm20_vm0, %v7132_v0  ;;  %96 = vst.msk [vmem:[#allocation2 + $0x268] sm:$0x3] %vm20_vm0, %v7132_v0  ;;  %528 = vrot.lane.b32.xlu1 %v7465_v22, %s7133_s5  ;;  %v149_v48 = vld [vmem:[%s13597_s0 + $0xb0] sm:$0xff]  ;;  %v150_v50 = vld [vmem:[%s13597_s0 + $0xb8] sm:$0xff] }
   0xe   :  { %99 = vst.msk [vmem:[#allocation2 + $0x280] sm:$0x3] %vm20_vm0, %v7132_v0  ;;  %102 = vst.msk [vmem:[#allocation2 + $0x298] sm:$0x3] %vm20_vm0, %v7132_v0  ;;  %v151_v51 = vld [vmem:[%s13597_s0 + $0xc0] sm:$0xff]  ;;  %v152_v52 = vld [vmem:[%s13597_s0 + $0xc8] sm:$0xff] }
   0xf   :  { %105 = vst.msk [vmem:[#allocation2 + $0x2b0] sm:$0x3] %vm20_vm0, %v7132_v0  ;;  %108 = vst.msk [vmem:[#allocation2 + $0x2c8] sm:$0x3] %vm20_vm0, %v7132_v0  ;;  %v153_v53 = vld [vmem:[%s13597_s0 + $0xd0] sm:$0xff]  ;;  %v154_v54 = vld [vmem:[%s13597_s0 + $0xd8] sm:$0xff] }
  0x10   :  { %111 = vst.msk [vmem:[#allocation2 + $0x2e0] sm:$0x3] %vm20_vm0, %v7132_v0  ;;  %114 = vst.msk [vmem:[#allocation2 + $0x2f8] sm:$0x3] %vm20_vm0, %v7132_v0  ;;  %v155_v56 = vld [vmem:[%s13597_s0 + $0xe0] sm:$0xff]  ;;  %v156_v57 = vld [vmem:[%s13597_s0 + $0xe8] sm:$0xff] }
  0x11   :  { %117 = vst.msk [vmem:[#allocation2 + $0x310] sm:$0x3] %vm20_vm0, %v7132_v0  ;;  %120 = vst.msk [vmem:[#allocation2 + $0x328] sm:$0x3] %vm20_vm0, %v7132_v0  ;;  %v159_v59 = vld [vmem:[%s13597_s0 + $0x100] sm:$0xff]  ;;  %v160_v60 = vld [vmem:[%s13597_s0 + $0x108] sm:$0xff] }
  0x12   :  { %123 = vst.msk [vmem:[#allocation2 + $0x340] sm:$0x3] %vm20_vm0, %v7132_v0  ;;  %126 = vst.msk [vmem:[#allocation2 + $0x358] sm:$0x3] %vm20_vm0, %v7132_v0  ;;  %v161_v61 = vld [vmem:[%s13597_s0 + $0x110] sm:$0xff]  ;;  %v162_v62 = vld [vmem:[%s13597_s0 + $0x118] sm:$0xff] }
  0x13   :  { %18 = vst.msk [vmem:[#allocation2] sm:$0xff] %vm17_vm1, %v7132_v0  ;;  %19 = vst.msk [vmem:[#allocation2 + $0x8] sm:$0xff] %vm17_vm1, %v7132_v0  ;;  %v163_v63 = vld [vmem:[%s13597_s0 + $0x120] sm:$0xff]  ;;  %vm812_vm3 = vcmask 48153   ;;  %vm814_vm4 = vcmask 48152   ;;  %vm1199_vm5 = vcmask 72754  }
  0x14   :  { %22 = vst.msk [vmem:[#allocation2 + $0x18] sm:$0xff] %vm17_vm1, %v7132_v0  ;;  %23 = vst.msk [vmem:[#allocation2 + $0x20] sm:$0xff] %vm17_vm1, %v7132_v0  ;;  %vm1201_vm6 = vcmask 72752   ;;  %vm1203_vm7 = vcmask 66608   ;;  %vm1494_vm8 = vcmask 97352   ;;  %s7136_s17 = smov 12  }
  0x15   :  { %25 = vst.msk [vmem:[#allocation2 + $0x30] sm:$0xff] %vm17_vm1, %v7132_v0  ;;  %26 = vst.msk [vmem:[#allocation2 + $0x38] sm:$0xff] %vm17_vm1, %v7132_v0  ;;  %vm1849_vm9 = vcmask 121953   ;;  %vm1851_vm10 = vcmask 121952   ;;  %vm1853_vm11 = vcmask 114784   ;;  %s7137_s18 = smov 15  }
  0x16   :  { %28 = vst.msk [vmem:[#allocation2 + $0x48] sm:$0xff] %vm17_vm1, %v7132_v0  ;;  %29 = vst.msk [vmem:[#allocation2 + $0x50] sm:$0xff] %vm17_vm1, %v7132_v0  ;;  %vm2236_vm12 = vcmask 146554   ;;  %vm2238_vm13 = vcmask 146552   ;;  %vm2240_vm14 = vcmask 140408   ;;  %s7138_s19 = smov 18  }
  0x17   :  { %31 = vst.msk [vmem:[#allocation2 + $0x60] sm:$0xff] %vm17_vm1, %v7132_v0  ;;  %32 = vst.msk [vmem:[#allocation2 + $0x68] sm:$0xff] %vm17_vm1, %v7132_v0  ;;  %s7139_s24 = smov 21   ;;  %vm3633_vm15 = vcmask 1042432   ;;  %vm7140_vm0 = vmmov 1  }
  0x18   :  { %34 = vst.msk [vmem:[#allocation2 + $0x78] sm:$0xff] %vm17_vm1, %v7132_v0  ;;  %35 = vst.msk [vmem:[#allocation2 + $0x80] sm:$0xff] %vm17_vm1, %v7132_v0 }
  0x19   :  { %37 = vst.msk [vmem:[#allocation2 + $0x90] sm:$0xff] %vm17_vm1, %v7132_v0  ;;  %38 = vst.msk [vmem:[#allocation2 + $0x98] sm:$0xff] %vm17_vm1, %v7132_v0 }
  0x1a   :  { %40 = vst.msk [vmem:[#allocation2 + $0xa8] sm:$0xff] %vm17_vm1, %v7132_v0  ;;  %41 = vst.msk [vmem:[#allocation2 + $0xb0] sm:$0xff] %vm17_vm1, %v7132_v0  ;;  %v7467_v23 = vld [vmem:[#allocation2] sm:$0xff]  ;;  %v7469_v24 = vld [vmem:[#allocation2 + $0x8] sm:$0xff] }
  0x1b   :  { %43 = vst.msk [vmem:[#allocation2 + $0xc0] sm:$0xff] %vm17_vm1, %v7132_v0  ;;  %44 = vst.msk [vmem:[#allocation2 + $0xc8] sm:$0xff] %vm17_vm1, %v7132_v0  ;;  %524 = vrot.lane.b32.xlu0 %v7467_v23, %s7133_s5 }
  0x1c   :  { %46 = vst.msk [vmem:[#allocation2 + $0xd8] sm:$0xff] %vm17_vm1, %v7132_v0  ;;  %47 = vst.msk [vmem:[#allocation2 + $0xe0] sm:$0xff] %vm17_vm1, %v7132_v0 }
  0x1d   :  { %49 = vst.msk [vmem:[#allocation2 + $0xf0] sm:$0xff] %vm17_vm1, %v7132_v0  ;;  %50 = vst.msk [vmem:[#allocation2 + $0xf8] sm:$0xff] %vm17_vm1, %v7132_v0 }
  0x1e   :  { %52 = vst.msk [vmem:[#allocation2 + $0x108] sm:$0xff] %vm17_vm1, %v7132_v0  ;;  %53 = vst.msk [vmem:[#allocation2 + $0x110] sm:$0xff] %vm17_vm1, %v7132_v0 }
  0x1f   :  { %55 = vst.msk [vmem:[#allocation2 + $0x120] sm:$0xff] %vm17_vm1, %v7132_v0  ;;  %56 = vst.msk [vmem:[#allocation2 + $0x128] sm:$0xff] %vm17_vm1, %v7132_v0  ;;  %526 = vrot.lane.b32.xlu0 %v7469_v24, %s7133_s5 }
  0x20   :  { %58 = vst.msk [vmem:[#allocation2 + $0x138] sm:$0xff] %vm17_vm1, %v7132_v0  ;;  %59 = vst.msk [vmem:[#allocation2 + $0x140] sm:$0xff] %vm17_vm1, %v7132_v0 }
  0x21   :  { %61 = vst.msk [vmem:[#allocation2 + $0x150] sm:$0xff] %vm17_vm1, %v7132_v0  ;;  %62 = vst.msk [vmem:[#allocation2 + $0x158] sm:$0xff] %vm17_vm1, %v7132_v0 }
  0x22   :  { %64 = vst.msk [vmem:[#allocation2 + $0x168] sm:$0xff] %vm17_vm1, %v7132_v0  ;;  %65 = vst.msk [vmem:[#allocation2 + $0x170] sm:$0xff] %vm17_vm1, %v7132_v0 }
  0x23   :  { %67 = vst.msk [vmem:[#allocation2 + $0x180] sm:$0xff] %vm17_vm1, %v7132_v0  ;;  %68 = vst.msk [vmem:[#allocation2 + $0x188] sm:$0xff] %vm17_vm1, %v7132_v0 }
  0x24   :  { %70 = vst.msk [vmem:[#allocation2 + $0x198] sm:$0xff] %vm17_vm1, %v7132_v0  ;;  %71 = vst.msk [vmem:[#allocation2 + $0x1a0] sm:$0xff] %vm17_vm1, %v7132_v0 }
  0x25   :  { %73 = vst.msk [vmem:[#allocation2 + $0x1b0] sm:$0xff] %vm17_vm1, %v7132_v0  ;;  %74 = vst.msk [vmem:[#allocation2 + $0x1b8] sm:$0xff] %vm17_vm1, %v7132_v0 }
  0x26   :  { %76 = vst.msk [vmem:[#allocation2 + $0x1c8] sm:$0xff] %vm17_vm1, %v7132_v0  ;;  %77 = vst.msk [vmem:[#allocation2 + $0x1d0] sm:$0xff] %vm17_vm1, %v7132_v0 }
  0x27   :  { %79 = vst.msk [vmem:[#allocation2 + $0x1e0] sm:$0xff] %vm17_vm1, %v7132_v0  ;;  %80 = vst.msk [vmem:[#allocation2 + $0x1e8] sm:$0xff] %vm17_vm1, %v7132_v0 }
  0x28   :  { %82 = vst.msk [vmem:[#allocation2 + $0x1f8] sm:$0xff] %vm17_vm1, %v7132_v0  ;;  %83 = vst.msk [vmem:[#allocation2 + $0x200] sm:$0xff] %vm17_vm1, %v7132_v0 }
  0x29   :  { %85 = vst.msk [vmem:[#allocation2 + $0x210] sm:$0xff] %vm17_vm1, %v7132_v0  ;;  %86 = vst.msk [vmem:[#allocation2 + $0x218] sm:$0xff] %vm17_vm1, %v7132_v0 }
  0x2a   :  { %88 = vst.msk [vmem:[#allocation2 + $0x228] sm:$0xff] %vm17_vm1, %v7132_v0  ;;  %89 = vst.msk [vmem:[#allocation2 + $0x230] sm:$0xff] %vm17_vm1, %v7132_v0 }
  0x2b   :  { %91 = vst.msk [vmem:[#allocation2 + $0x240] sm:$0xff] %vm17_vm1, %v7132_v0  ;;  %92 = vst.msk [vmem:[#allocation2 + $0x248] sm:$0xff] %vm17_vm1, %v7132_v0 }
  0x2c   :  { %94 = vst.msk [vmem:[#allocation2 + $0x258] sm:$0xff] %vm17_vm1, %v7132_v0  ;;  %95 = vst.msk [vmem:[#allocation2 + $0x260] sm:$0xff] %vm17_vm1, %v7132_v0  ;;  %v7608_v55 = vld [vmem:[#allocation2 + $0x1b0] sm:$0xff]  ;;  %v7620_v58 = vld [vmem:[#allocation2 + $0x1b8] sm:$0xff] }
  0x2d   :  { %97 = vst.msk [vmem:[#allocation2 + $0x270] sm:$0xff] %vm17_vm1, %v7132_v0  ;;  %98 = vst.msk [vmem:[#allocation2 + $0x278] sm:$0xff] %vm17_vm1, %v7132_v0 }
  0x2e   :  { %100 = vst.msk [vmem:[#allocation2 + $0x288] sm:$0xff] %vm17_vm1, %v7132_v0  ;;  %101 = vst.msk [vmem:[#allocation2 + $0x290] sm:$0xff] %vm17_vm1, %v7132_v0 }
  0x2f   :  { %103 = vst.msk [vmem:[#allocation2 + $0x2a0] sm:$0xff] %vm17_vm1, %v7132_v0  ;;  %104 = vst.msk [vmem:[#allocation2 + $0x2a8] sm:$0xff] %vm17_vm1, %v7132_v0 }
  0x30   :  { %106 = vst.msk [vmem:[#allocation2 + $0x2b8] sm:$0xff] %vm17_vm1, %v7132_v0  ;;  %107 = vst.msk [vmem:[#allocation2 + $0x2c0] sm:$0xff] %vm17_vm1, %v7132_v0 }
  0x31   :  { %109 = vst.msk [vmem:[#allocation2 + $0x2d0] sm:$0xff] %vm17_vm1, %v7132_v0  ;;  %110 = vst.msk [vmem:[#allocation2 + $0x2d8] sm:$0xff] %vm17_vm1, %v7132_v0 }
  0x32   :  { %112 = vst.msk [vmem:[#allocation2 + $0x2e8] sm:$0xff] %vm17_vm1, %v7132_v0  ;;  %113 = vst.msk [vmem:[#allocation2 + $0x2f0] sm:$0xff] %vm17_vm1, %v7132_v0 }
  0x33   :  { %115 = vst.msk [vmem:[#allocation2 + $0x300] sm:$0xff] %vm17_vm1, %v7132_v0  ;;  %116 = vst.msk [vmem:[#allocation2 + $0x308] sm:$0xff] %vm17_vm1, %v7132_v0 }
  0x34   :  { %118 = vst.msk [vmem:[#allocation2 + $0x318] sm:$0xff] %vm17_vm1, %v7132_v0  ;;  %119 = vst.msk [vmem:[#allocation2 + $0x320] sm:$0xff] %vm17_vm1, %v7132_v0 }
  0x35   :  { %121 = vst.msk [vmem:[#allocation2 + $0x330] sm:$0xff] %vm17_vm1, %v7132_v0  ;;  %122 = vst.msk [vmem:[#allocation2 + $0x338] sm:$0xff] %vm17_vm1, %v7132_v0 }
  0x36   :  { %124 = vst.msk [vmem:[#allocation2 + $0x348] sm:$0xff] %vm17_vm1, %v7132_v0  ;;  %125 = vst.msk [vmem:[#allocation2 + $0x350] sm:$0xff] %vm17_vm1, %v7132_v0 }
  0x37   :  { %192 = vst.msk [vmem:[#allocation2 + $0x19] sm:$0xff] %vm17_vm1, %v127_v1  ;;  %193 = vst.msk [vmem:[#allocation2 + $0x21] sm:$0xff] %vm17_vm1, %v128_v2  ;;  %v164_v1 = vld [vmem:[%s13597_s0 + $0x128] sm:$0xff]  ;;  %v165_v2 = vld [vmem:[%s13597_s0 + $0x130] sm:$0xff] }
  0x38   :  { %194 = vst.msk [vmem:[#allocation2 + $0x31] sm:$0xff] %vm17_vm1, %v129_v3  ;;  %195 = vst.msk [vmem:[#allocation2 + $0x39] sm:$0xff] %vm17_vm1, %v130_v4  ;;  %v166_v3 = vld [vmem:[%s13597_s0 + $0x138] sm:$0xff]  ;;  %v167_v4 = vld [vmem:[%s13597_s0 + $0x140] sm:$0xff] }
  0x39   :  { %196 = vst.msk [vmem:[#allocation2 + $0x49] sm:$0xff] %vm17_vm1, %v131_v5  ;;  %197 = vst.msk [vmem:[#allocation2 + $0x51] sm:$0xff] %vm17_vm1, %v132_v6  ;;  %v168_v5 = vld [vmem:[%s13597_s0 + $0x148] sm:$0xff] }
  0x3a   :  { %198 = vst.msk [vmem:[#allocation2 + $0x61] sm:$0xff] %vm17_vm1, %v133_v7  ;;  %199 = vst.msk [vmem:[#allocation2 + $0x69] sm:$0xff] %vm17_vm1, %v134_v8 }
  0x3b   :  { %200 = vst.msk [vmem:[#allocation2 + $0x79] sm:$0xff] %vm17_vm1, %v135_v9  ;;  %201 = vst.msk [vmem:[#allocation2 + $0x81] sm:$0xff] %vm17_vm1, %v136_v10 }
  0x3c   :  { %202 = vst.msk [vmem:[#allocation2 + $0x91] sm:$0xff] %vm17_vm1, %v137_v11  ;;  %203 = vst.msk [vmem:[#allocation2 + $0x99] sm:$0xff] %vm17_vm1, %v138_v12 }
  0x3d   :  { %204 = vst.msk [vmem:[#allocation2 + $0xa9] sm:$0xff] %vm17_vm1, %v139_v13  ;;  %205 = vst.msk [vmem:[#allocation2 + $0xb1] sm:$0xff] %vm17_vm1, %v140_v14 }
  0x3e   :  { %206 = vst.msk [vmem:[#allocation2 + $0xc1] sm:$0xff] %vm17_vm1, %v141_v15  ;;  %207 = vst.msk [vmem:[#allocation2 + $0xc9] sm:$0xff] %vm17_vm1, %v142_v16  ;;  %v7482_v25 = vld [vmem:[#allocation2 + $0x18] sm:$0xff]  ;;  %v7484_v26 = vld [vmem:[#allocation2 + $0x20] sm:$0xff] }
  0x3f   :  { %208 = vst.msk [vmem:[#allocation2 + $0xd9] sm:$0xff] %vm17_vm1, %v143_v17  ;;  %209 = vst.msk [vmem:[#allocation2 + $0xe1] sm:$0xff] %vm17_vm1, %v144_v18  ;;  %v7490_v27 = vld [vmem:[#allocation2 + $0x30] sm:$0xff]  ;;  %v7492_v28 = vld [vmem:[#allocation2 + $0x38] sm:$0xff]  ;;  %530 = vrot.lane.b32.xlu1 %v7482_v25, %s7133_s5  ;;  %532 = vrot.lane.b32.xlu0 %v7484_v26, %s7133_s5 }
  0x40   :  { %210 = vst.msk [vmem:[#allocation2 + $0xf1] sm:$0xff] %vm17_vm1, %v145_v19  ;;  %211 = vst.msk [vmem:[#allocation2 + $0xf9] sm:$0xff] %vm17_vm1, %v146_v20  ;;  %v7498_v29 = vld [vmem:[#allocation2 + $0x48] sm:$0xff]  ;;  %v7500_v30 = vld [vmem:[#allocation2 + $0x50] sm:$0xff] }
  0x41   :  { %212 = vst.msk [vmem:[#allocation2 + $0x109] sm:$0xff] %vm17_vm1, %v147_v21  ;;  %364 = vst.msk [vmem:[#allocation3] sm:$0xff] %vm17_vm1, %v7467_v23  ;;  %v7506_v31 = vld [vmem:[#allocation2 + $0x60] sm:$0xff]  ;;  %v7508_v32 = vld [vmem:[#allocation2 + $0x68] sm:$0xff] }
  0x42   :  { %365 = vst.msk [vmem:[#allocation3 + $0x8] sm:$0xff] %vm17_vm1, %v7469_v24  ;;  %14041 = vst [vmem:[#allocation4_spill] sm:$0xff] %v7484_v26  ;;  %v7518_v33 = vld [vmem:[#allocation2 + $0x78] sm:$0xff]  ;;  %v7520_v34 = vld [vmem:[#allocation2 + $0x80] sm:$0xff] }
  0x43   :  { %366 = vst.msk [vmem:[#allocation3 + $0x10] sm:$0xff] %vm17_vm1, %v7482_v25  ;;  %367 = vst.msk [vmem:[#allocation3 + $0x18] sm:$0xff] %vm17_vm1, %v7484_v26  ;;  %v7522_v35 = vld [vmem:[#allocation2 + $0x28] sm:$0x3]  ;;  %v7528_v36 = vld [vmem:[#allocation2 + $0x90] sm:$0xff]  ;;  %536 = vrot.lane.b32.xlu0 %v7490_v27, %s7133_s5 }
  0x44   :  { %14042 = vst [vmem:[#allocation5_spill] sm:$0xff] %v7492_v28  ;;  %368 = vst.msk [vmem:[#allocation3 + $0x20] sm:$0xff] %vm17_vm1, %v7490_v27  ;;  %v7530_v37 = vld [vmem:[#allocation2 + $0x98] sm:$0xff]  ;;  %v7536_v38 = vld [vmem:[#allocation2 + $0xa8] sm:$0xff]  ;;  %534 = vrot.lane.b32.xlu1 %v7522_v35, %s7133_s5 }
  0x45   :  { %369 = vst.msk [vmem:[#allocation3 + $0x28] sm:$0xff] %vm17_vm1, %v7492_v28  ;;  %14043 = vst [vmem:[#allocation6_spill] sm:$0xff] %v7500_v30  ;;  %v7538_v39 = vld [vmem:[#allocation2 + $0xb0] sm:$0xff]  ;;  %v7544_v40 = vld [vmem:[#allocation2 + $0xc0] sm:$0xff] }
  0x46   :  { %370 = vst.msk [vmem:[#allocation3 + $0x30] sm:$0xff] %vm17_vm1, %v7498_v29  ;;  %371 = vst.msk [vmem:[#allocation3 + $0x38] sm:$0xff] %vm17_vm1, %v7500_v30  ;;  %v7546_v41 = vld [vmem:[#allocation2 + $0xc8] sm:$0xff]  ;;  %v7556_v42 = vld [vmem:[#allocation2 + $0xd8] sm:$0xff] }
  0x47   :  { %14044 = vst [vmem:[#allocation7_spill] sm:$0xff] %v7508_v32  ;;  %372 = vst.msk [vmem:[#allocation3 + $0x40] sm:$0xff] %vm17_vm1, %v7506_v31  ;;  %v7558_v43 = vld [vmem:[#allocation2 + $0xe0] sm:$0xff]  ;;  %v7564_v44 = vld [vmem:[#allocation2 + $0xf0] sm:$0xff] }
  0x48   :  { %373 = vst.msk [vmem:[#allocation3 + $0x48] sm:$0xff] %vm17_vm1, %v7508_v32  ;;  %14045 = vst [vmem:[#allocation8_spill] sm:$0xff] %v7520_v34  ;;  %v7566_v45 = vld [vmem:[#allocation2 + $0xf8] sm:$0xff]  ;;  %v7572_v46 = vld [vmem:[#allocation2 + $0x108] sm:$0xff]  ;;  %538 = vrot.lane.b32.xlu1 %v7492_v28, %s7133_s5 }
  0x49   :  { %374 = vst.msk [vmem:[#allocation3 + $0x50] sm:$0xff] %vm17_vm1, %v7518_v33  ;;  %375 = vst.msk [vmem:[#allocation3 + $0x58] sm:$0xff] %vm17_vm1, %v7520_v34  ;;  %v7580_v49 = vld [vmem:[#allocation2 + $0x40] sm:$0x3]  ;;  %v7647_v0 = vld [vmem:[#allocation2 + $0x58] sm:$0x3] }
  0x4a   :  { %14046 = vst [vmem:[#allocation9_spill] sm:$0xff] %v7528_v36  ;;  %14047 = vst [vmem:[#allocation10_spill] sm:$0xff] %v7530_v37  ;;  %540 = vrot.lane.b32.xlu0 %v7580_v49, %s7133_s5  ;;  %v7732_v20 = vld [vmem:[#allocation2 + $0x70] sm:$0x3] }
  0x4b   :  { %376 = vst.msk [vmem:[#allocation3 + $0x60] sm:$0xff] %vm17_vm1, %v7528_v36  ;;  %377 = vst.msk [vmem:[#allocation3 + $0x68] sm:$0xff] %vm17_vm1, %v7530_v37 }
  0x4c   :  { %14048 = vst [vmem:[#allocation11_spill] sm:$0xff] %v7536_v38  ;;  %14049 = vst [vmem:[#allocation12_spill] sm:$0xff] %v7538_v39  ;;  %542 = vrot.lane.b32.xlu1 %v7498_v29, %s7133_s5 }
  0x4d   :  { %378 = vst.msk [vmem:[#allocation3 + $0x70] sm:$0xff] %vm17_vm1, %v7536_v38  ;;  %379 = vst.msk [vmem:[#allocation3 + $0x78] sm:$0xff] %vm17_vm1, %v7538_v39 }
  0x4e   :  { %14050 = vst [vmem:[#allocation13_spill] sm:$0xff] %v7544_v40  ;;  %14051 = vst [vmem:[#allocation14_spill] sm:$0xff] %v7546_v41  ;;  %544 = vrot.lane.b32.xlu0 %v7500_v30, %s7133_s5 }
  0x4f   :  { %380 = vst.msk [vmem:[#allocation3 + $0x80] sm:$0xff] %vm17_vm1, %v7544_v40  ;;  %381 = vst.msk [vmem:[#allocation3 + $0x88] sm:$0xff] %vm17_vm1, %v7546_v41 }
  0x50   :  { %14052 = vst [vmem:[#allocation15_spill] sm:$0xff] %v7556_v42  ;;  %14053 = vst [vmem:[#allocation16_spill] sm:$0xff] %v7558_v43  ;;  %546 = vrot.lane.b32.xlu1 %v7647_v0, %s7133_s5 }
  0x51   :  { %382 = vst.msk [vmem:[#allocation3 + $0x90] sm:$0xff] %vm17_vm1, %v7556_v42  ;;  %383 = vst.msk [vmem:[#allocation3 + $0x98] sm:$0xff] %vm17_vm1, %v7558_v43 }
  0x52   :  { %14054 = vst [vmem:[#allocation17_spill] sm:$0xff] %v7566_v45  ;;  %384 = vst.msk [vmem:[#allocation3 + $0xa0] sm:$0xff] %vm17_vm1, %v7564_v44  ;;  %548 = vrot.lane.b32.xlu0 %v7506_v31, %s7133_s5 }
  0x53   :  { %385 = vst.msk [vmem:[#allocation3 + $0xa8] sm:$0xff] %vm17_vm1, %v7566_v45  ;;  %14055 = vst [vmem:[#allocation18_spill] sm:$0xff] %v7572_v46 }
  0x54   :  { %386 = vst.msk [vmem:[#allocation3 + $0xb0] sm:$0xff] %vm17_vm1, %v7572_v46  ;;  %213 = vst.msk [vmem:[#allocation2 + $0x111] sm:$0xff] %vm17_vm1, %v148_v47  ;;  %550 = vrot.lane.b32.xlu1 %v7508_v32, %s7133_s5 }
  0x55   :  { %214 = vst.msk [vmem:[#allocation2 + $0x121] sm:$0xff] %vm17_vm1, %v149_v48  ;;  %215 = vst.msk [vmem:[#allocation2 + $0x129] sm:$0xff] %vm17_vm1, %v150_v50 }
  0x56   :  { %216 = vst.msk [vmem:[#allocation2 + $0x139] sm:$0xff] %vm17_vm1, %v151_v51  ;;  %217 = vst.msk [vmem:[#allocation2 + $0x141] sm:$0xff] %vm17_vm1, %v152_v52  ;;  %v169_v52 = vld [vmem:[%s13597_s0 + $0x150] sm:$0xff]  ;;  %552 = vrot.lane.b32.xlu0 %v7732_v20, %s7133_s5 }
  0x57   :  { %218 = vst.msk [vmem:[#allocation2 + $0x151] sm:$0xff] %vm17_vm1, %v153_v53  ;;  %219 = vst.msk [vmem:[#allocation2 + $0x159] sm:$0xff] %vm17_vm1, %v154_v54  ;;  %v7763_v53 = vld [vmem:[#allocation2 + $0x88] sm:$0x3]  ;;  %v170_v54 = vld [vmem:[%s13597_s0 + $0x158] sm:$0xff] }
  0x58   :  { %396 = vst.msk [vmem:[#allocation3 + $0x100] sm:$0xff] %vm17_vm1, %v7608_v55  ;;  %14056 = vst [vmem:[#allocation19_spill] sm:$0xff] %v7620_v58  ;;  %554 = vrot.lane.b32.xlu1 %v7518_v33, %s7133_s5 }
  0x59   :  { %220 = vst.msk [vmem:[#allocation2 + $0x169] sm:$0xff] %vm17_vm1, %v155_v56  ;;  %221 = vst.msk [vmem:[#allocation2 + $0x171] sm:$0xff] %vm17_vm1, %v156_v57  ;;  %v171_v56 = vld [vmem:[%s13597_s0 + $0x160] sm:$0xff]  ;;  %v172_v57 = vld [vmem:[%s13597_s0 + $0x168] sm:$0xff] }
  0x5a   :  { %397 = vst.msk [vmem:[#allocation3 + $0x108] sm:$0xff] %vm17_vm1, %v7620_v58  ;;  %224 = vst.msk [vmem:[#allocation2 + $0x1c9] sm:$0xff] %vm17_vm1, %v159_v59  ;;  %v173_v59 = vld [vmem:[%s13597_s0 + $0x170] sm:$0xff]  ;;  %556 = vrot.lane.b32.xlu0 %v7520_v34, %s7133_s5  ;;  %v186_v34 = vld [vmem:[%s13597_s0 + $0x1d8] sm:$0xff] }
  0x5b   :  { %225 = vst.msk [vmem:[#allocation2 + $0x1d1] sm:$0xff] %vm17_vm1, %v160_v60  ;;  %226 = vst.msk [vmem:[#allocation2 + $0x1e1] sm:$0xff] %vm17_vm1, %v161_v61  ;;  %v7669_v6 = vld [vmem:[#allocation2 + $0x110] sm:$0xff]  ;;  %v174_v60 = vld [vmem:[%s13597_s0 + $0x178] sm:$0xff] }
  0x5c   :  { %227 = vst.msk [vmem:[#allocation2 + $0x1e9] sm:$0xff] %vm17_vm1, %v162_v62  ;;  %228 = vst.msk [vmem:[#allocation2 + $0x1f9] sm:$0xff] %vm17_vm1, %v163_v63  ;;  %v7671_v7 = vld [vmem:[#allocation2 + $0x120] sm:$0xff]  ;;  %v7680_v8 = vld [vmem:[#allocation2 + $0x128] sm:$0xff]  ;;  %558 = vrot.lane.b32.xlu1 %v7763_v53, %s7133_s5 }
  0x5d   :  { %229 = vst.msk [vmem:[#allocation2 + $0x201] sm:$0xff] %vm17_vm1, %v164_v1  ;;  %230 = vst.msk [vmem:[#allocation2 + $0x211] sm:$0xff] %vm17_vm1, %v165_v2  ;;  %v7682_v9 = vld [vmem:[#allocation2 + $0x138] sm:$0xff]  ;;  %v7692_v10 = vld [vmem:[#allocation2 + $0x140] sm:$0xff] }
  0x5e   :  { %14057 = vst [vmem:[#allocation20_spill] sm:$0xff] %v7669_v6  ;;  %231 = vst.msk [vmem:[#allocation2 + $0x219] sm:$0xff] %vm17_vm1, %v166_v3  ;;  %v7694_v11 = vld [vmem:[#allocation2 + $0x150] sm:$0xff]  ;;  %v7700_v12 = vld [vmem:[#allocation2 + $0x158] sm:$0xff]  ;;  %560 = vrot.lane.b32.xlu0 %v7528_v36, %s7133_s5 }
  0x5f   :  { %232 = vst.msk [vmem:[#allocation2 + $0x229] sm:$0xff] %vm17_vm1, %v167_v4  ;;  %233 = vst.msk [vmem:[#allocation2 + $0x231] sm:$0xff] %vm17_vm1, %v168_v5  ;;  %v175_v61 = vld [vmem:[%s13597_s0 + $0x180] sm:$0xff]  ;;  %v176_v62 = vld [vmem:[%s13597_s0 + $0x188] sm:$0xff] }
  0x60   :  { %387 = vst.msk [vmem:[#allocation3 + $0xb8] sm:$0xff] %vm17_vm1, %v7669_v6  ;;  %388 = vst.msk [vmem:[#allocation3 + $0xc0] sm:$0xff] %vm17_vm1, %v7671_v7  ;;  %v7702_v13 = vld [vmem:[#allocation2 + $0x168] sm:$0xff]  ;;  %v7708_v14 = vld [vmem:[#allocation2 + $0x170] sm:$0xff]  ;;  %562 = vrot.lane.b32.xlu1 %v7530_v37, %s7133_s5 }
  0x61   :  { %14058 = vst [vmem:[#allocation21_spill] sm:$0xff] %v7680_v8  ;;  %14059 = vst [vmem:[#allocation22_spill] sm:$0xff] %v7682_v9  ;;  %v7710_v15 = vld [vmem:[#allocation2 + $0x1c8] sm:$0xff]  ;;  %v177_v63 = vld [vmem:[%s13597_s0 + $0x190] sm:$0xff] }
  0x62   :  { %389 = vst.msk [vmem:[#allocation3 + $0xc8] sm:$0xff] %vm17_vm1, %v7680_v8  ;;  %390 = vst.msk [vmem:[#allocation3 + $0xd0] sm:$0xff] %vm17_vm1, %v7682_v9  ;;  %v7716_v16 = vld [vmem:[#allocation2 + $0x1d0] sm:$0xff]  ;;  %v7718_v17 = vld [vmem:[#allocation2 + $0x1e0] sm:$0xff] }
  0x63   :  { %14060 = vst [vmem:[#allocation23_spill] sm:$0xff] %v7692_v10  ;;  %391 = vst.msk [vmem:[#allocation3 + $0xd8] sm:$0xff] %vm17_vm1, %v7692_v10  ;;  %v7728_v18 = vld [vmem:[#allocation2 + $0x1e8] sm:$0xff]  ;;  %v7730_v19 = vld [vmem:[#allocation2 + $0x1f8] sm:$0xff] }
  0x64   :  { %392 = vst.msk [vmem:[#allocation3 + $0xe0] sm:$0xff] %vm17_vm1, %v7694_v11  ;;  %14061 = vst [vmem:[#allocation24_spill] sm:$0xff] %v7700_v12  ;;  %v7738_v21 = vld [vmem:[#allocation2 + $0x200] sm:$0xff]  ;;  %v7740_v47 = vld [vmem:[#allocation2 + $0x210] sm:$0xff]  ;;  %566 = vrot.lane.b32.xlu1 %v7536_v38, %s7133_s5 }
  0x65   :  { %14062 = vst [vmem:[#allocation25_spill] sm:$0xff] %v7702_v13  ;;  %393 = vst.msk [vmem:[#allocation3 + $0xe8] sm:$0xff] %vm17_vm1, %v7700_v12  ;;  %v7746_v48 = vld [vmem:[#allocation2 + $0x218] sm:$0xff]  ;;  %v179_v2 = vld [vmem:[%s13597_s0 + $0x1a0] sm:$0xff] }
  0x66   :  { %394 = vst.msk [vmem:[#allocation3 + $0xf0] sm:$0xff] %vm17_vm1, %v7702_v13  ;;  %14063 = vst [vmem:[#allocation26_spill] sm:$0xff] %v7710_v15  ;;  %v7748_v50 = vld [vmem:[#allocation2 + $0x228] sm:$0xff]  ;;  %v7754_v51 = vld [vmem:[#allocation2 + $0x230] sm:$0xff] }
  0x67   :  { %395 = vst.msk [vmem:[#allocation3 + $0xf8] sm:$0xff] %vm17_vm1, %v7708_v14  ;;  %398 = vst.msk [vmem:[#allocation3 + $0x110] sm:$0xff] %vm17_vm1, %v7710_v15  ;;  %v178_v1 = vld [vmem:[%s13597_s0 + $0x198] sm:$0xff]  ;;  %v180_v3 = vld [vmem:[%s13597_s0 + $0x1a8] sm:$0xff] }
  0x68   :  { %14064 = vst [vmem:[#allocation27_spill] sm:$0xff] %v7716_v16  ;;  %399 = vst.msk [vmem:[#allocation3 + $0x118] sm:$0xff] %vm17_vm1, %v7716_v16  ;;  %v181_v4 = vld [vmem:[%s13597_s0 + $0x1b0] sm:$0xff]  ;;  %v182_v5 = vld [vmem:[%s13597_s0 + $0x1b8] sm:$0xff] }
  0x69   :  { %400 = vst.msk [vmem:[#allocation3 + $0x120] sm:$0xff] %vm17_vm1, %v7718_v17  ;;  %14065 = vst [vmem:[#allocation28_spill] sm:$0xff] %v7728_v18  ;;  %v184_v37 = vld [vmem:[%s13597_s0 + $0x1c8] sm:$0xff] }
  0x6a   :  { %14066 = vst [vmem:[#allocation29_spill] sm:$0xff] %v7730_v19  ;;  %401 = vst.msk [vmem:[#allocation3 + $0x128] sm:$0xff] %vm17_vm1, %v7728_v18 }
  0x6b   :  { %402 = vst.msk [vmem:[#allocation3 + $0x130] sm:$0xff] %vm17_vm1, %v7730_v19  ;;  %14067 = vst [vmem:[#allocation30_spill] sm:$0xff] %v7738_v21 }
  0x6c   :  { %14068 = vst [vmem:[#allocation31_spill] sm:$0xff] %v7740_v47  ;;  %403 = vst.msk [vmem:[#allocation3 + $0x138] sm:$0xff] %vm17_vm1, %v7738_v21 }
  0x6d   :  { %404 = vst.msk [vmem:[#allocation3 + $0x140] sm:$0xff] %vm17_vm1, %v7740_v47  ;;  %14069 = vst [vmem:[#allocation32_spill] sm:$0xff] %v7748_v50 }
  0x6e   :  { %405 = vst.msk [vmem:[#allocation3 + $0x148] sm:$0xff] %vm17_vm1, %v7746_v48  ;;  %406 = vst.msk [vmem:[#allocation3 + $0x150] sm:$0xff] %vm17_vm1, %v7748_v50 }
  0x6f   :  { %14070 = vst [vmem:[#allocation33_spill] sm:$0xff] %v7754_v51  ;;  %14071 = vst [vmem:[#allocation34_spill] sm:$0xff] %v7763_v53  ;;  %v185_v53 = vld [vmem:[%s13597_s0 + $0x1d0] sm:$0xff] }
  0x70   :  { %407 = vst.msk [vmem:[#allocation3 + $0x158] sm:$0xff] %vm17_vm1, %v7754_v51  ;;  %234 = vst.msk [vmem:[#allocation2 + $0x241] sm:$0xff] %vm17_vm1, %v169_v52 }
  0x71   :  { %235 = vst.msk [vmem:[#allocation2 + $0x249] sm:$0xff] %vm17_vm1, %v170_v54  ;;  %236 = vst.msk [vmem:[#allocation2 + $0x259] sm:$0xff] %vm17_vm1, %v171_v56  ;;  %v183_v54 = vld [vmem:[%s13597_s0 + $0x1c0] sm:$0xff] }
  0x72   :  { %237 = vst.msk [vmem:[#allocation2 + $0x261] sm:$0xff] %vm17_vm1, %v172_v57  ;;  %238 = vst.msk [vmem:[#allocation2 + $0x271] sm:$0xff] %vm17_vm1, %v173_v59  ;;  %v7840_v59 = vld [vmem:[#allocation2 + $0xa0] sm:$0x3] }
  0x73   :  { %239 = vst.msk [vmem:[#allocation2 + $0x279] sm:$0xff] %vm17_vm1, %v174_v60  ;;  %240 = vst.msk [vmem:[#allocation2 + $0x289] sm:$0xff] %vm17_vm1, %v175_v61  ;;  %564 = vrot.lane.b32.xlu0 %v7840_v59, %s7133_s5 }
  0x74   :  { %241 = vst.msk [vmem:[#allocation2 + $0x291] sm:$0xff] %vm17_vm1, %v176_v62  ;;  %242 = vst.msk [vmem:[#allocation2 + $0x2a1] sm:$0xff] %vm17_vm1, %v177_v63 }
  0x75   :  { %243 = vst.msk [vmem:[#allocation2 + $0x2a9] sm:$0xff] %vm17_vm1, %v178_v1  ;;  %244 = vst.msk [vmem:[#allocation2 + $0x2b9] sm:$0xff] %vm17_vm1, %v179_v2 }
  0x76   :  { %245 = vst.msk [vmem:[#allocation2 + $0x2c1] sm:$0xff] %vm17_vm1, %v180_v3  ;;  %246 = vst.msk [vmem:[#allocation2 + $0x2d1] sm:$0xff] %vm17_vm1, %v181_v4 }
  0x77   :  { %247 = vst.msk [vmem:[#allocation2 + $0x2d9] sm:$0xff] %vm17_vm1, %v182_v5  ;;  %v7824_v52 = vld [vmem:[#allocation2 + $0x240] sm:$0xff]  ;;  %248 = vst.msk [vmem:[#allocation2 + $0x2e9] sm:$0xff] %vm17_vm1, %v183_v54  ;;  %v7878_v5 = vld [vmem:[#allocation2 + $0xb8] sm:$0x3]  ;;  %568 = vrot.lane.b32.xlu0 %v7538_v39, %s7133_s5 }
  0x78   :  { %14072 = vst [vmem:[#allocation35_spill] sm:$0xff] %v7824_v52  ;;  %408 = vst.msk [vmem:[#allocation3 + $0x160] sm:$0xff] %vm17_vm1, %v7824_v52  ;;  %v7835_v56 = vld [vmem:[#allocation2 + $0x248] sm:$0xff]  ;;  %v7837_v57 = vld [vmem:[#allocation2 + $0x258] sm:$0xff]  ;;  %570 = vrot.lane.b32.xlu1 %v7878_v5, %s7133_s5 }
  0x79   :  { %14073 = vst [vmem:[#allocation36_spill] sm:$0xff] %v7835_v56  ;;  %14074 = vst [vmem:[#allocation37_spill] sm:$0xff] %v7837_v57  ;;  %v7846_v60 = vld [vmem:[#allocation2 + $0x260] sm:$0xff]  ;;  %v7848_v61 = vld [vmem:[#allocation2 + $0x270] sm:$0xff] }
  0x7a   :  { %14075 = vst [vmem:[#allocation38_spill] sm:$0xff] %v7840_v59  ;;  %409 = vst.msk [vmem:[#allocation3 + $0x168] sm:$0xff] %vm17_vm1, %v7835_v56  ;;  %v7854_v62 = vld [vmem:[#allocation2 + $0x278] sm:$0xff]  ;;  %v7856_v63 = vld [vmem:[#allocation2 + $0x288] sm:$0xff] }
  0x7b   :  { %410 = vst.msk [vmem:[#allocation3 + $0x170] sm:$0xff] %vm17_vm1, %v7837_v57  ;;  %14076 = vst [vmem:[#allocation39_spill] sm:$0xff] %v7846_v60  ;;  %v7862_v1 = vld [vmem:[#allocation2 + $0x290] sm:$0xff]  ;;  %v7864_v2 = vld [vmem:[#allocation2 + $0x2a0] sm:$0xff]  ;;  %572 = vrot.lane.b32.xlu0 %v7544_v40, %s7133_s5 }
  0x7c   :  { %14077 = vst [vmem:[#allocation40_spill] sm:$0xff] %v7848_v61  ;;  %411 = vst.msk [vmem:[#allocation3 + $0x178] sm:$0xff] %vm17_vm1, %v7846_v60  ;;  %v7874_v3 = vld [vmem:[#allocation2 + $0x2a8] sm:$0xff]  ;;  %v7876_v4 = vld [vmem:[#allocation2 + $0x2b8] sm:$0xff]  ;;  %574 = vrot.lane.b32.xlu1 %v7546_v41, %s7133_s5 }
  0x7d   :  { %412 = vst.msk [vmem:[#allocation3 + $0x180] sm:$0xff] %vm17_vm1, %v7848_v61  ;;  %14078 = vst [vmem:[#allocation41_spill] sm:$0xff] %v7854_v62  ;;  %v7884_v54 = vld [vmem:[#allocation2 + $0x2c0] sm:$0xff]  ;;  %v7886_v38 = vld [vmem:[#allocation2 + $0x2d0] sm:$0xff] }
  0x7e   :  { %14079 = vst [vmem:[#allocation42_spill] sm:$0xff] %v7856_v63  ;;  %413 = vst.msk [vmem:[#allocation3 + $0x188] sm:$0xff] %vm17_vm1, %v7854_v62  ;;  %v7892_v59 = vld [vmem:[#allocation2 + $0x2d8] sm:$0xff]  ;;  %v7899_v36 = vld [vmem:[#allocation2 + $0x2e8] sm:$0xff] }
  0x7f   :  { %414 = vst.msk [vmem:[#allocation3 + $0x190] sm:$0xff] %vm17_vm1, %v7856_v63  ;;  %14080 = vst [vmem:[#allocation43_spill] sm:$0xff] %v7862_v1  ;;  %v188_v39 = vld [vmem:[%s13597_s0 + $0x1e8] sm:$0xff] }
  0x80   :  { %14081 = vst [vmem:[#allocation44_spill] sm:$0xff] %v7864_v2  ;;  %415 = vst.msk [vmem:[#allocation3 + $0x198] sm:$0xff] %vm17_vm1, %v7862_v1  ;;  %578 = vrot.lane.b32.xlu1 %v7556_v42, %s7133_s5  ;;  %v7944_v41 = vld [vmem:[#allocation2 + $0xe8] sm:$0x3] }
  0x81   :  { %416 = vst.msk [vmem:[#allocation3 + $0x1a0] sm:$0xff] %vm17_vm1, %v7864_v2  ;;  %14082 = vst [vmem:[#allocation45_spill] sm:$0xff] %v7874_v3 }
  0x82   :  { %14083 = vst [vmem:[#allocation46_spill] sm:$0xff] %v7876_v4  ;;  %14084 = vst [vmem:[#allocation47_spill] sm:$0xff] %v7878_v5  ;;  %v7924_v5 = vld [vmem:[#allocation2 + $0xd0] sm:$0x3] }
  0x83   :  { %417 = vst.msk [vmem:[#allocation3 + $0x1a8] sm:$0xff] %vm17_vm1, %v7874_v3  ;;  %418 = vst.msk [vmem:[#allocation3 + $0x1b0] sm:$0xff] %vm17_vm1, %v7876_v4  ;;  %576 = vrot.lane.b32.xlu0 %v7924_v5, %s7133_s5 }
  0x84   :  { %14085 = vst [vmem:[#allocation48_spill] sm:$0xff] %v7884_v54  ;;  %14086 = vst [vmem:[#allocation49_spill] sm:$0xff] %v7886_v38  ;;  %582 = vrot.lane.b32.xlu1 %v7944_v41, %s7133_s5 }
  0x85   :  { %419 = vst.msk [vmem:[#allocation3 + $0x1b8] sm:$0xff] %vm17_vm1, %v7884_v54  ;;  %420 = vst.msk [vmem:[#allocation3 + $0x1c0] sm:$0xff] %vm17_vm1, %v7886_v38 }
  0x86   :  { %14087 = vst [vmem:[#allocation50_spill] sm:$0xff] %v7892_v59  ;;  %421 = vst.msk [vmem:[#allocation3 + $0x1c8] sm:$0xff] %vm17_vm1, %v7892_v59 }
  0x87   :  { %14088 = vst [vmem:[#allocation51_spill] sm:$0xff] %v7899_v36  ;;  %249 = vst.msk [vmem:[#allocation2 + $0x2f1] sm:$0xff] %vm17_vm1, %v184_v37  ;;  %v187_v37 = vld [vmem:[%s13597_s0 + $0x1e0] sm:$0xff]  ;;  %580 = vrot.lane.b32.xlu0 %v7558_v43, %s7133_s5 }
  0x88   :  { %422 = vst.msk [vmem:[#allocation3 + $0x1d0] sm:$0xff] %vm17_vm1, %v7899_v36  ;;  %250 = vst.msk [vmem:[#allocation2 + $0x301] sm:$0xff] %vm17_vm1, %v185_v53  ;;  %586 = vrot.lane.b32.xlu1 %v7566_v45, %s7133_s5  ;;  %v7980_v45 = vld [vmem:[#allocation2 + $0x130] sm:$0x3] }
  0x89   :  { %251 = vst.msk [vmem:[#allocation2 + $0x309] sm:$0xff] %vm17_vm1, %v186_v34  ;;  %252 = vst.msk [vmem:[#allocation2 + $0x319] sm:$0xff] %vm17_vm1, %v187_v37 }
  0x8a   :  { %253 = vst.msk [vmem:[#allocation2 + $0x321] sm:$0xff] %vm17_vm1, %v188_v39  ;;  %14092 = vst [vmem:[#allocation55_spill] sm:$0xff] %v7944_v41  ;;  %v7964_v39 = vld [vmem:[#allocation2 + $0x100] sm:$0x3]  ;;  %v7970_v41 = vld [vmem:[#allocation2 + $0x118] sm:$0x3] }
  0x8b   :  { %584 = vrot.lane.b32.xlu0 %v7564_v44, %s7133_s5 }
  0x8c   :  { %590 = vrot.lane.b32.xlu1 %v7572_v46, %s7133_s5  ;;  %v7986_v46 = vld [vmem:[#allocation2 + $0x148] sm:$0x3] }
  0x8e   :  { %v7926_v53 = vld [vmem:[#allocation2 + $0x2f0] sm:$0xff] }
  0x8f   :  { %14089 = vst [vmem:[#allocation52_spill] sm:$0xff] %v7926_v53  ;;  %423 = vst.msk [vmem:[#allocation3 + $0x1d8] sm:$0xff] %vm17_vm1, %v7926_v53  ;;  %v7930_v34 = vld [vmem:[#allocation2 + $0x300] sm:$0xff]  ;;  %588 = vrot.lane.b32.xlu0 %v7964_v39, %s7133_s5 }
  0x90   :  { %14090 = vst [vmem:[#allocation53_spill] sm:$0xff] %v7930_v34  ;;  %424 = vst.msk [vmem:[#allocation3 + $0x1e0] sm:$0xff] %vm17_vm1, %v7930_v34  ;;  %v7941_v37 = vld [vmem:[#allocation2 + $0x308] sm:$0xff]  ;;  %v7948_v40 = vld [vmem:[#allocation2 + $0x318] sm:$0xff]  ;;  %594 = vrot.lane.b32.xlu1 %v7970_v41, %s7133_s5 }
  0x91   :  { %14091 = vst [vmem:[#allocation54_spill] sm:$0xff] %v7941_v37  ;;  %425 = vst.msk [vmem:[#allocation3 + $0x1e8] sm:$0xff] %vm17_vm1, %v7941_v37  ;;  %v7956_v42 = vld [vmem:[#allocation2 + $0x320] sm:$0xff] }
  0x92   :  { %14093 = vst [vmem:[#allocation56_spill] sm:$0xff] %v7948_v40  ;;  %426 = vst.msk [vmem:[#allocation3 + $0x1f0] sm:$0xff] %vm17_vm1, %v7948_v40 }
  0x93   :  { %14094 = vst [vmem:[#allocation57_spill] sm:$0xff] %v7956_v42  ;;  %427 = vst.msk [vmem:[#allocation3 + $0x1f8] sm:$0xff] %vm17_vm1, %v7956_v42  ;;  %592 = vrot.lane.b32.xlu0 %v7669_v6, %s7133_s5 }
  0x94   :  { %598 = vrot.lane.b32.xlu1 %v7680_v8, %s7133_s5  ;;  %v7996_v8 = vld [vmem:[#allocation2 + $0x160] sm:$0x3] }
  0x97   :  { %596 = vrot.lane.b32.xlu0 %v7671_v7, %s7133_s5 }
  0x98   :  { %602 = vrot.lane.b32.xlu1 %v7682_v9, %s7133_s5  ;;  %v8002_v9 = vld [vmem:[#allocation2 + $0x178] sm:$0x3] }
  0x9b   :  { %600 = vrot.lane.b32.xlu0 %v7980_v45, %s7133_s5 }
  0x9c   :  { %606 = vrot.lane.b32.xlu1 %v7986_v46, %s7133_s5 }
  0x9f   :  { %604 = vrot.lane.b32.xlu0 %v7692_v10, %s7133_s5 }
  0xa0   :  { %610 = vrot.lane.b32.xlu1 %v7700_v12, %s7133_s5  ;;  %v8012_v12 = vld [vmem:[#allocation2 + $0x1c0] sm:$0x3] }
  0xa3   :  { %608 = vrot.lane.b32.xlu0 %v7694_v11, %s7133_s5 }
  0xa4   :  { %614 = vrot.lane.b32.xlu1 %v7702_v13, %s7133_s5  ;;  %v8018_v13 = vld [vmem:[#allocation2 + $0x1d8] sm:$0x3] }
  0xa5   :  { %14095 = vst [vmem:[#allocation58_spill] sm:$0xff] %v8018_v13 }
  0xa7   :  { %612 = vrot.lane.b32.xlu0 %v7996_v8, %s7133_s5 }
  0xa8   :  { %618 = vrot.lane.b32.xlu1 %v8002_v9, %s7133_s5 }
  0xab   :  { %616 = vrot.lane.b32.xlu0 %v7708_v14, %s7133_s5 }
  0xac   :  { %622 = vrot.lane.b32.xlu1 %v7620_v58, %s7133_s5  ;;  %v8028_v58 = vld [vmem:[#allocation2 + $0x1f0] sm:$0x3] }
  0xad   :  { %14096 = vst [vmem:[#allocation59_spill] sm:$0xff] %v8028_v58 }
  0xaf   :  { %620 = vrot.lane.b32.xlu0 %v7608_v55, %s7133_s5 }
  0xb0   :  { %626 = vrot.lane.b32.xlu1 %v7710_v15, %s7133_s5  ;;  %v529_v15 = vpop.permute.xlu1 %528 }
  0xb1   :  { %817 = vst.msk [vmem:[#allocation3 + $0xf] sm:$0x1] %vm816_vm2, %v529_v15 }
  0xb3   :  { %624 = vrot.lane.b32.xlu0 %v8012_v12, %s7133_s5 }
  0xb4   :  { %630 = vrot.lane.b32.xlu1 %v8018_v13, %s7133_s5  ;;  %v525_v13 = vpop.permute.xlu0 %524 }
  0xb5   :  { %813 = vst.msk [vmem:[#allocation3 - $0x1] sm:$0xfe] %vm812_vm3, %v525_v13  ;;  %v8048_v13 = vld [vmem:[#allocation2 + $0x220] sm:$0x3] }
  0xb7   :  { %628 = vrot.lane.b32.xlu0 %v7716_v16, %s7133_s5  ;;  %v8034_v16 = vld [vmem:[#allocation2 + $0x208] sm:$0x3] }
  0xb8   :  { %634 = vrot.lane.b32.xlu1 %v7728_v18, %s7133_s5  ;;  %v531_v18 = vpop.permute.xlu1 %530 }
  0xb9   :  { %818 = vst.msk [vmem:[#allocation3 + $0xf] sm:$0xfe] %vm812_vm3, %v531_v18 }
  0xbb   :  { %632 = vrot.lane.b32.xlu0 %v7718_v17, %s7133_s5 }
  0xbc   :  { %638 = vrot.lane.b32.xlu1 %v7730_v19, %s7133_s5 }
  0xbf   :  { %636 = vrot.lane.b32.xlu0 %v8028_v58, %s7133_s5  ;;  %v527_v58 = vpop.permute.xlu0 %526 }
  0xc0   :  { %642 = vrot.lane.b32.xlu1 %v8034_v16, %s7133_s5  ;;  %815 = vst.msk [vmem:[#allocation3 + $0x7] sm:$0xff] %vm814_vm4, %v527_v58  ;;  %v8056_v58 = vld [vmem:[#allocation2 + $0x238] sm:$0x3] }
  0xc3   :  { %640 = vrot.lane.b32.xlu0 %v7738_v21, %s7133_s5  ;;  %v533_v15 = vpop.permute.xlu0 %532  ;;  %v535_v21 = vpop.permute.xlu1 %534 }
  0xc4   :  { %646 = vrot.lane.b32.xlu1 %v7746_v48, %s7133_s5  ;;  %819 = vst.msk [vmem:[#allocation3 + $0x17] sm:$0xff] %vm814_vm4, %v533_v15 }
  0xc5   :  { %820 = vst.msk [vmem:[#allocation3 + $0x1f] sm:$0x1] %vm816_vm2, %v535_v21 }
  0xc7   :  { %644 = vrot.lane.b32.xlu0 %v7740_v47, %s7133_s5  ;;  %v537_v18 = vpop.permute.xlu0 %536  ;;  %v539_v47 = vpop.permute.xlu1 %538 }
  0xc8   :  { %650 = vrot.lane.b32.xlu1 %v7748_v50, %s7133_s5  ;;  %821 = vst.msk [vmem:[#allocation3 + $0x1f] sm:$0xfe] %vm812_vm3, %v537_v18  ;;  %v8070_v18 = vld [vmem:[#allocation2 + $0x250] sm:$0x3] }
  0xc9   :  { %822 = vst.msk [vmem:[#allocation3 + $0x27] sm:$0xff] %vm814_vm4, %v539_v47 }
  0xcb   :  { %648 = vrot.lane.b32.xlu0 %v8048_v13, %s7133_s5  ;;  %v541_v21 = vpop.permute.xlu0 %540  ;;  %v543_v15 = vpop.permute.xlu1 %542 }
  0xcc   :  { %654 = vrot.lane.b32.xlu1 %v8056_v58, %s7133_s5  ;;  %823 = vst.msk [vmem:[#allocation3 + $0x2f] sm:$0x1] %vm816_vm2, %v541_v21  ;;  %v8078_v21 = vld [vmem:[#allocation2 + $0x268] sm:$0x3] }
  0xcd   :  { %824 = vst.msk [vmem:[#allocation3 + $0x2f] sm:$0xfe] %vm812_vm3, %v543_v15 }
  0xcf   :  { %652 = vrot.lane.b32.xlu0 %v7754_v51, %s7133_s5  ;;  %v545_v47 = vpop.permute.xlu0 %544  ;;  %v547_v50 = vpop.permute.xlu1 %546 }
  0xd0   :  { %658 = vrot.lane.b32.xlu1 %v7835_v56, %s7133_s5  ;;  %825 = vst.msk [vmem:[#allocation3 + $0x37] sm:$0xff] %vm814_vm4, %v545_v47 }
  0xd1   :  { %826 = vst.msk [vmem:[#allocation3 + $0x3f] sm:$0x1] %vm816_vm2, %v547_v50 }
  0xd3   :  { %656 = vrot.lane.b32.xlu0 %v7824_v52, %s7133_s5  ;;  %v549_v15 = vpop.permute.xlu0 %548  ;;  %v551_v52 = vpop.permute.xlu1 %550 }
  0xd4   :  { %662 = vrot.lane.b32.xlu1 %v7837_v57, %s7133_s5  ;;  %827 = vst.msk [vmem:[#allocation3 + $0x3f] sm:$0xfe] %vm812_vm3, %v549_v15  ;;  %v8092_v15 = vld [vmem:[#allocation2 + $0x280] sm:$0x3] }
  0xd5   :  { %828 = vst.msk [vmem:[#allocation3 + $0x47] sm:$0xff] %vm814_vm4, %v551_v52 }
  0xd7   :  { %660 = vrot.lane.b32.xlu0 %v8070_v18, %s7133_s5  ;;  %v553_v50 = vpop.permute.xlu0 %552  ;;  %v555_v47 = vpop.permute.xlu1 %554 }
  0xd8   :  { %666 = vrot.lane.b32.xlu1 %v8078_v21, %s7133_s5  ;;  %829 = vst.msk [vmem:[#allocation3 + $0x4f] sm:$0x1] %vm816_vm2, %v553_v50  ;;  %v8100_v50 = vld [vmem:[#allocation2 + $0x298] sm:$0x3] }
  0xd9   :  { %830 = vst.msk [vmem:[#allocation3 + $0x4f] sm:$0xfe] %vm812_vm3, %v555_v47 }
  0xdb   :  { %664 = vrot.lane.b32.xlu0 %v7846_v60, %s7133_s5  ;;  %v557_v52 = vpop.permute.xlu0 %556  ;;  %v559_v57 = vpop.permute.xlu1 %558 }
  0xdc   :  { %670 = vrot.lane.b32.xlu1 %v7854_v62, %s7133_s5  ;;  %831 = vst.msk [vmem:[#allocation3 + $0x57] sm:$0xff] %vm814_vm4, %v557_v52 }
  0xdd   :  { %832 = vst.msk [vmem:[#allocation3 + $0x5f] sm:$0x1] %vm816_vm2, %v559_v57 }
  0xdf   :  { %668 = vrot.lane.b32.xlu0 %v7848_v61, %s7133_s5  ;;  %v561_v47 = vpop.permute.xlu0 %560  ;;  %v563_v61 = vpop.permute.xlu1 %562 }
  0xe0   :  { %674 = vrot.lane.b32.xlu1 %v7856_v63, %s7133_s5  ;;  %833 = vst.msk [vmem:[#allocation3 + $0x5f] sm:$0xfe] %vm812_vm3, %v561_v47  ;;  %v8114_v47 = vld [vmem:[#allocation2 + $0x2b0] sm:$0x3] }
  0xe1   :  { %834 = vst.msk [vmem:[#allocation3 + $0x67] sm:$0xff] %vm814_vm4, %v563_v61 }
  0xe3   :  { %672 = vrot.lane.b32.xlu0 %v8092_v15, %s7133_s5  ;;  %v567_v52 = vpop.permute.xlu1 %566 }
  0xe4   :  { %678 = vrot.lane.b32.xlu1 %v8100_v50, %s7133_s5  ;;  %836 = vst.msk [vmem:[#allocation3 + $0x6f] sm:$0xfe] %vm812_vm3, %v567_v52 }
  0xe5   :  { %v565_v57 = vpop.permute.xlu0 %564 }
  0xe6   :  { %835 = vst.msk [vmem:[#allocation3 + $0x6f] sm:$0x1] %vm816_vm2, %v565_v57  ;;  %v8122_v57 = vld [vmem:[#allocation2 + $0x2c8] sm:$0x3] }
  0xe7   :  { %676 = vrot.lane.b32.xlu0 %v7862_v1, %s7133_s5 }
  0xe8   :  { %682 = vrot.lane.b32.xlu1 %v7874_v3, %s7133_s5 }
  0xe9   :  { %v569_v61 = vpop.permute.xlu0 %568 }
  0xea   :  { %v571_v63 = vpop.permute.xlu1 %570  ;;  %837 = vst.msk [vmem:[#allocation3 + $0x77] sm:$0xff] %vm814_vm4, %v569_v61 }
  0xeb   :  { %680 = vrot.lane.b32.xlu0 %v7864_v2, %s7133_s5  ;;  %838 = vst.msk [vmem:[#allocation3 + $0x7f] sm:$0x1] %vm816_vm2, %v571_v63 }
  0xec   :  { %686 = vrot.lane.b32.xlu1 %v7876_v4, %s7133_s5 }
  0xed   :  { %v573_v52 = vpop.permute.xlu0 %572 }
  0xee   :  { %v575_v2 = vpop.permute.xlu1 %574  ;;  %839 = vst.msk [vmem:[#allocation3 + $0x7f] sm:$0xfe] %vm812_vm3, %v573_v52  ;;  %v8136_v52 = vld [vmem:[#allocation2 + $0x2e0] sm:$0x3] }
  0xef   :  { %684 = vrot.lane.b32.xlu0 %v8114_v47, %s7133_s5  ;;  %840 = vst.msk [vmem:[#allocation3 + $0x87] sm:$0xff] %vm814_vm4, %v575_v2 }
  0xf0   :  { %690 = vrot.lane.b32.xlu1 %v8122_v57, %s7133_s5 }
  0xf2   :  { %v579_v61 = vpop.permute.xlu1 %578 }
  0xf3   :  { %688 = vrot.lane.b32.xlu0 %v7884_v54, %s7133_s5  ;;  %842 = vst.msk [vmem:[#allocation3 + $0x8f] sm:$0xfe] %vm812_vm3, %v579_v61 }
  0xf4   :  { %694 = vrot.lane.b32.xlu1 %v7892_v59, %s7133_s5 }
  0xf5   :  { %v577_v63 = vpop.permute.xlu0 %576 }
  0xf6   :  { %841 = vst.msk [vmem:[#allocation3 + $0x8f] sm:$0x1] %vm816_vm2, %v577_v63  ;;  %v583_v4 = vpop.permute.xlu1 %582  ;;  %v8144_v63 = vld [vmem:[#allocation2 + $0x2f8] sm:$0x3] }
  0xf7   :  { %692 = vrot.lane.b32.xlu0 %v7886_v38, %s7133_s5  ;;  %844 = vst.msk [vmem:[#allocation3 + $0x9f] sm:$0x1] %vm816_vm2, %v583_v4 }
  0xf8   :  { %698 = vrot.lane.b32.xlu1 %v7899_v36, %s7133_s5 }
  0xf9   :  { %v581_v2 = vpop.permute.xlu0 %580 }
  0xfa   :  { %843 = vst.msk [vmem:[#allocation3 + $0x97] sm:$0xff] %vm814_vm4, %v581_v2  ;;  %v587_v38 = vpop.permute.xlu1 %586 }
  0xfb   :  { %696 = vrot.lane.b32.xlu0 %v8136_v52, %s7133_s5  ;;  %846 = vst.msk [vmem:[#allocation3 + $0xa7] sm:$0xff] %vm814_vm4, %v587_v38 }
  0xfc   :  { %702 = vrot.lane.b32.xlu1 %v8144_v63, %s7133_s5 }
  0xfd   :  { %v585_v61 = vpop.permute.xlu0 %584 }
  0xfe   :  { %845 = vst.msk [vmem:[#allocation3 + $0x9f] sm:$0xfe] %vm812_vm3, %v585_v61  ;;  %v591_v2 = vpop.permute.xlu1 %590  ;;  %v8158_v61 = vld [vmem:[#allocation2 + $0x310] sm:$0x3] }
  0xff   :  { %700 = vrot.lane.b32.xlu0 %v7926_v53, %s7133_s5  ;;  %848 = vst.msk [vmem:[#allocation3 + $0xaf] sm:$0xfe] %vm812_vm3, %v591_v2 }
 0x100   :  { %706 = vrot.lane.b32.xlu1 %v7941_v37, %s7133_s5 }
 0x101   :  { %v589_v4 = vpop.permute.xlu0 %588 }
 0x102   :  { %847 = vst.msk [vmem:[#allocation3 + $0xaf] sm:$0x1] %vm816_vm2, %v589_v4  ;;  %v595_v36 = vpop.permute.xlu1 %594  ;;  %v8166_v4 = vld [vmem:[#allocation2 + $0x328] sm:$0x3] }
 0x103   :  { %704 = vrot.lane.b32.xlu0 %v7930_v34, %s7133_s5  ;;  %850 = vst.msk [vmem:[#allocation3 + $0xbf] sm:$0x1] %vm816_vm2, %v595_v36 }
 0x104   :  { %710 = vrot.lane.b32.xlu1 %v7948_v40, %s7133_s5 }
 0x105   :  { %v593_v38 = vpop.permute.xlu0 %592 }
 0x106   :  { %849 = vst.msk [vmem:[#allocation3 + $0xb7] sm:$0xff] %vm814_vm4, %v593_v38  ;;  %v599_v34 = vpop.permute.xlu1 %598 }
 0x107   :  { %708 = vrot.lane.b32.xlu0 %v8158_v61, %s7133_s5  ;;  %852 = vst.msk [vmem:[#allocation3 + $0xc7] sm:$0xff] %vm814_vm4, %v599_v34 }
 0x108   :  { %714 = vrot.lane.b32.xlu1 %v8166_v4, %s7133_s5 }
 0x109   :  { %v597_v2 = vpop.permute.xlu0 %596 }
 0x10a   :  { %851 = vst.msk [vmem:[#allocation3 + $0xbf] sm:$0xfe] %vm812_vm3, %v597_v2  ;;  %v603_v38 = vpop.permute.xlu1 %602 }
 0x10b   :  { %712 = vrot.lane.b32.xlu0 %v7956_v42, %s7133_s5  ;;  %854 = vst.msk [vmem:[#allocation3 + $0xcf] sm:$0xfe] %vm812_vm3, %v603_v38 }
 0x10c   :  { %913 = vrot.lane.b32.xlu1 %v7469_v24, %s7134_s9 }
 0x10d   :  { %v601_v36 = vpop.permute.xlu0 %600 }
 0x10e   :  { %853 = vst.msk [vmem:[#allocation3 + $0xcf] sm:$0x1] %vm816_vm2, %v601_v36  ;;  %v607_v2 = vpop.permute.xlu1 %606 }
 0x10f   :  { %911 = vrot.lane.b32.xlu0 %v7467_v23, %s7134_s9  ;;  %856 = vst.msk [vmem:[#allocation3 + $0xdf] sm:$0x1] %vm816_vm2, %v607_v2 }
 0x110   :  { %917 = vrot.lane.b32.xlu1 %v7482_v25, %s7134_s9 }
 0x111   :  { %v605_v34 = vpop.permute.xlu0 %604 }
 0x112   :  { %855 = vst.msk [vmem:[#allocation3 + $0xd7] sm:$0xff] %vm814_vm4, %v605_v34  ;;  %v611_v38 = vpop.permute.xlu1 %610 }
 0x113   :  { %915 = vrot.lane.b32.xlu0 %v7465_v22, %s7134_s9  ;;  %858 = vst.msk [vmem:[#allocation3 + $0xe7] sm:$0xff] %vm814_vm4, %v611_v38 }
 0x114   :  { %921 = vrot.lane.b32.xlu1 %v7522_v35, %s7134_s9 }
 0x115   :  { %v609_v36 = vpop.permute.xlu0 %608 }
 0x116   :  { %857 = vst.msk [vmem:[#allocation3 + $0xdf] sm:$0xfe] %vm812_vm3, %v609_v36  ;;  %v615_v24 = vpop.permute.xlu1 %614 }
 0x117   :  { %919 = vrot.lane.b32.xlu0 %v7484_v26, %s7134_s9  ;;  %860 = vst.msk [vmem:[#allocation3 + $0xef] sm:$0xfe] %vm812_vm3, %v615_v24 }
 0x118   :  { %925 = vrot.lane.b32.xlu1 %v7492_v28, %s7134_s9 }
 0x119   :  { %v613_v23 = vpop.permute.xlu0 %612 }
 0x11a   :  { %859 = vst.msk [vmem:[#allocation3 + $0xef] sm:$0x1] %vm816_vm2, %v613_v23  ;;  %v619_v34 = vpop.permute.xlu1 %618 }
 0x11b   :  { %923 = vrot.lane.b32.xlu0 %v7490_v27, %s7134_s9  ;;  %862 = vst.msk [vmem:[#allocation3 + $0xff] sm:$0x1] %vm816_vm2, %v619_v34  ;;  %v14098_v34 = vld [vmem:[#allocation34_spill] sm:$0xff] }
 0x11c   :  { %929 = vrot.lane.b32.xlu1 %v7498_v29, %s7134_s9 }
 0x11d   :  { %v617_v22 = vpop.permute.xlu0 %616 }
 0x11e   :  { %861 = vst.msk [vmem:[#allocation3 + $0xf7] sm:$0xff] %vm814_vm4, %v617_v22  ;;  %v623_v2 = vpop.permute.xlu1 %622  ;;  %v14097_v22 = vld [vmem:[#allocation8_spill] sm:$0xff] }
 0x11f   :  { %927 = vrot.lane.b32.xlu0 %v7580_v49, %s7134_s9  ;;  %864 = vst.msk [vmem:[#allocation3 + $0x107] sm:$0xff] %vm814_vm4, %v623_v2 }
 0x120   :  { %933 = vrot.lane.b32.xlu1 %v7647_v0, %s7134_s9 }
 0x121   :  { %v621_v35 = vpop.permute.xlu0 %620 }
 0x122   :  { %863 = vst.msk [vmem:[#allocation3 + $0xff] sm:$0xfe] %vm812_vm3, %v621_v35  ;;  %v627_v38 = vpop.permute.xlu1 %626 }
 0x123   :  { %931 = vrot.lane.b32.xlu0 %v7500_v30, %s7134_s9  ;;  %866 = vst.msk [vmem:[#allocation3 + $0x10f] sm:$0xfe] %vm812_vm3, %v627_v38 }
 0x124   :  { %937 = vrot.lane.b32.xlu1 %v7508_v32, %s7134_s9 }
 0x125   :  { %v625_v36 = vpop.permute.xlu0 %624 }
 0x126   :  { %865 = vst.msk [vmem:[#allocation3 + $0x10f] sm:$0x1] %vm816_vm2, %v625_v36  ;;  %v631_v23 = vpop.permute.xlu1 %630  ;;  %v14100_v36 = vld [vmem:[#allocation10_spill] sm:$0xff] }
 0x127   :  { %935 = vrot.lane.b32.xlu0 %v7506_v31, %s7134_s9  ;;  %868 = vst.msk [vmem:[#allocation3 + $0x11f] sm:$0x1] %vm816_vm2, %v631_v23  ;;  %v14101_v23 = vld [vmem:[#allocation38_spill] sm:$0xff] }
 0x128   :  { %941 = vrot.lane.b32.xlu1 %v7518_v33, %s7134_s9 }
 0x129   :  { %v629_v49 = vpop.permute.xlu0 %628 }
 0x12a   :  { %867 = vst.msk [vmem:[#allocation3 + $0x117] sm:$0xff] %vm814_vm4, %v629_v49  ;;  %v635_v24 = vpop.permute.xlu1 %634 }
 0x12b   :  { %939 = vrot.lane.b32.xlu0 %v7732_v20, %s7134_s9  ;;  %870 = vst.msk [vmem:[#allocation3 + $0x127] sm:$0xff] %vm814_vm4, %v635_v24  ;;  %v14099_v20 = vld [vmem:[#allocation9_spill] sm:$0xff] }
 0x12c   :  { %945 = vrot.lane.b32.xlu1 %v14098_v34, %s7134_s9 }
 0x12d   :  { %v633_v0 = vpop.permute.xlu0 %632 }
 0x12e   :  { %869 = vst.msk [vmem:[#allocation3 + $0x11f] sm:$0xfe] %vm812_vm3, %v633_v0  ;;  %v639_v2 = vpop.permute.xlu1 %638  ;;  %v14102_v0 = vld [vmem:[#allocation11_spill] sm:$0xff] }
 0x12f   :  { %943 = vrot.lane.b32.xlu0 %v14097_v22, %s7134_s9  ;;  %872 = vst.msk [vmem:[#allocation3 + $0x12f] sm:$0xfe] %vm812_vm3, %v639_v2  ;;  %v14104_v2 = vld [vmem:[#allocation47_spill] sm:$0xff] }
 0x130   :  { %949 = vrot.lane.b32.xlu1 %v14100_v36, %s7134_s9 }
 0x131   :  { %v637_v35 = vpop.permute.xlu0 %636 }
 0x132   :  { %871 = vst.msk [vmem:[#allocation3 + $0x12f] sm:$0x1] %vm816_vm2, %v637_v35  ;;  %v643_v49 = vpop.permute.xlu1 %642  ;;  %v14103_v35 = vld [vmem:[#allocation12_spill] sm:$0xff] }
 0x133   :  { %947 = vrot.lane.b32.xlu0 %v14099_v20, %s7134_s9  ;;  %874 = vst.msk [vmem:[#allocation3 + $0x13f] sm:$0x1] %vm816_vm2, %v643_v49 }
 0x134   :  { %953 = vrot.lane.b32.xlu1 %v14102_v0, %s7134_s9  ;;  %v14106_v0 = vld [vmem:[#allocation14_spill] sm:$0xff] }
 0x135   :  { %v641_v38 = vpop.permute.xlu0 %640 }
 0x136   :  { %873 = vst.msk [vmem:[#allocation3 + $0x137] sm:$0xff] %vm814_vm4, %v641_v38  ;;  %v647_v34 = vpop.permute.xlu1 %646 }
 0x137   :  { %951 = vrot.lane.b32.xlu0 %v14101_v23, %s7134_s9  ;;  %876 = vst.msk [vmem:[#allocation3 + $0x147] sm:$0xff] %vm814_vm4, %v647_v34  ;;  %v14105_v23 = vld [vmem:[#allocation13_spill] sm:$0xff] }
 0x138   :  { %957 = vrot.lane.b32.xlu1 %v14104_v2, %s7134_s9  ;;  %v14107_v2 = vld [vmem:[#allocation15_spill] sm:$0xff] }
 0x139   :  { %v645_v24 = vpop.permute.xlu0 %644 }
 0x13a   :  { %875 = vst.msk [vmem:[#allocation3 + $0x13f] sm:$0xfe] %vm812_vm3, %v645_v24  ;;  %v651_v49 = vpop.permute.xlu1 %650 }
 0x13b   :  { %955 = vrot.lane.b32.xlu0 %v14103_v35, %s7134_s9  ;;  %878 = vst.msk [vmem:[#allocation3 + $0x14f] sm:$0xfe] %vm812_vm3, %v651_v49 }
 0x13c   :  { %961 = vrot.lane.b32.xlu1 %v14106_v0, %s7134_s9  ;;  %v14108_v0 = vld [vmem:[#allocation55_spill] sm:$0xff] }
 0x13d   :  { %v649_v38 = vpop.permute.xlu0 %648 }
 0x13e   :  { %877 = vst.msk [vmem:[#allocation3 + $0x14f] sm:$0x1] %vm816_vm2, %v649_v38  ;;  %v655_v34 = vpop.permute.xlu1 %654 }
 0x13f   :  { %959 = vrot.lane.b32.xlu0 %v14105_v23, %s7134_s9  ;;  %880 = vst.msk [vmem:[#allocation3 + $0x15f] sm:$0x1] %vm816_vm2, %v655_v34 }
 0x140   :  { %965 = vrot.lane.b32.xlu1 %v14107_v2, %s7134_s9 }
 0x141   :  { %v653_v24 = vpop.permute.xlu0 %652 }
 0x142   :  { %879 = vst.msk [vmem:[#allocation3 + $0x157] sm:$0xff] %vm814_vm4, %v653_v24  ;;  %v659_v49 = vpop.permute.xlu1 %658 }
 0x143   :  { %963 = vrot.lane.b32.xlu0 %v7924_v5, %s7134_s9  ;;  %882 = vst.msk [vmem:[#allocation3 + $0x167] sm:$0xff] %vm814_vm4, %v659_v49  ;;  %v14109_v5 = vld [vmem:[#allocation17_spill] sm:$0xff] }
 0x144   :  { %969 = vrot.lane.b32.xlu1 %v14108_v0, %s7134_s9  ;;  %v14110_v0 = vld [vmem:[#allocation18_spill] sm:$0xff] }
 0x145   :  { %v657_v38 = vpop.permute.xlu0 %656 }
 0x146   :  { %881 = vst.msk [vmem:[#allocation3 + $0x15f] sm:$0xfe] %vm812_vm3, %v657_v38  ;;  %v663_v34 = vpop.permute.xlu1 %662 }
 0x147   :  { %967 = vrot.lane.b32.xlu0 %v7558_v43, %s7134_s9  ;;  %884 = vst.msk [vmem:[#allocation3 + $0x16f] sm:$0xfe] %vm812_vm3, %v663_v34 }
 0x148   :  { %973 = vrot.lane.b32.xlu1 %v14109_v5, %s7134_s9 }
 0x149   :  { %v661_v24 = vpop.permute.xlu0 %660 }
 0x14a   :  { %883 = vst.msk [vmem:[#allocation3 + $0x16f] sm:$0x1] %vm816_vm2, %v661_v24  ;;  %v667_v49 = vpop.permute.xlu1 %666 }
 0x14b   :  { %971 = vrot.lane.b32.xlu0 %v7564_v44, %s7134_s9  ;;  %886 = vst.msk [vmem:[#allocation3 + $0x17f] sm:$0x1] %vm816_vm2, %v667_v49 }
 0x14c   :  { %977 = vrot.lane.b32.xlu1 %v14110_v0, %s7134_s9 }
 0x14d   :  { %v665_v38 = vpop.permute.xlu0 %664 }
 0x14e   :  { %885 = vst.msk [vmem:[#allocation3 + $0x177] sm:$0xff] %vm814_vm4, %v665_v38  ;;  %v671_v34 = vpop.permute.xlu1 %670 }
 0x14f   :  { %975 = vrot.lane.b32.xlu0 %v7964_v39, %s7134_s9  ;;  %888 = vst.msk [vmem:[#allocation3 + $0x187] sm:$0xff] %vm814_vm4, %v671_v34  ;;  %v14111_v39 = vld [vmem:[#allocation21_spill] sm:$0xff] }
 0x150   :  { %981 = vrot.lane.b32.xlu1 %v7970_v41, %s7134_s9  ;;  %v14112_v41 = vld [vmem:[#allocation22_spill] sm:$0xff] }
 0x151   :  { %v669_v24 = vpop.permute.xlu0 %668 }
 0x152   :  { %887 = vst.msk [vmem:[#allocation3 + $0x17f] sm:$0xfe] %vm812_vm3, %v669_v24  ;;  %v675_v49 = vpop.permute.xlu1 %674 }
 0x153   :  { %979 = vrot.lane.b32.xlu0 %v7669_v6, %s7134_s9  ;;  %890 = vst.msk [vmem:[#allocation3 + $0x18f] sm:$0xfe] %vm812_vm3, %v675_v49 }
 0x154   :  { %985 = vrot.lane.b32.xlu1 %v14111_v39, %s7134_s9 }
 0x155   :  { %v673_v38 = vpop.permute.xlu0 %672 }
 0x156   :  { %889 = vst.msk [vmem:[#allocation3 + $0x18f] sm:$0x1] %vm816_vm2, %v673_v38  ;;  %v679_v34 = vpop.permute.xlu1 %678 }
 0x157   :  { %983 = vrot.lane.b32.xlu0 %v7671_v7, %s7134_s9  ;;  %892 = vst.msk [vmem:[#allocation3 + $0x19f] sm:$0x1] %vm816_vm2, %v679_v34 }
 0x158   :  { %989 = vrot.lane.b32.xlu1 %v14112_v41, %s7134_s9 }
 0x159   :  { %v677_v24 = vpop.permute.xlu0 %676 }
 0x15a   :  { %891 = vst.msk [vmem:[#allocation3 + $0x197] sm:$0xff] %vm814_vm4, %v677_v24  ;;  %v683_v49 = vpop.permute.xlu1 %682 }
 0x15b   :  { %987 = vrot.lane.b32.xlu0 %v7980_v45, %s7134_s9  ;;  %894 = vst.msk [vmem:[#allocation3 + $0x1a7] sm:$0xff] %vm814_vm4, %v683_v49  ;;  %v14113_v45 = vld [vmem:[#allocation24_spill] sm:$0xff] }
 0x15c   :  { %993 = vrot.lane.b32.xlu1 %v7986_v46, %s7134_s9  ;;  %v14114_v46 = vld [vmem:[#allocation25_spill] sm:$0xff] }
 0x15d   :  { %v681_v38 = vpop.permute.xlu0 %680 }
 0x15e   :  { %893 = vst.msk [vmem:[#allocation3 + $0x19f] sm:$0xfe] %vm812_vm3, %v681_v38  ;;  %v687_v34 = vpop.permute.xlu1 %686 }
 0x15f   :  { %991 = vrot.lane.b32.xlu0 %v7692_v10, %s7134_s9  ;;  %896 = vst.msk [vmem:[#allocation3 + $0x1af] sm:$0xfe] %vm812_vm3, %v687_v34 }
 0x160   :  { %997 = vrot.lane.b32.xlu1 %v14113_v45, %s7134_s9 }
 0x161   :  { %v685_v24 = vpop.permute.xlu0 %684 }
 0x162   :  { %895 = vst.msk [vmem:[#allocation3 + $0x1af] sm:$0x1] %vm816_vm2, %v685_v24  ;;  %v691_v49 = vpop.permute.xlu1 %690 }
 0x163   :  { %995 = vrot.lane.b32.xlu0 %v7694_v11, %s7134_s9  ;;  %898 = vst.msk [vmem:[#allocation3 + $0x1bf] sm:$0x1] %vm816_vm2, %v691_v49 }
 0x164   :  { %1001 = vrot.lane.b32.xlu1 %v14114_v46, %s7134_s9 }
 0x165   :  { %v689_v38 = vpop.permute.xlu0 %688 }
 0x166   :  { %897 = vst.msk [vmem:[#allocation3 + $0x1b7] sm:$0xff] %vm814_vm4, %v689_v38  ;;  %v695_v34 = vpop.permute.xlu1 %694 }
 0x167   :  { %999 = vrot.lane.b32.xlu0 %v7996_v8, %s7134_s9  ;;  %900 = vst.msk [vmem:[#allocation3 + $0x1c7] sm:$0xff] %vm814_vm4, %v695_v34  ;;  %v14115_v8 = vld [vmem:[#allocation19_spill] sm:$0xff] }
 0x168   :  { %1005 = vrot.lane.b32.xlu1 %v8002_v9, %s7134_s9  ;;  %v14116_v9 = vld [vmem:[#allocation26_spill] sm:$0xff] }
 0x169   :  { %v693_v24 = vpop.permute.xlu0 %692 }
 0x16a   :  { %899 = vst.msk [vmem:[#allocation3 + $0x1bf] sm:$0xfe] %vm812_vm3, %v693_v24  ;;  %v699_v49 = vpop.permute.xlu1 %698 }
 0x16b   :  { %1003 = vrot.lane.b32.xlu0 %v7708_v14, %s7134_s9  ;;  %902 = vst.msk [vmem:[#allocation3 + $0x1cf] sm:$0xfe] %vm812_vm3, %v699_v49 }
 0x16c   :  { %1009 = vrot.lane.b32.xlu1 %v14115_v8, %s7134_s9  ;;  %v14118_v8 = vld [vmem:[#allocation58_spill] sm:$0xff] }
 0x16d   :  { %v697_v38 = vpop.permute.xlu0 %696 }
 0x16e   :  { %901 = vst.msk [vmem:[#allocation3 + $0x1cf] sm:$0x1] %vm816_vm2, %v697_v38  ;;  %v703_v34 = vpop.permute.xlu1 %702 }
 0x16f   :  { %1007 = vrot.lane.b32.xlu0 %v7608_v55, %s7134_s9  ;;  %904 = vst.msk [vmem:[#allocation3 + $0x1df] sm:$0x1] %vm816_vm2, %v703_v34  ;;  %v14117_v55 = vld [vmem:[#allocation27_spill] sm:$0xff] }
 0x170   :  { %1013 = vrot.lane.b32.xlu1 %v14116_v9, %s7134_s9 }
 0x171   :  { %v701_v24 = vpop.permute.xlu0 %700 }
 0x172   :  { %903 = vst.msk [vmem:[#allocation3 + $0x1d7] sm:$0xff] %vm814_vm4, %v701_v24  ;;  %v707_v49 = vpop.permute.xlu1 %706 }
 0x173   :  { %1011 = vrot.lane.b32.xlu0 %v8012_v12, %s7134_s9  ;;  %906 = vst.msk [vmem:[#allocation3 + $0x1e7] sm:$0xff] %vm814_vm4, %v707_v49  ;;  %v14119_v12 = vld [vmem:[#allocation28_spill] sm:$0xff] }
 0x174   :  { %1017 = vrot.lane.b32.xlu1 %v14118_v8, %s7134_s9  ;;  %v14120_v8 = vld [vmem:[#allocation59_spill] sm:$0xff] }
 0x175   :  { %v705_v38 = vpop.permute.xlu0 %704 }
 0x176   :  { %905 = vst.msk [vmem:[#allocation3 + $0x1df] sm:$0xfe] %vm812_vm3, %v705_v38  ;;  %v711_v34 = vpop.permute.xlu1 %710 }
 0x177   :  { %1015 = vrot.lane.b32.xlu0 %v14117_v55, %s7134_s9  ;;  %908 = vst.msk [vmem:[#allocation3 + $0x1ef] sm:$0xfe] %vm812_vm3, %v711_v34  ;;  %vm2886_vm3 = vcmask 195753  }
 0x178   :  { %1021 = vrot.lane.b32.xlu1 %v14119_v12, %s7134_s9 }
 0x179   :  { %v709_v24 = vpop.permute.xlu0 %708 }
 0x17a   :  { %907 = vst.msk [vmem:[#allocation3 + $0x1ef] sm:$0x1] %vm816_vm2, %v709_v24  ;;  %v715_v49 = vpop.permute.xlu1 %714 }
 0x17b   :  { %1019 = vrot.lane.b32.xlu0 %v7718_v17, %s7134_s9  ;;  %910 = vst.msk [vmem:[#allocation3 + $0x1ff] sm:$0x1] %vm816_vm2, %v715_v49  ;;  %v158_v49 = vld [vmem:[%s13597_s0 + $0xf8] sm:$0xff]  ;;  %vm2531_vm2 = vcmask 171152  }
 0x17c   :  { %1025 = vrot.lane.b32.xlu1 %v7730_v19, %s7134_s9  ;;  %223 = vst.msk [vmem:[#allocation2 + $0x189] sm:$0xff] %vm17_vm1, %v158_v49  ;;  %v14122_v19 = vld [vmem:[#allocation31_spill] sm:$0xff] }
 0x17d   :  { %v713_v38 = vpop.permute.xlu0 %712 }
 0x17e   :  { %909 = vst.msk [vmem:[#allocation3 + $0x1f7] sm:$0xff] %vm814_vm4, %v713_v38  ;;  %v914_v34 = vpop.permute.xlu1 %913  ;;  %v157_v38 = vld [vmem:[%s13597_s0 + $0xf0] sm:$0xff]  ;;  %vm2888_vm4 = vcmask 195752  }
 0x17f   :  { %1023 = vrot.lane.b32.xlu0 %v14120_v8, %s7134_s9  ;;  %1202 = vst.msk [vmem:[#allocation3 + $0x6] sm:$0xff] %vm1201_vm6, %v914_v34  ;;  %v14121_v8 = vld [vmem:[#allocation30_spill] sm:$0xff] }
 0x180   :  { %1029 = vrot.lane.b32.xlu1 %v8034_v16, %s7134_s9  ;;  %222 = vst.msk [vmem:[#allocation2 + $0x181] sm:$0xff] %vm17_vm1, %v157_v38  ;;  %v14123_v16 = vld [vmem:[#allocation32_spill] sm:$0xff] }
 0x181   :  { %v912_v24 = vpop.permute.xlu0 %911 }
 0x182   :  { %1200 = vst.msk [vmem:[#allocation3 - $0x2] sm:$0xfc] %vm1199_vm5, %v912_v24  ;;  %v918_v34 = vpop.permute.xlu1 %917 }
 0x183   :  { %1027 = vrot.lane.b32.xlu0 %v14121_v8, %s7134_s9  ;;  %1205 = vst.msk [vmem:[#allocation3 + $0xe] sm:$0xfc] %vm1199_vm5, %v918_v34 }
 0x184   :  { %1033 = vrot.lane.b32.xlu1 %v7746_v48, %s7134_s9 }
 0x185   :  { %v916_v24 = vpop.permute.xlu0 %915 }
 0x186   :  { %1204 = vst.msk [vmem:[#allocation3 + $0xe] sm:$0x3] %vm1203_vm7, %v916_v24  ;;  %v922_v12 = vpop.permute.xlu1 %921 }
 0x187   :  { %1031 = vrot.lane.b32.xlu0 %v14122_v19, %s7134_s9  ;;  %1207 = vst.msk [vmem:[#allocation3 + $0x1e] sm:$0x3] %vm1203_vm7, %v922_v12 }
 0x188   :  { %1037 = vrot.lane.b32.xlu1 %v14123_v16, %s7134_s9 }
 0x189   :  { %v920_v8 = vpop.permute.xlu0 %919 }
 0x18a   :  { %1206 = vst.msk [vmem:[#allocation3 + $0x16] sm:$0xff] %vm1201_vm6, %v920_v8  ;;  %v926_v49 = vpop.permute.xlu1 %925 }
 0x18b   :  { %1035 = vrot.lane.b32.xlu0 %v8048_v13, %s7134_s9  ;;  %1209 = vst.msk [vmem:[#allocation3 + $0x26] sm:$0xff] %vm1201_vm6, %v926_v49  ;;  %v14124_v13 = vld [vmem:[#allocation35_spill] sm:$0xff] }
 0x18c   :  { %1041 = vrot.lane.b32.xlu1 %v8056_v58, %s7134_s9  ;;  %v14125_v58 = vld [vmem:[#allocation37_spill] sm:$0xff] }
 0x18d   :  { %v924_v38 = vpop.permute.xlu0 %923 }
 0x18e   :  { %1208 = vst.msk [vmem:[#allocation3 + $0x1e] sm:$0xfc] %vm1199_vm5, %v924_v38  ;;  %v930_v12 = vpop.permute.xlu1 %929 }
 0x18f   :  { %1039 = vrot.lane.b32.xlu0 %v7754_v51, %s7134_s9  ;;  %1211 = vst.msk [vmem:[#allocation3 + $0x2e] sm:$0xfc] %vm1199_vm5, %v930_v12 }
 0x190   :  { %1045 = vrot.lane.b32.xlu1 %v7835_v56, %s7134_s9 }
 0x191   :  { %v928_v8 = vpop.permute.xlu0 %927 }
 0x192   :  { %1210 = vst.msk [vmem:[#allocation3 + $0x2e] sm:$0x3] %vm1203_vm7, %v928_v8  ;;  %v934_v34 = vpop.permute.xlu1 %933 }
 0x193   :  { %1043 = vrot.lane.b32.xlu0 %v14124_v13, %s7134_s9  ;;  %1213 = vst.msk [vmem:[#allocation3 + $0x3e] sm:$0x3] %vm1203_vm7, %v934_v34 }
 0x194   :  { %1049 = vrot.lane.b32.xlu1 %v14125_v58, %s7134_s9 }
 0x195   :  { %v932_v24 = vpop.permute.xlu0 %931 }
 0x196   :  { %1212 = vst.msk [vmem:[#allocation3 + $0x36] sm:$0xff] %vm1201_vm6, %v932_v24  ;;  %v938_v49 = vpop.permute.xlu1 %937 }
 0x197   :  { %1047 = vrot.lane.b32.xlu0 %v8070_v18, %s7134_s9  ;;  %1215 = vst.msk [vmem:[#allocation3 + $0x46] sm:$0xff] %vm1201_vm6, %v938_v49  ;;  %v14126_v18 = vld [vmem:[#allocation40_spill] sm:$0xff] }
 0x198   :  { %1053 = vrot.lane.b32.xlu1 %v8078_v21, %s7134_s9  ;;  %v14127_v21 = vld [vmem:[#allocation42_spill] sm:$0xff] }
 0x199   :  { %v936_v38 = vpop.permute.xlu0 %935 }
 0x19a   :  { %1214 = vst.msk [vmem:[#allocation3 + $0x3e] sm:$0xfc] %vm1199_vm5, %v936_v38  ;;  %v942_v12 = vpop.permute.xlu1 %941 }
 0x19b   :  { %1051 = vrot.lane.b32.xlu0 %v7846_v60, %s7134_s9  ;;  %1217 = vst.msk [vmem:[#allocation3 + $0x4e] sm:$0xfc] %vm1199_vm5, %v942_v12 }
 0x19c   :  { %1057 = vrot.lane.b32.xlu1 %v7854_v62, %s7134_s9 }
 0x19d   :  { %v940_v8 = vpop.permute.xlu0 %939 }
 0x19e   :  { %1216 = vst.msk [vmem:[#allocation3 + $0x4e] sm:$0x3] %vm1203_vm7, %v940_v8  ;;  %v946_v34 = vpop.permute.xlu1 %945 }
 0x19f   :  { %1055 = vrot.lane.b32.xlu0 %v14126_v18, %s7134_s9  ;;  %1219 = vst.msk [vmem:[#allocation3 + $0x5e] sm:$0x3] %vm1203_vm7, %v946_v34 }
 0x1a0   :  { %1061 = vrot.lane.b32.xlu1 %v14127_v21, %s7134_s9 }
 0x1a1   :  { %v944_v24 = vpop.permute.xlu0 %943 }
 0x1a2   :  { %1218 = vst.msk [vmem:[#allocation3 + $0x56] sm:$0xff] %vm1201_vm6, %v944_v24  ;;  %v950_v49 = vpop.permute.xlu1 %949 }
 0x1a3   :  { %1059 = vrot.lane.b32.xlu0 %v8092_v15, %s7134_s9  ;;  %1221 = vst.msk [vmem:[#allocation3 + $0x66] sm:$0xff] %vm1201_vm6, %v950_v49  ;;  %v14128_v15 = vld [vmem:[#allocation44_spill] sm:$0xff] }
 0x1a4   :  { %1065 = vrot.lane.b32.xlu1 %v8100_v50, %s7134_s9  ;;  %v14129_v50 = vld [vmem:[#allocation46_spill] sm:$0xff] }
 0x1a5   :  { %v948_v38 = vpop.permute.xlu0 %947 }
 0x1a6   :  { %1220 = vst.msk [vmem:[#allocation3 + $0x5e] sm:$0xfc] %vm1199_vm5, %v948_v38  ;;  %v954_v12 = vpop.permute.xlu1 %953 }
 0x1a7   :  { %1063 = vrot.lane.b32.xlu0 %v7862_v1, %s7134_s9  ;;  %1223 = vst.msk [vmem:[#allocation3 + $0x6e] sm:$0xfc] %vm1199_vm5, %v954_v12 }
 0x1a8   :  { %1069 = vrot.lane.b32.xlu1 %v7874_v3, %s7134_s9 }
 0x1a9   :  { %v952_v8 = vpop.permute.xlu0 %951 }
 0x1aa   :  { %1222 = vst.msk [vmem:[#allocation3 + $0x6e] sm:$0x3] %vm1203_vm7, %v952_v8  ;;  %v958_v34 = vpop.permute.xlu1 %957 }
 0x1ab   :  { %1067 = vrot.lane.b32.xlu0 %v14128_v15, %s7134_s9  ;;  %1225 = vst.msk [vmem:[#allocation3 + $0x7e] sm:$0x3] %vm1203_vm7, %v958_v34 }
 0x1ac   :  { %1073 = vrot.lane.b32.xlu1 %v14129_v50, %s7134_s9 }
 0x1ad   :  { %v956_v24 = vpop.permute.xlu0 %955 }
 0x1ae   :  { %1224 = vst.msk [vmem:[#allocation3 + $0x76] sm:$0xff] %vm1201_vm6, %v956_v24  ;;  %v962_v49 = vpop.permute.xlu1 %961 }
 0x1af   :  { %1071 = vrot.lane.b32.xlu0 %v8114_v47, %s7134_s9  ;;  %1227 = vst.msk [vmem:[#allocation3 + $0x86] sm:$0xff] %vm1201_vm6, %v962_v49  ;;  %v14130_v47 = vld [vmem:[#allocation49_spill] sm:$0xff] }
 0x1b0   :  { %1077 = vrot.lane.b32.xlu1 %v8122_v57, %s7134_s9  ;;  %v14131_v57 = vld [vmem:[#allocation51_spill] sm:$0xff] }
 0x1b1   :  { %v960_v38 = vpop.permute.xlu0 %959 }
 0x1b2   :  { %1226 = vst.msk [vmem:[#allocation3 + $0x7e] sm:$0xfc] %vm1199_vm5, %v960_v38  ;;  %v966_v12 = vpop.permute.xlu1 %965 }
 0x1b3   :  { %1075 = vrot.lane.b32.xlu0 %v7884_v54, %s7134_s9  ;;  %1229 = vst.msk [vmem:[#allocation3 + $0x8e] sm:$0xfc] %vm1199_vm5, %v966_v12 }
 0x1b4   :  { %1081 = vrot.lane.b32.xlu1 %v7892_v59, %s7134_s9 }
 0x1b5   :  { %v964_v8 = vpop.permute.xlu0 %963 }
 0x1b6   :  { %1228 = vst.msk [vmem:[#allocation3 + $0x8e] sm:$0x3] %vm1203_vm7, %v964_v8  ;;  %v970_v34 = vpop.permute.xlu1 %969 }
 0x1b7   :  { %1079 = vrot.lane.b32.xlu0 %v14130_v47, %s7134_s9  ;;  %1231 = vst.msk [vmem:[#allocation3 + $0x9e] sm:$0x3] %vm1203_vm7, %v970_v34  ;;  %v14132_v34 = vld [vmem:[#allocation53_spill] sm:$0xff] }
 0x1b8   :  { %1085 = vrot.lane.b32.xlu1 %v14131_v57, %s7134_s9 }
 0x1b9   :  { %v968_v24 = vpop.permute.xlu0 %967 }
 0x1ba   :  { %1230 = vst.msk [vmem:[#allocation3 + $0x96] sm:$0xff] %vm1201_vm6, %v968_v24  ;;  %v974_v49 = vpop.permute.xlu1 %973  ;;  %v190_v24 = vld [vmem:[%s13597_s0 + $0x1f8] sm:$0xff] }
 0x1bb   :  { %1083 = vrot.lane.b32.xlu0 %v8136_v52, %s7134_s9  ;;  %1233 = vst.msk [vmem:[#allocation3 + $0xa6] sm:$0xff] %vm1201_vm6, %v974_v49  ;;  %v189_v52 = vld [vmem:[%s13597_s0 + $0x1f0] sm:$0xff]  ;;  %s7135_s0 = smov 9  }
 0x1bc   :  { %1089 = vrot.lane.b32.xlu1 %v8144_v63, %s7134_s9  ;;  %254 = vst.msk [vmem:[#allocation2 + $0x331] sm:$0xff] %vm17_vm1, %v189_v52  ;;  %255 = vst.msk [vmem:[#allocation2 + $0x339] sm:$0xff] %vm17_vm1, %v190_v24 }
 0x1bd   :  { %v972_v38 = vpop.permute.xlu0 %971  ;;  %vm7042_vm1 = vmpackc.low %vm3633_vm15, %vm7140_vm0  ;;  %vm6524_vm15 = vcmask 1045509   ;;  %vm6526_vm0 = vcmask 1046534  }
 0x1be   :  { %1232 = vst.msk [vmem:[#allocation3 + $0x9e] sm:$0xfc] %vm1199_vm5, %v972_v38  ;;  %v978_v12 = vpop.permute.xlu1 %977 }
 0x1bf   :  { %1087 = vrot.lane.b32.xlu0 %v7926_v53, %s7134_s9  ;;  %1235 = vst.msk [vmem:[#allocation3 + $0xae] sm:$0xfc] %vm1199_vm5, %v978_v12 }
 0x1c0   :  { %1093 = vrot.lane.b32.xlu1 %v7941_v37, %s7134_s9 }
 0x1c1   :  { %v976_v8 = vpop.permute.xlu0 %975 }
 0x1c2   :  { %1234 = vst.msk [vmem:[#allocation3 + $0xae] sm:$0x3] %vm1203_vm7, %v976_v8  ;;  %v982_v38 = vpop.permute.xlu1 %981 }
 0x1c3   :  { %1091 = vrot.lane.b32.xlu0 %v14132_v34, %s7134_s9  ;;  %1237 = vst.msk [vmem:[#allocation3 + $0xbe] sm:$0x3] %vm1203_vm7, %v982_v38 }
 0x1c4   :  { %1097 = vrot.lane.b32.xlu1 %v7948_v40, %s7134_s9 }
 0x1c5   :  { %v980_v63 = vpop.permute.xlu0 %979 }
 0x1c6   :  { %1236 = vst.msk [vmem:[#allocation3 + $0xb6] sm:$0xff] %vm1201_vm6, %v980_v63  ;;  %v986_v8 = vpop.permute.xlu1 %985 }
 0x1c7   :  { %1095 = vrot.lane.b32.xlu0 %v8158_v61, %s7134_s9  ;;  %1239 = vst.msk [vmem:[#allocation3 + $0xc6] sm:$0xff] %vm1201_vm6, %v986_v8 }
 0x1c8   :  { %1101 = vrot.lane.b32.xlu1 %v8166_v4, %s7134_s9 }
 0x1c9   :  { %v984_v49 = vpop.permute.xlu0 %983 }
 0x1ca   :  { %1238 = vst.msk [vmem:[#allocation3 + $0xbe] sm:$0xfc] %vm1199_vm5, %v984_v49  ;;  %v990_v52 = vpop.permute.xlu1 %989 }
 0x1cb   :  { %1099 = vrot.lane.b32.xlu0 %v7956_v42, %s7134_s9  ;;  %1241 = vst.msk [vmem:[#allocation3 + $0xce] sm:$0xfc] %vm1199_vm5, %v990_v52 }
 0x1cc   :  { %1304 = vrot.lane.b32.xlu1 %v7484_v26, %s7135_s0 }
 0x1cd   :  { %v988_v12 = vpop.permute.xlu0 %987 }
 0x1ce   :  { %1240 = vst.msk [vmem:[#allocation3 + $0xce] sm:$0x3] %vm1203_vm7, %v988_v12  ;;  %v994_v24 = vpop.permute.xlu1 %993 }
 0x1cf   :  { %1302 = vrot.lane.b32.xlu0 %v7482_v25, %s7135_s0  ;;  %1243 = vst.msk [vmem:[#allocation3 + $0xde] sm:$0x3] %vm1203_vm7, %v994_v24 }
 0x1d0   :  { %1308 = vrot.lane.b32.xlu1 %v7492_v28, %s7135_s0 }
 0x1d1   :  { %v992_v61 = vpop.permute.xlu0 %991 }
 0x1d2   :  { %1242 = vst.msk [vmem:[#allocation3 + $0xd6] sm:$0xff] %vm1201_vm6, %v992_v61  ;;  %v998_v63 = vpop.permute.xlu1 %997 }
 0x1d3   :  { %1306 = vrot.lane.b32.xlu0 %v7490_v27, %s7135_s0  ;;  %1245 = vst.msk [vmem:[#allocation3 + $0xe6] sm:$0xff] %vm1201_vm6, %v998_v63  ;;  %v14133_v63 = vld [vmem:[#allocation11_spill] sm:$0xff] }
 0x1d4   :  { %1312 = vrot.lane.b32.xlu1 %v7500_v30, %s7135_s0 }
 0x1d5   :  { %v996_v4 = vpop.permute.xlu0 %995 }
 0x1d6   :  { %1244 = vst.msk [vmem:[#allocation3 + $0xde] sm:$0xfc] %vm1199_vm5, %v996_v4  ;;  %v1002_v49 = vpop.permute.xlu1 %1001 }
 0x1d7   :  { %1310 = vrot.lane.b32.xlu0 %v7498_v29, %s7135_s0  ;;  %1247 = vst.msk [vmem:[#allocation3 + $0xee] sm:$0xfc] %vm1199_vm5, %v1002_v49 }
 0x1d8   :  { %1316 = vrot.lane.b32.xlu1 %v7508_v32, %s7135_s0 }
 0x1d9   :  { %v1000_v38 = vpop.permute.xlu0 %999 }
 0x1da   :  { %1246 = vst.msk [vmem:[#allocation3 + $0xee] sm:$0x3] %vm1203_vm7, %v1000_v38  ;;  %v1006_v12 = vpop.permute.xlu1 %1005 }
 0x1db   :  { %1314 = vrot.lane.b32.xlu0 %v7506_v31, %s7135_s0  ;;  %1249 = vst.msk [vmem:[#allocation3 + $0xfe] sm:$0x3] %vm1203_vm7, %v1006_v12 }
 0x1dc   :  { %1320 = vrot.lane.b32.xlu1 %v14097_v22, %s7135_s0 }
 0x1dd   :  { %v1004_v8 = vpop.permute.xlu0 %1003 }
 0x1de   :  { %1248 = vst.msk [vmem:[#allocation3 + $0xf6] sm:$0xff] %vm1201_vm6, %v1004_v8  ;;  %v1010_v61 = vpop.permute.xlu1 %1009  ;;  %v14134_v8 = vld [vmem:[#allocation14_spill] sm:$0xff] }
 0x1df   :  { %1318 = vrot.lane.b32.xlu0 %v7518_v33, %s7135_s0  ;;  %1251 = vst.msk [vmem:[#allocation3 + $0x106] sm:$0xff] %vm1201_vm6, %v1010_v61 }
 0x1e0   :  { %1324 = vrot.lane.b32.xlu1 %v14100_v36, %s7135_s0 }
 0x1e1   :  { %v1008_v52 = vpop.permute.xlu0 %1007 }
 0x1e2   :  { %1250 = vst.msk [vmem:[#allocation3 + $0xfe] sm:$0xfc] %vm1199_vm5, %v1008_v52  ;;  %v1014_v4 = vpop.permute.xlu1 %1013 }
 0x1e3   :  { %1322 = vrot.lane.b32.xlu0 %v14099_v20, %s7135_s0  ;;  %1253 = vst.msk [vmem:[#allocation3 + $0x10e] sm:$0xfc] %vm1199_vm5, %v1014_v4 }
 0x1e4   :  { %1328 = vrot.lane.b32.xlu1 %v14103_v35, %s7135_s0 }
 0x1e5   :  { %v1012_v24 = vpop.permute.xlu0 %1011 }
 0x1e6   :  { %1252 = vst.msk [vmem:[#allocation3 + $0x10e] sm:$0x3] %vm1203_vm7, %v1012_v24  ;;  %v1018_v49 = vpop.permute.xlu1 %1017 }
 0x1e7   :  { %1326 = vrot.lane.b32.xlu0 %v14133_v63, %s7135_s0  ;;  %1255 = vst.msk [vmem:[#allocation3 + $0x11e] sm:$0x3] %vm1203_vm7, %v1018_v49 }
 0x1e8   :  { %1332 = vrot.lane.b32.xlu1 %v14134_v8, %s7135_s0 }
 0x1e9   :  { %v1016_v38 = vpop.permute.xlu0 %1015 }
 0x1ea   :  { %1254 = vst.msk [vmem:[#allocation3 + $0x116] sm:$0xff] %vm1201_vm6, %v1016_v38  ;;  %v1022_v52 = vpop.permute.xlu1 %1021 }
 0x1eb   :  { %1330 = vrot.lane.b32.xlu0 %v14105_v23, %s7135_s0  ;;  %1257 = vst.msk [vmem:[#allocation3 + $0x126] sm:$0xff] %vm1201_vm6, %v1022_v52 }
 0x1ec   :  { %1336 = vrot.lane.b32.xlu1 %v7558_v43, %s7135_s0 }
 0x1ed   :  { %v1020_v12 = vpop.permute.xlu0 %1019 }
 0x1ee   :  { %1256 = vst.msk [vmem:[#allocation3 + $0x11e] sm:$0xfc] %vm1199_vm5, %v1020_v12  ;;  %v1026_v24 = vpop.permute.xlu1 %1025 }
 0x1ef   :  { %1334 = vrot.lane.b32.xlu0 %v14107_v2, %s7135_s0  ;;  %1259 = vst.msk [vmem:[#allocation3 + $0x12e] sm:$0xfc] %vm1199_vm5, %v1026_v24 }
 0x1f0   :  { %1340 = vrot.lane.b32.xlu1 %v14109_v5, %s7135_s0 }
 0x1f1   :  { %v1024_v61 = vpop.permute.xlu0 %1023 }
 0x1f2   :  { %1258 = vst.msk [vmem:[#allocation3 + $0x12e] sm:$0x3] %vm1203_vm7, %v1024_v61  ;;  %v1030_v38 = vpop.permute.xlu1 %1029 }
 0x1f3   :  { %1338 = vrot.lane.b32.xlu0 %v7564_v44, %s7135_s0  ;;  %1261 = vst.msk [vmem:[#allocation3 + $0x13e] sm:$0x3] %vm1203_vm7, %v1030_v38 }
 0x1f4   :  { %1344 = vrot.lane.b32.xlu1 %v7669_v6, %s7135_s0 }
 0x1f5   :  { %v1028_v4 = vpop.permute.xlu0 %1027 }
 0x1f6   :  { %1260 = vst.msk [vmem:[#allocation3 + $0x136] sm:$0xff] %vm1201_vm6, %v1028_v4  ;;  %v1034_v12 = vpop.permute.xlu1 %1033 }
 0x1f7   :  { %1342 = vrot.lane.b32.xlu0 %v14110_v0, %s7135_s0  ;;  %1263 = vst.msk [vmem:[#allocation3 + $0x146] sm:$0xff] %vm1201_vm6, %v1034_v12  ;;  %v8568_v12 = vld [vmem:[#allocation2 + $0x180] sm:$0xff] }
 0x1f8   :  { %1348 = vrot.lane.b32.xlu1 %v14111_v39, %s7135_s0 }
 0x1f9   :  { %v1032_v49 = vpop.permute.xlu0 %1031 }
 0x1fa   :  { %1262 = vst.msk [vmem:[#allocation3 + $0x13e] sm:$0xfc] %vm1199_vm5, %v1032_v49  ;;  %v1038_v61 = vpop.permute.xlu1 %1037 }
 0x1fb   :  { %1346 = vrot.lane.b32.xlu0 %v7671_v7, %s7135_s0  ;;  %1265 = vst.msk [vmem:[#allocation3 + $0x14e] sm:$0xfc] %vm1199_vm5, %v1038_v61 }
 0x1fc   :  { %1352 = vrot.lane.b32.xlu1 %v7692_v10, %s7135_s0 }
 0x1fd   :  { %v1036_v52 = vpop.permute.xlu0 %1035 }
 0x1fe   :  { %1264 = vst.msk [vmem:[#allocation3 + $0x14e] sm:$0x3] %vm1203_vm7, %v1036_v52  ;;  %v1042_v4 = vpop.permute.xlu1 %1041  ;;  %v8570_v52 = vld [vmem:[#allocation2 + $0x188] sm:$0xff] }
 0x1ff   :  { %1350 = vrot.lane.b32.xlu0 %v14112_v41, %s7135_s0  ;;  %1267 = vst.msk [vmem:[#allocation3 + $0x15e] sm:$0x3] %vm1203_vm7, %v1042_v4 }
 0x200   :  { %1356 = vrot.lane.b32.xlu1 %v14113_v45, %s7135_s0 }
 0x201   :  { %v1040_v24 = vpop.permute.xlu0 %1039 }
 0x202   :  { %1266 = vst.msk [vmem:[#allocation3 + $0x156] sm:$0xff] %vm1201_vm6, %v1040_v24  ;;  %v1046_v49 = vpop.permute.xlu1 %1045 }
 0x203   :  { %1354 = vrot.lane.b32.xlu0 %v7694_v11, %s7135_s0  ;;  %1269 = vst.msk [vmem:[#allocation3 + $0x166] sm:$0xff] %vm1201_vm6, %v1046_v49 }
 0x204   :  { %1360 = vrot.lane.b32.xlu1 %v7708_v14, %s7135_s0 }
 0x205   :  { %v1044_v38 = vpop.permute.xlu0 %1043 }
 0x206   :  { %1268 = vst.msk [vmem:[#allocation3 + $0x15e] sm:$0xfc] %vm1199_vm5, %v1044_v38  ;;  %v1050_v24 = vpop.permute.xlu1 %1049 }
 0x207   :  { %1358 = vrot.lane.b32.xlu0 %v14114_v46, %s7135_s0  ;;  %1271 = vst.msk [vmem:[#allocation3 + $0x16e] sm:$0xfc] %vm1199_vm5, %v1050_v24  ;;  %v14135_v24 = vld [vmem:[#allocation28_spill] sm:$0xff] }
 0x208   :  { %1364 = vrot.lane.b32.xlu1 %v8570_v52, %s7135_s0 }
 0x209   :  { %v1048_v61 = vpop.permute.xlu0 %1047 }
 0x20a   :  { %1270 = vst.msk [vmem:[#allocation3 + $0x16e] sm:$0x3] %vm1203_vm7, %v1048_v61  ;;  %v1054_v38 = vpop.permute.xlu1 %1053 }
 0x20b   :  { %1362 = vrot.lane.b32.xlu0 %v8568_v12, %s7135_s0  ;;  %1273 = vst.msk [vmem:[#allocation3 + $0x17e] sm:$0x3] %vm1203_vm7, %v1054_v38 }
 0x20c   :  { %1368 = vrot.lane.b32.xlu1 %v14117_v55, %s7135_s0  ;;  %v14136_v55 = vld [vmem:[#allocation29_spill] sm:$0xff] }
 0x20d   :  { %v1052_v4 = vpop.permute.xlu0 %1051 }
 0x20e   :  { %1272 = vst.msk [vmem:[#allocation3 + $0x176] sm:$0xff] %vm1201_vm6, %v1052_v4  ;;  %v1058_v61 = vpop.permute.xlu1 %1057 }
 0x20f   :  { %1366 = vrot.lane.b32.xlu0 %v14116_v9, %s7135_s0  ;;  %1275 = vst.msk [vmem:[#allocation3 + $0x186] sm:$0xff] %vm1201_vm6, %v1058_v61  ;;  %v14137_v9 = vld [vmem:[#allocation30_spill] sm:$0xff] }
 0x210   :  { %1372 = vrot.lane.b32.xlu1 %v14135_v24, %s7135_s0 }
 0x211   :  { %v1056_v49 = vpop.permute.xlu0 %1055 }
 0x212   :  { %1274 = vst.msk [vmem:[#allocation3 + $0x17e] sm:$0xfc] %vm1199_vm5, %v1056_v49  ;;  %v1062_v38 = vpop.permute.xlu1 %1061 }
 0x213   :  { %1370 = vrot.lane.b32.xlu0 %v7718_v17, %s7135_s0  ;;  %1277 = vst.msk [vmem:[#allocation3 + $0x18e] sm:$0xfc] %vm1199_vm5, %v1062_v38 }
 0x214   :  { %1376 = vrot.lane.b32.xlu1 %v14137_v9, %s7135_s0 }
 0x215   :  { %v1060_v4 = vpop.permute.xlu0 %1059 }
 0x216   :  { %1276 = vst.msk [vmem:[#allocation3 + $0x18e] sm:$0x3] %vm1203_vm7, %v1060_v4  ;;  %v1066_v61 = vpop.permute.xlu1 %1065 }
 0x217   :  { %1374 = vrot.lane.b32.xlu0 %v14136_v55, %s7135_s0  ;;  %1279 = vst.msk [vmem:[#allocation3 + $0x19e] sm:$0x3] %vm1203_vm7, %v1066_v61 }
 0x218   :  { %1380 = vrot.lane.b32.xlu1 %v7746_v48, %s7135_s0 }
 0x219   :  { %v1064_v49 = vpop.permute.xlu0 %1063 }
 0x21a   :  { %1278 = vst.msk [vmem:[#allocation3 + $0x196] sm:$0xff] %vm1201_vm6, %v1064_v49  ;;  %v1070_v38 = vpop.permute.xlu1 %1069 }
 0x21b   :  { %1378 = vrot.lane.b32.xlu0 %v14122_v19, %s7135_s0  ;;  %1281 = vst.msk [vmem:[#allocation3 + $0x1a6] sm:$0xff] %vm1201_vm6, %v1070_v38 }
 0x21c   :  { %1384 = vrot.lane.b32.xlu1 %v7754_v51, %s7135_s0 }
 0x21d   :  { %v1068_v4 = vpop.permute.xlu0 %1067 }
 0x21e   :  { %1280 = vst.msk [vmem:[#allocation3 + $0x19e] sm:$0xfc] %vm1199_vm5, %v1068_v4  ;;  %v1074_v61 = vpop.permute.xlu1 %1073 }
 0x21f   :  { %1382 = vrot.lane.b32.xlu0 %v14123_v16, %s7135_s0  ;;  %1283 = vst.msk [vmem:[#allocation3 + $0x1ae] sm:$0xfc] %vm1199_vm5, %v1074_v61 }
 0x220   :  { %1388 = vrot.lane.b32.xlu1 %v7835_v56, %s7135_s0 }
 0x221   :  { %v1072_v49 = vpop.permute.xlu0 %1071 }
 0x222   :  { %1282 = vst.msk [vmem:[#allocation3 + $0x1ae] sm:$0x3] %vm1203_vm7, %v1072_v49  ;;  %v1078_v38 = vpop.permute.xlu1 %1077 }
 0x223   :  { %1386 = vrot.lane.b32.xlu0 %v14124_v13, %s7135_s0  ;;  %1285 = vst.msk [vmem:[#allocation3 + $0x1be] sm:$0x3] %vm1203_vm7, %v1078_v38 }
 0x224   :  { %1392 = vrot.lane.b32.xlu1 %v7846_v60, %s7135_s0 }
 0x225   :  { %v1076_v4 = vpop.permute.xlu0 %1075 }
 0x226   :  { %1284 = vst.msk [vmem:[#allocation3 + $0x1b6] sm:$0xff] %vm1201_vm6, %v1076_v4  ;;  %v1082_v61 = vpop.permute.xlu1 %1081 }
 0x227   :  { %1390 = vrot.lane.b32.xlu0 %v14125_v58, %s7135_s0  ;;  %1287 = vst.msk [vmem:[#allocation3 + $0x1c6] sm:$0xff] %vm1201_vm6, %v1082_v61 }
 0x228   :  { %1396 = vrot.lane.b32.xlu1 %v7854_v62, %s7135_s0 }
 0x229   :  { %v1080_v49 = vpop.permute.xlu0 %1079 }
 0x22a   :  { %1286 = vst.msk [vmem:[#allocation3 + $0x1be] sm:$0xfc] %vm1199_vm5, %v1080_v49  ;;  %v1086_v38 = vpop.permute.xlu1 %1085 }
 0x22b   :  { %1394 = vrot.lane.b32.xlu0 %v14126_v18, %s7135_s0  ;;  %1289 = vst.msk [vmem:[#allocation3 + $0x1ce] sm:$0xfc] %vm1199_vm5, %v1086_v38 }
 0x22c   :  { %1400 = vrot.lane.b32.xlu1 %v7862_v1, %s7135_s0 }
 0x22d   :  { %v1084_v4 = vpop.permute.xlu0 %1083 }
 0x22e   :  { %1288 = vst.msk [vmem:[#allocation3 + $0x1ce] sm:$0x3] %vm1203_vm7, %v1084_v4  ;;  %v1090_v61 = vpop.permute.xlu1 %1089 }
 0x22f   :  { %1398 = vrot.lane.b32.xlu0 %v14127_v21, %s7135_s0  ;;  %1291 = vst.msk [vmem:[#allocation3 + $0x1de] sm:$0x3] %vm1203_vm7, %v1090_v61 }
 0x230   :  { %1404 = vrot.lane.b32.xlu1 %v7874_v3, %s7135_s0 }
 0x231   :  { %v1088_v49 = vpop.permute.xlu0 %1087 }
 0x232   :  { %1290 = vst.msk [vmem:[#allocation3 + $0x1d6] sm:$0xff] %vm1201_vm6, %v1088_v49  ;;  %v1094_v38 = vpop.permute.xlu1 %1093 }
 0x233   :  { %1402 = vrot.lane.b32.xlu0 %v14128_v15, %s7135_s0  ;;  %1293 = vst.msk [vmem:[#allocation3 + $0x1e6] sm:$0xff] %vm1201_vm6, %v1094_v38 }
 0x234   :  { %1408 = vrot.lane.b32.xlu1 %v7884_v54, %s7135_s0 }
 0x235   :  { %v1092_v4 = vpop.permute.xlu0 %1091 }
 0x236   :  { %1292 = vst.msk [vmem:[#allocation3 + $0x1de] sm:$0xfc] %vm1199_vm5, %v1092_v4  ;;  %v1098_v61 = vpop.permute.xlu1 %1097 }
 0x237   :  { %1406 = vrot.lane.b32.xlu0 %v14129_v50, %s7135_s0  ;;  %1295 = vst.msk [vmem:[#allocation3 + $0x1ee] sm:$0xfc] %vm1199_vm5, %v1098_v61  ;;  %vm2890_vm5 = vcmask 188584  }
 0x238   :  { %1412 = vrot.lane.b32.xlu1 %v7892_v59, %s7135_s0 }
 0x239   :  { %v1096_v49 = vpop.permute.xlu0 %1095 }
 0x23a   :  { %1294 = vst.msk [vmem:[#allocation3 + $0x1ee] sm:$0x3] %vm1203_vm7, %v1096_v49  ;;  %v1102_v38 = vpop.permute.xlu1 %1101 }
 0x23b   :  { %1410 = vrot.lane.b32.xlu0 %v14130_v47, %s7135_s0  ;;  %1297 = vst.msk [vmem:[#allocation3 + $0x1fe] sm:$0x3] %vm1203_vm7, %v1102_v38  ;;  %vm3275_vm7 = vcmask 220352  }
 0x23c   :  { %1416 = vrot.lane.b32.xlu1 %v7926_v53, %s7135_s0 }
 0x23d   :  { %v1100_v4 = vpop.permute.xlu0 %1099 }
 0x23e   :  { %1296 = vst.msk [vmem:[#allocation3 + $0x1f6] sm:$0xff] %vm1201_vm6, %v1100_v4  ;;  %v1305_v61 = vpop.permute.xlu1 %1304  ;;  %vm3273_vm6 = vcmask 220354  }
 0x23f   :  { %1414 = vrot.lane.b32.xlu0 %v14131_v57, %s7135_s0  ;;  %1496 = vst.msk [vmem:[#allocation3 + $0x8] sm:$0xff] %vm1494_vm8, %v1305_v61  ;;  %v8670_v61 = vld [vmem:[#allocation2 + $0x338] sm:$0xff] }
 0x240   :  { %1420 = vrot.lane.b32.xlu1 %v7941_v37, %s7135_s0  ;;  %14138 = vst [vmem:[#allocation34_spill] sm:$0xff] %v8670_v61 }
 0x241   :  { %v1303_v49 = vpop.permute.xlu0 %1302 }
 0x242   :  { %1495 = vst.msk [vmem:[#allocation3] sm:$0xff] %vm1494_vm8, %v1303_v49  ;;  %v1309_v38 = vpop.permute.xlu1 %1308  ;;  %v8668_v49 = vld [vmem:[#allocation2 + $0x330] sm:$0xff] }
 0x243   :  { %1418 = vrot.lane.b32.xlu0 %v14132_v34, %s7135_s0  ;;  %1498 = vst.msk [vmem:[#allocation3 + $0x18] sm:$0xff] %vm1494_vm8, %v1309_v38 }
 0x244   :  { %1424 = vrot.lane.b32.xlu1 %v7956_v42, %s7135_s0 }
 0x245   :  { %v1307_v4 = vpop.permute.xlu0 %1306 }
 0x246   :  { %1497 = vst.msk [vmem:[#allocation3 + $0x10] sm:$0xff] %vm1494_vm8, %v1307_v4  ;;  %v1313_v53 = vpop.permute.xlu1 %1312 }
 0x247   :  { %1422 = vrot.lane.b32.xlu0 %v7948_v40, %s7135_s0  ;;  %1500 = vst.msk [vmem:[#allocation3 + $0x28] sm:$0xff] %vm1494_vm8, %v1313_v53 }
 0x248   :  { %1428 = vrot.lane.b32.xlu1 %v8670_v61, %s7135_s0  ;;  %v8686_v61 = vld [vmem:[#allocation2 + $0x28] sm:$0x3] }
 0x249   :  { %v1311_v34 = vpop.permute.xlu0 %1310 }
 0x24a   :  { %1499 = vst.msk [vmem:[#allocation3 + $0x20] sm:$0xff] %vm1494_vm8, %v1311_v34  ;;  %v1317_v38 = vpop.permute.xlu1 %1316 }
 0x24b   :  { %1426 = vrot.lane.b32.xlu0 %v8668_v49, %s7135_s0  ;;  %1502 = vst.msk [vmem:[#allocation3 + $0x38] sm:$0xff] %vm1494_vm8, %v1317_v38 }
 0x24c   :  { %1563 = vrot.lane.b32.xlu1 %v7484_v26, %s7136_s17 }
 0x24d   :  { %v1315_v4 = vpop.permute.xlu0 %1314 }
 0x24e   :  { %1501 = vst.msk [vmem:[#allocation3 + $0x30] sm:$0xff] %vm1494_vm8, %v1315_v4  ;;  %v1321_v34 = vpop.permute.xlu1 %1320 }
 0x24f   :  { %1561 = vrot.lane.b32.xlu0 %v7482_v25, %s7136_s17  ;;  %1504 = vst.msk [vmem:[#allocation3 + $0x48] sm:$0xff] %vm1494_vm8, %v1321_v34 }
 0x250   :  { %1567 = vrot.lane.b32.xlu1 %v7490_v27, %s7136_s17 }
 0x251   :  { %v1319_v53 = vpop.permute.xlu0 %1318 }
 0x252   :  { %1503 = vst.msk [vmem:[#allocation3 + $0x40] sm:$0xff] %vm1494_vm8, %v1319_v53  ;;  %v1325_v38 = vpop.permute.xlu1 %1324  ;;  %v8696_v53 = vld [vmem:[#allocation2 + $0x40] sm:$0x3] }
 0x253   :  { %1565 = vrot.lane.b32.xlu0 %v8686_v61, %s7136_s17  ;;  %1506 = vst.msk [vmem:[#allocation3 + $0x58] sm:$0xff] %vm1494_vm8, %v1325_v38 }
 0x254   :  { %1571 = vrot.lane.b32.xlu1 %v8696_v53, %s7136_s17 }
 0x255   :  { %v1323_v4 = vpop.permute.xlu0 %1322 }
 0x256   :  { %1505 = vst.msk [vmem:[#allocation3 + $0x50] sm:$0xff] %vm1494_vm8, %v1323_v4  ;;  %v1329_v26 = vpop.permute.xlu1 %1328 }
 0x257   :  { %1569 = vrot.lane.b32.xlu0 %v7492_v28, %s7136_s17  ;;  %1508 = vst.msk [vmem:[#allocation3 + $0x68] sm:$0xff] %vm1494_vm8, %v1329_v26  ;;  %v8708_v28 = vld [vmem:[#allocation2 + $0x58] sm:$0x3] }
 0x258   :  { %1575 = vrot.lane.b32.xlu1 %v7500_v30, %s7136_s17 }
 0x259   :  { %v1327_v34 = vpop.permute.xlu0 %1326 }
 0x25a   :  { %1507 = vst.msk [vmem:[#allocation3 + $0x60] sm:$0xff] %vm1494_vm8, %v1327_v34  ;;  %v1333_v38 = vpop.permute.xlu1 %1332 }
 0x25b   :  { %1573 = vrot.lane.b32.xlu0 %v7498_v29, %s7136_s17  ;;  %1510 = vst.msk [vmem:[#allocation3 + $0x78] sm:$0xff] %vm1494_vm8, %v1333_v38 }
 0x25c   :  { %1579 = vrot.lane.b32.xlu1 %v7506_v31, %s7136_s17 }
 0x25d   :  { %v1331_v4 = vpop.permute.xlu0 %1330 }
 0x25e   :  { %1509 = vst.msk [vmem:[#allocation3 + $0x70] sm:$0xff] %vm1494_vm8, %v1331_v4  ;;  %v1337_v34 = vpop.permute.xlu1 %1336  ;;  %v8718_v4 = vld [vmem:[#allocation2 + $0x70] sm:$0x3] }
 0x25f   :  { %1577 = vrot.lane.b32.xlu0 %v8708_v28, %s7136_s17  ;;  %1512 = vst.msk [vmem:[#allocation3 + $0x88] sm:$0xff] %vm1494_vm8, %v1337_v34 }
 0x260   :  { %1583 = vrot.lane.b32.xlu1 %v8718_v4, %s7136_s17 }
 0x261   :  { %v1335_v26 = vpop.permute.xlu0 %1334 }
 0x262   :  { %1511 = vst.msk [vmem:[#allocation3 + $0x80] sm:$0xff] %vm1494_vm8, %v1335_v26  ;;  %v1341_v30 = vpop.permute.xlu1 %1340 }
 0x263   :  { %1581 = vrot.lane.b32.xlu0 %v7508_v32, %s7136_s17  ;;  %1514 = vst.msk [vmem:[#allocation3 + $0x98] sm:$0xff] %vm1494_vm8, %v1341_v30  ;;  %v8730_v32 = vld [vmem:[#allocation2 + $0x88] sm:$0x3] }
 0x264   :  { %1587 = vrot.lane.b32.xlu1 %v14097_v22, %s7136_s17 }
 0x265   :  { %v1339_v38 = vpop.permute.xlu0 %1338 }
 0x266   :  { %1513 = vst.msk [vmem:[#allocation3 + $0x90] sm:$0xff] %vm1494_vm8, %v1339_v38  ;;  %v1345_v34 = vpop.permute.xlu1 %1344 }
 0x267   :  { %1585 = vrot.lane.b32.xlu0 %v7518_v33, %s7136_s17  ;;  %1516 = vst.msk [vmem:[#allocation3 + $0xa8] sm:$0xff] %vm1494_vm8, %v1345_v34 }
 0x268   :  { %1591 = vrot.lane.b32.xlu1 %v14099_v20, %s7136_s17 }
 0x269   :  { %v1343_v26 = vpop.permute.xlu0 %1342 }
 0x26a   :  { %1515 = vst.msk [vmem:[#allocation3 + $0xa0] sm:$0xff] %vm1494_vm8, %v1343_v26  ;;  %v1349_v38 = vpop.permute.xlu1 %1348  ;;  %v8740_v26 = vld [vmem:[#allocation2 + $0xa0] sm:$0x3] }
 0x26b   :  { %1589 = vrot.lane.b32.xlu0 %v8730_v32, %s7136_s17  ;;  %1518 = vst.msk [vmem:[#allocation3 + $0xb8] sm:$0xff] %vm1494_vm8, %v1349_v38 }
 0x26c   :  { %1595 = vrot.lane.b32.xlu1 %v8740_v26, %s7136_s17 }
 0x26d   :  { %v1347_v30 = vpop.permute.xlu0 %1346 }
 0x26e   :  { %1517 = vst.msk [vmem:[#allocation3 + $0xb0] sm:$0xff] %vm1494_vm8, %v1347_v30  ;;  %v1353_v22 = vpop.permute.xlu1 %1352 }
 0x26f   :  { %1593 = vrot.lane.b32.xlu0 %v14100_v36, %s7136_s17  ;;  %1520 = vst.msk [vmem:[#allocation3 + $0xc8] sm:$0xff] %vm1494_vm8, %v1353_v22  ;;  %v8752_v36 = vld [vmem:[#allocation2 + $0xb8] sm:$0x3] }
 0x270   :  { %1599 = vrot.lane.b32.xlu1 %v14103_v35, %s7136_s17 }
 0x271   :  { %v1351_v34 = vpop.permute.xlu0 %1350 }
 0x272   :  { %1519 = vst.msk [vmem:[#allocation3 + $0xc0] sm:$0xff] %vm1494_vm8, %v1351_v34  ;;  %v1357_v38 = vpop.permute.xlu1 %1356 }
 0x273   :  { %1597 = vrot.lane.b32.xlu0 %v14133_v63, %s7136_s17  ;;  %1522 = vst.msk [vmem:[#allocation3 + $0xd8] sm:$0xff] %vm1494_vm8, %v1357_v38 }
 0x274   :  { %1603 = vrot.lane.b32.xlu1 %v14105_v23, %s7136_s17 }
 0x275   :  { %v1355_v30 = vpop.permute.xlu0 %1354 }
 0x276   :  { %1521 = vst.msk [vmem:[#allocation3 + $0xd0] sm:$0xff] %vm1494_vm8, %v1355_v30  ;;  %v1361_v34 = vpop.permute.xlu1 %1360  ;;  %v8762_v30 = vld [vmem:[#allocation2 + $0xd0] sm:$0x3] }
 0x277   :  { %1601 = vrot.lane.b32.xlu0 %v8752_v36, %s7136_s17  ;;  %1524 = vst.msk [vmem:[#allocation3 + $0xe8] sm:$0xff] %vm1494_vm8, %v1361_v34 }
 0x278   :  { %1607 = vrot.lane.b32.xlu1 %v8762_v30, %s7136_s17 }
 0x279   :  { %v1359_v22 = vpop.permute.xlu0 %1358 }
 0x27a   :  { %1523 = vst.msk [vmem:[#allocation3 + $0xe0] sm:$0xff] %vm1494_vm8, %v1359_v22  ;;  %v1365_v35 = vpop.permute.xlu1 %1364 }
 0x27b   :  { %1605 = vrot.lane.b32.xlu0 %v14134_v8, %s7136_s17  ;;  %1526 = vst.msk [vmem:[#allocation3 + $0xf8] sm:$0xff] %vm1494_vm8, %v1365_v35  ;;  %v8774_v8 = vld [vmem:[#allocation2 + $0xe8] sm:$0x3] }
 0x27c   :  { %1611 = vrot.lane.b32.xlu1 %v7558_v43, %s7136_s17 }
 0x27d   :  { %v1363_v38 = vpop.permute.xlu0 %1362 }
 0x27e   :  { %1525 = vst.msk [vmem:[#allocation3 + $0xf0] sm:$0xff] %vm1494_vm8, %v1363_v38  ;;  %v1369_v34 = vpop.permute.xlu1 %1368 }
 0x27f   :  { %1609 = vrot.lane.b32.xlu0 %v14107_v2, %s7136_s17  ;;  %1528 = vst.msk [vmem:[#allocation3 + $0x108] sm:$0xff] %vm1494_vm8, %v1369_v34 }
 0x280   :  { %1615 = vrot.lane.b32.xlu1 %v7564_v44, %s7136_s17 }
 0x281   :  { %v1367_v22 = vpop.permute.xlu0 %1366 }
 0x282   :  { %1527 = vst.msk [vmem:[#allocation3 + $0x100] sm:$0xff] %vm1494_vm8, %v1367_v22  ;;  %v1373_v38 = vpop.permute.xlu1 %1372  ;;  %v8784_v22 = vld [vmem:[#allocation2 + $0x100] sm:$0x3] }
 0x283   :  { %1613 = vrot.lane.b32.xlu0 %v8774_v8, %s7136_s17  ;;  %1530 = vst.msk [vmem:[#allocation3 + $0x118] sm:$0xff] %vm1494_vm8, %v1373_v38 }
 0x284   :  { %1619 = vrot.lane.b32.xlu1 %v8784_v22, %s7136_s17 }
 0x285   :  { %v1371_v35 = vpop.permute.xlu0 %1370 }
 0x286   :  { %1529 = vst.msk [vmem:[#allocation3 + $0x110] sm:$0xff] %vm1494_vm8, %v1371_v35  ;;  %v1377_v43 = vpop.permute.xlu1 %1376 }
 0x287   :  { %1617 = vrot.lane.b32.xlu0 %v14109_v5, %s7136_s17  ;;  %1532 = vst.msk [vmem:[#allocation3 + $0x128] sm:$0xff] %vm1494_vm8, %v1377_v43  ;;  %v8796_v5 = vld [vmem:[#allocation2 + $0x118] sm:$0x3] }
 0x288   :  { %1623 = vrot.lane.b32.xlu1 %v7669_v6, %s7136_s17 }
 0x289   :  { %v1375_v34 = vpop.permute.xlu0 %1374 }
 0x28a   :  { %1531 = vst.msk [vmem:[#allocation3 + $0x120] sm:$0xff] %vm1494_vm8, %v1375_v34  ;;  %v1381_v38 = vpop.permute.xlu1 %1380 }
 0x28b   :  { %1621 = vrot.lane.b32.xlu0 %v14110_v0, %s7136_s17  ;;  %1534 = vst.msk [vmem:[#allocation3 + $0x138] sm:$0xff] %vm1494_vm8, %v1381_v38 }
 0x28c   :  { %1627 = vrot.lane.b32.xlu1 %v7671_v7, %s7136_s17 }
 0x28d   :  { %v1379_v35 = vpop.permute.xlu0 %1378 }
 0x28e   :  { %1533 = vst.msk [vmem:[#allocation3 + $0x130] sm:$0xff] %vm1494_vm8, %v1379_v35  ;;  %v1385_v34 = vpop.permute.xlu1 %1384  ;;  %v8806_v35 = vld [vmem:[#allocation2 + $0x130] sm:$0x3] }
 0x28f   :  { %1625 = vrot.lane.b32.xlu0 %v8796_v5, %s7136_s17  ;;  %1536 = vst.msk [vmem:[#allocation3 + $0x148] sm:$0xff] %vm1494_vm8, %v1385_v34 }
 0x290   :  { %1631 = vrot.lane.b32.xlu1 %v8806_v35, %s7136_s17 }
 0x291   :  { %v1383_v43 = vpop.permute.xlu0 %1382 }
 0x292   :  { %1535 = vst.msk [vmem:[#allocation3 + $0x140] sm:$0xff] %vm1494_vm8, %v1383_v43  ;;  %v1389_v6 = vpop.permute.xlu1 %1388 }
 0x293   :  { %1629 = vrot.lane.b32.xlu0 %v14111_v39, %s7136_s17  ;;  %1538 = vst.msk [vmem:[#allocation3 + $0x158] sm:$0xff] %vm1494_vm8, %v1389_v6  ;;  %v8818_v39 = vld [vmem:[#allocation2 + $0x148] sm:$0x3] }
 0x294   :  { %1635 = vrot.lane.b32.xlu1 %v7692_v10, %s7136_s17 }
 0x295   :  { %v1387_v38 = vpop.permute.xlu0 %1386 }
 0x296   :  { %1537 = vst.msk [vmem:[#allocation3 + $0x150] sm:$0xff] %vm1494_vm8, %v1387_v38  ;;  %v1393_v34 = vpop.permute.xlu1 %1392 }
 0x297   :  { %1633 = vrot.lane.b32.xlu0 %v14112_v41, %s7136_s17  ;;  %1540 = vst.msk [vmem:[#allocation3 + $0x168] sm:$0xff] %vm1494_vm8, %v1393_v34 }
 0x298   :  { %1639 = vrot.lane.b32.xlu1 %v7694_v11, %s7136_s17 }
 0x299   :  { %v1391_v43 = vpop.permute.xlu0 %1390 }
 0x29a   :  { %1539 = vst.msk [vmem:[#allocation3 + $0x160] sm:$0xff] %vm1494_vm8, %v1391_v43  ;;  %v1397_v38 = vpop.permute.xlu1 %1396  ;;  %v8828_v43 = vld [vmem:[#allocation2 + $0x160] sm:$0x3] }
 0x29b   :  { %1637 = vrot.lane.b32.xlu0 %v8818_v39, %s7136_s17  ;;  %1542 = vst.msk [vmem:[#allocation3 + $0x178] sm:$0xff] %vm1494_vm8, %v1397_v38 }
 0x29c   :  { %1643 = vrot.lane.b32.xlu1 %v8828_v43, %s7136_s17 }
 0x29d   :  { %v1395_v6 = vpop.permute.xlu0 %1394 }
 0x29e   :  { %1541 = vst.msk [vmem:[#allocation3 + $0x170] sm:$0xff] %vm1494_vm8, %v1395_v6  ;;  %v1401_v10 = vpop.permute.xlu1 %1400 }
 0x29f   :  { %1641 = vrot.lane.b32.xlu0 %v14113_v45, %s7136_s17  ;;  %1544 = vst.msk [vmem:[#allocation3 + $0x188] sm:$0xff] %vm1494_vm8, %v1401_v10  ;;  %v8840_v45 = vld [vmem:[#allocation2 + $0x178] sm:$0x3]  ;;  %v8846_v10 = vld [vmem:[#allocation2 + $0x190] sm:$0x3] }
 0x2a0   :  { %1647 = vrot.lane.b32.xlu1 %v7708_v14, %s7136_s17  ;;  %14139 = vst [vmem:[#allocation9_spill] sm:$0xff] %v8840_v45 }
 0x2a1   :  { %v1399_v34 = vpop.permute.xlu0 %1398 }
 0x2a2   :  { %1543 = vst.msk [vmem:[#allocation3 + $0x180] sm:$0xff] %vm1494_vm8, %v1399_v34  ;;  %v1405_v38 = vpop.permute.xlu1 %1404 }
 0x2a3   :  { %1645 = vrot.lane.b32.xlu0 %v14114_v46, %s7136_s17  ;;  %1546 = vst.msk [vmem:[#allocation3 + $0x198] sm:$0xff] %vm1494_vm8, %v1405_v38 }
 0x2a4   :  { %1651 = vrot.lane.b32.xlu1 %v8568_v12, %s7136_s17  ;;  %v14140_v12 = vld [vmem:[#allocation26_spill] sm:$0xff] }
 0x2a5   :  { %v1403_v6 = vpop.permute.xlu0 %1402 }
 0x2a6   :  { %1545 = vst.msk [vmem:[#allocation3 + $0x190] sm:$0xff] %vm1494_vm8, %v1403_v6  ;;  %v1409_v46 = vpop.permute.xlu1 %1408 }
 0x2a7   :  { %1649 = vrot.lane.b32.xlu0 %v8840_v45, %s7136_s17  ;;  %1548 = vst.msk [vmem:[#allocation3 + $0x1a8] sm:$0xff] %vm1494_vm8, %v1409_v46  ;;  %v14141_v45 = vld [vmem:[#allocation27_spill] sm:$0xff] }
 0x2a8   :  { %1655 = vrot.lane.b32.xlu1 %v8846_v10, %s7136_s17 }
 0x2a9   :  { %v1407_v34 = vpop.permute.xlu0 %1406 }
 0x2aa   :  { %1547 = vst.msk [vmem:[#allocation3 + $0x1a0] sm:$0xff] %vm1494_vm8, %v1407_v34  ;;  %v1413_v38 = vpop.permute.xlu1 %1412 }
 0x2ab   :  { %1653 = vrot.lane.b32.xlu0 %v8570_v52, %s7136_s17  ;;  %1550 = vst.msk [vmem:[#allocation3 + $0x1b8] sm:$0xff] %vm1494_vm8, %v1413_v38  ;;  %v8862_v52 = vld [vmem:[#allocation2 + $0x1d8] sm:$0x3] }
 0x2ac   :  { %1659 = vrot.lane.b32.xlu1 %v14141_v45, %s7136_s17 }
 0x2ad   :  { %v1411_v6 = vpop.permute.xlu0 %1410 }
 0x2ae   :  { %1549 = vst.msk [vmem:[#allocation3 + $0x1b0] sm:$0xff] %vm1494_vm8, %v1411_v6  ;;  %v1417_v46 = vpop.permute.xlu1 %1416 }
 0x2af   :  { %1657 = vrot.lane.b32.xlu0 %v14140_v12, %s7136_s17  ;;  %1552 = vst.msk [vmem:[#allocation3 + $0x1c8] sm:$0xff] %vm1494_vm8, %v1417_v46 }
 0x2b0   :  { %1663 = vrot.lane.b32.xlu1 %v7718_v17, %s7136_s17 }
 0x2b1   :  { %v1415_v34 = vpop.permute.xlu0 %1414 }
 0x2b2   :  { %1551 = vst.msk [vmem:[#allocation3 + $0x1c0] sm:$0xff] %vm1494_vm8, %v1415_v34  ;;  %v1421_v38 = vpop.permute.xlu1 %1420  ;;  %v8872_v34 = vld [vmem:[#allocation2 + $0x1f0] sm:$0x3] }
 0x2b3   :  { %1661 = vrot.lane.b32.xlu0 %v8862_v52, %s7136_s17  ;;  %1554 = vst.msk [vmem:[#allocation3 + $0x1d8] sm:$0xff] %vm1494_vm8, %v1421_v38 }
 0x2b4   :  { %1667 = vrot.lane.b32.xlu1 %v8872_v34, %s7136_s17 }
 0x2b5   :  { %v1419_v6 = vpop.permute.xlu0 %1418 }
 0x2b6   :  { %1553 = vst.msk [vmem:[#allocation3 + $0x1d0] sm:$0xff] %vm1494_vm8, %v1419_v6  ;;  %v1425_v45 = vpop.permute.xlu1 %1424 }
 0x2b7   :  { %1665 = vrot.lane.b32.xlu0 %v14135_v24, %s7136_s17  ;;  %1556 = vst.msk [vmem:[#allocation3 + $0x1e8] sm:$0xff] %vm1494_vm8, %v1425_v45  ;;  %v8884_v24 = vld [vmem:[#allocation2 + $0x208] sm:$0x3] }
 0x2b8   :  { %1671 = vrot.lane.b32.xlu1 %v14137_v9, %s7136_s17  ;;  %14142 = vst [vmem:[#allocation38_spill] sm:$0xff] %v8884_v24 }
 0x2b9   :  { %v1423_v46 = vpop.permute.xlu0 %1422 }
 0x2ba   :  { %1555 = vst.msk [vmem:[#allocation3 + $0x1e0] sm:$0xff] %vm1494_vm8, %v1423_v46  ;;  %v1429_v38 = vpop.permute.xlu1 %1428 }
 0x2bb   :  { %1669 = vrot.lane.b32.xlu0 %v14136_v55, %s7136_s17  ;;  %1558 = vst.msk [vmem:[#allocation3 + $0x1f8] sm:$0xff] %vm1494_vm8, %v1429_v38 }
 0x2bc   :  { %1675 = vrot.lane.b32.xlu1 %v14122_v19, %s7136_s17 }
 0x2bd   :  { %v1427_v6 = vpop.permute.xlu0 %1426 }
 0x2be   :  { %1557 = vst.msk [vmem:[#allocation3 + $0x1f0] sm:$0xff] %vm1494_vm8, %v1427_v6  ;;  %v1564_v46 = vpop.permute.xlu1 %1563  ;;  %v8894_v6 = vld [vmem:[#allocation2 + $0x220] sm:$0x3]  ;;  %vm3277_vm8 = vcmask 214208  }
 0x2bf   :  { %1673 = vrot.lane.b32.xlu0 %v8884_v24, %s7136_s17  ;;  %1852 = vst.msk [vmem:[#allocation3 + $0x7] sm:$0xff] %vm1851_vm10, %v1564_v46  ;;  %14143 = vst [vmem:[#allocation47_spill] sm:$0xff] %v8894_v6 }
 0x2c0   :  { %1679 = vrot.lane.b32.xlu1 %v8894_v6, %s7136_s17  ;;  %v8906_v6 = vld [vmem:[#allocation2 + $0x238] sm:$0x3] }
 0x2c1   :  { %v1562_v45 = vpop.permute.xlu0 %1561 }
 0x2c2   :  { %1850 = vst.msk [vmem:[#allocation3 - $0x1] sm:$0xfe] %vm1849_vm9, %v1562_v45  ;;  %v1568_v24 = vpop.permute.xlu1 %1567 }
 0x2c3   :  { %1677 = vrot.lane.b32.xlu0 %v7746_v48, %s7136_s17  ;;  %1855 = vst.msk [vmem:[#allocation3 + $0xf] sm:$0xfe] %vm1849_vm9, %v1568_v24 }
 0x2c4   :  { %1683 = vrot.lane.b32.xlu1 %v7754_v51, %s7136_s17 }
 0x2c5   :  { %v1566_v38 = vpop.permute.xlu0 %1565 }
 0x2c6   :  { %1854 = vst.msk [vmem:[#allocation3 + $0xf] sm:$0x1] %vm1853_vm11, %v1566_v38  ;;  %v1572_v46 = vpop.permute.xlu1 %1571 }
 0x2c7   :  { %1681 = vrot.lane.b32.xlu0 %v14123_v16, %s7136_s17  ;;  %1857 = vst.msk [vmem:[#allocation3 + $0x1f] sm:$0x1] %vm1853_vm11, %v1572_v46 }
 0x2c8   :  { %1687 = vrot.lane.b32.xlu1 %v14124_v13, %s7136_s17 }
 0x2c9   :  { %v1570_v45 = vpop.permute.xlu0 %1569 }
 0x2ca   :  { %1856 = vst.msk [vmem:[#allocation3 + $0x17] sm:$0xff] %vm1851_vm10, %v1570_v45  ;;  %v1576_v38 = vpop.permute.xlu1 %1575  ;;  %v8916_v45 = vld [vmem:[#allocation2 + $0x250] sm:$0x3] }
 0x2cb   :  { %1685 = vrot.lane.b32.xlu0 %v8906_v6, %s7136_s17  ;;  %1859 = vst.msk [vmem:[#allocation3 + $0x27] sm:$0xff] %vm1851_vm10, %v1576_v38 }
 0x2cc   :  { %1691 = vrot.lane.b32.xlu1 %v8916_v45, %s7136_s17 }
 0x2cd   :  { %v1574_v24 = vpop.permute.xlu0 %1573 }
 0x2ce   :  { %1858 = vst.msk [vmem:[#allocation3 + $0x1f] sm:$0xfe] %vm1849_vm9, %v1574_v24  ;;  %v1580_v51 = vpop.permute.xlu1 %1579 }
 0x2cf   :  { %1689 = vrot.lane.b32.xlu0 %v7835_v56, %s7136_s17  ;;  %1861 = vst.msk [vmem:[#allocation3 + $0x2f] sm:$0xfe] %vm1849_vm9, %v1580_v51  ;;  %v8928_v56 = vld [vmem:[#allocation2 + $0x268] sm:$0x3] }
 0x2d0   :  { %1695 = vrot.lane.b32.xlu1 %v7846_v60, %s7136_s17 }
 0x2d1   :  { %v1578_v46 = vpop.permute.xlu0 %1577 }
 0x2d2   :  { %1860 = vst.msk [vmem:[#allocation3 + $0x2f] sm:$0x1] %vm1853_vm11, %v1578_v46  ;;  %v1584_v38 = vpop.permute.xlu1 %1583 }
 0x2d3   :  { %1693 = vrot.lane.b32.xlu0 %v14125_v58, %s7136_s17  ;;  %1863 = vst.msk [vmem:[#allocation3 + $0x3f] sm:$0x1] %vm1853_vm11, %v1584_v38 }
 0x2d4   :  { %1699 = vrot.lane.b32.xlu1 %v14126_v18, %s7136_s17 }
 0x2d5   :  { %v1582_v24 = vpop.permute.xlu0 %1581 }
 0x2d6   :  { %1862 = vst.msk [vmem:[#allocation3 + $0x37] sm:$0xff] %vm1851_vm10, %v1582_v24  ;;  %v1588_v46 = vpop.permute.xlu1 %1587  ;;  %v8938_v24 = vld [vmem:[#allocation2 + $0x280] sm:$0x3] }
 0x2d7   :  { %1697 = vrot.lane.b32.xlu0 %v8928_v56, %s7136_s17  ;;  %1865 = vst.msk [vmem:[#allocation3 + $0x47] sm:$0xff] %vm1851_vm10, %v1588_v46 }
 0x2d8   :  { %1703 = vrot.lane.b32.xlu1 %v8938_v24, %s7136_s17 }
 0x2d9   :  { %v1586_v51 = vpop.permute.xlu0 %1585 }
 0x2da   :  { %1864 = vst.msk [vmem:[#allocation3 + $0x3f] sm:$0xfe] %vm1849_vm9, %v1586_v51  ;;  %v1592_v60 = vpop.permute.xlu1 %1591 }
 0x2db   :  { %1701 = vrot.lane.b32.xlu0 %v7854_v62, %s7136_s17  ;;  %1867 = vst.msk [vmem:[#allocation3 + $0x4f] sm:$0xfe] %vm1849_vm9, %v1592_v60  ;;  %v8950_v62 = vld [vmem:[#allocation2 + $0x298] sm:$0x3] }
 0x2dc   :  { %1707 = vrot.lane.b32.xlu1 %v7862_v1, %s7136_s17 }
 0x2dd   :  { %v1590_v38 = vpop.permute.xlu0 %1589 }
 0x2de   :  { %1866 = vst.msk [vmem:[#allocation3 + $0x4f] sm:$0x1] %vm1853_vm11, %v1590_v38  ;;  %v1596_v46 = vpop.permute.xlu1 %1595 }
 0x2df   :  { %1705 = vrot.lane.b32.xlu0 %v14127_v21, %s7136_s17  ;;  %1869 = vst.msk [vmem:[#allocation3 + $0x5f] sm:$0x1] %vm1853_vm11, %v1596_v46 }
 0x2e0   :  { %1711 = vrot.lane.b32.xlu1 %v14128_v15, %s7136_s17 }
 0x2e1   :  { %v1594_v51 = vpop.permute.xlu0 %1593 }
 0x2e2   :  { %1868 = vst.msk [vmem:[#allocation3 + $0x57] sm:$0xff] %vm1851_vm10, %v1594_v51  ;;  %v1600_v38 = vpop.permute.xlu1 %1599  ;;  %v8960_v51 = vld [vmem:[#allocation2 + $0x2b0] sm:$0x3] }
 0x2e3   :  { %1709 = vrot.lane.b32.xlu0 %v8950_v62, %s7136_s17  ;;  %1871 = vst.msk [vmem:[#allocation3 + $0x67] sm:$0xff] %vm1851_vm10, %v1600_v38 }
 0x2e4   :  { %1715 = vrot.lane.b32.xlu1 %v8960_v51, %s7136_s17 }
 0x2e5   :  { %v1598_v60 = vpop.permute.xlu0 %1597 }
 0x2e6   :  { %1870 = vst.msk [vmem:[#allocation3 + $0x5f] sm:$0xfe] %vm1849_vm9, %v1598_v60  ;;  %v1604_v1 = vpop.permute.xlu1 %1603 }
 0x2e7   :  { %1713 = vrot.lane.b32.xlu0 %v7874_v3, %s7136_s17  ;;  %1873 = vst.msk [vmem:[#allocation3 + $0x6f] sm:$0xfe] %vm1849_vm9, %v1604_v1  ;;  %v8972_v3 = vld [vmem:[#allocation2 + $0x2c8] sm:$0x3] }
 0x2e8   :  { %1719 = vrot.lane.b32.xlu1 %v7884_v54, %s7136_s17 }
 0x2e9   :  { %v1602_v46 = vpop.permute.xlu0 %1601 }
 0x2ea   :  { %1872 = vst.msk [vmem:[#allocation3 + $0x6f] sm:$0x1] %vm1853_vm11, %v1602_v46  ;;  %v1608_v38 = vpop.permute.xlu1 %1607 }
 0x2eb   :  { %1717 = vrot.lane.b32.xlu0 %v14129_v50, %s7136_s17  ;;  %1875 = vst.msk [vmem:[#allocation3 + $0x7f] sm:$0x1] %vm1853_vm11, %v1608_v38 }
 0x2ec   :  { %1723 = vrot.lane.b32.xlu1 %v14130_v47, %s7136_s17 }
 0x2ed   :  { %v1606_v60 = vpop.permute.xlu0 %1605 }
 0x2ee   :  { %1874 = vst.msk [vmem:[#allocation3 + $0x77] sm:$0xff] %vm1851_vm10, %v1606_v60  ;;  %v1612_v46 = vpop.permute.xlu1 %1611  ;;  %v8982_v60 = vld [vmem:[#allocation2 + $0x2e0] sm:$0x3] }
 0x2ef   :  { %1721 = vrot.lane.b32.xlu0 %v8972_v3, %s7136_s17  ;;  %1877 = vst.msk [vmem:[#allocation3 + $0x87] sm:$0xff] %vm1851_vm10, %v1612_v46  ;;  %14144 = vst [vmem:[#allocation13_spill] sm:$0xff] %v8982_v60 }
 0x2f0   :  { %1727 = vrot.lane.b32.xlu1 %v8982_v60, %s7136_s17 }
 0x2f1   :  { %v1610_v1 = vpop.permute.xlu0 %1609 }
 0x2f2   :  { %1876 = vst.msk [vmem:[#allocation3 + $0x7f] sm:$0xfe] %vm1849_vm9, %v1610_v1  ;;  %v1616_v54 = vpop.permute.xlu1 %1615  ;;  %v14145_v1 = vld [vmem:[#allocation52_spill] sm:$0xff] }
 0x2f3   :  { %1725 = vrot.lane.b32.xlu0 %v7892_v59, %s7136_s17  ;;  %1879 = vst.msk [vmem:[#allocation3 + $0x8f] sm:$0xfe] %vm1849_vm9, %v1616_v54  ;;  %v8994_v59 = vld [vmem:[#allocation2 + $0x2f8] sm:$0x3] }
 0x2f4   :  { %1731 = vrot.lane.b32.xlu1 %v14145_v1, %s7136_s17 }
 0x2f5   :  { %v1614_v38 = vpop.permute.xlu0 %1613 }
 0x2f6   :  { %1878 = vst.msk [vmem:[#allocation3 + $0x8f] sm:$0x1] %vm1853_vm11, %v1614_v38  ;;  %v1620_v47 = vpop.permute.xlu1 %1619  ;;  %v14146_v38 = vld [vmem:[#allocation53_spill] sm:$0xff] }
 0x2f7   :  { %1729 = vrot.lane.b32.xlu0 %v14131_v57, %s7136_s17  ;;  %1881 = vst.msk [vmem:[#allocation3 + $0x9f] sm:$0x1] %vm1853_vm11, %v1620_v47 }
 0x2f8   :  { %1735 = vrot.lane.b32.xlu1 %v14146_v38, %s7136_s17 }
 0x2f9   :  { %v1618_v46 = vpop.permute.xlu0 %1617 }
 0x2fa   :  { %1880 = vst.msk [vmem:[#allocation3 + $0x97] sm:$0xff] %vm1851_vm10, %v1618_v46  ;;  %v1624_v60 = vpop.permute.xlu1 %1623  ;;  %v9004_v46 = vld [vmem:[#allocation2 + $0x310] sm:$0x3] }
 0x2fb   :  { %1733 = vrot.lane.b32.xlu0 %v8994_v59, %s7136_s17  ;;  %1883 = vst.msk [vmem:[#allocation3 + $0xa7] sm:$0xff] %vm1851_vm10, %v1624_v60 }
 0x2fc   :  { %1739 = vrot.lane.b32.xlu1 %v9004_v46, %s7136_s17 }
 0x2fd   :  { %v1622_v54 = vpop.permute.xlu0 %1621 }
 0x2fe   :  { %1882 = vst.msk [vmem:[#allocation3 + $0x9f] sm:$0xfe] %vm1849_vm9, %v1622_v54  ;;  %v1628_v1 = vpop.permute.xlu1 %1627 }
 0x2ff   :  { %1737 = vrot.lane.b32.xlu0 %v7941_v37, %s7136_s17  ;;  %1885 = vst.msk [vmem:[#allocation3 + $0xaf] sm:$0xfe] %vm1849_vm9, %v1628_v1  ;;  %v9016_v37 = vld [vmem:[#allocation2 + $0x328] sm:$0x3]  ;;  %v9022_v1 = vld [vmem:[#allocation2 + $0x340] sm:$0x3] }
 0x300   :  { %1743 = vrot.lane.b32.xlu1 %v7956_v42, %s7136_s17 }
 0x301   :  { %v1626_v47 = vpop.permute.xlu0 %1625 }
 0x302   :  { %1884 = vst.msk [vmem:[#allocation3 + $0xaf] sm:$0x1] %vm1853_vm11, %v1626_v47  ;;  %v1632_v54 = vpop.permute.xlu1 %1631 }
 0x303   :  { %1741 = vrot.lane.b32.xlu0 %v7948_v40, %s7136_s17  ;;  %1887 = vst.msk [vmem:[#allocation3 + $0xbf] sm:$0x1] %vm1853_vm11, %v1632_v54 }
 0x304   :  { %1747 = vrot.lane.b32.xlu1 %v8668_v49, %s7136_s17  ;;  %v14148_v49 = vld [vmem:[#allocation4_spill] sm:$0xff] }
 0x305   :  { %v1630_v60 = vpop.permute.xlu0 %1629 }
 0x306   :  { %1886 = vst.msk [vmem:[#allocation3 + $0xb7] sm:$0xff] %vm1851_vm10, %v1630_v60  ;;  %v1636_v40 = vpop.permute.xlu1 %1635  ;;  %v14147_v60 = vld [vmem:[#allocation34_spill] sm:$0xff] }
 0x307   :  { %1745 = vrot.lane.b32.xlu0 %v9016_v37, %s7136_s17  ;;  %1889 = vst.msk [vmem:[#allocation3 + $0xc7] sm:$0xff] %vm1851_vm10, %v1636_v40 }
 0x308   :  { %1751 = vrot.lane.b32.xlu1 %v9022_v1, %s7136_s17 }
 0x309   :  { %v1634_v47 = vpop.permute.xlu0 %1633 }
 0x30a   :  { %1888 = vst.msk [vmem:[#allocation3 + $0xbf] sm:$0xfe] %vm1849_vm9, %v1634_v47  ;;  %v1640_v42 = vpop.permute.xlu1 %1639 }
 0x30b   :  { %1749 = vrot.lane.b32.xlu0 %v14147_v60, %s7136_s17  ;;  %1891 = vst.msk [vmem:[#allocation3 + $0xcf] sm:$0xfe] %vm1849_vm9, %v1640_v42 }
 0x30c   :  { %1950 = vrot.lane.b32.xlu1 %v14148_v49, %s7137_s18 }
 0x30d   :  { %v1638_v54 = vpop.permute.xlu0 %1637 }
 0x30e   :  { %1890 = vst.msk [vmem:[#allocation3 + $0xcf] sm:$0x1] %vm1853_vm11, %v1638_v54  ;;  %v1644_v47 = vpop.permute.xlu1 %1643 }
 0x30f   :  { %1948 = vrot.lane.b32.xlu0 %v7482_v25, %s7137_s18  ;;  %1893 = vst.msk [vmem:[#allocation3 + $0xdf] sm:$0x1] %vm1853_vm11, %v1644_v47  ;;  %v14149_v25 = vld [vmem:[#allocation5_spill] sm:$0xff] }
 0x310   :  { %1954 = vrot.lane.b32.xlu1 %v7490_v27, %s7137_s18 }
 0x311   :  { %v1642_v40 = vpop.permute.xlu0 %1641 }
 0x312   :  { %1892 = vst.msk [vmem:[#allocation3 + $0xd7] sm:$0xff] %vm1851_vm10, %v1642_v40  ;;  %v1648_v60 = vpop.permute.xlu1 %1647 }
 0x313   :  { %1952 = vrot.lane.b32.xlu0 %v8686_v61, %s7137_s18  ;;  %1895 = vst.msk [vmem:[#allocation3 + $0xe7] sm:$0xff] %vm1851_vm10, %v1648_v60  ;;  %v14150_v61 = vld [vmem:[#allocation6_spill] sm:$0xff]  ;;  %v14151_v60 = vld [vmem:[#allocation7_spill] sm:$0xff] }
 0x314   :  { %1958 = vrot.lane.b32.xlu1 %v8696_v53, %s7137_s18 }
 0x315   :  { %v1646_v42 = vpop.permute.xlu0 %1645 }
 0x316   :  { %1894 = vst.msk [vmem:[#allocation3 + $0xdf] sm:$0xfe] %vm1849_vm9, %v1646_v42  ;;  %v1652_v49 = vpop.permute.xlu1 %1651 }
 0x317   :  { %1956 = vrot.lane.b32.xlu0 %v14149_v25, %s7137_s18  ;;  %1897 = vst.msk [vmem:[#allocation3 + $0xef] sm:$0xfe] %vm1849_vm9, %v1652_v49 }
 0x318   :  { %1962 = vrot.lane.b32.xlu1 %v14150_v61, %s7137_s18 }
 0x319   :  { %v1650_v54 = vpop.permute.xlu0 %1649 }
 0x31a   :  { %1896 = vst.msk [vmem:[#allocation3 + $0xef] sm:$0x1] %vm1853_vm11, %v1650_v54  ;;  %v1656_v47 = vpop.permute.xlu1 %1655 }
 0x31b   :  { %1960 = vrot.lane.b32.xlu0 %v7498_v29, %s7137_s18  ;;  %1899 = vst.msk [vmem:[#allocation3 + $0xff] sm:$0x1] %vm1853_vm11, %v1656_v47 }
 0x31c   :  { %1966 = vrot.lane.b32.xlu1 %v7506_v31, %s7137_s18 }
 0x31d   :  { %v1654_v40 = vpop.permute.xlu0 %1653 }
 0x31e   :  { %1898 = vst.msk [vmem:[#allocation3 + $0xf7] sm:$0xff] %vm1851_vm10, %v1654_v40  ;;  %v1660_v42 = vpop.permute.xlu1 %1659 }
 0x31f   :  { %1964 = vrot.lane.b32.xlu0 %v8708_v28, %s7137_s18  ;;  %1901 = vst.msk [vmem:[#allocation3 + $0x107] sm:$0xff] %vm1851_vm10, %v1660_v42  ;;  %v14152_v28 = vld [vmem:[#allocation8_spill] sm:$0xff]  ;;  %v14153_v42 = vld [vmem:[#allocation10_spill] sm:$0xff] }
 0x320   :  { %1970 = vrot.lane.b32.xlu1 %v8718_v4, %s7137_s18 }
 0x321   :  { %v1658_v53 = vpop.permute.xlu0 %1657 }
 0x322   :  { %1900 = vst.msk [vmem:[#allocation3 + $0xff] sm:$0xfe] %vm1849_vm9, %v1658_v53  ;;  %v1664_v49 = vpop.permute.xlu1 %1663 }
 0x323   :  { %1968 = vrot.lane.b32.xlu0 %v14151_v60, %s7137_s18  ;;  %1903 = vst.msk [vmem:[#allocation3 + $0x10f] sm:$0xfe] %vm1849_vm9, %v1664_v49 }
 0x324   :  { %1974 = vrot.lane.b32.xlu1 %v14152_v28, %s7137_s18 }
 0x325   :  { %v1662_v54 = vpop.permute.xlu0 %1661 }
 0x326   :  { %1902 = vst.msk [vmem:[#allocation3 + $0x10f] sm:$0x1] %vm1853_vm11, %v1662_v54  ;;  %v1668_v47 = vpop.permute.xlu1 %1667 }
 0x327   :  { %1972 = vrot.lane.b32.xlu0 %v7518_v33, %s7137_s18  ;;  %1905 = vst.msk [vmem:[#allocation3 + $0x11f] sm:$0x1] %vm1853_vm11, %v1668_v47 }
 0x328   :  { %1978 = vrot.lane.b32.xlu1 %v14099_v20, %s7137_s18 }
 0x329   :  { %v1666_v40 = vpop.permute.xlu0 %1665 }
 0x32a   :  { %1904 = vst.msk [vmem:[#allocation3 + $0x117] sm:$0xff] %vm1851_vm10, %v1666_v40  ;;  %v1672_v53 = vpop.permute.xlu1 %1671 }
 0x32b   :  { %1976 = vrot.lane.b32.xlu0 %v8730_v32, %s7137_s18  ;;  %1907 = vst.msk [vmem:[#allocation3 + $0x127] sm:$0xff] %vm1851_vm10, %v1672_v53  ;;  %v14154_v32 = vld [vmem:[#allocation12_spill] sm:$0xff]  ;;  %v14155_v53 = vld [vmem:[#allocation14_spill] sm:$0xff] }
 0x32c   :  { %1982 = vrot.lane.b32.xlu1 %v8740_v26, %s7137_s18 }
 0x32d   :  { %v1670_v4 = vpop.permute.xlu0 %1669 }
 0x32e   :  { %1906 = vst.msk [vmem:[#allocation3 + $0x11f] sm:$0xfe] %vm1849_vm9, %v1670_v4  ;;  %v1676_v49 = vpop.permute.xlu1 %1675 }
 0x32f   :  { %1980 = vrot.lane.b32.xlu0 %v14153_v42, %s7137_s18  ;;  %1909 = vst.msk [vmem:[#allocation3 + $0x12f] sm:$0xfe] %vm1849_vm9, %v1676_v49 }
 0x330   :  { %1986 = vrot.lane.b32.xlu1 %v14154_v32, %s7137_s18 }
 0x331   :  { %v1674_v54 = vpop.permute.xlu0 %1673 }
 0x332   :  { %1908 = vst.msk [vmem:[#allocation3 + $0x12f] sm:$0x1] %vm1853_vm11, %v1674_v54  ;;  %v1680_v47 = vpop.permute.xlu1 %1679 }
 0x333   :  { %1984 = vrot.lane.b32.xlu0 %v14133_v63, %s7137_s18  ;;  %1911 = vst.msk [vmem:[#allocation3 + $0x13f] sm:$0x1] %vm1853_vm11, %v1680_v47 }
 0x334   :  { %1990 = vrot.lane.b32.xlu1 %v14105_v23, %s7137_s18 }
 0x335   :  { %v1678_v40 = vpop.permute.xlu0 %1677 }
 0x336   :  { %1910 = vst.msk [vmem:[#allocation3 + $0x137] sm:$0xff] %vm1851_vm10, %v1678_v40  ;;  %v1684_v4 = vpop.permute.xlu1 %1683 }
 0x337   :  { %1988 = vrot.lane.b32.xlu0 %v8752_v36, %s7137_s18  ;;  %1913 = vst.msk [vmem:[#allocation3 + $0x147] sm:$0xff] %vm1851_vm10, %v1684_v4  ;;  %v14156_v36 = vld [vmem:[#allocation16_spill] sm:$0xff]  ;;  %v14157_v4 = vld [vmem:[#allocation17_spill] sm:$0xff] }
 0x338   :  { %1994 = vrot.lane.b32.xlu1 %v8762_v30, %s7137_s18 }
 0x339   :  { %v1682_v26 = vpop.permute.xlu0 %1681 }
 0x33a   :  { %1912 = vst.msk [vmem:[#allocation3 + $0x13f] sm:$0xfe] %vm1849_vm9, %v1682_v26  ;;  %v1688_v49 = vpop.permute.xlu1 %1687 }
 0x33b   :  { %1992 = vrot.lane.b32.xlu0 %v14155_v53, %s7137_s18  ;;  %1915 = vst.msk [vmem:[#allocation3 + $0x14f] sm:$0xfe] %vm1849_vm9, %v1688_v49 }
 0x33c   :  { %1998 = vrot.lane.b32.xlu1 %v14156_v36, %s7137_s18 }
 0x33d   :  { %v1686_v54 = vpop.permute.xlu0 %1685 }
 0x33e   :  { %1914 = vst.msk [vmem:[#allocation3 + $0x14f] sm:$0x1] %vm1853_vm11, %v1686_v54  ;;  %v1692_v47 = vpop.permute.xlu1 %1691 }
 0x33f   :  { %1996 = vrot.lane.b32.xlu0 %v14107_v2, %s7137_s18  ;;  %1917 = vst.msk [vmem:[#allocation3 + $0x15f] sm:$0x1] %vm1853_vm11, %v1692_v47 }
 0x340   :  { %2002 = vrot.lane.b32.xlu1 %v7564_v44, %s7137_s18 }
 0x341   :  { %v1690_v40 = vpop.permute.xlu0 %1689 }
 0x342   :  { %1916 = vst.msk [vmem:[#allocation3 + $0x157] sm:$0xff] %vm1851_vm10, %v1690_v40  ;;  %v1696_v26 = vpop.permute.xlu1 %1695 }
 0x343   :  { %2000 = vrot.lane.b32.xlu0 %v8774_v8, %s7137_s18  ;;  %1919 = vst.msk [vmem:[#allocation3 + $0x167] sm:$0xff] %vm1851_vm10, %v1696_v26  ;;  %v14158_v8 = vld [vmem:[#allocation20_spill] sm:$0xff]  ;;  %v14159_v26 = vld [vmem:[#allocation21_spill] sm:$0xff] }
 0x344   :  { %2006 = vrot.lane.b32.xlu1 %v8784_v22, %s7137_s18 }
 0x345   :  { %v1694_v30 = vpop.permute.xlu0 %1693 }
 0x346   :  { %1918 = vst.msk [vmem:[#allocation3 + $0x15f] sm:$0xfe] %vm1849_vm9, %v1694_v30  ;;  %v1700_v49 = vpop.permute.xlu1 %1699 }
 0x347   :  { %2004 = vrot.lane.b32.xlu0 %v14157_v4, %s7137_s18  ;;  %1921 = vst.msk [vmem:[#allocation3 + $0x16f] sm:$0xfe] %vm1849_vm9, %v1700_v49 }
 0x348   :  { %2010 = vrot.lane.b32.xlu1 %v14158_v8, %s7137_s18 }
 0x349   :  { %v1698_v54 = vpop.permute.xlu0 %1697 }
 0x34a   :  { %1920 = vst.msk [vmem:[#allocation3 + $0x16f] sm:$0x1] %vm1853_vm11, %v1698_v54  ;;  %v1704_v47 = vpop.permute.xlu1 %1703 }
 0x34b   :  { %2008 = vrot.lane.b32.xlu0 %v14110_v0, %s7137_s18  ;;  %1923 = vst.msk [vmem:[#allocation3 + $0x17f] sm:$0x1] %vm1853_vm11, %v1704_v47 }
 0x34c   :  { %2014 = vrot.lane.b32.xlu1 %v7671_v7, %s7137_s18 }
 0x34d   :  { %v1702_v40 = vpop.permute.xlu0 %1701 }
 0x34e   :  { %1922 = vst.msk [vmem:[#allocation3 + $0x177] sm:$0xff] %vm1851_vm10, %v1702_v40  ;;  %v1708_v30 = vpop.permute.xlu1 %1707 }
 0x34f   :  { %2012 = vrot.lane.b32.xlu0 %v8796_v5, %s7137_s18  ;;  %1925 = vst.msk [vmem:[#allocation3 + $0x187] sm:$0xff] %vm1851_vm10, %v1708_v30  ;;  %v14160_v5 = vld [vmem:[#allocation23_spill] sm:$0xff]  ;;  %v14161_v30 = vld [vmem:[#allocation24_spill] sm:$0xff] }
 0x350   :  { %2018 = vrot.lane.b32.xlu1 %v8806_v35, %s7137_s18 }
 0x351   :  { %v1706_v22 = vpop.permute.xlu0 %1705 }
 0x352   :  { %1924 = vst.msk [vmem:[#allocation3 + $0x17f] sm:$0xfe] %vm1849_vm9, %v1706_v22  ;;  %v1712_v49 = vpop.permute.xlu1 %1711 }
 0x353   :  { %2016 = vrot.lane.b32.xlu0 %v14159_v26, %s7137_s18  ;;  %1927 = vst.msk [vmem:[#allocation3 + $0x18f] sm:$0xfe] %vm1849_vm9, %v1712_v49 }
 0x354   :  { %2022 = vrot.lane.b32.xlu1 %v14160_v5, %s7137_s18 }
 0x355   :  { %v1710_v54 = vpop.permute.xlu0 %1709 }
 0x356   :  { %1926 = vst.msk [vmem:[#allocation3 + $0x18f] sm:$0x1] %vm1853_vm11, %v1710_v54  ;;  %v1716_v47 = vpop.permute.xlu1 %1715 }
 0x357   :  { %2020 = vrot.lane.b32.xlu0 %v14112_v41, %s7137_s18  ;;  %1929 = vst.msk [vmem:[#allocation3 + $0x19f] sm:$0x1] %vm1853_vm11, %v1716_v47 }
 0x358   :  { %2026 = vrot.lane.b32.xlu1 %v7694_v11, %s7137_s18 }
 0x359   :  { %v1714_v40 = vpop.permute.xlu0 %1713 }
 0x35a   :  { %1928 = vst.msk [vmem:[#allocation3 + $0x197] sm:$0xff] %vm1851_vm10, %v1714_v40  ;;  %v1720_v22 = vpop.permute.xlu1 %1719 }
 0x35b   :  { %2024 = vrot.lane.b32.xlu0 %v8818_v39, %s7137_s18  ;;  %1931 = vst.msk [vmem:[#allocation3 + $0x1a7] sm:$0xff] %vm1851_vm10, %v1720_v22  ;;  %v14162_v39 = vld [vmem:[#allocation25_spill] sm:$0xff] }
 0x35c   :  { %2030 = vrot.lane.b32.xlu1 %v8828_v43, %s7137_s18  ;;  %v14163_v43 = vld [vmem:[#allocation9_spill] sm:$0xff] }
 0x35d   :  { %v1718_v35 = vpop.permute.xlu0 %1717 }
 0x35e   :  { %1930 = vst.msk [vmem:[#allocation3 + $0x19f] sm:$0xfe] %vm1849_vm9, %v1718_v35  ;;  %v1724_v49 = vpop.permute.xlu1 %1723  ;;  %v7094_v35 = vld [vmem:[#allocation2 + $0x180] sm:$0xff] }
 0x35f   :  { %2028 = vrot.lane.b32.xlu0 %v14161_v30, %s7137_s18  ;;  %1933 = vst.msk [vmem:[#allocation3 + $0x1af] sm:$0xfe] %vm1849_vm9, %v1724_v49  ;;  %v7095_v49 = vld [vmem:[#allocation2 + $0x188] sm:$0xff] }
 0x360   :  { %2034 = vrot.lane.b32.xlu1 %v7708_v14, %s7137_s18 }
 0x361   :  { %v1722_v54 = vpop.permute.xlu0 %1721 }
 0x362   :  { %1932 = vst.msk [vmem:[#allocation3 + $0x1af] sm:$0x1] %vm1853_vm11, %v1722_v54  ;;  %v1728_v47 = vpop.permute.xlu1 %1727 }
 0x363   :  { %2032 = vrot.lane.b32.xlu0 %v14162_v39, %s7137_s18  ;;  %1935 = vst.msk [vmem:[#allocation3 + $0x1bf] sm:$0x1] %vm1853_vm11, %v1728_v47 }
 0x364   :  { %2038 = vrot.lane.b32.xlu1 %v7094_v35, %s7137_s18 }
 0x365   :  { %v1726_v40 = vpop.permute.xlu0 %1725 }
 0x366   :  { %1934 = vst.msk [vmem:[#allocation3 + $0x1b7] sm:$0xff] %vm1851_vm10, %v1726_v40  ;;  %v1732_v54 = vpop.permute.xlu1 %1731 }
 0x367   :  { %2036 = vrot.lane.b32.xlu0 %v14163_v43, %s7137_s18  ;;  %1937 = vst.msk [vmem:[#allocation3 + $0x1c7] sm:$0xff] %vm1851_vm10, %v1732_v54  ;;  %v14164_v43 = vld [vmem:[#allocation27_spill] sm:$0xff] }
 0x368   :  { %2042 = vrot.lane.b32.xlu1 %v8846_v10, %s7137_s18 }
 0x369   :  { %v1730_v22 = vpop.permute.xlu0 %1729 }
 0x36a   :  { %1936 = vst.msk [vmem:[#allocation3 + $0x1bf] sm:$0xfe] %vm1849_vm9, %v1730_v22  ;;  %v1736_v47 = vpop.permute.xlu1 %1735 }
 0x36b   :  { %2040 = vrot.lane.b32.xlu0 %v7095_v49, %s7137_s18  ;;  %1939 = vst.msk [vmem:[#allocation3 + $0x1cf] sm:$0xfe] %vm1849_vm9, %v1736_v47 }
 0x36c   :  { %2046 = vrot.lane.b32.xlu1 %v14164_v43, %s7137_s18 }
 0x36d   :  { %v1734_v40 = vpop.permute.xlu0 %1733 }
 0x36e   :  { %1938 = vst.msk [vmem:[#allocation3 + $0x1cf] sm:$0x1] %vm1853_vm11, %v1734_v40  ;;  %v1740_v22 = vpop.permute.xlu1 %1739 }
 0x36f   :  { %2044 = vrot.lane.b32.xlu0 %v14140_v12, %s7137_s18  ;;  %1941 = vst.msk [vmem:[#allocation3 + $0x1df] sm:$0x1] %vm1853_vm11, %v1740_v22  ;;  %v14165_v12 = vld [vmem:[#allocation28_spill] sm:$0xff]  ;;  %v14167_v22 = vld [vmem:[#allocation47_spill] sm:$0xff] }
 0x370   :  { %2050 = vrot.lane.b32.xlu1 %v7718_v17, %s7137_s18 }
 0x371   :  { %v1738_v35 = vpop.permute.xlu0 %1737 }
 0x372   :  { %1940 = vst.msk [vmem:[#allocation3 + $0x1d7] sm:$0xff] %vm1851_vm10, %v1738_v35  ;;  %v1744_v54 = vpop.permute.xlu1 %1743 }
 0x373   :  { %2048 = vrot.lane.b32.xlu0 %v8862_v52, %s7137_s18  ;;  %1943 = vst.msk [vmem:[#allocation3 + $0x1e7] sm:$0xff] %vm1851_vm10, %v1744_v54 }
 0x374   :  { %2054 = vrot.lane.b32.xlu1 %v8872_v34, %s7137_s18  ;;  %v14166_v34 = vld [vmem:[#allocation38_spill] sm:$0xff] }
 0x375   :  { %v1742_v10 = vpop.permute.xlu0 %1741 }
 0x376   :  { %1942 = vst.msk [vmem:[#allocation3 + $0x1df] sm:$0xfe] %vm1849_vm9, %v1742_v10  ;;  %v1748_v40 = vpop.permute.xlu1 %1747 }
 0x377   :  { %2052 = vrot.lane.b32.xlu0 %v14165_v12, %s7137_s18  ;;  %1945 = vst.msk [vmem:[#allocation3 + $0x1ef] sm:$0xfe] %vm1849_vm9, %v1748_v40  ;;  %vm3440_vm9 = vcmask 220160  }
 0x378   :  { %2058 = vrot.lane.b32.xlu1 %v14137_v9, %s7137_s18 }
 0x379   :  { %v1746_v49 = vpop.permute.xlu0 %1745 }
 0x37a   :  { %1944 = vst.msk [vmem:[#allocation3 + $0x1ef] sm:$0x1] %vm1853_vm11, %v1746_v49  ;;  %v1752_v47 = vpop.permute.xlu1 %1751  ;;  %v14168_v49 = vld [vmem:[#allocation33_spill] sm:$0xff] }
 0x37b   :  { %2056 = vrot.lane.b32.xlu0 %v14136_v55, %s7137_s18  ;;  %1947 = vst.msk [vmem:[#allocation3 + $0x1ff] sm:$0x1] %vm1853_vm11, %v1752_v47  ;;  %vm6516_vm11 = vcmask 1041409  }
 0x37c   :  { %2062 = vrot.lane.b32.xlu1 %v14122_v19, %s7137_s18 }
 0x37d   :  { %v1750_v52 = vpop.permute.xlu0 %1749 }
 0x37e   :  { %1946 = vst.msk [vmem:[#allocation3 + $0x1f7] sm:$0xff] %vm1851_vm10, %v1750_v52  ;;  %v1951_v35 = vpop.permute.xlu1 %1950  ;;  %vm4022_vm10 = vcmask 31744  }
 0x37f   :  { %2060 = vrot.lane.b32.xlu0 %v14166_v34, %s7137_s18  ;;  %2239 = vst.msk [vmem:[#allocation3 + $0x6] sm:$0xff] %vm2238_vm13, %v1951_v35 }
 0x380   :  { %2066 = vrot.lane.b32.xlu1 %v14167_v22, %s7137_s18 }
 0x381   :  { %v1949_v43 = vpop.permute.xlu0 %1948 }
 0x382   :  { %2237 = vst.msk [vmem:[#allocation3 - $0x2] sm:$0xfc] %vm2236_vm12, %v1949_v43  ;;  %v1955_v54 = vpop.permute.xlu1 %1954  ;;  %v14169_v43 = vld [vmem:[#allocation36_spill] sm:$0xff] }
 0x383   :  { %2064 = vrot.lane.b32.xlu0 %v7746_v48, %s7137_s18  ;;  %2242 = vst.msk [vmem:[#allocation3 + $0xe] sm:$0xfc] %vm2236_vm12, %v1955_v54 }
 0x384   :  { %2070 = vrot.lane.b32.xlu1 %v14168_v49, %s7137_s18 }
 0x385   :  { %v1953_v10 = vpop.permute.xlu0 %1952 }
 0x386   :  { %2241 = vst.msk [vmem:[#allocation3 + $0xe] sm:$0x3] %vm2240_vm14, %v1953_v10  ;;  %v1959_v52 = vpop.permute.xlu1 %1958 }
 0x387   :  { %2068 = vrot.lane.b32.xlu0 %v14123_v16, %s7137_s18  ;;  %2244 = vst.msk [vmem:[#allocation3 + $0x1e] sm:$0x3] %vm2240_vm14, %v1959_v52  ;;  %v14171_v52 = vld [vmem:[#allocation41_spill] sm:$0xff] }
 0x388   :  { %2074 = vrot.lane.b32.xlu1 %v14124_v13, %s7137_s18 }
 0x389   :  { %v1957_v40 = vpop.permute.xlu0 %1956 }
 0x38a   :  { %2243 = vst.msk [vmem:[#allocation3 + $0x16] sm:$0xff] %vm2238_vm13, %v1957_v40  ;;  %v1963_v34 = vpop.permute.xlu1 %1962 }
 0x38b   :  { %2072 = vrot.lane.b32.xlu0 %v8906_v6, %s7137_s18  ;;  %2246 = vst.msk [vmem:[#allocation3 + $0x26] sm:$0xff] %vm2238_vm13, %v1963_v34  ;;  %v14170_v6 = vld [vmem:[#allocation39_spill] sm:$0xff] }
 0x38c   :  { %2078 = vrot.lane.b32.xlu1 %v8916_v45, %s7137_s18 }
 0x38d   :  { %v1961_v47 = vpop.permute.xlu0 %1960 }
 0x38e   :  { %2245 = vst.msk [vmem:[#allocation3 + $0x1e] sm:$0xfc] %vm2236_vm12, %v1961_v47  ;;  %v1967_v22 = vpop.permute.xlu1 %1966 }
 0x38f   :  { %2076 = vrot.lane.b32.xlu0 %v14169_v43, %s7137_s18  ;;  %2248 = vst.msk [vmem:[#allocation3 + $0x2e] sm:$0xfc] %vm2236_vm12, %v1967_v22 }
 0x390   :  { %2082 = vrot.lane.b32.xlu1 %v14170_v6, %s7137_s18 }
 0x391   :  { %v1965_v35 = vpop.permute.xlu0 %1964 }
 0x392   :  { %2247 = vst.msk [vmem:[#allocation3 + $0x2e] sm:$0x3] %vm2240_vm14, %v1965_v35  ;;  %v1971_v54 = vpop.permute.xlu1 %1970 }
 0x393   :  { %2080 = vrot.lane.b32.xlu0 %v14125_v58, %s7137_s18  ;;  %2250 = vst.msk [vmem:[#allocation3 + $0x3e] sm:$0x3] %vm2240_vm14, %v1971_v54  ;;  %v14173_v54 = vld [vmem:[#allocation45_spill] sm:$0xff] }
 0x394   :  { %2086 = vrot.lane.b32.xlu1 %v14126_v18, %s7137_s18 }
 0x395   :  { %v1969_v10 = vpop.permute.xlu0 %1968 }
 0x396   :  { %2249 = vst.msk [vmem:[#allocation3 + $0x36] sm:$0xff] %vm2238_vm13, %v1969_v10  ;;  %v1975_v40 = vpop.permute.xlu1 %1974 }
 0x397   :  { %2084 = vrot.lane.b32.xlu0 %v8928_v56, %s7137_s18  ;;  %2252 = vst.msk [vmem:[#allocation3 + $0x46] sm:$0xff] %vm2238_vm13, %v1975_v40  ;;  %v14172_v56 = vld [vmem:[#allocation43_spill] sm:$0xff] }
 0x398   :  { %2090 = vrot.lane.b32.xlu1 %v8938_v24, %s7137_s18 }
 0x399   :  { %v1973_v45 = vpop.permute.xlu0 %1972 }
 0x39a   :  { %2251 = vst.msk [vmem:[#allocation3 + $0x3e] sm:$0xfc] %vm2236_vm12, %v1973_v45  ;;  %v1979_v34 = vpop.permute.xlu1 %1978 }
 0x39b   :  { %2088 = vrot.lane.b32.xlu0 %v14171_v52, %s7137_s18  ;;  %2254 = vst.msk [vmem:[#allocation3 + $0x4e] sm:$0xfc] %vm2236_vm12, %v1979_v34 }
 0x39c   :  { %2094 = vrot.lane.b32.xlu1 %v14172_v56, %s7137_s18 }
 0x39d   :  { %v1977_v47 = vpop.permute.xlu0 %1976 }
 0x39e   :  { %2253 = vst.msk [vmem:[#allocation3 + $0x4e] sm:$0x3] %vm2240_vm14, %v1977_v47  ;;  %v1983_v22 = vpop.permute.xlu1 %1982 }
 0x39f   :  { %2092 = vrot.lane.b32.xlu0 %v14127_v21, %s7137_s18  ;;  %2256 = vst.msk [vmem:[#allocation3 + $0x5e] sm:$0x3] %vm2240_vm14, %v1983_v22 }
 0x3a0   :  { %2098 = vrot.lane.b32.xlu1 %v14128_v15, %s7137_s18 }
 0x3a1   :  { %v1981_v35 = vpop.permute.xlu0 %1980 }
 0x3a2   :  { %2255 = vst.msk [vmem:[#allocation3 + $0x56] sm:$0xff] %vm2238_vm13, %v1981_v35  ;;  %v1987_v10 = vpop.permute.xlu1 %1986 }
 0x3a3   :  { %2096 = vrot.lane.b32.xlu0 %v8950_v62, %s7137_s18  ;;  %2258 = vst.msk [vmem:[#allocation3 + $0x66] sm:$0xff] %vm2238_vm13, %v1987_v10  ;;  %v14174_v62 = vld [vmem:[#allocation48_spill] sm:$0xff]  ;;  %v14177_v10 = vld [vmem:[#allocation13_spill] sm:$0xff] }
 0x3a4   :  { %2102 = vrot.lane.b32.xlu1 %v8960_v51, %s7137_s18  ;;  %v14175_v51 = vld [vmem:[#allocation49_spill] sm:$0xff] }
 0x3a5   :  { %v1985_v24 = vpop.permute.xlu0 %1984 }
 0x3a6   :  { %2257 = vst.msk [vmem:[#allocation3 + $0x5e] sm:$0xfc] %vm2236_vm12, %v1985_v24  ;;  %v1991_v40 = vpop.permute.xlu1 %1990  ;;  %v14176_v24 = vld [vmem:[#allocation50_spill] sm:$0xff] }
 0x3a7   :  { %2100 = vrot.lane.b32.xlu0 %v14173_v54, %s7137_s18  ;;  %2260 = vst.msk [vmem:[#allocation3 + $0x6e] sm:$0xfc] %vm2236_vm12, %v1991_v40 }
 0x3a8   :  { %2106 = vrot.lane.b32.xlu1 %v14174_v62, %s7137_s18 }
 0x3a9   :  { %v1989_v45 = vpop.permute.xlu0 %1988 }
 0x3aa   :  { %2259 = vst.msk [vmem:[#allocation3 + $0x6e] sm:$0x3] %vm2240_vm14, %v1989_v45  ;;  %v1995_v34 = vpop.permute.xlu1 %1994 }
 0x3ab   :  { %2104 = vrot.lane.b32.xlu0 %v14129_v50, %s7137_s18  ;;  %2262 = vst.msk [vmem:[#allocation3 + $0x7e] sm:$0x3] %vm2240_vm14, %v1995_v34 }
 0x3ac   :  { %2110 = vrot.lane.b32.xlu1 %v14175_v51, %s7137_s18 }
 0x3ad   :  { %v1993_v47 = vpop.permute.xlu0 %1992 }
 0x3ae   :  { %2261 = vst.msk [vmem:[#allocation3 + $0x76] sm:$0xff] %vm2238_vm13, %v1993_v47  ;;  %v1999_v22 = vpop.permute.xlu1 %1998 }
 0x3af   :  { %2108 = vrot.lane.b32.xlu0 %v8972_v3, %s7137_s18  ;;  %2264 = vst.msk [vmem:[#allocation3 + $0x86] sm:$0xff] %vm2238_vm13, %v1999_v22  ;;  %v14178_v3 = vld [vmem:[#allocation52_spill] sm:$0xff] }
 0x3b0   :  { %2114 = vrot.lane.b32.xlu1 %v14177_v10, %s7137_s18  ;;  %v14179_v10 = vld [vmem:[#allocation54_spill] sm:$0xff] }
 0x3b1   :  { %v1997_v35 = vpop.permute.xlu0 %1996 }
 0x3b2   :  { %2263 = vst.msk [vmem:[#allocation3 + $0x7e] sm:$0xfc] %vm2236_vm12, %v1997_v35  ;;  %v2003_v40 = vpop.permute.xlu1 %2002 }
 0x3b3   :  { %2112 = vrot.lane.b32.xlu0 %v14176_v24, %s7137_s18  ;;  %2266 = vst.msk [vmem:[#allocation3 + $0x8e] sm:$0xfc] %vm2236_vm12, %v2003_v40 }
 0x3b4   :  { %2118 = vrot.lane.b32.xlu1 %v14178_v3, %s7137_s18 }
 0x3b5   :  { %v2001_v45 = vpop.permute.xlu0 %2000 }
 0x3b6   :  { %2265 = vst.msk [vmem:[#allocation3 + $0x8e] sm:$0x3] %vm2240_vm14, %v2001_v45  ;;  %v2007_v34 = vpop.permute.xlu1 %2006 }
 0x3b7   :  { %2116 = vrot.lane.b32.xlu0 %v14131_v57, %s7137_s18  ;;  %2268 = vst.msk [vmem:[#allocation3 + $0x9e] sm:$0x3] %vm2240_vm14, %v2007_v34 }
 0x3b8   :  { %2122 = vrot.lane.b32.xlu1 %v14146_v38, %s7137_s18 }
 0x3b9   :  { %v2005_v47 = vpop.permute.xlu0 %2004 }
 0x3ba   :  { %2267 = vst.msk [vmem:[#allocation3 + $0x96] sm:$0xff] %vm2238_vm13, %v2005_v47  ;;  %v2011_v22 = vpop.permute.xlu1 %2010  ;;  %v14181_v47 = vld [vmem:[#allocation57_spill] sm:$0xff] }
 0x3bb   :  { %2120 = vrot.lane.b32.xlu0 %v8994_v59, %s7137_s18  ;;  %2270 = vst.msk [vmem:[#allocation3 + $0xa6] sm:$0xff] %vm2238_vm13, %v2011_v22  ;;  %v14180_v59 = vld [vmem:[#allocation56_spill] sm:$0xff] }
 0x3bc   :  { %2126 = vrot.lane.b32.xlu1 %v9004_v46, %s7137_s18  ;;  %v7096_v46 = vld [vmem:[#allocation2 + $0x330] sm:$0xff] }
 0x3bd   :  { %v2009_v35 = vpop.permute.xlu0 %2008 }
 0x3be   :  { %2269 = vst.msk [vmem:[#allocation3 + $0x9e] sm:$0xfc] %vm2236_vm12, %v2009_v35  ;;  %v2015_v40 = vpop.permute.xlu1 %2014 }
 0x3bf   :  { %2124 = vrot.lane.b32.xlu0 %v14179_v10, %s7137_s18  ;;  %2272 = vst.msk [vmem:[#allocation3 + $0xae] sm:$0xfc] %vm2236_vm12, %v2015_v40  ;;  %v7097_v40 = vld [vmem:[#allocation2 + $0x338] sm:$0xff] }
 0x3c0   :  { %2130 = vrot.lane.b32.xlu1 %v14181_v47, %s7137_s18 }
 0x3c1   :  { %v2013_v45 = vpop.permute.xlu0 %2012 }
 0x3c2   :  { %2271 = vst.msk [vmem:[#allocation3 + $0xae] sm:$0x3] %vm2240_vm14, %v2013_v45  ;;  %v2019_v35 = vpop.permute.xlu1 %2018 }
 0x3c3   :  { %2128 = vrot.lane.b32.xlu0 %v14180_v59, %s7137_s18  ;;  %2274 = vst.msk [vmem:[#allocation3 + $0xbe] sm:$0x3] %vm2240_vm14, %v2019_v35 }
 0x3c4   :  { %2134 = vrot.lane.b32.xlu1 %v7096_v46, %s7137_s18 }
 0x3c5   :  { %v2017_v34 = vpop.permute.xlu0 %2016 }
 0x3c6   :  { %2273 = vst.msk [vmem:[#allocation3 + $0xb6] sm:$0xff] %vm2238_vm13, %v2017_v34  ;;  %v2023_v45 = vpop.permute.xlu1 %2022 }
 0x3c7   :  { %2132 = vrot.lane.b32.xlu0 %v9016_v37, %s7137_s18  ;;  %2276 = vst.msk [vmem:[#allocation3 + $0xc6] sm:$0xff] %vm2238_vm13, %v2023_v45 }
 0x3c8   :  { %2138 = vrot.lane.b32.xlu1 %v9022_v1, %s7137_s18 }
 0x3c9   :  { %v2021_v22 = vpop.permute.xlu0 %2020 }
 0x3ca   :  { %2275 = vst.msk [vmem:[#allocation3 + $0xbe] sm:$0xfc] %vm2236_vm12, %v2021_v22  ;;  %v2027_v35 = vpop.permute.xlu1 %2026 }
 0x3cb   :  { %2136 = vrot.lane.b32.xlu0 %v7097_v40, %s7137_s18  ;;  %2278 = vst.msk [vmem:[#allocation3 + $0xce] sm:$0xfc] %vm2236_vm12, %v2027_v35 }
 0x3cc   :  { %2341 = vrot.lane.b32.xlu1 %v14149_v25, %s7138_s19 }
 0x3cd   :  { %v2025_v34 = vpop.permute.xlu0 %2024 }
 0x3ce   :  { %2277 = vst.msk [vmem:[#allocation3 + $0xce] sm:$0x3] %vm2240_vm14, %v2025_v34  ;;  %v2031_v46 = vpop.permute.xlu1 %2030 }
 0x3cf   :  { %2339 = vrot.lane.b32.xlu0 %v7490_v27, %s7138_s19  ;;  %2280 = vst.msk [vmem:[#allocation3 + $0xde] sm:$0x3] %vm2240_vm14, %v2031_v46 }
 0x3d0   :  { %2345 = vrot.lane.b32.xlu1 %v14150_v61, %s7138_s19 }
 0x3d1   :  { %v2029_v37 = vpop.permute.xlu0 %2028 }
 0x3d2   :  { %2279 = vst.msk [vmem:[#allocation3 + $0xd6] sm:$0xff] %vm2238_vm13, %v2029_v37  ;;  %v2035_v22 = vpop.permute.xlu1 %2034 }
 0x3d3   :  { %2343 = vrot.lane.b32.xlu0 %v7498_v29, %s7138_s19  ;;  %2282 = vst.msk [vmem:[#allocation3 + $0xe6] sm:$0xff] %vm2238_vm13, %v2035_v22 }
 0x3d4   :  { %2349 = vrot.lane.b32.xlu1 %v14151_v60, %s7138_s19 }
 0x3d5   :  { %v2033_v1 = vpop.permute.xlu0 %2032 }
 0x3d6   :  { %2281 = vst.msk [vmem:[#allocation3 + $0xde] sm:$0xfc] %vm2236_vm12, %v2033_v1  ;;  %v2039_v40 = vpop.permute.xlu1 %2038 }
 0x3d7   :  { %2347 = vrot.lane.b32.xlu0 %v7506_v31, %s7138_s19  ;;  %2284 = vst.msk [vmem:[#allocation3 + $0xee] sm:$0xfc] %vm2236_vm12, %v2039_v40 }
 0x3d8   :  { %2353 = vrot.lane.b32.xlu1 %v14152_v28, %s7138_s19 }
 0x3d9   :  { %v2037_v45 = vpop.permute.xlu0 %2036 }
 0x3da   :  { %2283 = vst.msk [vmem:[#allocation3 + $0xee] sm:$0x3] %vm2240_vm14, %v2037_v45  ;;  %v2043_v35 = vpop.permute.xlu1 %2042 }
 0x3db   :  { %2351 = vrot.lane.b32.xlu0 %v7518_v33, %s7138_s19  ;;  %2286 = vst.msk [vmem:[#allocation3 + $0xfe] sm:$0x3] %vm2240_vm14, %v2043_v35 }
 0x3dc   :  { %2357 = vrot.lane.b32.xlu1 %v14153_v42, %s7138_s19 }
 0x3dd   :  { %v2041_v34 = vpop.permute.xlu0 %2040 }
 0x3de   :  { %2285 = vst.msk [vmem:[#allocation3 + $0xf6] sm:$0xff] %vm2238_vm13, %v2041_v34  ;;  %v2047_v46 = vpop.permute.xlu1 %2046 }
 0x3df   :  { %2355 = vrot.lane.b32.xlu0 %v14099_v20, %s7138_s19  ;;  %2288 = vst.msk [vmem:[#allocation3 + $0x106] sm:$0xff] %vm2238_vm13, %v2047_v46 }
 0x3e0   :  { %2361 = vrot.lane.b32.xlu1 %v14154_v32, %s7138_s19 }
 0x3e1   :  { %v2045_v37 = vpop.permute.xlu0 %2044 }
 0x3e2   :  { %2287 = vst.msk [vmem:[#allocation3 + $0xfe] sm:$0xfc] %vm2236_vm12, %v2045_v37  ;;  %v2051_v22 = vpop.permute.xlu1 %2050 }
 0x3e3   :  { %2359 = vrot.lane.b32.xlu0 %v14133_v63, %s7138_s19  ;;  %2290 = vst.msk [vmem:[#allocation3 + $0x10e] sm:$0xfc] %vm2236_vm12, %v2051_v22  ;;  %v3437_v22 = vld [vmem:[%s13598_s1 + $0x8] sm:$0xff] }
 0x3e4   :  { %2365 = vrot.lane.b32.xlu1 %v14155_v53, %s7138_s19 }
 0x3e5   :  { %v2049_v1 = vpop.permute.xlu0 %2048 }
 0x3e6   :  { %2289 = vst.msk [vmem:[#allocation3 + $0x10e] sm:$0x3] %vm2240_vm14, %v2049_v1  ;;  %v2055_v40 = vpop.permute.xlu1 %2054  ;;  %v3436_v1 = vld [vmem:[%s13598_s1] sm:$0xff] }
 0x3e7   :  { %2363 = vrot.lane.b32.xlu0 %v14105_v23, %s7138_s19  ;;  %2292 = vst.msk [vmem:[#allocation3 + $0x11e] sm:$0x3] %vm2240_vm14, %v2055_v40 }
 0x3e8   :  { %2369 = vrot.lane.b32.xlu1 %v14156_v36, %s7138_s19 }
 0x3e9   :  { %v2053_v45 = vpop.permute.xlu0 %2052 }
 0x3ea   :  { %2291 = vst.msk [vmem:[#allocation3 + $0x116] sm:$0xff] %vm2238_vm13, %v2053_v45  ;;  %v2059_v35 = vpop.permute.xlu1 %2058  ;;  %v7037_v45 = vpack.c.bf16 %v3437_v22, %v3436_v1 }
 0x3eb   :  { %2367 = vrot.lane.b32.xlu0 %v14107_v2, %s7138_s19  ;;  %2294 = vst.msk [vmem:[#allocation3 + $0x126] sm:$0xff] %vm2238_vm13, %v2059_v35  ;;  %v3438_v35 = vld [vmem:[%s13598_s1 + $0x10] sm:$0xff] }
 0x3ec   :  { %2373 = vrot.lane.b32.xlu1 %v14157_v4, %s7138_s19  ;;  %7038 = vmatprep.subr.bf16.mxu0 %v7037_v45 }
 0x3ed   :  { %v2057_v34 = vpop.permute.xlu0 %2056  ;;  %7047 = vmatprep.subr.bf16.mxu1 %v7037_v45  ;;  %7040 = vmatpush3.bf16.msra.mxu0 %v7037_v45 }
 0x3ee   :  { %2293 = vst.msk [vmem:[#allocation3 + $0x11e] sm:$0xfc] %vm2236_vm12, %v2057_v34  ;;  %v2063_v46 = vpop.permute.xlu1 %2062  ;;  %7049 = vmatpush3.bf16.msra.mxu1 %v7037_v45 }
 0x3ef   :  { %2371 = vrot.lane.b32.xlu0 %v7564_v44, %s7138_s19  ;;  %2296 = vst.msk [vmem:[#allocation3 + $0x12e] sm:$0xfc] %vm2236_vm12, %v2063_v46 }
 0x3f0   :  { %2377 = vrot.lane.b32.xlu1 %v14158_v8, %s7138_s19 }
 0x3f1   :  { %v2061_v37 = vpop.permute.xlu0 %2060 }
 0x3f2   :  { %2295 = vst.msk [vmem:[#allocation3 + $0x12e] sm:$0x3] %vm2240_vm14, %v2061_v37  ;;  %v2067_v34 = vpop.permute.xlu1 %2066  ;;  %v3439_v37 = vld [vmem:[%s13598_s1 + $0x18] sm:$0x7]  ;;  %s7141_s1 = smov 24  }
 0x3f3   :  { %2375 = vrot.lane.b32.xlu0 %v14110_v0, %s7138_s19  ;;  %2298 = vst.msk [vmem:[#allocation3 + $0x13e] sm:$0x3] %vm2240_vm14, %v2067_v34  ;;  %v7041_v46 = vpack.c.bf16 %v3439_v37, %v3438_v35 }
 0x3f4   :  { %2598 = vrot.lane.b32.xlu1 %v7490_v27, %s7139_s24 }
 0x3f5   :  { %v2065_v40 = vpop.permute.xlu0 %2064  ;;  %7043 = vmatprep.subr.msk.bf16.mxu0 %vm7042_vm1, %v7041_v46  ;;  %7048 = vmatprep.subr.msk.bf16.mxu1 %vm7042_vm1, %v7041_v46 }
 0x3f6   :  { %2297 = vst.msk [vmem:[#allocation3 + $0x136] sm:$0xff] %vm2238_vm13, %v2065_v40  ;;  %v2071_v22 = vpop.permute.xlu1 %2070  ;;  %v7098_v40 = vld [vmem:[#allocation2 + $0x40] sm:$0x3]  ;;  %7046 = vmatpush3.bf16.msk.msra.mxu0 %vm7042_vm1, %v7041_v46  ;;  %7050 = vmatpush3.bf16.msk.msra.mxu1 %vm7042_vm1, %v7041_v46  ;;  %vm6528_vm1 = vcmask 1047559  }
 0x3f7   :  { %2379 = vrot.lane.b32.xlu0 %v7671_v7, %s7138_s19  ;;  %2300 = vst.msk [vmem:[#allocation3 + $0x146] sm:$0xff] %vm2238_vm13, %v2071_v22 }
 0x3f8   :  { %2602 = vrot.lane.b32.xlu1 %v7098_v40, %s7139_s24 }
 0x3f9   :  { %v2069_v1 = vpop.permute.xlu0 %2068 }
 0x3fa   :  { %2299 = vst.msk [vmem:[#allocation3 + $0x13e] sm:$0xfc] %vm2236_vm12, %v2069_v1  ;;  %v2075_v45 = vpop.permute.xlu1 %2074 }
 0x3fb   :  { %2600 = vrot.lane.b32.xlu0 %v14149_v25, %s7139_s24  ;;  %2302 = vst.msk [vmem:[#allocation3 + $0x14e] sm:$0xfc] %vm2236_vm12, %v2075_v45 }
 0x3fc   :  { %2987 = vrot.lane.b32.xlu1 %v14149_v25, %s7141_s1 }
 0x3fd   :  { %v2073_v34 = vpop.permute.xlu0 %2072 }
 0x3fe   :  { %2301 = vst.msk [vmem:[#allocation3 + $0x14e] sm:$0x3] %vm2240_vm14, %v2073_v34  ;;  %v2079_v37 = vpop.permute.xlu1 %2078 }
 0x3ff   :  { %2985 = vrot.lane.b32.xlu0 %v7490_v27, %s7141_s1  ;;  %2304 = vst.msk [vmem:[#allocation3 + $0x15e] sm:$0x3] %vm2240_vm14, %v2079_v37  ;;  %v7099_v27 = vld [vmem:[#allocation2 + $0x58] sm:$0x3] }
 0x400   :  { %2604 = vrot.lane.b32.xlu1 %v7498_v29, %s7139_s24 }
 0x401   :  { %v2077_v35 = vpop.permute.xlu0 %2076 }
 0x402   :  { %2303 = vst.msk [vmem:[#allocation3 + $0x156] sm:$0xff] %vm2238_vm13, %v2077_v35  ;;  %v2083_v1 = vpop.permute.xlu1 %2082 }
 0x403   :  { %2989 = vrot.lane.b32.xlu0 %v7098_v40, %s7141_s1  ;;  %2306 = vst.msk [vmem:[#allocation3 + $0x166] sm:$0xff] %vm2238_vm13, %v2083_v1 }
 0x404   :  { %2608 = vrot.lane.b32.xlu1 %v7099_v27, %s7139_s24 }
 0x405   :  { %v2081_v46 = vpop.permute.xlu0 %2080 }
 0x406   :  { %2305 = vst.msk [vmem:[#allocation3 + $0x15e] sm:$0xfc] %vm2236_vm12, %v2081_v46  ;;  %v2087_v22 = vpop.permute.xlu1 %2086 }
 0x407   :  { %2606 = vrot.lane.b32.xlu0 %v14150_v61, %s7139_s24  ;;  %2308 = vst.msk [vmem:[#allocation3 + $0x16e] sm:$0xfc] %vm2236_vm12, %v2087_v22 }
 0x408   :  { %2993 = vrot.lane.b32.xlu1 %v14150_v61, %s7141_s1 }
 0x409   :  { %v2085_v25 = vpop.permute.xlu0 %2084 }
 0x40a   :  { %2307 = vst.msk [vmem:[#allocation3 + $0x16e] sm:$0x3] %vm2240_vm14, %v2085_v25  ;;  %v2091_v34 = vpop.permute.xlu1 %2090 }
 0x40b   :  { %2991 = vrot.lane.b32.xlu0 %v7498_v29, %s7141_s1  ;;  %2310 = vst.msk [vmem:[#allocation3 + $0x17e] sm:$0x3] %vm2240_vm14, %v2091_v34  ;;  %v7100_v29 = vld [vmem:[#allocation2 + $0x70] sm:$0x3] }
 0x40c   :  { %2610 = vrot.lane.b32.xlu1 %v7506_v31, %s7139_s24 }
 0x40d   :  { %v2089_v40 = vpop.permute.xlu0 %2088 }
 0x40e   :  { %2309 = vst.msk [vmem:[#allocation3 + $0x176] sm:$0xff] %vm2238_vm13, %v2089_v40  ;;  %v2095_v35 = vpop.permute.xlu1 %2094 }
 0x40f   :  { %2995 = vrot.lane.b32.xlu0 %v7099_v27, %s7141_s1  ;;  %2312 = vst.msk [vmem:[#allocation3 + $0x186] sm:$0xff] %vm2238_vm13, %v2095_v35 }
 0x410   :  { %2614 = vrot.lane.b32.xlu1 %v7100_v29, %s7139_s24 }
 0x411   :  { %v2093_v45 = vpop.permute.xlu0 %2092 }
 0x412   :  { %2311 = vst.msk [vmem:[#allocation3 + $0x17e] sm:$0xfc] %vm2236_vm12, %v2093_v45  ;;  %v2099_v37 = vpop.permute.xlu1 %2098 }
 0x413   :  { %2612 = vrot.lane.b32.xlu0 %v14151_v60, %s7139_s24  ;;  %2314 = vst.msk [vmem:[#allocation3 + $0x18e] sm:$0xfc] %vm2236_vm12, %v2099_v37 }
 0x414   :  { %2999 = vrot.lane.b32.xlu1 %v14151_v60, %s7141_s1 }
 0x415   :  { %v2097_v61 = vpop.permute.xlu0 %2096 }
 0x416   :  { %2313 = vst.msk [vmem:[#allocation3 + $0x18e] sm:$0x3] %vm2240_vm14, %v2097_v61  ;;  %v2103_v1 = vpop.permute.xlu1 %2102 }
 0x417   :  { %2997 = vrot.lane.b32.xlu0 %v7506_v31, %s7141_s1  ;;  %2316 = vst.msk [vmem:[#allocation3 + $0x19e] sm:$0x3] %vm2240_vm14, %v2103_v1  ;;  %v7101_v31 = vld [vmem:[#allocation2 + $0x88] sm:$0x3] }
 0x418   :  { %2616 = vrot.lane.b32.xlu1 %v7518_v33, %s7139_s24 }
 0x419   :  { %v2101_v46 = vpop.permute.xlu0 %2100 }
 0x41a   :  { %2315 = vst.msk [vmem:[#allocation3 + $0x196] sm:$0xff] %vm2238_vm13, %v2101_v46  ;;  %v2107_v25 = vpop.permute.xlu1 %2106 }
 0x41b   :  { %3001 = vrot.lane.b32.xlu0 %v7100_v29, %s7141_s1  ;;  %2318 = vst.msk [vmem:[#allocation3 + $0x1a6] sm:$0xff] %vm2238_vm13, %v2107_v25 }
 0x41c   :  { %2620 = vrot.lane.b32.xlu1 %v7101_v31, %s7139_s24 }
 0x41d   :  { %v2105_v27 = vpop.permute.xlu0 %2104 }
 0x41e   :  { %2317 = vst.msk [vmem:[#allocation3 + $0x19e] sm:$0xfc] %vm2236_vm12, %v2105_v27  ;;  %v2111_v22 = vpop.permute.xlu1 %2110 }
 0x41f   :  { %2618 = vrot.lane.b32.xlu0 %v14152_v28, %s7139_s24  ;;  %2320 = vst.msk [vmem:[#allocation3 + $0x1ae] sm:$0xfc] %vm2236_vm12, %v2111_v22 }
 0x420   :  { %3005 = vrot.lane.b32.xlu1 %v14152_v28, %s7141_s1 }
 0x421   :  { %v2109_v60 = vpop.permute.xlu0 %2108 }
 0x422   :  { %2319 = vst.msk [vmem:[#allocation3 + $0x1ae] sm:$0x3] %vm2240_vm14, %v2109_v60  ;;  %v2115_v34 = vpop.permute.xlu1 %2114 }
 0x423   :  { %3003 = vrot.lane.b32.xlu0 %v7518_v33, %s7141_s1  ;;  %2322 = vst.msk [vmem:[#allocation3 + $0x1be] sm:$0x3] %vm2240_vm14, %v2115_v34  ;;  %v7102_v33 = vld [vmem:[#allocation2 + $0xa0] sm:$0x3] }
 0x424   :  { %2622 = vrot.lane.b32.xlu1 %v14099_v20, %s7139_s24 }
 0x425   :  { %v2113_v40 = vpop.permute.xlu0 %2112 }
 0x426   :  { %2321 = vst.msk [vmem:[#allocation3 + $0x1b6] sm:$0xff] %vm2238_vm13, %v2113_v40  ;;  %v2119_v35 = vpop.permute.xlu1 %2118 }
 0x427   :  { %3007 = vrot.lane.b32.xlu0 %v7101_v31, %s7141_s1  ;;  %2324 = vst.msk [vmem:[#allocation3 + $0x1c6] sm:$0xff] %vm2238_vm13, %v2119_v35 }
 0x428   :  { %2626 = vrot.lane.b32.xlu1 %v7102_v33, %s7139_s24 }
 0x429   :  { %v2117_v45 = vpop.permute.xlu0 %2116 }
 0x42a   :  { %2323 = vst.msk [vmem:[#allocation3 + $0x1be] sm:$0xfc] %vm2236_vm12, %v2117_v45  ;;  %v2123_v29 = vpop.permute.xlu1 %2122 }
 0x42b   :  { %2624 = vrot.lane.b32.xlu0 %v14153_v42, %s7139_s24  ;;  %2326 = vst.msk [vmem:[#allocation3 + $0x1ce] sm:$0xfc] %vm2236_vm12, %v2123_v29 }
 0x42c   :  { %3011 = vrot.lane.b32.xlu1 %v14153_v42, %s7141_s1 }
 0x42d   :  { %v2121_v28 = vpop.permute.xlu0 %2120 }
 0x42e   :  { %2325 = vst.msk [vmem:[#allocation3 + $0x1ce] sm:$0x3] %vm2240_vm14, %v2121_v28  ;;  %v2127_v37 = vpop.permute.xlu1 %2126 }
 0x42f   :  { %3009 = vrot.lane.b32.xlu0 %v14099_v20, %s7141_s1  ;;  %2328 = vst.msk [vmem:[#allocation3 + $0x1de] sm:$0x3] %vm2240_vm14, %v2127_v37  ;;  %v7103_v20 = vld [vmem:[#allocation2 + $0xb8] sm:$0x3] }
 0x430   :  { %2628 = vrot.lane.b32.xlu1 %v14133_v63, %s7139_s24 }
 0x431   :  { %v2125_v61 = vpop.permute.xlu0 %2124 }
 0x432   :  { %2327 = vst.msk [vmem:[#allocation3 + $0x1d6] sm:$0xff] %vm2238_vm13, %v2125_v61  ;;  %v2131_v1 = vpop.permute.xlu1 %2130 }
 0x433   :  { %3013 = vrot.lane.b32.xlu0 %v7102_v33, %s7141_s1  ;;  %2330 = vst.msk [vmem:[#allocation3 + $0x1e6] sm:$0xff] %vm2238_vm13, %v2131_v1 }
 0x434   :  { %2632 = vrot.lane.b32.xlu1 %v7103_v20, %s7139_s24 }
 0x435   :  { %v2129_v46 = vpop.permute.xlu0 %2128 }
 0x436   :  { %2329 = vst.msk [vmem:[#allocation3 + $0x1de] sm:$0xfc] %vm2236_vm12, %v2129_v46  ;;  %v2135_v27 = vpop.permute.xlu1 %2134 }
 0x437   :  { %2630 = vrot.lane.b32.xlu0 %v14154_v32, %s7139_s24  ;;  %2332 = vst.msk [vmem:[#allocation3 + $0x1ee] sm:$0xfc] %vm2236_vm12, %v2135_v27  ;;  %vm6518_vm12 = vcmask 1042434  }
 0x438   :  { %3017 = vrot.lane.b32.xlu1 %v14154_v32, %s7141_s1 }
 0x439   :  { %v2133_v42 = vpop.permute.xlu0 %2132 }
 0x43a   :  { %2331 = vst.msk [vmem:[#allocation3 + $0x1ee] sm:$0x3] %vm2240_vm14, %v2133_v42  ;;  %v2139_v31 = vpop.permute.xlu1 %2138 }
 0x43b   :  { %3015 = vrot.lane.b32.xlu0 %v14133_v63, %s7141_s1  ;;  %2334 = vst.msk [vmem:[#allocation3 + $0x1fe] sm:$0x3] %vm2240_vm14, %v2139_v31  ;;  %v7104_v63 = vld [vmem:[#allocation2 + $0xd0] sm:$0x3]  ;;  %vm6522_vm14 = vcmask 1044484  }
 0x43c   :  { %2634 = vrot.lane.b32.xlu1 %v14105_v23, %s7139_s24 }
 0x43d   :  { %v2137_v25 = vpop.permute.xlu0 %2136 }
 0x43e   :  { %2333 = vst.msk [vmem:[#allocation3 + $0x1f6] sm:$0xff] %vm2238_vm13, %v2137_v25  ;;  %v2342_v22 = vpop.permute.xlu1 %2341  ;;  %vm6520_vm13 = vcmask 1043459  }
 0x43f   :  { %3019 = vrot.lane.b32.xlu0 %v7103_v20, %s7141_s1  ;;  %2533 = vst.msk [vmem:[#allocation3 + $0x8] sm:$0xff] %vm2531_vm2, %v2342_v22 }
 0x440   :  { %2638 = vrot.lane.b32.xlu1 %v7104_v63, %s7139_s24 }
 0x441   :  { %v2340_v60 = vpop.permute.xlu0 %2339 }
 0x442   :  { %2532 = vst.msk [vmem:[#allocation3] sm:$0xff] %vm2531_vm2, %v2340_v60  ;;  %v2346_v40 = vpop.permute.xlu1 %2345 }
 0x443   :  { %2636 = vrot.lane.b32.xlu0 %v14155_v53, %s7139_s24  ;;  %2535 = vst.msk [vmem:[#allocation3 + $0x18] sm:$0xff] %vm2531_vm2, %v2346_v40  ;;  %v7108_v40 = vld [vmem:[#allocation2 + $0x130] sm:$0x3] }
 0x444   :  { %3023 = vrot.lane.b32.xlu1 %v14155_v53, %s7141_s1 }
 0x445   :  { %v2344_v32 = vpop.permute.xlu0 %2343 }
 0x446   :  { %2534 = vst.msk [vmem:[#allocation3 + $0x10] sm:$0xff] %vm2531_vm2, %v2344_v32  ;;  %v2350_v45 = vpop.permute.xlu1 %2349 }
 0x447   :  { %3021 = vrot.lane.b32.xlu0 %v14105_v23, %s7141_s1  ;;  %2537 = vst.msk [vmem:[#allocation3 + $0x28] sm:$0xff] %vm2531_vm2, %v2350_v45  ;;  %v7105_v23 = vld [vmem:[#allocation2 + $0xe8] sm:$0x3] }
 0x448   :  { %2640 = vrot.lane.b32.xlu1 %v14107_v2, %s7139_s24 }
 0x449   :  { %v2348_v34 = vpop.permute.xlu0 %2347 }
 0x44a   :  { %2536 = vst.msk [vmem:[#allocation3 + $0x20] sm:$0xff] %vm2531_vm2, %v2348_v34  ;;  %v2354_v33 = vpop.permute.xlu1 %2353 }
 0x44b   :  { %3025 = vrot.lane.b32.xlu0 %v7104_v63, %s7141_s1  ;;  %2539 = vst.msk [vmem:[#allocation3 + $0x38] sm:$0xff] %vm2531_vm2, %v2354_v33 }
 0x44c   :  { %2644 = vrot.lane.b32.xlu1 %v7105_v23, %s7139_s24 }
 0x44d   :  { %v2352_v35 = vpop.permute.xlu0 %2351 }
 0x44e   :  { %2538 = vst.msk [vmem:[#allocation3 + $0x30] sm:$0xff] %vm2531_vm2, %v2352_v35  ;;  %v2358_v28 = vpop.permute.xlu1 %2357 }
 0x44f   :  { %2642 = vrot.lane.b32.xlu0 %v14156_v36, %s7139_s24  ;;  %2541 = vst.msk [vmem:[#allocation3 + $0x48] sm:$0xff] %vm2531_vm2, %v2358_v28 }
 0x450   :  { %3029 = vrot.lane.b32.xlu1 %v14156_v36, %s7141_s1 }
 0x451   :  { %v2356_v53 = vpop.permute.xlu0 %2355 }
 0x452   :  { %2540 = vst.msk [vmem:[#allocation3 + $0x40] sm:$0xff] %vm2531_vm2, %v2356_v53  ;;  %v2362_v61 = vpop.permute.xlu1 %2361 }
 0x453   :  { %3027 = vrot.lane.b32.xlu0 %v14107_v2, %s7141_s1  ;;  %2543 = vst.msk [vmem:[#allocation3 + $0x58] sm:$0xff] %vm2531_vm2, %v2362_v61  ;;  %v7106_v2 = vld [vmem:[#allocation2 + $0x100] sm:$0x3] }
 0x454   :  { %2646 = vrot.lane.b32.xlu1 %v7564_v44, %s7139_s24 }
 0x455   :  { %v2360_v29 = vpop.permute.xlu0 %2359 }
 0x456   :  { %2542 = vst.msk [vmem:[#allocation3 + $0x50] sm:$0xff] %vm2531_vm2, %v2360_v29  ;;  %v2366_v46 = vpop.permute.xlu1 %2365 }
 0x457   :  { %3031 = vrot.lane.b32.xlu0 %v7105_v23, %s7141_s1  ;;  %2545 = vst.msk [vmem:[#allocation3 + $0x68] sm:$0xff] %vm2531_vm2, %v2366_v46 }
 0x458   :  { %2650 = vrot.lane.b32.xlu1 %v7106_v2, %s7139_s24 }
 0x459   :  { %v2364_v37 = vpop.permute.xlu0 %2363 }
 0x45a   :  { %2544 = vst.msk [vmem:[#allocation3 + $0x60] sm:$0xff] %vm2531_vm2, %v2364_v37  ;;  %v2370_v1 = vpop.permute.xlu1 %2369  ;;  %v7109_v37 = vld [vmem:[#allocation2 + $0x148] sm:$0x3] }
 0x45b   :  { %2648 = vrot.lane.b32.xlu0 %v14157_v4, %s7139_s24  ;;  %2547 = vst.msk [vmem:[#allocation3 + $0x78] sm:$0xff] %vm2531_vm2, %v2370_v1 }
 0x45c   :  { %3035 = vrot.lane.b32.xlu1 %v14157_v4, %s7141_s1 }
 0x45d   :  { %v2368_v36 = vpop.permute.xlu0 %2367 }
 0x45e   :  { %2546 = vst.msk [vmem:[#allocation3 + $0x70] sm:$0xff] %vm2531_vm2, %v2368_v36  ;;  %v2374_v42 = vpop.permute.xlu1 %2373 }
 0x45f   :  { %3033 = vrot.lane.b32.xlu0 %v7564_v44, %s7141_s1  ;;  %2549 = vst.msk [vmem:[#allocation3 + $0x88] sm:$0xff] %vm2531_vm2, %v2374_v42  ;;  %v7107_v44 = vld [vmem:[#allocation2 + $0x118] sm:$0x3] }
 0x460   :  { %2652 = vrot.lane.b32.xlu1 %v14110_v0, %s7139_s24 }
 0x461   :  { %v2372_v20 = vpop.permute.xlu0 %2371 }
 0x462   :  { %2548 = vst.msk [vmem:[#allocation3 + $0x80] sm:$0xff] %vm2531_vm2, %v2372_v20  ;;  %v2378_v25 = vpop.permute.xlu1 %2377 }
 0x463   :  { %3037 = vrot.lane.b32.xlu0 %v7106_v2, %s7141_s1  ;;  %2551 = vst.msk [vmem:[#allocation3 + $0x98] sm:$0xff] %vm2531_vm2, %v2378_v25 }
 0x464   :  { %2656 = vrot.lane.b32.xlu1 %v7107_v44, %s7139_s24 }
 0x465   :  { %v2376_v27 = vpop.permute.xlu0 %2375 }
 0x466   :  { %2550 = vst.msk [vmem:[#allocation3 + $0x90] sm:$0xff] %vm2531_vm2, %v2376_v27  ;;  %v2599_v31 = vpop.permute.xlu1 %2598 }
 0x467   :  { %2654 = vrot.lane.b32.xlu0 %v14158_v8, %s7139_s24  ;;  %2887 = vst.msk [vmem:[#allocation3 - $0x1] sm:$0xfe] %vm2886_vm3, %v2599_v31 }
 0x468   :  { %3041 = vrot.lane.b32.xlu1 %v14158_v8, %s7141_s1 }
 0x469   :  { %v2380_v4 = vpop.permute.xlu0 %2379 }
 0x46a   :  { %2552 = vst.msk [vmem:[#allocation3 + $0xa0] sm:$0xff] %vm2531_vm2, %v2380_v4  ;;  %v2603_v22 = vpop.permute.xlu1 %2602  ;;  %v7110_v4 = vld [vmem:[#allocation2 + $0x160] sm:$0x3] }
 0x46b   :  { %3039 = vrot.lane.b32.xlu0 %v14110_v0, %s7141_s1  ;;  %2891 = vst.msk [vmem:[#allocation3 + $0xf] sm:$0x1] %vm2890_vm5, %v2603_v22 }
 0x46c   :  { %2381 = vrot.lane.b32.xlu1 %v14159_v26, %s7138_s19 }
 0x46d   :  { %v2601_v60 = vpop.permute.xlu0 %2600 }
 0x46e   :  { %2889 = vst.msk [vmem:[#allocation3 + $0x7] sm:$0xff] %vm2888_vm4, %v2601_v60  ;;  %v2988_v0 = vpop.permute.xlu1 %2987 }
 0x46f   :  { %3043 = vrot.lane.b32.xlu0 %v7107_v44, %s7141_s1  ;;  %3276 = vst.msk [vmem:[#allocation3 + $0x6] sm:$0xff] %vm3275_vm7, %v2988_v0 }
 0x470   :  { %2660 = vrot.lane.b32.xlu1 %v14159_v26, %s7139_s24 }
 0x471   :  { %v2986_v63 = vpop.permute.xlu0 %2985 }
 0x472   :  { %3274 = vst.msk [vmem:[#allocation3 - $0x2] sm:$0xfc] %vm3273_vm6, %v2986_v63  ;;  %v2605_v32 = vpop.permute.xlu1 %2604 }
 0x473   :  { %2658 = vrot.lane.b32.xlu0 %v7671_v7, %s7139_s24  ;;  %2892 = vst.msk [vmem:[#allocation3 + $0xf] sm:$0xfe] %vm2886_vm3, %v2605_v32 }
 0x474   :  { %3045 = vrot.lane.b32.xlu1 %v7671_v7, %s7141_s1 }
 0x475   :  { %v2990_v8 = vpop.permute.xlu0 %2989 }
 0x476   :  { %3278 = vst.msk [vmem:[#allocation3 + $0xe] sm:$0x3] %vm3277_vm8, %v2990_v8  ;;  %v2609_v45 = vpop.permute.xlu1 %2608 }
 0x477   :  { %2662 = vrot.lane.b32.xlu0 %v7108_v40, %s7139_s24  ;;  %2894 = vst.msk [vmem:[#allocation3 + $0x1f] sm:$0x1] %vm2890_vm5, %v2609_v45 }
 0x478   :  { %3049 = vrot.lane.b32.xlu1 %v7108_v40, %s7141_s1 }
 0x479   :  { %v2607_v34 = vpop.permute.xlu0 %2606  ;;  %v3372_v35 = vld [vmem:[#allocation3] sm:$0xff] }
 0x47a   :  { %2893 = vst.msk [vmem:[#allocation3 + $0x17] sm:$0xff] %vm2888_vm4, %v2607_v34  ;;  %6941 = vmatprep.mubr.msk.f32.mxu0 %vm3440_vm9, %v3372_v35  ;;  %v2994_v23 = vpop.permute.xlu1 %2993  ;;  %v7111_v34 = vld [vmem:[#allocation2 + $0x178] sm:$0x3] }
 0x47b   :  { %3047 = vrot.lane.b32.xlu0 %v14159_v26, %s7141_s1  ;;  %3280 = vst.msk [vmem:[#allocation3 + $0x16] sm:$0xff] %vm3275_vm7, %v2994_v23 }
 0x47c   :  { %2385 = vrot.lane.b32.xlu1 %v14160_v5, %s7138_s19 }
 0x47d   :  { %v2992_v33 = vpop.permute.xlu0 %2991  ;;  %v3373_v53 = vld [vmem:[#allocation3 + $0x8] sm:$0xff] }
 0x47e   :  { %3279 = vst.msk [vmem:[#allocation3 + $0xe] sm:$0xfc] %vm3273_vm6, %v2992_v33  ;;  %6942 = vmatmul.mubr.msk.f32.vlgmr.msra.gmra.mrb[0].mxu0 %vm3440_vm9, %v3373_v53  ;;  %v2611_v28 = vpop.permute.xlu1 %2610 }
 0x47f   :  { %2383 = vrot.lane.b32.xlu0 %v14112_v41, %s7138_s19  ;;  %2895 = vst.msk [vmem:[#allocation3 + $0x1f] sm:$0xfe] %vm2886_vm3, %v2611_v28  ;;  %v7113_v28 = vld [vmem:[#allocation2 + $0x188] sm:$0xff] }
 0x480   :  { %2666 = vrot.lane.b32.xlu1 %v14160_v5, %s7139_s24 }
 0x481   :  { %v2996_v7 = vpop.permute.xlu0 %2995 }
 0x482   :  { %3281 = vst.msk [vmem:[#allocation3 + $0x1e] sm:$0x3] %vm3277_vm8, %v2996_v7  ;;  %v2615_v29 = vpop.permute.xlu1 %2614 }
 0x483   :  { %2664 = vrot.lane.b32.xlu0 %v14112_v41, %s7139_s24  ;;  %2897 = vst.msk [vmem:[#allocation3 + $0x2f] sm:$0x1] %vm2890_vm5, %v2615_v29 }
 0x484   :  { %3051 = vrot.lane.b32.xlu1 %v14112_v41, %s7141_s1 }
 0x485   :  { %v2613_v26 = vpop.permute.xlu0 %2612  ;;  %v3374_v61 = vld [vmem:[#allocation3 + $0x10] sm:$0xff] }
 0x486   :  { %2896 = vst.msk [vmem:[#allocation3 + $0x27] sm:$0xff] %vm2888_vm4, %v2613_v26  ;;  %6944 = vmatprep.mubr.msk.f32.mxu0 %vm3440_vm9, %v3374_v61  ;;  %v3000_v2 = vpop.permute.xlu1 %2999 }
 0x487   :  { %2668 = vrot.lane.b32.xlu0 %v7109_v37, %s7139_s24  ;;  %3283 = vst.msk [vmem:[#allocation3 + $0x26] sm:$0xff] %vm3275_vm7, %v3000_v2 }
 0x488   :  { %3055 = vrot.lane.b32.xlu1 %v7109_v37, %s7141_s1 }
 0x489   :  { %v2998_v46 = vpop.permute.xlu0 %2997  ;;  %v3375_v36 = vld [vmem:[#allocation3 + $0x18] sm:$0xff] }
 0x48a   :  { %3282 = vst.msk [vmem:[#allocation3 + $0x1e] sm:$0xfc] %vm3273_vm6, %v2998_v46  ;;  %6945 = vmatmul.mubr.msk.f32.gmra.mrb[2].mxu0 %vm3440_vm9, %v3375_v36  ;;  %v2617_v20 = vpop.permute.xlu1 %2616  ;;  %v7114_v46 = vld [vmem:[#allocation2 + $0x190] sm:$0x3] }
 0x48b   :  { %3053 = vrot.lane.b32.xlu0 %v14160_v5, %s7141_s1  ;;  %2898 = vst.msk [vmem:[#allocation3 + $0x2f] sm:$0xfe] %vm2886_vm3, %v2617_v20  ;;  %v307_v20 = vld [vmem:[#allocation2 + $0x198] sm:$0xff] }
 0x48c   :  { %2389 = vrot.lane.b32.xlu1 %v14161_v30, %s7138_s19 }
 0x48d   :  { %v3002_v1 = vpop.permute.xlu0 %3001 }
 0x48e   :  { %3284 = vst.msk [vmem:[#allocation3 + $0x2e] sm:$0x3] %vm3277_vm8, %v3002_v1  ;;  %v2621_v42 = vpop.permute.xlu1 %2620 }
 0x48f   :  { %2387 = vrot.lane.b32.xlu0 %v7694_v11, %s7138_s19  ;;  %2900 = vst.msk [vmem:[#allocation3 + $0x3f] sm:$0x1] %vm2890_vm5, %v2621_v42 }
 0x490   :  { %2672 = vrot.lane.b32.xlu1 %v14161_v30, %s7139_s24 }
 0x491   :  { %v2619_v41 = vpop.permute.xlu0 %2618  ;;  %v3376_v27 = vld [vmem:[#allocation3 + $0x20] sm:$0xff] }
 0x492   :  { %2899 = vst.msk [vmem:[#allocation3 + $0x37] sm:$0xff] %vm2888_vm4, %v2619_v41  ;;  %6947 = vmatprep.mubr.msk.f32.mxu0 %vm3440_vm9, %v3376_v27  ;;  %v3006_v25 = vpop.permute.xlu1 %3005  ;;  %v308_v41 = vld [vmem:[#allocation2 + $0x1a0] sm:$0xff] }
 0x493   :  { %2670 = vrot.lane.b32.xlu0 %v7694_v11, %s7139_s24  ;;  %3286 = vst.msk [vmem:[#allocation3 + $0x36] sm:$0xff] %vm3275_vm7, %v3006_v25 }
 0x494   :  { %3057 = vrot.lane.b32.xlu1 %v7694_v11, %s7141_s1 }
 0x495   :  { %v3004_v5 = vpop.permute.xlu0 %3003  ;;  %v3377_v44 = vld [vmem:[#allocation3 + $0x28] sm:$0xff] }
 0x496   :  { %3285 = vst.msk [vmem:[#allocation3 + $0x2e] sm:$0xfc] %vm3273_vm6, %v3004_v5  ;;  %6948 = vmatmul.mubr.msk.f32.gmra.mrb[4].mxu0 %vm3440_vm9, %v3377_v44  ;;  %v2623_v60 = vpop.permute.xlu1 %2622 }
 0x497   :  { %2674 = vrot.lane.b32.xlu0 %v7110_v4, %s7139_s24  ;;  %2901 = vst.msk [vmem:[#allocation3 + $0x3f] sm:$0xfe] %vm2886_vm3, %v2623_v60 }
 0x498   :  { %3061 = vrot.lane.b32.xlu1 %v7110_v4, %s7141_s1  ;;  %v309_v4 = vld [vmem:[#allocation2 + $0x1a8] sm:$0x3] }
 0x499   :  { %v3008_v31 = vpop.permute.xlu0 %3007 }
 0x49a   :  { %3287 = vst.msk [vmem:[#allocation3 + $0x3e] sm:$0x3] %vm3277_vm8, %v3008_v31  ;;  %v2627_v63 = vpop.permute.xlu1 %2626 }
 0x49b   :  { %3059 = vrot.lane.b32.xlu0 %v14161_v30, %s7141_s1  ;;  %2903 = vst.msk [vmem:[#allocation3 + $0x4f] sm:$0x1] %vm2890_vm5, %v2627_v63 }
 0x49c   :  { %2393 = vrot.lane.b32.xlu1 %v7708_v14, %s7138_s19 }
 0x49d   :  { %v2625_v22 = vpop.permute.xlu0 %2624  ;;  %v3378_v0 = vld [vmem:[#allocation3 + $0x30] sm:$0xff] }
 0x49e   :  { %2902 = vst.msk [vmem:[#allocation3 + $0x47] sm:$0xff] %vm2888_vm4, %v2625_v22  ;;  %6950 = vmatprep.mubr.msk.f32.mxu0 %vm3440_vm9, %v3378_v0  ;;  %v3012_v8 = vpop.permute.xlu1 %3011 }
 0x49f   :  { %2391 = vrot.lane.b32.xlu0 %v14162_v39, %s7138_s19  ;;  %3289 = vst.msk [vmem:[#allocation3 + $0x46] sm:$0xff] %vm3275_vm7, %v3012_v8 }
 0x4a0   :  { %2678 = vrot.lane.b32.xlu1 %v7708_v14, %s7139_s24 }
 0x4a1   :  { %v3010_v11 = vpop.permute.xlu0 %3009  ;;  %v3379_v30 = vld [vmem:[#allocation3 + $0x38] sm:$0xff] }
 0x4a2   :  { %3288 = vst.msk [vmem:[#allocation3 + $0x3e] sm:$0xfc] %vm3273_vm6, %v3010_v11  ;;  %6951 = vmatmul.mubr.msk.f32.gmra.mrb[6].mxu0 %vm3440_vm9, %v3379_v30  ;;  %v2629_v40 = vpop.permute.xlu1 %2628 }
 0x4a3   :  { %2676 = vrot.lane.b32.xlu0 %v14162_v39, %s7139_s24  ;;  %2904 = vst.msk [vmem:[#allocation3 + $0x4f] sm:$0xfe] %vm2886_vm3, %v2629_v40 }
 0x4a4   :  { %3063 = vrot.lane.b32.xlu1 %v14162_v39, %s7141_s1  ;;  %v7112_v39 = vld [vmem:[#allocation2 + $0x180] sm:$0xff] }
 0x4a5   :  { %v3014_v32 = vpop.permute.xlu0 %3013 }
 0x4a6   :  { %3290 = vst.msk [vmem:[#allocation3 + $0x4e] sm:$0x3] %vm3277_vm8, %v3014_v32  ;;  %v2633_v35 = vpop.permute.xlu1 %2632 }
 0x4a7   :  { %2680 = vrot.lane.b32.xlu0 %v7111_v34, %s7139_s24  ;;  %2906 = vst.msk [vmem:[#allocation3 + $0x5f] sm:$0x1] %vm2890_vm5, %v2633_v35 }
 0x4a8   :  { %3067 = vrot.lane.b32.xlu1 %v7111_v34, %s7141_s1 }
 0x4a9   :  { %v2631_v45 = vpop.permute.xlu0 %2630  ;;  %v3380_v33 = vld [vmem:[#allocation3 + $0x40] sm:$0xff] }
 0x4aa   :  { %2905 = vst.msk [vmem:[#allocation3 + $0x57] sm:$0xff] %vm2888_vm4, %v2631_v45  ;;  %6953 = vmatprep.mubr.msk.f32.mxu0 %vm3440_vm9, %v3380_v33  ;;  %v3018_v53 = vpop.permute.xlu1 %3017  ;;  %v7115_v33 = vld [vmem:[#allocation2 + $0x1f0] sm:$0x3] }
 0x4ab   :  { %3065 = vrot.lane.b32.xlu0 %v7708_v14, %s7141_s1  ;;  %3292 = vst.msk [vmem:[#allocation3 + $0x56] sm:$0xff] %vm3275_vm7, %v3018_v53 }
 0x4ac   :  { %2397 = vrot.lane.b32.xlu1 %v7113_v28, %s7138_s19 }
 0x4ad   :  { %v3016_v23 = vpop.permute.xlu0 %3015  ;;  %v3381_v7 = vld [vmem:[#allocation3 + $0x48] sm:$0xff] }
 0x4ae   :  { %3291 = vst.msk [vmem:[#allocation3 + $0x4e] sm:$0xfc] %vm3273_vm6, %v3016_v23  ;;  %6954 = vmatmul.mubr.msk.f32.gmra.mrb[8].mxu0 %vm3440_vm9, %v3381_v7  ;;  %v2635_v29 = vpop.permute.xlu1 %2634 }
 0x4af   :  { %2395 = vrot.lane.b32.xlu0 %v7112_v39, %s7138_s19  ;;  %2907 = vst.msk [vmem:[#allocation3 + $0x5f] sm:$0xfe] %vm2886_vm3, %v2635_v29 }
 0x4b0   :  { %2684 = vrot.lane.b32.xlu1 %v7113_v28, %s7139_s24 }
 0x4b1   :  { %v3020_v26 = vpop.permute.xlu0 %3019 }
 0x4b2   :  { %3293 = vst.msk [vmem:[#allocation3 + $0x5e] sm:$0x3] %vm3277_vm8, %v3020_v26  ;;  %v2639_v61 = vpop.permute.xlu1 %2638 }
 0x4b3   :  { %2682 = vrot.lane.b32.xlu0 %v7112_v39, %s7139_s24  ;;  %2909 = vst.msk [vmem:[#allocation3 + $0x6f] sm:$0x1] %vm2890_vm5, %v2639_v61 }
 0x4b4   :  { %3069 = vrot.lane.b32.xlu1 %v7112_v39, %s7141_s1 }
 0x4b5   :  { %v2637_v14 = vpop.permute.xlu0 %2636  ;;  %v3382_v37 = vld [vmem:[#allocation3 + $0x50] sm:$0xff] }
 0x4b6   :  { %2908 = vst.msk [vmem:[#allocation3 + $0x67] sm:$0xff] %vm2888_vm4, %v2637_v14  ;;  %6956 = vmatprep.mubr.msk.f32.mxu0 %vm3440_vm9, %v3382_v37  ;;  %v3024_v36 = vpop.permute.xlu1 %3023  ;;  %v7116_v37 = vld [vmem:[#allocation2 + $0x208] sm:$0x3] }
 0x4b7   :  { %2686 = vrot.lane.b32.xlu0 %v7114_v46, %s7139_s24  ;;  %3295 = vst.msk [vmem:[#allocation3 + $0x66] sm:$0xff] %vm3275_vm7, %v3024_v36 }
 0x4b8   :  { %3073 = vrot.lane.b32.xlu1 %v7114_v46, %s7141_s1 }
 0x4b9   :  { %v3022_v2 = vpop.permute.xlu0 %3021  ;;  %v3383_v1 = vld [vmem:[#allocation3 + $0x58] sm:$0xff] }
 0x4ba   :  { %3294 = vst.msk [vmem:[#allocation3 + $0x5e] sm:$0xfc] %vm3273_vm6, %v3022_v2  ;;  %6957 = vmatmul.mubr.msk.f32.gmra.mrb[10].mxu0 %vm3440_vm9, %v3383_v1  ;;  %v2641_v27 = vpop.permute.xlu1 %2640 }
 0x4bb   :  { %3071 = vrot.lane.b32.xlu0 %v7113_v28, %s7141_s1  ;;  %2910 = vst.msk [vmem:[#allocation3 + $0x6f] sm:$0xfe] %vm2886_vm3, %v2641_v27 }
 0x4bc   :  { %2401 = vrot.lane.b32.xlu1 %v308_v41, %s7138_s19 }
 0x4bd   :  { %v3026_v42 = vpop.permute.xlu0 %3025 }
 0x4be   :  { %3296 = vst.msk [vmem:[#allocation3 + $0x6e] sm:$0x3] %vm3277_vm8, %v3026_v42  ;;  %v2645_v25 = vpop.permute.xlu1 %2644 }
 0x4bf   :  { %2399 = vrot.lane.b32.xlu0 %v307_v20, %s7138_s19  ;;  %2912 = vst.msk [vmem:[#allocation3 + $0x7f] sm:$0x1] %vm2890_vm5, %v2645_v25  ;;  %v7117_v25 = vld [vmem:[#allocation2 + $0x220] sm:$0x3] }
 0x4c0   :  { %2690 = vrot.lane.b32.xlu1 %v308_v41, %s7139_s24 }
 0x4c1   :  { %v2643_v5 = vpop.permute.xlu0 %2642  ;;  %v3384_v44 = vld [vmem:[#allocation3 + $0x60] sm:$0xff] }
 0x4c2   :  { %2911 = vst.msk [vmem:[#allocation3 + $0x77] sm:$0xff] %vm2888_vm4, %v2643_v5  ;;  %6959 = vmatprep.mubr.msk.f32.mxu0 %vm3440_vm9, %v3384_v44  ;;  %v3030_v60 = vpop.permute.xlu1 %3029 }
 0x4c3   :  { %2688 = vrot.lane.b32.xlu0 %v307_v20, %s7139_s24  ;;  %3298 = vst.msk [vmem:[#allocation3 + $0x76] sm:$0xff] %vm3275_vm7, %v3030_v60 }
 0x4c4   :  { %3075 = vrot.lane.b32.xlu1 %v307_v20, %s7141_s1 }
 0x4c5   :  { %v3028_v31 = vpop.permute.xlu0 %3027  ;;  %v3385_v22 = vld [vmem:[#allocation3 + $0x68] sm:$0xff] }
 0x4c6   :  { %3297 = vst.msk [vmem:[#allocation3 + $0x6e] sm:$0xfc] %vm3273_vm6, %v3028_v31  ;;  %6960 = vmatmul.mubr.msk.f32.gmra.mrb[12].mxu0 %vm3440_vm9, %v3385_v22  ;;  %v2647_v0 = vpop.permute.xlu1 %2646 }
 0x4c7   :  { %2692 = vrot.lane.b32.xlu0 %v309_v4, %s7139_s24  ;;  %2913 = vst.msk [vmem:[#allocation3 + $0x7f] sm:$0xfe] %vm2886_vm3, %v2647_v0 }
 0x4c8   :  { %3079 = vrot.lane.b32.xlu1 %v309_v4, %s7141_s1 }
 0x4c9   :  { %v3032_v63 = vpop.permute.xlu0 %3031 }
 0x4ca   :  { %3299 = vst.msk [vmem:[#allocation3 + $0x7e] sm:$0x3] %vm3277_vm8, %v3032_v63  ;;  %v2651_v8 = vpop.permute.xlu1 %2650 }
 0x4cb   :  { %3077 = vrot.lane.b32.xlu0 %v308_v41, %s7141_s1  ;;  %2915 = vst.msk [vmem:[#allocation3 + $0x8f] sm:$0x1] %vm2890_vm5, %v2651_v8  ;;  %v7118_v8 = vld [vmem:[#allocation2 + $0x238] sm:$0x3] }
 0x4cc   :  { %2405 = vrot.lane.b32.xlu1 %v14165_v12, %s7138_s19 }
 0x4cd   :  { %v2649_v11 = vpop.permute.xlu0 %2648  ;;  %v3386_v30 = vld [vmem:[#allocation3 + $0x70] sm:$0xff] }
 0x4ce   :  { %2914 = vst.msk [vmem:[#allocation3 + $0x87] sm:$0xff] %vm2888_vm4, %v2649_v11  ;;  %6962 = vmatprep.mubr.msk.f32.mxu0 %vm3440_vm9, %v3386_v30  ;;  %v3036_v40 = vpop.permute.xlu1 %3035 }
 0x4cf   :  { %2403 = vrot.lane.b32.xlu0 %v7718_v17, %s7138_s19  ;;  %3301 = vst.msk [vmem:[#allocation3 + $0x86] sm:$0xff] %vm3275_vm7, %v3036_v40 }
 0x4d0   :  { %2696 = vrot.lane.b32.xlu1 %v14165_v12, %s7139_s24 }
 0x4d1   :  { %v3034_v32 = vpop.permute.xlu0 %3033  ;;  %v3387_v34 = vld [vmem:[#allocation3 + $0x78] sm:$0xff] }
 0x4d2   :  { %3300 = vst.msk [vmem:[#allocation3 + $0x7e] sm:$0xfc] %vm3273_vm6, %v3034_v32  ;;  %6963 = vmatmul.mubr.msk.f32.gmra.mrb[14].mxu0 %vm3440_vm9, %v3387_v34  ;;  %v2653_v35 = vpop.permute.xlu1 %2652 }
 0x4d3   :  { %2694 = vrot.lane.b32.xlu0 %v7718_v17, %s7139_s24  ;;  %2916 = vst.msk [vmem:[#allocation3 + $0x8f] sm:$0xfe] %vm2886_vm3, %v2653_v35 }
 0x4d4   :  { %3081 = vrot.lane.b32.xlu1 %v7718_v17, %s7141_s1 }
 0x4d5   :  { %v3038_v45 = vpop.permute.xlu0 %3037 }
 0x4d6   :  { %3302 = vst.msk [vmem:[#allocation3 + $0x8e] sm:$0x3] %vm3277_vm8, %v3038_v45  ;;  %v2657_v53 = vpop.permute.xlu1 %2656 }
 0x4d7   :  { %2698 = vrot.lane.b32.xlu0 %v7115_v33, %s7139_s24  ;;  %2918 = vst.msk [vmem:[#allocation3 + $0x9f] sm:$0x1] %vm2890_vm5, %v2657_v53  ;;  %v7119_v53 = vld [vmem:[#allocation2 + $0x250] sm:$0x3] }
 0x4d8   :  { %3085 = vrot.lane.b32.xlu1 %v7115_v33, %s7141_s1 }
 0x4d9   :  { %v2655_v23 = vpop.permute.xlu0 %2654  ;;  %v3388_v7 = vld [vmem:[#allocation3 + $0x80] sm:$0xff] }
 0x4da   :  { %2917 = vst.msk [vmem:[#allocation3 + $0x97] sm:$0xff] %vm2888_vm4, %v2655_v23  ;;  %6965 = vmatprep.mubr.msk.f32.mxu0 %vm3440_vm9, %v3388_v7  ;;  %v3042_v28 = vpop.permute.xlu1 %3041 }
 0x4db   :  { %3083 = vrot.lane.b32.xlu0 %v14165_v12, %s7141_s1  ;;  %3304 = vst.msk [vmem:[#allocation3 + $0x96] sm:$0xff] %vm3275_vm7, %v3042_v28 }
 0x4dc   :  { %2409 = vrot.lane.b32.xlu1 %v14137_v9, %s7138_s19 }
 0x4dd   :  { %v3040_v39 = vpop.permute.xlu0 %3039  ;;  %v3389_v26 = vld [vmem:[#allocation3 + $0x88] sm:$0xff] }
 0x4de   :  { %3303 = vst.msk [vmem:[#allocation3 + $0x8e] sm:$0xfc] %vm3273_vm6, %v3040_v39  ;;  %6966 = vmatmul.mubr.msk.f32.gmra.mrb[16].mxu0 %vm3440_vm9, %v3389_v26  ;;  %v2382_v29 = vpop.permute.xlu1 %2381 }
 0x4df   :  { %2407 = vrot.lane.b32.xlu0 %v14136_v55, %s7138_s19  ;;  %2553 = vst.msk [vmem:[#allocation3 + $0xa8] sm:$0xff] %vm2531_vm2, %v2382_v29 }
 0x4e0   :  { %2702 = vrot.lane.b32.xlu1 %v14137_v9, %s7139_s24 }
 0x4e1   :  { %v3044_v17 = vpop.permute.xlu0 %3043 }
 0x4e2   :  { %3305 = vst.msk [vmem:[#allocation3 + $0x9e] sm:$0x3] %vm3277_vm8, %v3044_v17  ;;  %v2661_v14 = vpop.permute.xlu1 %2660 }
 0x4e3   :  { %2700 = vrot.lane.b32.xlu0 %v14136_v55, %s7139_s24  ;;  %2920 = vst.msk [vmem:[#allocation3 + $0xa7] sm:$0xff] %vm2888_vm4, %v2661_v14 }
 0x4e4   :  { %3087 = vrot.lane.b32.xlu1 %v14136_v55, %s7141_s1 }
 0x4e5   :  { %v2659_v12 = vpop.permute.xlu0 %2658  ;;  %v3390_v61 = vld [vmem:[#allocation3 + $0x90] sm:$0xff] }
 0x4e6   :  { %2919 = vst.msk [vmem:[#allocation3 + $0x9f] sm:$0xfe] %vm2886_vm3, %v2659_v12  ;;  %6968 = vmatprep.mubr.msk.f32.mxu0 %vm3440_vm9, %v3390_v61  ;;  %v3046_v2 = vpop.permute.xlu1 %3045  ;;  %v7120_v61 = vld [vmem:[#allocation2 + $0x268] sm:$0x3] }
 0x4e7   :  { %2704 = vrot.lane.b32.xlu0 %v7116_v37, %s7139_s24  ;;  %3306 = vst.msk [vmem:[#allocation3 + $0x9e] sm:$0xfc] %vm3273_vm6, %v3046_v2 }
 0x4e8   :  { %3091 = vrot.lane.b32.xlu1 %v7116_v37, %s7141_s1 }
 0x4e9   :  { %v2663_v46 = vpop.permute.xlu0 %2662  ;;  %v3391_v36 = vld [vmem:[#allocation3 + $0x98] sm:$0xff] }
 0x4ea   :  { %2921 = vst.msk [vmem:[#allocation3 + $0xaf] sm:$0x1] %vm2890_vm5, %v2663_v46  ;;  %6969 = vmatmul.mubr.msk.f32.gmra.mrb[18].mxu0 %vm3440_vm9, %v3391_v36  ;;  %v3050_v20 = vpop.permute.xlu1 %3049 }
 0x4eb   :  { %3089 = vrot.lane.b32.xlu0 %v14137_v9, %s7141_s1  ;;  %3308 = vst.msk [vmem:[#allocation3 + $0xae] sm:$0x3] %vm3277_vm8, %v3050_v20 }
 0x4ec   :  { %2413 = vrot.lane.b32.xlu1 %v7746_v48, %s7138_s19 }
 0x4ed   :  { %v3048_v1 = vpop.permute.xlu0 %3047 }
 0x4ee   :  { %3307 = vst.msk [vmem:[#allocation3 + $0xa6] sm:$0xff] %vm3275_vm7, %v3048_v1  ;;  %v2386_v41 = vpop.permute.xlu1 %2385 }
 0x4ef   :  { %2411 = vrot.lane.b32.xlu0 %v14122_v19, %s7138_s19  ;;  %2555 = vst.msk [vmem:[#allocation3 + $0xb8] sm:$0xff] %vm2531_vm2, %v2386_v41 }
 0x4f0   :  { %2708 = vrot.lane.b32.xlu1 %v7746_v48, %s7139_s24 }
 0x4f1   :  { %v2384_v55 = vpop.permute.xlu0 %2383 }
 0x4f2   :  { %2554 = vst.msk [vmem:[#allocation3 + $0xb0] sm:$0xff] %vm2531_vm2, %v2384_v55  ;;  %v2667_v42 = vpop.permute.xlu1 %2666 }
 0x4f3   :  { %2706 = vrot.lane.b32.xlu0 %v14122_v19, %s7139_s24  ;;  %2923 = vst.msk [vmem:[#allocation3 + $0xb7] sm:$0xff] %vm2888_vm4, %v2667_v42 }
 0x4f4   :  { %3093 = vrot.lane.b32.xlu1 %v14122_v19, %s7141_s1 }
 0x4f5   :  { %v2665_v9 = vpop.permute.xlu0 %2664  ;;  %v3392_v27 = vld [vmem:[#allocation3 + $0xa0] sm:$0xff]  ;;  %v3393_v5 = vld [vmem:[#allocation3 + $0xa8] sm:$0xff] }
 0x4f6   :  { %2922 = vst.msk [vmem:[#allocation3 + $0xaf] sm:$0xfe] %vm2886_vm3, %v2665_v9  ;;  %6971 = vmatprep.mubr.msk.f32.mxu0 %vm3440_vm9, %v3392_v27  ;;  %v3052_v4 = vpop.permute.xlu1 %3051  ;;  %v7121_v9 = vld [vmem:[#allocation2 + $0x280] sm:$0x3] }
 0x4f7   :  { %2710 = vrot.lane.b32.xlu0 %v7117_v25, %s7139_s24  ;;  %6972 = vmatmul.mubr.msk.f32.gmra.mrb[20].mxu0 %vm3440_vm9, %v3393_v5  ;;  %3309 = vst.msk [vmem:[#allocation3 + $0xae] sm:$0xfc] %vm3273_vm6, %v3052_v4 }
 0x4f8   :  { %3097 = vrot.lane.b32.xlu1 %v7117_v25, %s7141_s1 }
 0x4f9   :  { %v2669_v44 = vpop.permute.xlu0 %2668 }
 0x4fa   :  { %2924 = vst.msk [vmem:[#allocation3 + $0xbf] sm:$0x1] %vm2890_vm5, %v2669_v44  ;;  %v3056_v60 = vpop.permute.xlu1 %3055 }
 0x4fb   :  { %3095 = vrot.lane.b32.xlu0 %v7746_v48, %s7141_s1  ;;  %3311 = vst.msk [vmem:[#allocation3 + $0xbe] sm:$0x3] %vm3277_vm8, %v3056_v60 }
 0x4fc   :  { %2417 = vrot.lane.b32.xlu1 %v14168_v49, %s7138_s19 }
 0x4fd   :  { %v3054_v31 = vpop.permute.xlu0 %3053 }
 0x4fe   :  { %3310 = vst.msk [vmem:[#allocation3 + $0xb6] sm:$0xff] %vm3275_vm7, %v3054_v31  ;;  %v2390_v22 = vpop.permute.xlu1 %2389 }
 0x4ff   :  { %2415 = vrot.lane.b32.xlu0 %v14123_v16, %s7138_s19  ;;  %2557 = vst.msk [vmem:[#allocation3 + $0xc8] sm:$0xff] %vm2531_vm2, %v2390_v22 }
 0x500   :  { %2714 = vrot.lane.b32.xlu1 %v14168_v49, %s7139_s24 }
 0x501   :  { %v2388_v19 = vpop.permute.xlu0 %2387 }
 0x502   :  { %2556 = vst.msk [vmem:[#allocation3 + $0xc0] sm:$0xff] %vm2531_vm2, %v2388_v19  ;;  %v2673_v63 = vpop.permute.xlu1 %2672  ;;  %v7122_v19 = vld [vmem:[#allocation2 + $0x298] sm:$0x3] }
 0x503   :  { %2712 = vrot.lane.b32.xlu0 %v14123_v16, %s7139_s24  ;;  %2926 = vst.msk [vmem:[#allocation3 + $0xc7] sm:$0xff] %vm2888_vm4, %v2673_v63 }
 0x504   :  { %3099 = vrot.lane.b32.xlu1 %v14123_v16, %s7141_s1 }
 0x505   :  { %v2671_v48 = vpop.permute.xlu0 %2670  ;;  %v3394_v0 = vld [vmem:[#allocation3 + $0xb0] sm:$0xff]  ;;  %v3395_v11 = vld [vmem:[#allocation3 + $0xb8] sm:$0xff] }
 0x506   :  { %2925 = vst.msk [vmem:[#allocation3 + $0xbf] sm:$0xfe] %vm2886_vm3, %v2671_v48  ;;  %6974 = vmatprep.mubr.msk.f32.mxu0 %vm3440_vm9, %v3394_v0  ;;  %v3058_v32 = vpop.permute.xlu1 %3057 }
 0x507   :  { %2716 = vrot.lane.b32.xlu0 %v7118_v8, %s7139_s24  ;;  %6975 = vmatmul.mubr.msk.f32.gmra.mrb[22].mxu0 %vm3440_vm9, %v3395_v11  ;;  %3312 = vst.msk [vmem:[#allocation3 + $0xbe] sm:$0xfc] %vm3273_vm6, %v3058_v32 }
 0x508   :  { %3103 = vrot.lane.b32.xlu1 %v7118_v8, %s7141_s1 }
 0x509   :  { %v2675_v30 = vpop.permute.xlu0 %2674 }
 0x50a   :  { %2927 = vst.msk [vmem:[#allocation3 + $0xcf] sm:$0x1] %vm2890_vm5, %v2675_v30  ;;  %v3062_v34 = vpop.permute.xlu1 %3061 }
 0x50b   :  { %3101 = vrot.lane.b32.xlu0 %v14168_v49, %s7141_s1  ;;  %3314 = vst.msk [vmem:[#allocation3 + $0xce] sm:$0x3] %vm3277_vm8, %v3062_v34 }
 0x50c   :  { %2421 = vrot.lane.b32.xlu1 %v14169_v43, %s7138_s19 }
 0x50d   :  { %v3060_v40 = vpop.permute.xlu0 %3059 }
 0x50e   :  { %3313 = vst.msk [vmem:[#allocation3 + $0xc6] sm:$0xff] %vm3275_vm7, %v3060_v40  ;;  %v2394_v45 = vpop.permute.xlu1 %2393 }
 0x50f   :  { %2419 = vrot.lane.b32.xlu0 %v14124_v13, %s7138_s19  ;;  %2559 = vst.msk [vmem:[#allocation3 + $0xd8] sm:$0xff] %vm2531_vm2, %v2394_v45 }
 0x510   :  { %2720 = vrot.lane.b32.xlu1 %v14169_v43, %s7139_s24 }
 0x511   :  { %v2392_v16 = vpop.permute.xlu0 %2391 }
 0x512   :  { %2558 = vst.msk [vmem:[#allocation3 + $0xd0] sm:$0xff] %vm2531_vm2, %v2392_v16  ;;  %v2679_v35 = vpop.permute.xlu1 %2678 }
 0x513   :  { %2718 = vrot.lane.b32.xlu0 %v14124_v13, %s7139_s24  ;;  %2929 = vst.msk [vmem:[#allocation3 + $0xd7] sm:$0xff] %vm2888_vm4, %v2679_v35 }
 0x514   :  { %3105 = vrot.lane.b32.xlu1 %v14124_v13, %s7141_s1 }
 0x515   :  { %v2677_v49 = vpop.permute.xlu0 %2676  ;;  %v3396_v33 = vld [vmem:[#allocation3 + $0xc0] sm:$0xff]  ;;  %v3397_v23 = vld [vmem:[#allocation3 + $0xc8] sm:$0xff] }
 0x516   :  { %2928 = vst.msk [vmem:[#allocation3 + $0xcf] sm:$0xfe] %vm2886_vm3, %v2677_v49  ;;  %6977 = vmatprep.mubr.msk.f32.mxu0 %vm3440_vm9, %v3396_v33  ;;  %v3064_v39 = vpop.permute.xlu1 %3063 }
 0x517   :  { %2722 = vrot.lane.b32.xlu0 %v7119_v53, %s7139_s24  ;;  %6978 = vmatmul.mubr.msk.f32.gmra.mrb[24].mxu0 %vm3440_vm9, %v3397_v23  ;;  %3315 = vst.msk [vmem:[#allocation3 + $0xce] sm:$0xfc] %vm3273_vm6, %v3064_v39  ;;  %v7123_v39 = vld [vmem:[#allocation2 + $0x2b0] sm:$0x3] }
 0x518   :  { %3109 = vrot.lane.b32.xlu1 %v7119_v53, %s7141_s1 }
 0x519   :  { %v2681_v7 = vpop.permute.xlu0 %2680 }
 0x51a   :  { %2930 = vst.msk [vmem:[#allocation3 + $0xdf] sm:$0x1] %vm2890_vm5, %v2681_v7  ;;  %v3068_v26 = vpop.permute.xlu1 %3067 }
 0x51b   :  { %3107 = vrot.lane.b32.xlu0 %v14169_v43, %s7141_s1  ;;  %3317 = vst.msk [vmem:[#allocation3 + $0xde] sm:$0x3] %vm3277_vm8, %v3068_v26 }
 0x51c   :  { %2425 = vrot.lane.b32.xlu1 %v14170_v6, %s7138_s19 }
 0x51d   :  { %v3066_v28 = vpop.permute.xlu0 %3065 }
 0x51e   :  { %3316 = vst.msk [vmem:[#allocation3 + $0xd6] sm:$0xff] %vm3275_vm7, %v3066_v28  ;;  %v2398_v17 = vpop.permute.xlu1 %2397 }
 0x51f   :  { %2423 = vrot.lane.b32.xlu0 %v14125_v58, %s7138_s19  ;;  %2561 = vst.msk [vmem:[#allocation3 + $0xe8] sm:$0xff] %vm2531_vm2, %v2398_v17 }
 0x520   :  { %2726 = vrot.lane.b32.xlu1 %v14170_v6, %s7139_s24 }
 0x521   :  { %v2396_v13 = vpop.permute.xlu0 %2395 }
 0x522   :  { %2560 = vst.msk [vmem:[#allocation3 + $0xe0] sm:$0xff] %vm2531_vm2, %v2396_v13  ;;  %v2685_v29 = vpop.permute.xlu1 %2684 }
 0x523   :  { %2724 = vrot.lane.b32.xlu0 %v14125_v58, %s7139_s24  ;;  %2932 = vst.msk [vmem:[#allocation3 + $0xe7] sm:$0xff] %vm2888_vm4, %v2685_v29 }
 0x524   :  { %3111 = vrot.lane.b32.xlu1 %v14125_v58, %s7141_s1 }
 0x525   :  { %v2683_v43 = vpop.permute.xlu0 %2682  ;;  %v3398_v12 = vld [vmem:[#allocation3 + $0xd0] sm:$0xff]  ;;  %v3399_v14 = vld [vmem:[#allocation3 + $0xd8] sm:$0xff] }
 0x526   :  { %2931 = vst.msk [vmem:[#allocation3 + $0xdf] sm:$0xfe] %vm2886_vm3, %v2683_v43  ;;  %6980 = vmatprep.mubr.msk.f32.mxu0 %vm3440_vm9, %v3398_v12  ;;  %v3070_v46 = vpop.permute.xlu1 %3069 }
 0x527   :  { %2728 = vrot.lane.b32.xlu0 %v7120_v61, %s7139_s24  ;;  %6981 = vmatmul.mubr.msk.f32.gmra.mrb[26].mxu0 %vm3440_vm9, %v3399_v14  ;;  %3318 = vst.msk [vmem:[#allocation3 + $0xde] sm:$0xfc] %vm3273_vm6, %v3070_v46 }
 0x528   :  { %3115 = vrot.lane.b32.xlu1 %v7120_v61, %s7141_s1 }
 0x529   :  { %v2687_v37 = vpop.permute.xlu0 %2686 }
 0x52a   :  { %2933 = vst.msk [vmem:[#allocation3 + $0xef] sm:$0x1] %vm2890_vm5, %v2687_v37  ;;  %v3074_v36 = vpop.permute.xlu1 %3073 }
 0x52b   :  { %3113 = vrot.lane.b32.xlu0 %v14170_v6, %s7141_s1  ;;  %3320 = vst.msk [vmem:[#allocation3 + $0xee] sm:$0x3] %vm3277_vm8, %v3074_v36 }
 0x52c   :  { %2429 = vrot.lane.b32.xlu1 %v14171_v52, %s7138_s19 }
 0x52d   :  { %v3072_v2 = vpop.permute.xlu0 %3071 }
 0x52e   :  { %3319 = vst.msk [vmem:[#allocation3 + $0xe6] sm:$0xff] %vm3275_vm7, %v3072_v2  ;;  %v2402_v1 = vpop.permute.xlu1 %2401 }
 0x52f   :  { %2427 = vrot.lane.b32.xlu0 %v14126_v18, %s7138_s19  ;;  %2563 = vst.msk [vmem:[#allocation3 + $0xf8] sm:$0xff] %vm2531_vm2, %v2402_v1 }
 0x530   :  { %2732 = vrot.lane.b32.xlu1 %v14171_v52, %s7139_s24 }
 0x531   :  { %v2400_v58 = vpop.permute.xlu0 %2399 }
 0x532   :  { %2562 = vst.msk [vmem:[#allocation3 + $0xf0] sm:$0xff] %vm2531_vm2, %v2400_v58  ;;  %v2691_v20 = vpop.permute.xlu1 %2690 }
 0x533   :  { %2730 = vrot.lane.b32.xlu0 %v14126_v18, %s7139_s24  ;;  %2935 = vst.msk [vmem:[#allocation3 + $0xf7] sm:$0xff] %vm2888_vm4, %v2691_v20 }
 0x534   :  { %3117 = vrot.lane.b32.xlu1 %v14126_v18, %s7141_s1 }
 0x535   :  { %v2689_v6 = vpop.permute.xlu0 %2688  ;;  %v3400_v55 = vld [vmem:[#allocation3 + $0xe0] sm:$0xff]  ;;  %v3401_v41 = vld [vmem:[#allocation3 + $0xe8] sm:$0xff] }
 0x536   :  { %2934 = vst.msk [vmem:[#allocation3 + $0xef] sm:$0xfe] %vm2886_vm3, %v2689_v6  ;;  %6983 = vmatprep.mubr.msk.f32.mxu0 %vm3440_vm9, %v3400_v55  ;;  %v3076_v27 = vpop.permute.xlu1 %3075 }
 0x537   :  { %2734 = vrot.lane.b32.xlu0 %v7121_v9, %s7139_s24  ;;  %6984 = vmatmul.mubr.msk.f32.gmra.mrb[28].mxu0 %vm3440_vm9, %v3401_v41  ;;  %3321 = vst.msk [vmem:[#allocation3 + $0xee] sm:$0xfc] %vm3273_vm6, %v3076_v27 }
 0x538   :  { %3121 = vrot.lane.b32.xlu1 %v7121_v9, %s7141_s1 }
 0x539   :  { %v2693_v42 = vpop.permute.xlu0 %2692 }
 0x53a   :  { %2936 = vst.msk [vmem:[#allocation3 + $0xff] sm:$0x1] %vm2890_vm5, %v2693_v42  ;;  %v3080_v25 = vpop.permute.xlu1 %3079  ;;  %v7124_v42 = vld [vmem:[#allocation2 + $0x2c8] sm:$0x3] }
 0x53b   :  { %3119 = vrot.lane.b32.xlu0 %v14171_v52, %s7141_s1  ;;  %3323 = vst.msk [vmem:[#allocation3 + $0xfe] sm:$0x3] %vm3277_vm8, %v3080_v25 }
 0x53c   :  { %2433 = vrot.lane.b32.xlu1 %v14172_v56, %s7138_s19 }
 0x53d   :  { %v3078_v5 = vpop.permute.xlu0 %3077 }
 0x53e   :  { %3322 = vst.msk [vmem:[#allocation3 + $0xf6] sm:$0xff] %vm3275_vm7, %v3078_v5  ;;  %v2406_v44 = vpop.permute.xlu1 %2405 }
 0x53f   :  { %2431 = vrot.lane.b32.xlu0 %v14127_v21, %s7138_s19  ;;  %2565 = vst.msk [vmem:[#allocation3 + $0x108] sm:$0xff] %vm2531_vm2, %v2406_v44 }
 0x540   :  { %2738 = vrot.lane.b32.xlu1 %v14172_v56, %s7139_s24 }
 0x541   :  { %v2404_v18 = vpop.permute.xlu0 %2403 }
 0x542   :  { %2564 = vst.msk [vmem:[#allocation3 + $0x100] sm:$0xff] %vm2531_vm2, %v2404_v18  ;;  %v2697_v4 = vpop.permute.xlu1 %2696 }
 0x543   :  { %2736 = vrot.lane.b32.xlu0 %v14127_v21, %s7139_s24  ;;  %2938 = vst.msk [vmem:[#allocation3 + $0x107] sm:$0xff] %vm2888_vm4, %v2697_v4 }
 0x544   :  { %3123 = vrot.lane.b32.xlu1 %v14127_v21, %s7141_s1 }
 0x545   :  { %v2695_v52 = vpop.permute.xlu0 %2694  ;;  %v3402_v31 = vld [vmem:[#allocation3 + $0xf0] sm:$0xff]  ;;  %v3403_v60 = vld [vmem:[#allocation3 + $0xf8] sm:$0xff] }
 0x546   :  { %2937 = vst.msk [vmem:[#allocation3 + $0xff] sm:$0xfe] %vm2886_vm3, %v2695_v52  ;;  %6986 = vmatprep.mubr.msk.f32.mxu0 %vm3440_vm9, %v3402_v31  ;;  %v3082_v48 = vpop.permute.xlu1 %3081 }
 0x547   :  { %2740 = vrot.lane.b32.xlu0 %v7122_v19, %s7139_s24  ;;  %6987 = vmatmul.mubr.msk.f32.gmra.mrb[30].mxu0 %vm3440_vm9, %v3403_v60  ;;  %3324 = vst.msk [vmem:[#allocation3 + $0xfe] sm:$0xfc] %vm3273_vm6, %v3082_v48 }
 0x548   :  { %3127 = vrot.lane.b32.xlu1 %v7122_v19, %s7141_s1 }
 0x549   :  { %v2699_v22 = vpop.permute.xlu0 %2698 }
 0x54a   :  { %2939 = vst.msk [vmem:[#allocation3 + $0x10f] sm:$0x1] %vm2890_vm5, %v2699_v22  ;;  %v3086_v0 = vpop.permute.xlu1 %3085 }
 0x54b   :  { %3125 = vrot.lane.b32.xlu0 %v14172_v56, %s7141_s1  ;;  %3326 = vst.msk [vmem:[#allocation3 + $0x10e] sm:$0x3] %vm3277_vm8, %v3086_v0 }
 0x54c   :  { %2437 = vrot.lane.b32.xlu1 %v14173_v54, %s7138_s19 }
 0x54d   :  { %v3084_v63 = vpop.permute.xlu0 %3083 }
 0x54e   :  { %3325 = vst.msk [vmem:[#allocation3 + $0x106] sm:$0xff] %vm3275_vm7, %v3084_v63  ;;  %v2410_v30 = vpop.permute.xlu1 %2409 }
 0x54f   :  { %2435 = vrot.lane.b32.xlu0 %v14128_v15, %s7138_s19  ;;  %2567 = vst.msk [vmem:[#allocation3 + $0x118] sm:$0xff] %vm2531_vm2, %v2410_v30 }
 0x550   :  { %2744 = vrot.lane.b32.xlu1 %v14173_v54, %s7139_s24 }
 0x551   :  { %v2408_v21 = vpop.permute.xlu0 %2407  ;;  %v9880_v11 = vpop.f32.mrb[0].mxu0 }
 0x552   :  { %2566 = vst.msk [vmem:[#allocation3 + $0x110] sm:$0xff] %vm2531_vm2, %v2408_v21  ;;  %v4024_v56 = vsel %vm4022_vm10, %v9880_v11, 0.0  ;;  %v4157_v8 = vmul.f32 %v9880_v11, %v9880_v11  ;;  %v9887_v32 = vpop.f32.mrb[1].mxu0  ;;  %v2703_v7 = vpop.permute.xlu1 %2702 }
 0x553   :  { %v4023_v40 = vsel %vm4022_vm10, %v9887_v32, 0.0  ;;  %v4156_v34 = vmul.f32 %v9887_v32, %v9887_v32  ;;  %2742 = vrot.lane.b32.xlu0 %v14128_v15, %s7139_s24  ;;  %2941 = vst.msk [vmem:[#allocation3 + $0x117] sm:$0xff] %vm2888_vm4, %v2703_v7 }
 0x554   :  { %v4221_v16 = vsel %vm4022_vm10, %v4157_v8, 0.0  ;;  %v4025_v45 = vadd.f32 %v4024_v56, %v4023_v40  ;;  %3129 = vrot.lane.b32.xlu1 %v14128_v15, %s7141_s1 }
 0x555   :  { %v4220_v49 = vsel %vm4022_vm10, %v4156_v34, 0.0  ;;  %v2701_v35 = vpop.permute.xlu0 %2700  ;;  %v3404_v33 = vld [vmem:[#allocation3 + $0x100] sm:$0xff]  ;;  %v3405_v23 = vld [vmem:[#allocation3 + $0x108] sm:$0xff] }
 0x556   :  { %v4222_v53 = vadd.f32 %v4221_v16, %v4220_v49  ;;  %2940 = vst.msk [vmem:[#allocation3 + $0x10f] sm:$0xfe] %vm2886_vm3, %v2701_v35  ;;  %6989 = vmatprep.mubr.msk.f32.mxu1 %vm3440_vm9, %v3404_v33  ;;  %v3088_v26 = vpop.permute.xlu1 %3087 }
 0x557   :  { %2746 = vrot.lane.b32.xlu0 %v7123_v39, %s7139_s24  ;;  %6990 = vmatmul.mubr.msk.f32.vlgmr.msra.gmra.mrb[0].mxu1 %vm3440_vm9, %v3405_v23  ;;  %3327 = vst.msk [vmem:[#allocation3 + $0x10e] sm:$0xfc] %vm3273_vm6, %v3088_v26  ;;  %v7125_v23 = vld [vmem:[#allocation2 + $0x2e0] sm:$0x3] }
 0x558   :  { %3133 = vrot.lane.b32.xlu1 %v7123_v39, %s7141_s1 }
 0x559   :  { %v2705_v28 = vpop.permute.xlu0 %2704 }
 0x55a   :  { %2942 = vst.msk [vmem:[#allocation3 + $0x11f] sm:$0x1] %vm2890_vm5, %v2705_v28  ;;  %v3092_v43 = vpop.permute.xlu1 %3091 }
 0x55b   :  { %3131 = vrot.lane.b32.xlu0 %v14173_v54, %s7141_s1  ;;  %3329 = vst.msk [vmem:[#allocation3 + $0x11e] sm:$0x3] %vm3277_vm8, %v3092_v43 }
 0x55c   :  { %2441 = vrot.lane.b32.xlu1 %v14174_v62, %s7138_s19 }
 0x55d   :  { %v3090_v13 = vpop.permute.xlu0 %3089  ;;  %v9912_v17 = vpop.f32.mrb[2].mxu0 }
 0x55e   :  { %3328 = vst.msk [vmem:[#allocation3 + $0x116] sm:$0xff] %vm3275_vm7, %v3090_v13  ;;  %v9915_v15 = vpop.f32.mrb[3].mxu0  ;;  %v4159_v29 = vmul.f32 %v9912_v17, %v9912_v17  ;;  %v4028_v61 = vsel %vm4022_vm10, %v9912_v17, 0.0  ;;  %v2414_v36 = vpop.permute.xlu1 %2413 }
 0x55f   :  { %v4026_v12 = vsel %vm4022_vm10, %v9915_v15, 0.0  ;;  %v4158_v54 = vmul.f32 %v9915_v15, %v9915_v15  ;;  %2439 = vrot.lane.b32.xlu0 %v14129_v50, %s7138_s19  ;;  %2569 = vst.msk [vmem:[#allocation3 + $0x128] sm:$0xff] %vm2531_vm2, %v2414_v36 }
 0x560   :  { %v4027_v14 = vadd.f32 %v4026_v12, %v4025_v45  ;;  %v4225_v1 = vsel %vm4022_vm10, %v4159_v29, 0.0  ;;  %2750 = vrot.lane.b32.xlu1 %v14174_v62, %s7139_s24 }
 0x561   :  { %v4223_v37 = vsel %vm4022_vm10, %v4158_v54, 0.0  ;;  %v2412_v46 = vpop.permute.xlu0 %2411 }
 0x562   :  { %v4224_v2 = vadd.f32 %v4223_v37, %v4222_v53  ;;  %2568 = vst.msk [vmem:[#allocation3 + $0x120] sm:$0xff] %vm2531_vm2, %v2412_v46  ;;  %v4029_v58 = vadd.f32 %v4028_v61, %v4027_v14  ;;  %v2709_v41 = vpop.permute.xlu1 %2708 }
 0x563   :  { %2748 = vrot.lane.b32.xlu0 %v14129_v50, %s7139_s24  ;;  %2944 = vst.msk [vmem:[#allocation3 + $0x127] sm:$0xff] %vm2888_vm4, %v2709_v41 }
 0x564   :  { %v4226_v6 = vadd.f32 %v4225_v1, %v4224_v2  ;;  %3135 = vrot.lane.b32.xlu1 %v14129_v50, %s7141_s1 }
 0x565   :  { %v2707_v20 = vpop.permute.xlu0 %2706  ;;  %v3406_v55 = vld [vmem:[#allocation3 + $0x110] sm:$0xff]  ;;  %v3407_v9 = vld [vmem:[#allocation3 + $0x118] sm:$0xff] }
 0x566   :  { %2943 = vst.msk [vmem:[#allocation3 + $0x11f] sm:$0xfe] %vm2886_vm3, %v2707_v20  ;;  %6992 = vmatprep.mubr.msk.f32.mxu1 %vm3440_vm9, %v3406_v55  ;;  %v3094_v25 = vpop.permute.xlu1 %3093 }
 0x567   :  { %2752 = vrot.lane.b32.xlu0 %v7124_v42, %s7139_s24  ;;  %6993 = vmatmul.mubr.msk.f32.gmra.mrb[2].mxu1 %vm3440_vm9, %v3407_v9  ;;  %3330 = vst.msk [vmem:[#allocation3 + $0x11e] sm:$0xfc] %vm3273_vm6, %v3094_v25 }
 0x568   :  { %3139 = vrot.lane.b32.xlu1 %v7124_v42, %s7141_s1 }
 0x569   :  { %v2711_v27 = vpop.permute.xlu0 %2710  ;;  %v9945_v5 = vpop.f32.mrb[4].mxu0 }
 0x56a   :  { %2945 = vst.msk [vmem:[#allocation3 + $0x12f] sm:$0x1] %vm2890_vm5, %v2711_v27  ;;  %v9948_v18 = vpop.f32.mrb[5].mxu0  ;;  %v4161_v44 = vmul.f32 %v9945_v5, %v9945_v5  ;;  %v4032_v31 = vsel %vm4022_vm10, %v9945_v5, 0.0  ;;  %v3098_v48 = vpop.permute.xlu1 %3097 }
 0x56b   :  { %v4030_v52 = vsel %vm4022_vm10, %v9948_v18, 0.0  ;;  %v4160_v50 = vmul.f32 %v9948_v18, %v9948_v18  ;;  %3137 = vrot.lane.b32.xlu0 %v14174_v62, %s7141_s1  ;;  %3332 = vst.msk [vmem:[#allocation3 + $0x12e] sm:$0x3] %vm3277_vm8, %v3098_v48 }
 0x56c   :  { %v4031_v4 = vadd.f32 %v4030_v52, %v4029_v58  ;;  %v4229_v0 = vsel %vm4022_vm10, %v4161_v44, 0.0  ;;  %2445 = vrot.lane.b32.xlu1 %v14176_v24, %s7138_s19  ;;  %v7126_v44 = vld [vmem:[#allocation2 + $0x2f8] sm:$0x3] }
 0x56d   :  { %v4227_v60 = vsel %vm4022_vm10, %v4160_v50, 0.0  ;;  %v3096_v19 = vpop.permute.xlu0 %3095 }
 0x56e   :  { %v4228_v22 = vadd.f32 %v4227_v60, %v4226_v6  ;;  %3331 = vst.msk [vmem:[#allocation3 + $0x126] sm:$0xff] %vm3275_vm7, %v3096_v19  ;;  %v4033_v63 = vadd.f32 %v4032_v31, %v4031_v4  ;;  %v2418_v56 = vpop.permute.xlu1 %2417 }
 0x56f   :  { %2443 = vrot.lane.b32.xlu0 %v14175_v51, %s7138_s19  ;;  %2571 = vst.msk [vmem:[#allocation3 + $0x138] sm:$0xff] %vm2531_vm2, %v2418_v56 }
 0x570   :  { %v4230_v62 = vadd.f32 %v4229_v0, %v4228_v22  ;;  %2756 = vrot.lane.b32.xlu1 %v14176_v24, %s7139_s24 }
 0x571   :  { %v2416_v21 = vpop.permute.xlu0 %2415 }
 0x572   :  { %2570 = vst.msk [vmem:[#allocation3 + $0x130] sm:$0xff] %vm2531_vm2, %v2416_v21  ;;  %v2715_v34 = vpop.permute.xlu1 %2714 }
 0x573   :  { %2754 = vrot.lane.b32.xlu0 %v14175_v51, %s7139_s24  ;;  %2947 = vst.msk [vmem:[#allocation3 + $0x137] sm:$0xff] %vm2888_vm4, %v2715_v34 }
 0x574   :  { %3141 = vrot.lane.b32.xlu1 %v14175_v51, %s7141_s1 }
 0x575   :  { %v2713_v8 = vpop.permute.xlu0 %2712  ;;  %v9976_v30 = vpop.f32.mrb[6].mxu0  ;;  %v3408_v40 = vld [vmem:[#allocation3 + $0x120] sm:$0xff]  ;;  %v3409_v45 = vld [vmem:[#allocation3 + $0x128] sm:$0xff] }
 0x576   :  { %2946 = vst.msk [vmem:[#allocation3 + $0x12f] sm:$0xfe] %vm2886_vm3, %v2713_v8  ;;  %v9979_v16 = vpop.f32.mrb[7].mxu0  ;;  %6995 = vmatprep.mubr.msk.f32.mxu1 %vm3440_vm9, %v3408_v40  ;;  %v4163_v49 = vmul.f32 %v9976_v30, %v9976_v30  ;;  %v4036_v7 = vsel %vm4022_vm10, %v9976_v30, 0.0  ;;  %v3100_v13 = vpop.permute.xlu1 %3099 }
 0x577   :  { %v4034_v35 = vsel %vm4022_vm10, %v9979_v16, 0.0  ;;  %v4162_v33 = vmul.f32 %v9979_v16, %v9979_v16  ;;  %2758 = vrot.lane.b32.xlu0 %v7125_v23, %s7139_s24  ;;  %6996 = vmatmul.mubr.msk.f32.gmra.mrb[4].mxu1 %vm3440_vm9, %v3409_v45  ;;  %3333 = vst.msk [vmem:[#allocation3 + $0x12e] sm:$0xfc] %vm3273_vm6, %v3100_v13 }
 0x578   :  { %v4035_v53 = vadd.f32 %v4034_v35, %v4033_v63  ;;  %v4233_v29 = vsel %vm4022_vm10, %v4163_v49, 0.0  ;;  %3145 = vrot.lane.b32.xlu1 %v7125_v23, %s7141_s1 }
 0x579   :  { %v4231_v39 = vsel %vm4022_vm10, %v4162_v33, 0.0  ;;  %v2717_v28 = vpop.permute.xlu0 %2716 }
 0x57a   :  { %v4232_v26 = vadd.f32 %v4231_v39, %v4230_v62  ;;  %2948 = vst.msk [vmem:[#allocation3 + $0x13f] sm:$0x1] %vm2890_vm5, %v2717_v28  ;;  %v4037_v43 = vadd.f32 %v4036_v7, %v4035_v53  ;;  %v3104_v54 = vpop.permute.xlu1 %3103  ;;  %v7127_v53 = vld [vmem:[#allocation2 + $0x310] sm:$0x3] }
 0x57b   :  { %3143 = vrot.lane.b32.xlu0 %v14176_v24, %s7141_s1  ;;  %3335 = vst.msk [vmem:[#allocation3 + $0x13e] sm:$0x3] %vm3277_vm8, %v3104_v54 }
 0x57c   :  { %v4234_v51 = vadd.f32 %v4233_v29, %v4232_v26  ;;  %2449 = vrot.lane.b32.xlu1 %v14178_v3, %s7138_s19 }
 0x57d   :  { %v3102_v12 = vpop.permute.xlu0 %3101 }
 0x57e   :  { %3334 = vst.msk [vmem:[#allocation3 + $0x136] sm:$0xff] %vm3275_vm7, %v3102_v12  ;;  %v2422_v24 = vpop.permute.xlu1 %2421 }
 0x57f   :  { %2447 = vrot.lane.b32.xlu0 %v14131_v57, %s7138_s19  ;;  %2573 = vst.msk [vmem:[#allocation3 + $0x148] sm:$0xff] %vm2531_vm2, %v2422_v24 }
 0x580   :  { %2762 = vrot.lane.b32.xlu1 %v14178_v3, %s7139_s24 }
 0x581   :  { %v2420_v14 = vpop.permute.xlu0 %2419  ;;  %v10008_v61 = vpop.f32.mrb[8].mxu0 }
 0x582   :  { %2572 = vst.msk [vmem:[#allocation3 + $0x140] sm:$0xff] %vm2531_vm2, %v2420_v14  ;;  %v10011_v37 = vpop.f32.mrb[9].mxu0  ;;  %v4165_v46 = vmul.f32 %v10008_v61, %v10008_v61  ;;  %v4040_v1 = vsel %vm4022_vm10, %v10008_v61, 0.0  ;;  %v2721_v9 = vpop.permute.xlu1 %2720 }
 0x583   :  { %v4038_v2 = vsel %vm4022_vm10, %v10011_v37, 0.0  ;;  %v4164_v36 = vmul.f32 %v10011_v37, %v10011_v37  ;;  %2760 = vrot.lane.b32.xlu0 %v14131_v57, %s7139_s24  ;;  %2950 = vst.msk [vmem:[#allocation3 + $0x147] sm:$0xff] %vm2888_vm4, %v2721_v9 }
 0x584   :  { %v4039_v58 = vadd.f32 %v4038_v2, %v4037_v43  ;;  %v4237_v25 = vsel %vm4022_vm10, %v4165_v46, 0.0  ;;  %3147 = vrot.lane.b32.xlu1 %v14131_v57, %s7141_s1 }
 0x585   :  { %v4235_v6 = vsel %vm4022_vm10, %v4164_v36, 0.0  ;;  %v2719_v20 = vpop.permute.xlu0 %2718  ;;  %v3410_v55 = vld [vmem:[#allocation3 + $0x130] sm:$0xff]  ;;  %v3411_v42 = vld [vmem:[#allocation3 + $0x138] sm:$0xff] }
 0x586   :  { %v4236_v41 = vadd.f32 %v4235_v6, %v4234_v51  ;;  %2949 = vst.msk [vmem:[#allocation3 + $0x13f] sm:$0xfe] %vm2886_vm3, %v2719_v20  ;;  %6998 = vmatprep.mubr.msk.f32.mxu1 %vm3440_vm9, %v3410_v55  ;;  %v4041_v27 = vadd.f32 %v4040_v1, %v4039_v58  ;;  %v3106_v4 = vpop.permute.xlu1 %3105 }
 0x587   :  { %2764 = vrot.lane.b32.xlu0 %v7126_v44, %s7139_s24  ;;  %6999 = vmatmul.mubr.msk.f32.gmra.mrb[6].mxu1 %vm3440_vm9, %v3411_v42  ;;  %3336 = vst.msk [vmem:[#allocation3 + $0x13e] sm:$0xfc] %vm3273_vm6, %v3106_v4 }
 0x588   :  { %v4238_v52 = vadd.f32 %v4237_v25, %v4236_v41  ;;  %3151 = vrot.lane.b32.xlu1 %v7126_v44, %s7141_s1  ;;  %v7128_v44 = vld [vmem:[#allocation2 + $0x328] sm:$0x3] }
 0x589   :  { %v2723_v50 = vpop.permute.xlu0 %2722 }
 0x58a   :  { %2951 = vst.msk [vmem:[#allocation3 + $0x14f] sm:$0x1] %vm2890_vm5, %v2723_v50  ;;  %v3110_v57 = vpop.permute.xlu1 %3109 }
 0x58b   :  { %3149 = vrot.lane.b32.xlu0 %v14178_v3, %s7141_s1  ;;  %3338 = vst.msk [vmem:[#allocation3 + $0x14e] sm:$0x3] %vm3277_vm8, %v3110_v57 }
 0x58c   :  { %2453 = vrot.lane.b32.xlu1 %v14179_v10, %s7138_s19 }
 0x58d   :  { %v3108_v31 = vpop.permute.xlu0 %3107  ;;  %v10040_v60 = vpop.f32.mrb[10].mxu0 }
 0x58e   :  { %3337 = vst.msk [vmem:[#allocation3 + $0x146] sm:$0xff] %vm3275_vm7, %v3108_v31  ;;  %v10043_v19 = vpop.f32.mrb[11].mxu0  ;;  %v4167_v22 = vmul.f32 %v10040_v60, %v10040_v60  ;;  %v4044_v0 = vsel %vm4022_vm10, %v10040_v60, 0.0  ;;  %v2426_v8 = vpop.permute.xlu1 %2425 }
 0x58f   :  { %v4042_v48 = vsel %vm4022_vm10, %v10043_v19, 0.0  ;;  %v4166_v3 = vmul.f32 %v10043_v19, %v10043_v19  ;;  %2451 = vrot.lane.b32.xlu0 %v14146_v38, %s7138_s19  ;;  %2575 = vst.msk [vmem:[#allocation3 + $0x158] sm:$0xff] %vm2531_vm2, %v2426_v8 }
 0x590   :  { %v4043_v63 = vadd.f32 %v4042_v48, %v4041_v27  ;;  %v4241_v34 = vsel %vm4022_vm10, %v4167_v22, 0.0  ;;  %2768 = vrot.lane.b32.xlu1 %v14179_v10, %s7139_s24 }
 0x591   :  { %v4239_v62 = vsel %vm4022_vm10, %v4166_v3, 0.0  ;;  %v2424_v21 = vpop.permute.xlu0 %2423 }
 0x592   :  { %v4240_v56 = vadd.f32 %v4239_v62, %v4238_v52  ;;  %2574 = vst.msk [vmem:[#allocation3 + $0x150] sm:$0xff] %vm2531_vm2, %v2424_v21  ;;  %v4045_v40 = vadd.f32 %v4044_v0, %v4043_v63  ;;  %v2727_v33 = vpop.permute.xlu1 %2726  ;;  %v7129_v62 = vld [vmem:[#allocation2 + $0x330] sm:$0xff]  ;;  %v7130_v21 = vld [vmem:[#allocation2 + $0x338] sm:$0xff] }
 0x593   :  { %2766 = vrot.lane.b32.xlu0 %v14146_v38, %s7139_s24  ;;  %2953 = vst.msk [vmem:[#allocation3 + $0x157] sm:$0xff] %vm2888_vm4, %v2727_v33 }
 0x594   :  { %v4242_v45 = vadd.f32 %v4241_v34, %v4240_v56  ;;  %3153 = vrot.lane.b32.xlu1 %v14146_v38, %s7141_s1 }
 0x595   :  { %v2725_v49 = vpop.permute.xlu0 %2724  ;;  %v3412_v35 = vld [vmem:[#allocation3 + $0x140] sm:$0xff]  ;;  %v3413_v23 = vld [vmem:[#allocation3 + $0x148] sm:$0xff] }
 0x596   :  { %2952 = vst.msk [vmem:[#allocation3 + $0x14f] sm:$0xfe] %vm2886_vm3, %v2725_v49  ;;  %7001 = vmatprep.mubr.msk.f32.mxu1 %vm3440_vm9, %v3412_v35  ;;  %v3112_v28 = vpop.permute.xlu1 %3111 }
 0x597   :  { %2770 = vrot.lane.b32.xlu0 %v7127_v53, %s7139_s24  ;;  %7002 = vmatmul.mubr.msk.f32.gmra.mrb[8].mxu1 %vm3440_vm9, %v3413_v23  ;;  %3339 = vst.msk [vmem:[#allocation3 + $0x14e] sm:$0xfc] %vm3273_vm6, %v3112_v28 }
 0x598   :  { %3157 = vrot.lane.b32.xlu1 %v7127_v53, %s7141_s1 }
 0x599   :  { %v2729_v7 = vpop.permute.xlu0 %2728  ;;  %v10073_v39 = vpop.f32.mrb[12].mxu0 }
 0x59a   :  { %2954 = vst.msk [vmem:[#allocation3 + $0x15f] sm:$0x1] %vm2890_vm5, %v2729_v7  ;;  %v10076_v26 = vpop.f32.mrb[13].mxu0  ;;  %v4169_v13 = vmul.f32 %v10073_v39, %v10073_v39  ;;  %v4048_v51 = vsel %vm4022_vm10, %v10073_v39, 0.0  ;;  %v3116_v24 = vpop.permute.xlu1 %3115 }
 0x59b   :  { %v4046_v43 = vsel %vm4022_vm10, %v10076_v26, 0.0  ;;  %v4168_v38 = vmul.f32 %v10076_v26, %v10076_v26  ;;  %3155 = vrot.lane.b32.xlu0 %v14179_v10, %s7141_s1  ;;  %3341 = vst.msk [vmem:[#allocation3 + $0x15e] sm:$0x3] %vm3277_vm8, %v3116_v24  ;;  %v361_v24 = vld [vmem:[#allocation2 + $0x348] sm:$0xff] }
 0x59c   :  { %v4047_v29 = vadd.f32 %v4046_v43, %v4045_v40  ;;  %v4245_v2 = vsel %vm4022_vm10, %v4169_v13, 0.0  ;;  %2457 = vrot.lane.b32.xlu1 %v14181_v47, %s7138_s19 }
 0x59d   :  { %v4243_v12 = vsel %vm4022_vm10, %v4168_v38, 0.0  ;;  %v3114_v54 = vpop.permute.xlu0 %3113 }
 0x59e   :  { %v4244_v14 = vadd.f32 %v4243_v12, %v4242_v45  ;;  %3340 = vst.msk [vmem:[#allocation3 + $0x156] sm:$0xff] %vm3275_vm7, %v3114_v54  ;;  %v4049_v46 = vadd.f32 %v4048_v51, %v4047_v29  ;;  %v2430_v58 = vpop.permute.xlu1 %2429  ;;  %v7131_v51 = vld [vmem:[#allocation2 + $0x340] sm:$0x3] }
 0x59f   :  { %2455 = vrot.lane.b32.xlu0 %v14180_v59, %s7138_s19  ;;  %2577 = vst.msk [vmem:[#allocation3 + $0x168] sm:$0xff] %vm2531_vm2, %v2430_v58 }
 0x5a0   :  { %v4246_v10 = vadd.f32 %v4245_v2, %v4244_v14  ;;  %2774 = vrot.lane.b32.xlu1 %v14181_v47, %s7139_s24 }
 0x5a1   :  { %v2428_v36 = vpop.permute.xlu0 %2427 }
 0x5a2   :  { %2576 = vst.msk [vmem:[#allocation3 + $0x160] sm:$0xff] %vm2531_vm2, %v2428_v36  ;;  %v2733_v55 = vpop.permute.xlu1 %2732 }
 0x5a3   :  { %2772 = vrot.lane.b32.xlu0 %v14180_v59, %s7139_s24  ;;  %2956 = vst.msk [vmem:[#allocation3 + $0x167] sm:$0xff] %vm2888_vm4, %v2733_v55 }
 0x5a4   :  { %3159 = vrot.lane.b32.xlu1 %v14180_v59, %s7141_s1 }
 0x5a5   :  { %v2731_v1 = vpop.permute.xlu0 %2730  ;;  %v10104_v6 = vpop.f32.mrb[14].mxu0  ;;  %v3414_v20 = vld [vmem:[#allocation3 + $0x150] sm:$0xff]  ;;  %v3415_v9 = vld [vmem:[#allocation3 + $0x158] sm:$0xff] }
 0x5a6   :  { %2955 = vst.msk [vmem:[#allocation3 + $0x15f] sm:$0xfe] %vm2886_vm3, %v2731_v1  ;;  %v10107_v41 = vpop.f32.mrb[15].mxu0  ;;  %7004 = vmatprep.mubr.msk.f32.mxu1 %vm3440_vm9, %v3414_v20  ;;  %v4171_v42 = vmul.f32 %v10104_v6, %v10104_v6  ;;  %v4052_v50 = vsel %vm4022_vm10, %v10104_v6, 0.0  ;;  %v3118_v22 = vpop.permute.xlu1 %3117 }
 0x5a7   :  { %v4050_v27 = vsel %vm4022_vm10, %v10107_v41, 0.0  ;;  %v4170_v25 = vmul.f32 %v10107_v41, %v10107_v41  ;;  %2776 = vrot.lane.b32.xlu0 %v7128_v44, %s7139_s24  ;;  %7005 = vmatmul.mubr.msk.f32.gmra.mrb[10].mxu1 %vm3440_vm9, %v3415_v9  ;;  %3342 = vst.msk [vmem:[#allocation3 + $0x15e] sm:$0xfc] %vm3273_vm6, %v3118_v22 }
 0x5a8   :  { %v4051_v52 = vadd.f32 %v4050_v27, %v4049_v46  ;;  %v4249_v3 = vsel %vm4022_vm10, %v4171_v42, 0.0  ;;  %3163 = vrot.lane.b32.xlu1 %v7128_v44, %s7141_s1  ;;  %v362_v46 = vld [vmem:[#allocation2 + $0x350] sm:$0xff] }
 0x5a9   :  { %v4247_v4 = vsel %vm4022_vm10, %v4170_v25, 0.0  ;;  %v2735_v31 = vpop.permute.xlu0 %2734 }
 0x5aa   :  { %v4248_v57 = vadd.f32 %v4247_v4, %v4246_v10  ;;  %2957 = vst.msk [vmem:[#allocation3 + $0x16f] sm:$0x1] %vm2890_vm5, %v2735_v31  ;;  %v4053_v48 = vadd.f32 %v4052_v50, %v4051_v52  ;;  %v3122_v0 = vpop.permute.xlu1 %3121  ;;  %v363_v31 = vld [vmem:[#allocation2 + $0x358] sm:$0x3] }
 0x5ab   :  { %3161 = vrot.lane.b32.xlu0 %v14181_v47, %s7141_s1  ;;  %3344 = vst.msk [vmem:[#allocation3 + $0x16e] sm:$0x3] %vm3277_vm8, %v3122_v0 }
 0x5ac   :  { %v4250_v59 = vadd.f32 %v4249_v3, %v4248_v57  ;;  %2461 = vrot.lane.b32.xlu1 %v7130_v21, %s7138_s19 }
 0x5ad   :  { %v3120_v63 = vpop.permute.xlu0 %3119 }
 0x5ae   :  { %3343 = vst.msk [vmem:[#allocation3 + $0x166] sm:$0xff] %vm3275_vm7, %v3120_v63  ;;  %v2434_v47 = vpop.permute.xlu1 %2433 }
 0x5af   :  { %2459 = vrot.lane.b32.xlu0 %v7129_v62, %s7138_s19  ;;  %2579 = vst.msk [vmem:[#allocation3 + $0x178] sm:$0xff] %vm2531_vm2, %v2434_v47 }
 0x5b0   :  { %2780 = vrot.lane.b32.xlu1 %v7130_v21, %s7139_s24 }
 0x5b1   :  { %v2432_v56 = vpop.permute.xlu0 %2431  ;;  %v10134_v8 = vpop.f32.mrb[16].mxu0 }
 0x5b2   :  { %2578 = vst.msk [vmem:[#allocation3 + $0x170] sm:$0xff] %vm2531_vm2, %v2432_v56  ;;  %v10137_v40 = vpop.f32.mrb[17].mxu0  ;;  %v4173_v34 = vmul.f32 %v10134_v8, %v10134_v8  ;;  %v4056_v33 = vsel %vm4022_vm10, %v10134_v8, 0.0  ;;  %v2739_v13 = vpop.permute.xlu1 %2738 }
 0x5b3   :  { %v4054_v45 = vsel %vm4022_vm10, %v10137_v40, 0.0  ;;  %v4172_v49 = vmul.f32 %v10137_v40, %v10137_v40  ;;  %2778 = vrot.lane.b32.xlu0 %v7129_v62, %s7139_s24  ;;  %2959 = vst.msk [vmem:[#allocation3 + $0x177] sm:$0xff] %vm2888_vm4, %v2739_v13 }
 0x5b4   :  { %v4055_v35 = vadd.f32 %v4054_v45, %v4053_v48  ;;  %v4253_v29 = vsel %vm4022_vm10, %v4173_v34, 0.0  ;;  %3165 = vrot.lane.b32.xlu1 %v7129_v62, %s7141_s1 }
 0x5b5   :  { %v4251_v23 = vsel %vm4022_vm10, %v4172_v49, 0.0  ;;  %v2737_v53 = vpop.permute.xlu0 %2736  ;;  %v3416_v7 = vld [vmem:[#allocation3 + $0x160] sm:$0xff]  ;;  %v3417_v43 = vld [vmem:[#allocation3 + $0x168] sm:$0xff] }
 0x5b6   :  { %v4252_v28 = vadd.f32 %v4251_v23, %v4250_v59  ;;  %2958 = vst.msk [vmem:[#allocation3 + $0x16f] sm:$0xfe] %vm2886_vm3, %v2737_v53  ;;  %7007 = vmatprep.mubr.msk.f32.mxu1 %vm3440_vm9, %v3416_v7  ;;  %v4057_v38 = vadd.f32 %v4056_v33, %v4055_v35  ;;  %v3124_v14 = vpop.permute.xlu1 %3123 }
 0x5b7   :  { %2782 = vrot.lane.b32.xlu0 %v7131_v51, %s7139_s24  ;;  %7008 = vmatmul.mubr.msk.f32.gmra.mrb[12].mxu1 %vm3440_vm9, %v3417_v43  ;;  %3345 = vst.msk [vmem:[#allocation3 + $0x16e] sm:$0xfc] %vm3273_vm6, %v3124_v14 }
 0x5b8   :  { %v4254_v12 = vadd.f32 %v4253_v29, %v4252_v28  ;;  %3169 = vrot.lane.b32.xlu1 %v7131_v51, %s7141_s1 }
 0x5b9   :  { %v2741_v54 = vpop.permute.xlu0 %2740 }
 0x5ba   :  { %2960 = vst.msk [vmem:[#allocation3 + $0x17f] sm:$0x1] %vm2890_vm5, %v2741_v54  ;;  %v3128_v36 = vpop.permute.xlu1 %3127 }
 0x5bb   :  { %3167 = vrot.lane.b32.xlu0 %v7130_v21, %s7141_s1  ;;  %3347 = vst.msk [vmem:[#allocation3 + $0x17e] sm:$0x3] %vm3277_vm8, %v3128_v36 }
 0x5bc   :  { %2465 = vrot.lane.b32.xlu1 %v362_v46, %s7138_s19 }
 0x5bd   :  { %v3126_v2 = vpop.permute.xlu0 %3125  ;;  %v10162_v10 = vpop.f32.mrb[18].mxu0 }
 0x5be   :  { %3346 = vst.msk [vmem:[#allocation3 + $0x176] sm:$0xff] %vm3275_vm7, %v3126_v2  ;;  %v10165_v58 = vpop.f32.mrb[19].mxu0  ;;  %v4175_v1 = vmul.f32 %v10162_v10, %v10162_v10  ;;  %v4060_v42 = vsel %vm4022_vm10, %v10162_v10, 0.0  ;;  %v2438_v52 = vpop.permute.xlu1 %2437 }
 0x5bf   :  { %v4058_v20 = vsel %vm4022_vm10, %v10165_v58, 0.0  ;;  %v4174_v55 = vmul.f32 %v10165_v58, %v10165_v58  ;;  %2463 = vrot.lane.b32.xlu0 %v361_v24, %s7138_s19  ;;  %2581 = vst.msk [vmem:[#allocation3 + $0x188] sm:$0xff] %vm2531_vm2, %v2438_v52 }
 0x5c0   :  { %v4059_v9 = vadd.f32 %v4058_v20, %v4057_v38  ;;  %v4257_v4 = vsel %vm4022_vm10, %v4175_v1, 0.0  ;;  %2786 = vrot.lane.b32.xlu1 %v362_v46, %s7139_s24 }
 0x5c1   :  { %v4255_v27 = vsel %vm4022_vm10, %v4174_v55, 0.0  ;;  %v2436_v25 = vpop.permute.xlu0 %2435 }
 0x5c2   :  { %v4256_v44 = vadd.f32 %v4255_v27, %v4254_v12  ;;  %2580 = vst.msk [vmem:[#allocation3 + $0x180] sm:$0xff] %vm2531_vm2, %v2436_v25  ;;  %v4061_v50 = vadd.f32 %v4060_v42, %v4059_v9  ;;  %v2745_v3 = vpop.permute.xlu1 %2744 }
 0x5c3   :  { %2784 = vrot.lane.b32.xlu0 %v361_v24, %s7139_s24  ;;  %2962 = vst.msk [vmem:[#allocation3 + $0x187] sm:$0xff] %vm2888_vm4, %v2745_v3 }
 0x5c4   :  { %v4258_v57 = vadd.f32 %v4257_v4, %v4256_v44  ;;  %3171 = vrot.lane.b32.xlu1 %v361_v24, %s7141_s1 }
 0x5c5   :  { %v2743_v22 = vpop.permute.xlu0 %2742  ;;  %v3418_v48 = vld [vmem:[#allocation3 + $0x170] sm:$0xff]  ;;  %v3419_v59 = vld [vmem:[#allocation3 + $0x178] sm:$0xff] }
 0x5c6   :  { %2961 = vst.msk [vmem:[#allocation3 + $0x17f] sm:$0xfe] %vm2886_vm3, %v2743_v22  ;;  %7010 = vmatprep.mubr.msk.f32.mxu1 %vm3440_vm9, %v3418_v48  ;;  %v3130_v0 = vpop.permute.xlu1 %3129 }
 0x5c7   :  { %2788 = vrot.lane.b32.xlu0 %v363_v31, %s7139_s24  ;;  %7011 = vmatmul.mubr.msk.f32.gmra.mrb[14].mxu1 %vm3440_vm9, %v3419_v59  ;;  %3348 = vst.msk [vmem:[#allocation3 + $0x17e] sm:$0xfc] %vm3273_vm6, %v3130_v0 }
 0x5c8   :  { %3175 = vrot.lane.b32.xlu1 %v363_v31, %s7141_s1 }
 0x5c9   :  { %v2747_v63 = vpop.permute.xlu0 %2746 }
 0x5ca   :  { %2963 = vst.msk [vmem:[#allocation3 + $0x18f] sm:$0x1] %vm2890_vm5, %v2747_v63  ;;  %v10192_v62 = vpop.f32.mrb[20].mxu0  ;;  %v3134_v35 = vpop.permute.xlu1 %3133 }
 0x5cb   :  { %3173 = vrot.lane.b32.xlu0 %v362_v46, %s7141_s1  ;;  %v10196_v21 = vpop.f32.mrb[21].mxu0  ;;  %v4177_v56 = vmul.f32 %v10192_v62, %v10192_v62  ;;  %v4064_v33 = vsel %vm4022_vm10, %v10192_v62, 0.0  ;;  %3350 = vst.msk [vmem:[#allocation3 + $0x18e] sm:$0x3] %vm3277_vm8, %v3134_v35 }
 0x5cc   :  { %v4062_v47 = vsel %vm4022_vm10, %v10196_v21, 0.0  ;;  %v4176_v34 = vmul.f32 %v10196_v21, %v10196_v21 }
 0x5cd   :  { %v3132_v45 = vpop.permute.xlu0 %3131  ;;  %v4063_v49 = vadd.f32 %v4062_v47, %v4061_v50  ;;  %v4261_v28 = vsel %vm4022_vm10, %v4177_v56, 0.0 }
 0x5ce   :  { %3349 = vst.msk [vmem:[#allocation3 + $0x186] sm:$0xff] %vm3275_vm7, %v3132_v45  ;;  %v4259_v23 = vsel %vm4022_vm10, %v4176_v34, 0.0  ;;  %v2442_v43 = vpop.permute.xlu1 %2441 }
 0x5cf   :  { %v4260_v53 = vadd.f32 %v4259_v23, %v4258_v57  ;;  %v4065_v7 = vadd.f32 %v4064_v33, %v4063_v49  ;;  %2583 = vst.msk [vmem:[#allocation3 + $0x198] sm:$0xff] %vm2531_vm2, %v2442_v43 }
 0x5d1   :  { %v2440_v13 = vpop.permute.xlu0 %2439  ;;  %v4262_v38 = vadd.f32 %v4261_v28, %v4260_v53 }
 0x5d2   :  { %2582 = vst.msk [vmem:[#allocation3 + $0x190] sm:$0xff] %vm2531_vm2, %v2440_v13  ;;  %v2751_v12 = vpop.permute.xlu1 %2750 }
 0x5d3   :  { %2965 = vst.msk [vmem:[#allocation3 + $0x197] sm:$0xff] %vm2888_vm4, %v2751_v12 }
 0x5d5   :  { %v2749_v29 = vpop.permute.xlu0 %2748  ;;  %v3420_v51 = vld [vmem:[#allocation3 + $0x180] sm:$0xff]  ;;  %v3421_v54 = vld [vmem:[#allocation3 + $0x188] sm:$0xff] }
 0x5d6   :  { %2964 = vst.msk [vmem:[#allocation3 + $0x18f] sm:$0xfe] %vm2886_vm3, %v2749_v29  ;;  %7013 = vmatprep.mubr.msk.f32.mxu1 %vm3440_vm9, %v3420_v51  ;;  %v3136_v24 = vpop.permute.xlu1 %3135 }
 0x5d7   :  { %7014 = vmatmul.mubr.msk.f32.gmra.mrb[16].mxu1 %vm3440_vm9, %v3421_v54  ;;  %3351 = vst.msk [vmem:[#allocation3 + $0x18e] sm:$0xfc] %vm3273_vm6, %v3136_v24 }
 0x5d9   :  { %v2753_v14 = vpop.permute.xlu0 %2752 }
 0x5da   :  { %2966 = vst.msk [vmem:[#allocation3 + $0x19f] sm:$0x1] %vm2890_vm5, %v2753_v14  ;;  %v10218_v46 = vpop.f32.mrb[22].mxu0  ;;  %v3140_v42 = vpop.permute.xlu1 %3139 }
 0x5db   :  { %v10220_v2 = vpop.f32.mrb[23].mxu0  ;;  %v4179_v36 = vmul.f32 %v10218_v46, %v10218_v46  ;;  %v4068_v27 = vsel %vm4022_vm10, %v10218_v46, 0.0  ;;  %3353 = vst.msk [vmem:[#allocation3 + $0x19e] sm:$0x3] %vm3277_vm8, %v3140_v42 }
 0x5dc   :  { %v4066_v1 = vsel %vm4022_vm10, %v10220_v2, 0.0  ;;  %v4178_v20 = vmul.f32 %v10220_v2, %v10220_v2 }
 0x5dd   :  { %v3138_v55 = vpop.permute.xlu0 %3137  ;;  %v4067_v9 = vadd.f32 %v4066_v1, %v4065_v7  ;;  %v4265_v50 = vsel %vm4022_vm10, %v4179_v36, 0.0 }
 0x5de   :  { %3352 = vst.msk [vmem:[#allocation3 + $0x196] sm:$0xff] %vm3275_vm7, %v3138_v55  ;;  %v4263_v25 = vsel %vm4022_vm10, %v4178_v20, 0.0  ;;  %v2446_v31 = vpop.permute.xlu1 %2445 }
 0x5df   :  { %v4264_v44 = vadd.f32 %v4263_v25, %v4262_v38  ;;  %v4069_v52 = vadd.f32 %v4068_v27, %v4067_v9  ;;  %2585 = vst.msk [vmem:[#allocation3 + $0x1a8] sm:$0xff] %vm2531_vm2, %v2446_v31 }
 0x5e1   :  { %v2444_v4 = vpop.permute.xlu0 %2443  ;;  %v4266_v57 = vadd.f32 %v4265_v50, %v4264_v44 }
 0x5e2   :  { %2584 = vst.msk [vmem:[#allocation3 + $0x1a0] sm:$0xff] %vm2531_vm2, %v2444_v4  ;;  %v2757_v3 = vpop.permute.xlu1 %2756 }
 0x5e3   :  { %2968 = vst.msk [vmem:[#allocation3 + $0x1a7] sm:$0xff] %vm2888_vm4, %v2757_v3 }
 0x5e5   :  { %v2755_v22 = vpop.permute.xlu0 %2754  ;;  %v3422_v48 = vld [vmem:[#allocation3 + $0x190] sm:$0xff]  ;;  %v3423_v59 = vld [vmem:[#allocation3 + $0x198] sm:$0xff] }
 0x5e6   :  { %2967 = vst.msk [vmem:[#allocation3 + $0x19f] sm:$0xfe] %vm2886_vm3, %v2755_v22  ;;  %7016 = vmatprep.mubr.msk.f32.mxu1 %vm3440_vm9, %v3422_v48  ;;  %v3142_v0 = vpop.permute.xlu1 %3141 }
 0x5e7   :  { %7017 = vmatmul.mubr.msk.f32.gmra.mrb[18].mxu1 %vm3440_vm9, %v3423_v59  ;;  %3354 = vst.msk [vmem:[#allocation3 + $0x19e] sm:$0xfc] %vm3273_vm6, %v3142_v0 }
 0x5e9   :  { %v2759_v63 = vpop.permute.xlu0 %2758 }
 0x5ea   :  { %2969 = vst.msk [vmem:[#allocation3 + $0x1af] sm:$0x1] %vm2890_vm5, %v2759_v63  ;;  %v10242_v56 = vpop.f32.mrb[24].mxu0  ;;  %v3146_v23 = vpop.permute.xlu1 %3145 }
 0x5eb   :  { %v10244_v47 = vpop.f32.mrb[25].mxu0  ;;  %v4181_v34 = vmul.f32 %v10242_v56, %v10242_v56  ;;  %v4072_v53 = vsel %vm4022_vm10, %v10242_v56, 0.0  ;;  %3356 = vst.msk [vmem:[#allocation3 + $0x1ae] sm:$0x3] %vm3277_vm8, %v3146_v23 }
 0x5ec   :  { %v4070_v45 = vsel %vm4022_vm10, %v10244_v47, 0.0  ;;  %v4180_v49 = vmul.f32 %v10244_v47, %v10244_v47 }
 0x5ed   :  { %v3144_v35 = vpop.permute.xlu0 %3143  ;;  %v4071_v33 = vadd.f32 %v4070_v45, %v4069_v52  ;;  %v4269_v43 = vsel %vm4022_vm10, %v4181_v34, 0.0 }
 0x5ee   :  { %3355 = vst.msk [vmem:[#allocation3 + $0x1a6] sm:$0xff] %vm3275_vm7, %v3144_v35  ;;  %v4267_v7 = vsel %vm4022_vm10, %v4180_v49, 0.0  ;;  %v2450_v29 = vpop.permute.xlu1 %2449 }
 0x5ef   :  { %v4268_v28 = vadd.f32 %v4267_v7, %v4266_v57  ;;  %v4073_v13 = vadd.f32 %v4072_v53, %v4071_v33  ;;  %2587 = vst.msk [vmem:[#allocation3 + $0x1b8] sm:$0xff] %vm2531_vm2, %v2450_v29 }
 0x5f1   :  { %v2448_v38 = vpop.permute.xlu0 %2447  ;;  %v4270_v51 = vadd.f32 %v4269_v43, %v4268_v28 }
 0x5f2   :  { %2586 = vst.msk [vmem:[#allocation3 + $0x1b0] sm:$0xff] %vm2531_vm2, %v2448_v38  ;;  %v2763_v14 = vpop.permute.xlu1 %2762 }
 0x5f3   :  { %2971 = vst.msk [vmem:[#allocation3 + $0x1b7] sm:$0xff] %vm2888_vm4, %v2763_v14 }
 0x5f5   :  { %v2761_v12 = vpop.permute.xlu0 %2760  ;;  %v3424_v54 = vld [vmem:[#allocation3 + $0x1a0] sm:$0xff]  ;;  %v3425_v24 = vld [vmem:[#allocation3 + $0x1a8] sm:$0xff] }
 0x5f6   :  { %2970 = vst.msk [vmem:[#allocation3 + $0x1af] sm:$0xfe] %vm2886_vm3, %v2761_v12  ;;  %7019 = vmatprep.mubr.msk.f32.mxu1 %vm3440_vm9, %v3424_v54  ;;  %v3148_v1 = vpop.permute.xlu1 %3147 }
 0x5f7   :  { %7020 = vmatmul.mubr.msk.f32.gmra.mrb[20].mxu1 %vm3440_vm9, %v3425_v24  ;;  %3357 = vst.msk [vmem:[#allocation3 + $0x1ae] sm:$0xfc] %vm3273_vm6, %v3148_v1 }
 0x5f9   :  { %v2765_v36 = vpop.permute.xlu0 %2764 }
 0x5fa   :  { %2972 = vst.msk [vmem:[#allocation3 + $0x1bf] sm:$0x1] %vm2890_vm5, %v2765_v36  ;;  %v10266_v20 = vpop.f32.mrb[26].mxu0  ;;  %v3152_v52 = vpop.permute.xlu1 %3151 }
 0x5fb   :  { %v10268_v55 = vpop.f32.mrb[27].mxu0  ;;  %v4183_v9 = vmul.f32 %v10266_v20, %v10266_v20  ;;  %v4076_v50 = vsel %vm4022_vm10, %v10266_v20, 0.0  ;;  %3359 = vst.msk [vmem:[#allocation3 + $0x1be] sm:$0x3] %vm3277_vm8, %v3152_v52 }
 0x5fc   :  { %v4074_v42 = vsel %vm4022_vm10, %v10268_v55, 0.0  ;;  %v4182_v27 = vmul.f32 %v10268_v55, %v10268_v55 }
 0x5fd   :  { %v3150_v25 = vpop.permute.xlu0 %3149  ;;  %v4075_v44 = vadd.f32 %v4074_v42, %v4073_v13  ;;  %v4273_v22 = vsel %vm4022_vm10, %v4183_v9, 0.0 }
 0x5fe   :  { %3358 = vst.msk [vmem:[#allocation3 + $0x1b6] sm:$0xff] %vm3275_vm7, %v3150_v25  ;;  %v4271_v4 = vsel %vm4022_vm10, %v4182_v27, 0.0  ;;  %v2454_v3 = vpop.permute.xlu1 %2453 }
 0x5ff   :  { %v4272_v31 = vadd.f32 %v4271_v4, %v4270_v51  ;;  %v4077_v57 = vadd.f32 %v4076_v50, %v4075_v44  ;;  %2589 = vst.msk [vmem:[#allocation3 + $0x1c8] sm:$0xff] %vm2531_vm2, %v2454_v3 }
 0x601   :  { %v2452_v48 = vpop.permute.xlu0 %2451  ;;  %v4274_v59 = vadd.f32 %v4273_v22, %v4272_v31 }
 0x602   :  { %2588 = vst.msk [vmem:[#allocation3 + $0x1c0] sm:$0xff] %vm2531_vm2, %v2452_v48  ;;  %v2769_v34 = vpop.permute.xlu1 %2768 }
 0x603   :  { %2974 = vst.msk [vmem:[#allocation3 + $0x1c7] sm:$0xff] %vm2888_vm4, %v2769_v34 }
 0x605   :  { %v2767_v63 = vpop.permute.xlu0 %2766  ;;  %v3426_v0 = vld [vmem:[#allocation3 + $0x1b0] sm:$0xff]  ;;  %v3427_v45 = vld [vmem:[#allocation3 + $0x1b8] sm:$0xff] }
 0x606   :  { %2973 = vst.msk [vmem:[#allocation3 + $0x1bf] sm:$0xfe] %vm2886_vm3, %v2767_v63  ;;  %7022 = vmatprep.mubr.msk.f32.mxu1 %vm3440_vm9, %v3426_v0  ;;  %v3154_v35 = vpop.permute.xlu1 %3153 }
 0x607   :  { %7023 = vmatmul.mubr.msk.f32.gmra.mrb[22].mxu1 %vm3440_vm9, %v3427_v45  ;;  %3360 = vst.msk [vmem:[#allocation3 + $0x1be] sm:$0xfc] %vm3273_vm6, %v3154_v35 }
 0x609   :  { %v2771_v49 = vpop.permute.xlu0 %2770 }
 0x60a   :  { %2975 = vst.msk [vmem:[#allocation3 + $0x1cf] sm:$0x1] %vm2890_vm5, %v2771_v49  ;;  %v10290_v33 = vpop.f32.mrb[28].mxu0  ;;  %v3158_v38 = vpop.permute.xlu1 %3157 }
 0x60b   :  { %v10292_v23 = vpop.f32.mrb[29].mxu0  ;;  %v4185_v53 = vmul.f32 %v10290_v33, %v10290_v33  ;;  %v4080_v29 = vsel %vm4022_vm10, %v10290_v33, 0.0  ;;  %3362 = vst.msk [vmem:[#allocation3 + $0x1ce] sm:$0x3] %vm3277_vm8, %v3158_v38 }
 0x60c   :  { %v4078_v7 = vsel %vm4022_vm10, %v10292_v23, 0.0  ;;  %v4184_v28 = vmul.f32 %v10292_v23, %v10292_v23 }
 0x60d   :  { %v3156_v13 = vpop.permute.xlu0 %3155  ;;  %v4079_v43 = vadd.f32 %v4078_v7, %v4077_v57  ;;  %v4277_v14 = vsel %vm4022_vm10, %v4185_v53, 0.0 }
 0x60e   :  { %3361 = vst.msk [vmem:[#allocation3 + $0x1c6] sm:$0xff] %vm3275_vm7, %v3156_v13  ;;  %v4275_v51 = vsel %vm4022_vm10, %v4184_v28, 0.0  ;;  %v2458_v36 = vpop.permute.xlu1 %2457 }
 0x60f   :  { %v4276_v12 = vadd.f32 %v4275_v51, %v4274_v59  ;;  %v4081_v54 = vadd.f32 %v4080_v29, %v4079_v43  ;;  %2591 = vst.msk [vmem:[#allocation3 + $0x1d8] sm:$0xff] %vm2531_vm2, %v2458_v36 }
 0x611   :  { %v2456_v24 = vpop.permute.xlu0 %2455  ;;  %v4278_v1 = vadd.f32 %v4277_v14, %v4276_v12 }
 0x612   :  { %2590 = vst.msk [vmem:[#allocation3 + $0x1d0] sm:$0xff] %vm2531_vm2, %v2456_v24  ;;  %v2775_v27 = vpop.permute.xlu1 %2774 }
 0x613   :  { %2977 = vst.msk [vmem:[#allocation3 + $0x1d7] sm:$0xff] %vm2888_vm4, %v2775_v27 }
 0x615   :  { %v2773_v9 = vpop.permute.xlu0 %2772  ;;  %v3428_v42 = vld [vmem:[#allocation3 + $0x1c0] sm:$0xff]  ;;  %v3429_v25 = vld [vmem:[#allocation3 + $0x1c8] sm:$0xff] }
 0x616   :  { %2976 = vst.msk [vmem:[#allocation3 + $0x1cf] sm:$0xfe] %vm2886_vm3, %v2773_v9  ;;  %7025 = vmatprep.mubr.msk.f32.mxu1 %vm3440_vm9, %v3428_v42  ;;  %v3160_v52 = vpop.permute.xlu1 %3159 }
 0x617   :  { %7026 = vmatmul.mubr.msk.f32.gmra.mrb[24].mxu1 %vm3440_vm9, %v3429_v25  ;;  %3363 = vst.msk [vmem:[#allocation3 + $0x1ce] sm:$0xfc] %vm3273_vm6, %v3160_v52 }
 0x619   :  { %v2777_v44 = vpop.permute.xlu0 %2776 }
 0x61a   :  { %2978 = vst.msk [vmem:[#allocation3 + $0x1df] sm:$0x1] %vm2890_vm5, %v2777_v44  ;;  %v10314_v50 = vpop.f32.mrb[30].mxu0  ;;  %v3164_v59 = vpop.permute.xlu1 %3163 }
 0x61b   :  { %v10316_v4 = vpop.f32.mrb[31].mxu0  ;;  %v4187_v31 = vmul.f32 %v10314_v50, %v10314_v50  ;;  %v4084_v63 = vsel %vm4022_vm10, %v10314_v50, 0.0  ;;  %3365 = vst.msk [vmem:[#allocation3 + $0x1de] sm:$0x3] %vm3277_vm8, %v3164_v59 }
 0x61c   :  { %v4082_v57 = vsel %vm4022_vm10, %v10316_v4, 0.0  ;;  %v4186_v22 = vmul.f32 %v10316_v4, %v10316_v4 }
 0x61d   :  { %v3162_v48 = vpop.permute.xlu0 %3161  ;;  %v4083_v3 = vadd.f32 %v4082_v57, %v4081_v54  ;;  %v4281_v49 = vsel %vm4022_vm10, %v4187_v31, 0.0 }
 0x61e   :  { %3364 = vst.msk [vmem:[#allocation3 + $0x1d6] sm:$0xff] %vm3275_vm7, %v3162_v48  ;;  %v4279_v0 = vsel %vm4022_vm10, %v4186_v22, 0.0  ;;  %v2462_v7 = vpop.permute.xlu1 %2461 }
 0x61f   :  { %v4085_v34 = vadd.f32 %v4084_v63, %v4083_v3  ;;  %v4280_v45 = vadd.f32 %v4279_v0, %v4278_v1  ;;  %2593 = vst.msk [vmem:[#allocation3 + $0x1e8] sm:$0xff] %vm2531_vm2, %v2462_v7 }
 0x621   :  { %v2460_v35 = vpop.permute.xlu0 %2459  ;;  %v4282_v53 = vadd.f32 %v4281_v49, %v4280_v45 }
 0x622   :  { %2592 = vst.msk [vmem:[#allocation3 + $0x1e0] sm:$0xff] %vm2531_vm2, %v2460_v35  ;;  %v2781_v43 = vpop.permute.xlu1 %2780 }
 0x623   :  { %2980 = vst.msk [vmem:[#allocation3 + $0x1e7] sm:$0xff] %vm2888_vm4, %v2781_v43 }
 0x625   :  { %v2779_v28 = vpop.permute.xlu0 %2778  ;;  %v3430_v13 = vld [vmem:[#allocation3 + $0x1d0] sm:$0xff]  ;;  %v3431_v38 = vld [vmem:[#allocation3 + $0x1d8] sm:$0xff] }
 0x626   :  { %2979 = vst.msk [vmem:[#allocation3 + $0x1df] sm:$0xfe] %vm2886_vm3, %v2779_v28  ;;  %7028 = vmatprep.mubr.msk.f32.mxu1 %vm3440_vm9, %v3430_v13  ;;  %v3166_v51 = vpop.permute.xlu1 %3165 }
 0x627   :  { %7029 = vmatmul.mubr.msk.f32.gmra.mrb[26].mxu1 %vm3440_vm9, %v3431_v38  ;;  %3366 = vst.msk [vmem:[#allocation3 + $0x1de] sm:$0xfc] %vm3273_vm6, %v3166_v51 }
 0x629   :  { %v2783_v29 = vpop.permute.xlu0 %2782 }
 0x62a   :  { %2981 = vst.msk [vmem:[#allocation3 + $0x1ef] sm:$0x1] %vm2890_vm5, %v2783_v29  ;;  %v10338_v12 = vpop.f32.mrb[0].mxu1  ;;  %v3170_v42 = vpop.permute.xlu1 %3169 }
 0x62b   :  { %v10340_v54 = vpop.f32.mrb[1].mxu1  ;;  %v4189_v14 = vmul.f32 %v10338_v12, %v10338_v12  ;;  %v4088_v27 = vsel %vm4022_vm10, %v10338_v12, 0.0  ;;  %3368 = vst.msk [vmem:[#allocation3 + $0x1ee] sm:$0x3] %vm3277_vm8, %v3170_v42 }
 0x62c   :  { %v4086_v24 = vsel %vm4022_vm10, %v10340_v54, 0.0  ;;  %v4188_v36 = vmul.f32 %v10340_v54, %v10340_v54 }
 0x62d   :  { %v3168_v1 = vpop.permute.xlu0 %3167  ;;  %v4087_v9 = vadd.f32 %v4086_v24, %v4085_v34  ;;  %v4285_v31 = vsel %vm4022_vm10, %v4189_v14, 0.0 }
 0x62e   :  { %3367 = vst.msk [vmem:[#allocation3 + $0x1e6] sm:$0xff] %vm3275_vm7, %v3168_v1  ;;  %v4283_v25 = vsel %vm4022_vm10, %v4188_v36, 0.0  ;;  %v2466_v22 = vpop.permute.xlu1 %2465 }
 0x62f   :  { %v4284_v44 = vadd.f32 %v4283_v25, %v4282_v53  ;;  %v4089_v52 = vadd.f32 %v4088_v27, %v4087_v9  ;;  %2595 = vst.msk [vmem:[#allocation3 + $0x1f8] sm:$0xff] %vm2531_vm2, %v2466_v22 }
 0x631   :  { %v2464_v57 = vpop.permute.xlu0 %2463  ;;  %v4286_v48 = vadd.f32 %v4285_v31, %v4284_v44 }
 0x632   :  { %2594 = vst.msk [vmem:[#allocation3 + $0x1f0] sm:$0xff] %vm2531_vm2, %v2464_v57  ;;  %v2787_v63 = vpop.permute.xlu1 %2786 }
 0x633   :  { %2983 = vst.msk [vmem:[#allocation3 + $0x1f7] sm:$0xff] %vm2888_vm4, %v2787_v63 }
 0x635   :  { %v2785_v3 = vpop.permute.xlu0 %2784  ;;  %v3432_v59 = vld [vmem:[#allocation3 + $0x1e0] sm:$0xff]  ;;  %v3433_v0 = vld [vmem:[#allocation3 + $0x1e8] sm:$0xff] }
 0x636   :  { %2982 = vst.msk [vmem:[#allocation3 + $0x1ef] sm:$0xfe] %vm2886_vm3, %v2785_v3  ;;  %7031 = vmatprep.mubr.msk.f32.mxu1 %vm3440_vm9, %v3432_v59  ;;  %v3172_v45 = vpop.permute.xlu1 %3171 }
 0x637   :  { %7032 = vmatmul.mubr.msk.f32.gmra.mrb[28].mxu1 %vm3440_vm9, %v3433_v0  ;;  %3369 = vst.msk [vmem:[#allocation3 + $0x1ee] sm:$0xfc] %vm3273_vm6, %v3172_v45 }
 0x639   :  { %v2789_v34 = vpop.permute.xlu0 %2788 }
 0x63a   :  { %2984 = vst.msk [vmem:[#allocation3 + $0x1ff] sm:$0x1] %vm2890_vm5, %v2789_v34  ;;  %v10362_v49 = vpop.f32.mrb[2].mxu1  ;;  %v3176_v38 = vpop.permute.xlu1 %3175 }
 0x63b   :  { %v10364_v35 = vpop.f32.mrb[3].mxu1  ;;  %v4191_v53 = vmul.f32 %v10362_v49, %v10362_v49  ;;  %v4092_v29 = vsel %vm4022_vm10, %v10362_v49, 0.0  ;;  %3371 = vst.msk [vmem:[#allocation3 + $0x1fe] sm:$0x3] %vm3277_vm8, %v3176_v38 }
 0x63c   :  { %v4090_v7 = vsel %vm4022_vm10, %v10364_v35, 0.0  ;;  %v4190_v28 = vmul.f32 %v10364_v35, %v10364_v35 }
 0x63d   :  { %v3174_v13 = vpop.permute.xlu0 %3173  ;;  %v4091_v43 = vadd.f32 %v4090_v7, %v4089_v52  ;;  %v4289_v36 = vsel %vm4022_vm10, %v4191_v53, 0.0 }
 0x63e   :  { %3370 = vst.msk [vmem:[#allocation3 + $0x1f6] sm:$0xff] %vm3275_vm7, %v3174_v13  ;;  %v4287_v51 = vsel %vm4022_vm10, %v4190_v28, 0.0 }
 0x63f   :  { %v4288_v14 = vadd.f32 %v4287_v51, %v4286_v48  ;;  %v4093_v24 = vadd.f32 %v4092_v29, %v4091_v43 }
 0x641   :  { %v4290_v1 = vadd.f32 %v4289_v36, %v4288_v14 }
 0x645   :  { %v3434_v9 = vld [vmem:[#allocation3 + $0x1f0] sm:$0xff]  ;;  %v3435_v42 = vld [vmem:[#allocation3 + $0x1f8] sm:$0xff] }
 0x646   :  { %7034 = vmatprep.mubr.msk.f32.mxu1 %vm3440_vm9, %v3434_v9 }
 0x647   :  { %7035 = vmatmul.mubr.msk.f32.gmra.mrb[30].mxu1 %vm3440_vm9, %v3435_v42 }
 0x64a   :  { %v10380_v27 = vpop.f32.mrb[4].mxu1 }
 0x64b   :  { %v10382_v25 = vpop.f32.mrb[5].mxu1  ;;  %v4193_v44 = vmul.f32 %v10380_v27, %v10380_v27  ;;  %v4096_v22 = vsel %vm4022_vm10, %v10380_v27, 0.0 }
 0x64c   :  { %v4094_v52 = vsel %vm4022_vm10, %v10382_v25, 0.0  ;;  %v4192_v31 = vmul.f32 %v10382_v25, %v10382_v25 }
 0x64d   :  { %v4095_v57 = vadd.f32 %v4094_v52, %v4093_v24  ;;  %v4293_v63 = vsel %vm4022_vm10, %v4193_v44, 0.0 }
 0x64e   :  { %v4291_v48 = vsel %vm4022_vm10, %v4192_v31, 0.0 }
 0x64f   :  { %v4292_v3 = vadd.f32 %v4291_v48, %v4290_v1  ;;  %v4097_v59 = vadd.f32 %v4096_v22, %v4095_v57 }
 0x651   :  { %v4294_v0 = vadd.f32 %v4293_v63, %v4292_v3 }
 0x65a   :  { %v10394_v34 = vpop.f32.mrb[6].mxu1 }
 0x65b   :  { %v10396_v45 = vpop.f32.mrb[7].mxu1  ;;  %v4195_v53 = vmul.f32 %v10394_v34, %v10394_v34  ;;  %v4100_v43 = vsel %vm4022_vm10, %v10394_v34, 0.0 }
 0x65c   :  { %v4098_v7 = vsel %vm4022_vm10, %v10396_v45, 0.0  ;;  %v4194_v28 = vmul.f32 %v10396_v45, %v10396_v45 }
 0x65d   :  { %v4099_v13 = vadd.f32 %v4098_v7, %v4097_v59  ;;  %v4297_v14 = vsel %vm4022_vm10, %v4195_v53, 0.0 }
 0x65e   :  { %v4295_v38 = vsel %vm4022_vm10, %v4194_v28, 0.0 }
 0x65f   :  { %v4296_v29 = vadd.f32 %v4295_v38, %v4294_v0  ;;  %v4101_v51 = vadd.f32 %v4100_v43, %v4099_v13 }
 0x661   :  { %v4298_v24 = vadd.f32 %v4297_v14, %v4296_v29 }
 0x66a   :  { %v10408_v36 = vpop.f32.mrb[8].mxu1 }
 0x66b   :  { %14182 = vst [vmem:[#allocation15_spill] sm:$0xff] %v10408_v36  ;;  %v10410_v1 = vpop.f32.mrb[9].mxu1  ;;  %v4197_v9 = vmul.f32 %v10408_v36, %v10408_v36  ;;  %v4104_v31 = vsel %vm4022_vm10, %v10408_v36, 0.0 }
 0x66c   :  { %v4102_v42 = vsel %vm4022_vm10, %v10410_v1, 0.0  ;;  %v4196_v44 = vmul.f32 %v10410_v1, %v10410_v1 }
 0x66d   :  { %v4103_v52 = vadd.f32 %v4102_v42, %v4101_v51  ;;  %v4301_v3 = vsel %vm4022_vm10, %v4197_v9, 0.0 }
 0x66e   :  { %v4299_v57 = vsel %vm4022_vm10, %v4196_v44, 0.0 }
 0x66f   :  { %v4300_v22 = vadd.f32 %v4299_v57, %v4298_v24  ;;  %v4105_v48 = vadd.f32 %v4104_v31, %v4103_v52 }
 0x671   :  { %v4302_v59 = vadd.f32 %v4301_v3, %v4300_v22 }
 0x67a   :  { %v10422_v63 = vpop.f32.mrb[10].mxu1 }
 0x67b   :  { %14183 = vst [vmem:[#allocation55_spill] sm:$0xff] %v10422_v63  ;;  %v10424_v0 = vpop.f32.mrb[11].mxu1  ;;  %v4199_v53 = vmul.f32 %v10422_v63, %v10422_v63  ;;  %v4108_v43 = vsel %vm4022_vm10, %v10422_v63, 0.0 }
 0x67c   :  { %14184 = vst [vmem:[#allocation18_spill] sm:$0xff] %v10424_v0  ;;  %v4106_v7 = vsel %vm4022_vm10, %v10424_v0, 0.0  ;;  %v4198_v28 = vmul.f32 %v10424_v0, %v10424_v0 }
 0x67d   :  { %v4107_v13 = vadd.f32 %v4106_v7, %v4105_v48  ;;  %v4305_v14 = vsel %vm4022_vm10, %v4199_v53, 0.0 }
 0x67e   :  { %v4303_v38 = vsel %vm4022_vm10, %v4198_v28, 0.0 }
 0x67f   :  { %v4304_v29 = vadd.f32 %v4303_v38, %v4302_v59  ;;  %v4109_v51 = vadd.f32 %v4108_v43, %v4107_v13 }
 0x681   :  { %v4306_v24 = vadd.f32 %v4305_v14, %v4304_v29 }
 0x68a   :  { %v10436_v9 = vpop.f32.mrb[12].mxu1 }
 0x68b   :  { %14185 = vst [vmem:[#allocation22_spill] sm:$0xff] %v10436_v9  ;;  %v10438_v42 = vpop.f32.mrb[13].mxu1  ;;  %v4201_v44 = vmul.f32 %v10436_v9, %v10436_v9  ;;  %v4112_v22 = vsel %vm4022_vm10, %v10436_v9, 0.0 }
 0x68c   :  { %14186 = vst [vmem:[#allocation19_spill] sm:$0xff] %v10438_v42  ;;  %v4110_v52 = vsel %vm4022_vm10, %v10438_v42, 0.0  ;;  %v4200_v31 = vmul.f32 %v10438_v42, %v10438_v42  ;;  %v4425_v42 = vlaneseq }
 0x68d   :  { %v4111_v57 = vadd.f32 %v4110_v52, %v4109_v51  ;;  %v4309_v53 = vsel %vm4022_vm10, %v4201_v44, 0.0 }
 0x68e   :  { %v4307_v48 = vsel %vm4022_vm10, %v4200_v31, 0.0 }
 0x68f   :  { %v4308_v3 = vadd.f32 %v4307_v48, %v4306_v24  ;;  %v4113_v59 = vadd.f32 %v4112_v22, %v4111_v57 }
 0x691   :  { %v4310_v7 = vadd.f32 %v4309_v53, %v4308_v3 }
 0x69a   :  { %v10450_v28 = vpop.f32.mrb[14].mxu1 }
 0x69b   :  { %14187 = vst [vmem:[#allocation58_spill] sm:$0xff] %v10450_v28  ;;  %v10452_v13 = vpop.f32.mrb[15].mxu1  ;;  %v4203_v43 = vmul.f32 %v10450_v28, %v10450_v28  ;;  %v4116_v14 = vsel %vm4022_vm10, %v10450_v28, 0.0 }
 0x69c   :  { %14188 = vst [vmem:[#allocation59_spill] sm:$0xff] %v10452_v13  ;;  %v4114_v38 = vsel %vm4022_vm10, %v10452_v13, 0.0  ;;  %v4202_v29 = vmul.f32 %v10452_v13, %v10452_v13 }
 0x69d   :  { %v4115_v51 = vadd.f32 %v4114_v38, %v4113_v59  ;;  %v4313_v31 = vsel %vm4022_vm10, %v4203_v43, 0.0 }
 0x69e   :  { %v4311_v24 = vsel %vm4022_vm10, %v4202_v29, 0.0 }
 0x69f   :  { %v4312_v44 = vadd.f32 %v4311_v24, %v4310_v7  ;;  %v4117_v52 = vadd.f32 %v4116_v14, %v4115_v51 }
 0x6a1   :  { %v4314_v57 = vadd.f32 %v4313_v31, %v4312_v44 }
 0x6aa   :  { %v10464_v22 = vpop.f32.mrb[16].mxu1 }
 0x6ab   :  { %14189 = vst [vmem:[#allocation31_spill] sm:$0xff] %v10464_v22  ;;  %v10466_v48 = vpop.f32.mrb[17].mxu1  ;;  %v4205_v3 = vmul.f32 %v10464_v22, %v10464_v22  ;;  %v4120_v7 = vsel %vm4022_vm10, %v10464_v22, 0.0 }
 0x6ac   :  { %14190 = vst [vmem:[#allocation32_spill] sm:$0xff] %v10466_v48  ;;  %v4118_v59 = vsel %vm4022_vm10, %v10466_v48, 0.0  ;;  %v4204_v53 = vmul.f32 %v10466_v48, %v10466_v48 }
 0x6ad   :  { %v4119_v38 = vadd.f32 %v4118_v59, %v4117_v52  ;;  %v4317_v14 = vsel %vm4022_vm10, %v4205_v3, 0.0 }
 0x6ae   :  { %v4315_v43 = vsel %vm4022_vm10, %v4204_v53, 0.0 }
 0x6af   :  { %v4316_v29 = vadd.f32 %v4315_v43, %v4314_v57  ;;  %v4121_v51 = vadd.f32 %v4120_v7, %v4119_v38 }
 0x6b1   :  { %v4318_v24 = vadd.f32 %v4317_v14, %v4316_v29 }
 0x6ba   :  { %v10478_v44 = vpop.f32.mrb[18].mxu1 }
 0x6bb   :  { %14191 = vst [vmem:[#allocation35_spill] sm:$0xff] %v10478_v44  ;;  %v10480_v31 = vpop.f32.mrb[19].mxu1  ;;  %v4207_v28 = vmul.f32 %v10478_v44, %v10478_v44  ;;  %v4124_v57 = vsel %vm4022_vm10, %v10478_v44, 0.0 }
 0x6bc   :  { %14192 = vst [vmem:[#allocation37_spill] sm:$0xff] %v10480_v31  ;;  %v4122_v52 = vsel %vm4022_vm10, %v10480_v31, 0.0  ;;  %v4206_v59 = vmul.f32 %v10480_v31, %v10480_v31 }
 0x6bd   :  { %v4123_v22 = vadd.f32 %v4122_v52, %v4121_v51  ;;  %v4321_v7 = vsel %vm4022_vm10, %v4207_v28, 0.0 }
 0x6be   :  { %v4319_v3 = vsel %vm4022_vm10, %v4206_v59, 0.0 }
 0x6bf   :  { %v4320_v53 = vadd.f32 %v4319_v3, %v4318_v24  ;;  %v4125_v38 = vadd.f32 %v4124_v57, %v4123_v22 }
 0x6c1   :  { %v4322_v43 = vadd.f32 %v4321_v7, %v4320_v53 }
 0x6ca   :  { %v10492_v29 = vpop.f32.mrb[20].mxu1 }
 0x6cb   :  { %14193 = vst [vmem:[#allocation40_spill] sm:$0xff] %v10492_v29  ;;  %v10494_v14 = vpop.f32.mrb[21].mxu1  ;;  %v4209_v48 = vmul.f32 %v10492_v29, %v10492_v29  ;;  %v4128_v22 = vsel %vm4022_vm10, %v10492_v29, 0.0 }
 0x6cc   :  { %14194 = vst [vmem:[#allocation42_spill] sm:$0xff] %v10494_v14  ;;  %v4126_v51 = vsel %vm4022_vm10, %v10494_v14, 0.0  ;;  %v4208_v52 = vmul.f32 %v10494_v14, %v10494_v14 }
 0x6cd   :  { %v4127_v44 = vadd.f32 %v4126_v51, %v4125_v38  ;;  %v4325_v57 = vsel %vm4022_vm10, %v4209_v48, 0.0 }
 0x6ce   :  { %v4323_v28 = vsel %vm4022_vm10, %v4208_v52, 0.0 }
 0x6cf   :  { %v4324_v24 = vadd.f32 %v4323_v28, %v4322_v43  ;;  %v4129_v59 = vadd.f32 %v4128_v22, %v4127_v44 }
 0x6d1   :  { %v4326_v3 = vadd.f32 %v4325_v57, %v4324_v24 }
 0x6da   :  { %v10506_v53 = vpop.f32.mrb[22].mxu1 }
 0x6db   :  { %14195 = vst [vmem:[#allocation44_spill] sm:$0xff] %v10506_v53  ;;  %v10508_v7 = vpop.f32.mrb[23].mxu1  ;;  %v4211_v31 = vmul.f32 %v10506_v53, %v10506_v53  ;;  %v4132_v44 = vsel %vm4022_vm10, %v10506_v53, 0.0 }
 0x6dc   :  { %14196 = vst [vmem:[#allocation46_spill] sm:$0xff] %v10508_v7  ;;  %v4130_v38 = vsel %vm4022_vm10, %v10508_v7, 0.0  ;;  %v4210_v51 = vmul.f32 %v10508_v7, %v10508_v7 }
 0x6dd   :  { %v4131_v29 = vadd.f32 %v4130_v38, %v4129_v59  ;;  %v4329_v22 = vsel %vm4022_vm10, %v4211_v31, 0.0 }
 0x6de   :  { %v4327_v48 = vsel %vm4022_vm10, %v4210_v51, 0.0 }
 0x6df   :  { %v4328_v43 = vadd.f32 %v4327_v48, %v4326_v3  ;;  %v4133_v52 = vadd.f32 %v4132_v44, %v4131_v29 }
 0x6e1   :  { %v4330_v28 = vadd.f32 %v4329_v22, %v4328_v43 }
 0x6ea   :  { %v10520_v24 = vpop.f32.mrb[24].mxu1 }
 0x6eb   :  { %14197 = vst [vmem:[#allocation51_spill] sm:$0xff] %v10520_v24  ;;  %v10522_v57 = vpop.f32.mrb[25].mxu1  ;;  %v4213_v14 = vmul.f32 %v10520_v24, %v10520_v24  ;;  %v4136_v29 = vsel %vm4022_vm10, %v10520_v24, 0.0 }
 0x6ec   :  { %14198 = vst [vmem:[#allocation11_spill] sm:$0xff] %v10522_v57  ;;  %v4134_v59 = vsel %vm4022_vm10, %v10522_v57, 0.0  ;;  %v4212_v38 = vmul.f32 %v10522_v57, %v10522_v57 }
 0x6ed   :  { %v4135_v53 = vadd.f32 %v4134_v59, %v4133_v52  ;;  %v4333_v44 = vsel %vm4022_vm10, %v4213_v14, 0.0 }
 0x6ee   :  { %v4331_v31 = vsel %vm4022_vm10, %v4212_v38, 0.0 }
 0x6ef   :  { %v4332_v3 = vadd.f32 %v4331_v31, %v4330_v28  ;;  %v4137_v51 = vadd.f32 %v4136_v29, %v4135_v53 }
 0x6f1   :  { %v4334_v48 = vadd.f32 %v4333_v44, %v4332_v3 }
 0x6fa   :  { %v10534_v43 = vpop.f32.mrb[26].mxu1 }
 0x6fb   :  { %14199 = vst [vmem:[#allocation29_spill] sm:$0xff] %v10534_v43  ;;  %v10536_v22 = vpop.f32.mrb[27].mxu1  ;;  %v4215_v7 = vmul.f32 %v10534_v43, %v10534_v43  ;;  %v4140_v53 = vsel %vm4022_vm10, %v10534_v43, 0.0 }
 0x6fc   :  { %14200 = vst [vmem:[#allocation30_spill] sm:$0xff] %v10536_v22  ;;  %v4138_v52 = vsel %vm4022_vm10, %v10536_v22, 0.0  ;;  %v4214_v59 = vmul.f32 %v10536_v22, %v10536_v22 }
 0x6fd   :  { %v4139_v24 = vadd.f32 %v4138_v52, %v4137_v51  ;;  %v4337_v29 = vsel %vm4022_vm10, %v4215_v7, 0.0 }
 0x6fe   :  { %v4335_v14 = vsel %vm4022_vm10, %v4214_v59, 0.0 }
 0x6ff   :  { %v4336_v28 = vadd.f32 %v4335_v14, %v4334_v48  ;;  %v4141_v38 = vadd.f32 %v4140_v53, %v4139_v24 }
 0x701   :  { %v4338_v31 = vadd.f32 %v4337_v29, %v4336_v28 }
 0x70a   :  { %v10548_v3 = vpop.f32.mrb[28].mxu1 }
 0x70b   :  { %14201 = vst [vmem:[#allocation26_spill] sm:$0xff] %v10548_v3  ;;  %v10550_v44 = vpop.f32.mrb[29].mxu1  ;;  %v4217_v57 = vmul.f32 %v10548_v3, %v10548_v3  ;;  %v4144_v24 = vsel %vm4022_vm10, %v10548_v3, 0.0 }
 0x70c   :  { %14202 = vst [vmem:[#allocation53_spill] sm:$0xff] %v10550_v44  ;;  %v4142_v51 = vsel %vm4022_vm10, %v10550_v44, 0.0  ;;  %v4216_v52 = vmul.f32 %v10550_v44, %v10550_v44 }
 0x70d   :  { %v4143_v43 = vadd.f32 %v4142_v51, %v4141_v38  ;;  %v4341_v53 = vsel %vm4022_vm10, %v4217_v57, 0.0 }
 0x70e   :  { %v4339_v7 = vsel %vm4022_vm10, %v4216_v52, 0.0 }
 0x70f   :  { %v4340_v48 = vadd.f32 %v4339_v7, %v4338_v31  ;;  %v4145_v59 = vadd.f32 %v4144_v24, %v4143_v43 }
 0x711   :  { %v4342_v14 = vadd.f32 %v4341_v53, %v4340_v48 }
 0x71a   :  { %v10562_v28 = vpop.f32.mrb[30].mxu1 }
 0x71b   :  { %14203 = vst [vmem:[#allocation34_spill] sm:$0xff] %v10562_v28  ;;  %v10564_v29 = vpop.f32.mrb[31].mxu1  ;;  %v4219_v22 = vmul.f32 %v10562_v28, %v10562_v28  ;;  %v4148_v43 = vsel %vm4022_vm10, %v10562_v28, 0.0  ;;  %v7142_v28 = vmov 1983009808  }
 0x71c   :  { %14204 = vst [vmem:[#allocation4_spill] sm:$0xff] %v10564_v29  ;;  %v4146_v38 = vsel %vm4022_vm10, %v10564_v29, 0.0  ;;  %v4218_v51 = vmul.f32 %v10564_v29, %v10564_v29  ;;  %v10578_v36 = vunpack.c.l.s4 %v7142_v28 }
 0x71d   :  { %v4147_v3 = vadd.f32 %v4146_v38, %v4145_v59  ;;  %v4345_v24 = vsel %vm4022_vm10, %v4219_v22, 0.0  ;;  %v10576_v38 = vshrl.u32 %v4425_v42, 7 }
 0x71e   :  { %v4343_v57 = vsel %vm4022_vm10, %v4218_v51, 0.0 }
 0x71f   :  { %v4149_v31 = vadd.f32 %v4148_v43, %v4147_v3  ;;  %v4344_v52 = vadd.f32 %v4343_v57, %v4342_v14  ;;  %v10583_v43 = vsub.s32 0, %v10576_v38 }
 0x721   :  { %v4150_v7 = vrot.slane %v4149_v31, 4  ;;  %v4346_v48 = vadd.f32 %v4345_v24, %v4344_v52  ;;  %14205 = vst [vmem:[#allocation5_spill] sm:$0xff] %v10583_v43  ;;  %v4359_v24 = vld [vmem:[%s13599_s2] sm:$0x1]  ;;  %v14229_v52 = vunpack.c.0.s8 %v10578_v36 }
 0x723   :  { %v4151_v53 = vadd.f32 %v4150_v7, %v4149_v31  ;;  %v4347_v44 = vrot.slane %v4346_v48, 4 }
 0x725   :  { %v4152_v13 = vrot.slane %v4151_v53, 2  ;;  %v4348_v9 = vadd.f32 %v4347_v44, %v4346_v48  ;;  %v14224_v44 = vld [vmem:[#allocation29_spill] sm:$0xff] }
 0x727   :  { %v4153_v63 = vadd.f32 %v4152_v13, %v4151_v53  ;;  %v4349_v0 = vrot.slane %v4348_v9, 2 }
 0x729   :  { %v4154_v29 = vrot.slane %v4153_v63, 1  ;;  %v4350_v59 = vadd.f32 %v4349_v0, %v4348_v9  ;;  %v14223_v0 = vld [vmem:[#allocation30_spill] sm:$0xff] }
 0x72a   :  { %v14228_v9 = vld [vmem:[#allocation34_spill] sm:$0xff] }
 0x72b   :  { %v4155_v3 = vadd.f32 %v4154_v29, %v4153_v63  ;;  %v4351_v14 = vrot.slane %v4350_v59, 1  ;;  %v10725_v29 = vsub.s32 %v14229_v52, %v10576_v38 }
 0x72d   :  { %v4352_v51 = vadd.f32 %v4351_v14, %v4350_v59  ;;  %v10580_v22 = vmul.f32 0.001953125, %v4155_v3  ;;  %v14227_v3 = vld [vmem:[#allocation4_spill] sm:$0xff]  ;;  %14230 = vst [vmem:[#allocation6_spill] sm:$0xff] %v10725_v29 }
 0x72f   :  { %v4354_v57 = vmul.f32 0.001953125, %v4352_v51  ;;  %v4355_v13 = vmul.f32 %v10580_v22, %v10580_v22  ;;  %v14206_v51 = vld [vmem:[#allocation15_spill] sm:$0xff]  ;;  %v14231_v28 = vsub.f32 %v9887_v32, %v10580_v22  ;;  %v14234_v36 = vsub.f32 %v9912_v17, %v10580_v22 }
 0x730   :  { %v14235_v38 = vsub.f32 %v9948_v18, %v10580_v22  ;;  %v14237_v52 = vsub.f32 %v9979_v16, %v10580_v22 }
 0x731   :  { %v4356_v31 = vsub.f32 %v4354_v57, %v4355_v13  ;;  %v14207_v57 = vld [vmem:[#allocation18_spill] sm:$0xff]  ;;  %v14208_v13 = vld [vmem:[#allocation55_spill] sm:$0xff] }
 0x733   :  { %v4357_v14 = vadd.f32 1e-05, %v4356_v31  ;;  %v14226_v31 = vld [vmem:[#allocation26_spill] sm:$0xff] }
 0x735   :  { %7062 = vrsqrt.f32 %v4357_v14  ;;  %v14225_v14 = vld [vmem:[#allocation53_spill] sm:$0xff] }
 0x73f   :  { %v7063_v48 = vpop.eup %7062 }
 0x740   :  { %v4360_v7 = vmul.f32 %v7063_v48, %v4359_v24  ;;  %v14232_v24 = vsub.f32 %v9880_v11, %v10580_v22 }
 0x742   :  { %v10720_v59 = vrot.slane %v4360_v7, %v10583_v43  ;;  %v14233_v7 = vsub.f32 %v9915_v15, %v10580_v22 }
 0x744   :  { %v10731_v42 = vmul.f32 %v10720_v59, %v14231_v28  ;;  %v10737_v48 = vmul.f32 %v10720_v59, %v14232_v24  ;;  %v10743_v53 = vmul.f32 %v10720_v59, %v14233_v7  ;;  %v10749_v32 = vmul.f32 %v10720_v59, %v14234_v36 }
 0x745   :  { %v10755_v11 = vmul.f32 %v10720_v59, %v14235_v38  ;;  %v14236_v28 = vsub.f32 %v9945_v5, %v10580_v22  ;;  %v10767_v17 = vmul.f32 %v10720_v59, %v14237_v52  ;;  %v14238_v24 = vsub.f32 %v9976_v30, %v10580_v22 }
 0x746   :  { %v14239_v7 = vsub.f32 %v10011_v37, %v10580_v22  ;;  %v14240_v36 = vsub.f32 %v10008_v61, %v10580_v22  ;;  %v14241_v38 = vsub.f32 %v10043_v19, %v10580_v22  ;;  %v14243_v52 = vsub.f32 %v10076_v26, %v10580_v22 }
 0x747   :  { %v10761_v15 = vmul.f32 %v10720_v59, %v14236_v28  ;;  %v10773_v18 = vmul.f32 %v10720_v59, %v14238_v24  ;;  %v14242_v28 = vsub.f32 %v10040_v60, %v10580_v22  ;;  %v14244_v24 = vsub.f32 %v10073_v39, %v10580_v22 }
 0x748   :  { %v10779_v5 = vmul.f32 %v10720_v59, %v14239_v7  ;;  %v10785_v16 = vmul.f32 %v10720_v59, %v14240_v36  ;;  %v10791_v30 = vmul.f32 %v10720_v59, %v14241_v38  ;;  %v10803_v61 = vmul.f32 %v10720_v59, %v14243_v52 }
 0x749   :  { %v10797_v37 = vmul.f32 %v10720_v59, %v14242_v28  ;;  %v10809_v19 = vmul.f32 %v10720_v59, %v14244_v24  ;;  %v14245_v7 = vsub.f32 %v10107_v41, %v10580_v22  ;;  %v14246_v36 = vsub.f32 %v10104_v6, %v10580_v22 }
 0x74a   :  { %v14247_v38 = vsub.f32 %v10137_v40, %v10580_v22  ;;  %v14248_v28 = vsub.f32 %v10134_v8, %v10580_v22  ;;  %v14249_v52 = vsub.f32 %v10165_v58, %v10580_v22  ;;  %v14250_v24 = vsub.f32 %v10162_v10, %v10580_v22 }
 0x74b   :  { %v10815_v60 = vmul.f32 %v10720_v59, %v14245_v7  ;;  %v10821_v26 = vmul.f32 %v10720_v59, %v14246_v36  ;;  %v14251_v7 = vsub.f32 %v10196_v21, %v10580_v22  ;;  %v14252_v36 = vsub.f32 %v10192_v62, %v10580_v22 }
 0x74c   :  { %v10827_v39 = vmul.f32 %v10720_v59, %v14247_v38  ;;  %v10833_v41 = vmul.f32 %v10720_v59, %v14248_v28  ;;  %v10839_v6 = vmul.f32 %v10720_v59, %v14249_v52  ;;  %v10845_v40 = vmul.f32 %v10720_v59, %v14250_v24 }
 0x74d   :  { %v10851_v8 = vmul.f32 %v10720_v59, %v14251_v7  ;;  %v10857_v58 = vmul.f32 %v10720_v59, %v14252_v36  ;;  %v14253_v38 = vsub.f32 %v10220_v2, %v10580_v22  ;;  %v14254_v28 = vsub.f32 %v10218_v46, %v10580_v22 }
 0x74e   :  { %v14255_v52 = vsub.f32 %v10244_v47, %v10580_v22  ;;  %v14256_v24 = vsub.f32 %v10242_v56, %v10580_v22  ;;  %v14257_v7 = vsub.f32 %v10268_v55, %v10580_v22  ;;  %v14258_v36 = vsub.f32 %v10266_v20, %v10580_v22 }
 0x74f   :  { %v10863_v10 = vmul.f32 %v10720_v59, %v14253_v38  ;;  %v10869_v21 = vmul.f32 %v10720_v59, %v14254_v28  ;;  %v14259_v38 = vsub.f32 %v10292_v23, %v10580_v22  ;;  %v14260_v28 = vsub.f32 %v10290_v33, %v10580_v22 }
 0x750   :  { %v10875_v62 = vmul.f32 %v10720_v59, %v14255_v52  ;;  %v10881_v2 = vmul.f32 %v10720_v59, %v14256_v24  ;;  %v10887_v46 = vmul.f32 %v10720_v59, %v14257_v7  ;;  %v10893_v47 = vmul.f32 %v10720_v59, %v14258_v36 }
 0x751   :  { %v10899_v56 = vmul.f32 %v10720_v59, %v14259_v38  ;;  %v10905_v55 = vmul.f32 %v10720_v59, %v14260_v28  ;;  %v14261_v52 = vsub.f32 %v10316_v4, %v10580_v22  ;;  %v14262_v24 = vsub.f32 %v10314_v50, %v10580_v22 }
 0x752   :  { %v14263_v7 = vsub.f32 %v10340_v54, %v10580_v22  ;;  %v14264_v36 = vsub.f32 %v10338_v12, %v10580_v22  ;;  %v14265_v38 = vsub.f32 %v10364_v35, %v10580_v22  ;;  %v14266_v28 = vsub.f32 %v10362_v49, %v10580_v22 }
 0x753   :  { %v10911_v20 = vmul.f32 %v10720_v59, %v14261_v52  ;;  %v10917_v23 = vmul.f32 %v10720_v59, %v14262_v24  ;;  %v14267_v52 = vsub.f32 %v10382_v25, %v10580_v22  ;;  %v14268_v24 = vsub.f32 %v10380_v27, %v10580_v22 }
 0x754   :  { %v10923_v33 = vmul.f32 %v10720_v59, %v14263_v7  ;;  %v10929_v4 = vmul.f32 %v10720_v59, %v14264_v36  ;;  %v10935_v50 = vmul.f32 %v10720_v59, %v14265_v38  ;;  %v10941_v54 = vmul.f32 %v10720_v59, %v14266_v28 }
 0x755   :  { %v10947_v12 = vmul.f32 %v10720_v59, %v14267_v52  ;;  %v10953_v35 = vmul.f32 %v10720_v59, %v14268_v24  ;;  %v14269_v7 = vsub.f32 %v10396_v45, %v10580_v22  ;;  %v14270_v36 = vsub.f32 %v10394_v34, %v10580_v22 }
 0x756   :  { %v14271_v38 = vsub.f32 %v10410_v1, %v10580_v22  ;;  %v14272_v28 = vsub.f32 %v14206_v51, %v10580_v22  ;;  %v14273_v52 = vsub.f32 %v14207_v57, %v10580_v22  ;;  %v14274_v24 = vsub.f32 %v14208_v13, %v10580_v22 }
 0x757   :  { %v10959_v49 = vmul.f32 %v10720_v59, %v14269_v7  ;;  %v10965_v25 = vmul.f32 %v10720_v59, %v14270_v36  ;;  %v14275_v7 = vld [vmem:[#allocation19_spill] sm:$0xff] }
 0x758   :  { %v10971_v27 = vmul.f32 %v10720_v59, %v14271_v38  ;;  %v10977_v45 = vmul.f32 %v10720_v59, %v14272_v28  ;;  %v10983_v34 = vmul.f32 %v10720_v59, %v14273_v52  ;;  %v10989_v1 = vmul.f32 %v10720_v59, %v14274_v24  ;;  %v14277_v38 = vld [vmem:[#allocation22_spill] sm:$0xff]  ;;  %v14280_v52 = vld [vmem:[#allocation59_spill] sm:$0xff] }
 0x759   :  { %v14276_v36 = vsub.f32 %v14275_v7, %v10580_v22  ;;  %v14278_v28 = vsub.f32 %v14277_v38, %v10580_v22  ;;  %v14281_v63 = vsub.f32 %v14280_v52, %v10580_v22  ;;  %v14283_v24 = vld [vmem:[#allocation58_spill] sm:$0xff] }
 0x75a   :  { %v14284_v43 = vsub.f32 %v14283_v24, %v10580_v22 }
 0x75b   :  { %v10995_v51 = vmul.f32 %v10720_v59, %v14276_v36  ;;  %v11001_v57 = vmul.f32 %v10720_v59, %v14278_v28  ;;  %v11007_v13 = vmul.f32 %v10720_v59, %v14281_v63  ;;  %v14286_v36 = vld [vmem:[#allocation32_spill] sm:$0xff]  ;;  %v14289_v28 = vld [vmem:[#allocation31_spill] sm:$0xff]  ;;  %v14292_v63 = vld [vmem:[#allocation37_spill] sm:$0xff] }
 0x75c   :  { %v11013_v7 = vmul.f32 %v10720_v59, %v14284_v43  ;;  %v14287_v29 = vsub.f32 %v14286_v36, %v10580_v22  ;;  %v14295_v43 = vld [vmem:[#allocation35_spill] sm:$0xff] }
 0x75d   :  { %14279 = vst [vmem:[#allocation7_spill] sm:$0xff] %v11001_v57  ;;  %14282 = vst [vmem:[#allocation8_spill] sm:$0xff] %v11007_v13  ;;  %v14290_v57 = vsub.f32 %v14289_v28, %v10580_v22  ;;  %v14293_v13 = vsub.f32 %v14292_v63, %v10580_v22 }
 0x75e   :  { %14285 = vst [vmem:[#allocation10_spill] sm:$0xff] %v11013_v7  ;;  %v11019_v38 = vmul.f32 %v10720_v59, %v14287_v29  ;;  %v14296_v7 = vsub.f32 %v14295_v43, %v10580_v22  ;;  %v14298_v29 = vld [vmem:[#allocation42_spill] sm:$0xff] }
 0x75f   :  { %v11025_v52 = vmul.f32 %v10720_v59, %v14290_v57  ;;  %v11031_v24 = vmul.f32 %v10720_v59, %v14293_v13  ;;  %v14300_v57 = vld [vmem:[#allocation40_spill] sm:$0xff]  ;;  %v14303_v13 = vld [vmem:[#allocation46_spill] sm:$0xff] }
 0x760   :  { %14288 = vst [vmem:[#allocation12_spill] sm:$0xff] %v11019_v38  ;;  %v11037_v36 = vmul.f32 %v10720_v59, %v14296_v7  ;;  %v14299_v38 = vsub.f32 %v14298_v29, %v10580_v22  ;;  %v14306_v7 = vld [vmem:[#allocation44_spill] sm:$0xff] }
 0x761   :  { %14291 = vst [vmem:[#allocation14_spill] sm:$0xff] %v11025_v52  ;;  %14294 = vst [vmem:[#allocation16_spill] sm:$0xff] %v11031_v24  ;;  %v14301_v52 = vsub.f32 %v14300_v57, %v10580_v22  ;;  %v14304_v24 = vsub.f32 %v14303_v13, %v10580_v22  ;;  %v14309_v57 = vld [vmem:[#allocation11_spill] sm:$0xff] }
 0x762   :  { %14297 = vst [vmem:[#allocation17_spill] sm:$0xff] %v11037_v36  ;;  %v11043_v28 = vmul.f32 %v10720_v59, %v14299_v38  ;;  %v14307_v36 = vsub.f32 %v14306_v7, %v10580_v22  ;;  %v11066_v38 = vld [vmem:[%s13600_s3] ss:$0 sm:$0xff]  ;;  %v14311_v13 = vld [vmem:[#allocation51_spill] sm:$0xff] }
 0x763   :  { %v11049_v63 = vmul.f32 %v10720_v59, %v14301_v52  ;;  %v11055_v43 = vmul.f32 %v10720_v59, %v14304_v24  ;;  %v14310_v52 = vsub.f32 %v14309_v57, %v10580_v22  ;;  %v14312_v24 = vsub.f32 %v14311_v13, %v10580_v22 }
 0x764   :  { %v11061_v29 = vmul.f32 %v10720_v59, %v14307_v36  ;;  %v14313_v36 = vsub.f32 %v14223_v0, %v10580_v22 }
 0x765   :  { %14302 = vst [vmem:[#allocation20_spill] sm:$0xff] %v11049_v63  ;;  %14305 = vst [vmem:[#allocation21_spill] sm:$0xff] %v11055_v43  ;;  %v11072_v63 = vmul.f32 %v10720_v59, %v14310_v52  ;;  %v11078_v43 = vmul.f32 %v10720_v59, %v14312_v24  ;;  %v14315_v52 = vsub.f32 %v14225_v14, %v10580_v22 }
 0x766   :  { %14308 = vst [vmem:[#allocation23_spill] sm:$0xff] %v11061_v29  ;;  %v11084_v7 = vmul.f32 %v10720_v59, %v14313_v36  ;;  %v14314_v29 = vsub.f32 %v14224_v44, %v10580_v22  ;;  %v14316_v24 = vsub.f32 %v14226_v31, %v10580_v22  ;;  %v14317_v36 = vsub.f32 %v14227_v3, %v10580_v22 }
 0x767   :  { %v11096_v13 = vmul.f32 %v10720_v59, %v14315_v52  ;;  %v11118_v52 = vadd.f32 %v11066_v38, %v10731_v42  ;;  %v11122_v31 = vadd.f32 %v11066_v38, %v10737_v48  ;;  %v11126_v3 = vadd.f32 %v11066_v38, %v10743_v53 }
 0x768   :  { %v11090_v57 = vmul.f32 %v10720_v59, %v14314_v29  ;;  %v11102_v0 = vmul.f32 %v10720_v59, %v14316_v24  ;;  %v11108_v44 = vmul.f32 %v10720_v59, %v14317_v36  ;;  %v14318_v29 = vsub.f32 %v14228_v9, %v10580_v22  ;;  %v14326_v36 = vld [vmem:[#allocation10_spill] sm:$0xff] }
 0x769   :  { %14319 = vst [vmem:[#allocation24_spill] sm:$0xff] %v11118_v52  ;;  %14320 = vst [vmem:[#allocation25_spill] sm:$0xff] %v11122_v31  ;;  %v11130_v24 = vadd.f32 %v11066_v38, %v10749_v32  ;;  %v11134_v22 = vadd.f32 %v11066_v38, %v10755_v11  ;;  %v11138_v9 = vadd.f32 %v11066_v38, %v10761_v15 }
 0x76a   :  { %v11114_v14 = vmul.f32 %v10720_v59, %v14318_v29  ;;  %v11142_v42 = vadd.f32 %v11066_v38, %v10767_v17  ;;  %v11146_v53 = vadd.f32 %v11066_v38, %v10773_v18  ;;  %v11150_v59 = vadd.f32 %v11066_v38, %v10779_v5  ;;  %v14328_v29 = vld [vmem:[#allocation12_spill] sm:$0xff] }
 0x76b   :  { %v11154_v48 = vadd.f32 %v11066_v38, %v10785_v16  ;;  %v11158_v32 = vadd.f32 %v11066_v38, %v10791_v30  ;;  %v11162_v11 = vadd.f32 %v11066_v38, %v10797_v37  ;;  %v11166_v15 = vadd.f32 %v11066_v38, %v10803_v61 }
 0x76c   :  { %v11170_v17 = vadd.f32 %v11066_v38, %v10809_v19  ;;  %v11174_v18 = vadd.f32 %v11066_v38, %v10815_v60  ;;  %v11178_v5 = vadd.f32 %v11066_v38, %v10821_v26  ;;  %v11182_v16 = vadd.f32 %v11066_v38, %v10827_v39 }
 0x76d   :  { %v11186_v30 = vadd.f32 %v11066_v38, %v10833_v41  ;;  %v11190_v37 = vadd.f32 %v11066_v38, %v10839_v6  ;;  %v11194_v61 = vadd.f32 %v11066_v38, %v10845_v40  ;;  %v11198_v19 = vadd.f32 %v11066_v38, %v10851_v8 }
 0x76e   :  { %v11202_v60 = vadd.f32 %v11066_v38, %v10857_v58  ;;  %v11206_v26 = vadd.f32 %v11066_v38, %v10863_v10  ;;  %v11210_v39 = vadd.f32 %v11066_v38, %v10869_v21  ;;  %v11214_v41 = vadd.f32 %v11066_v38, %v10875_v62 }
 0x76f   :  { %v11218_v6 = vadd.f32 %v11066_v38, %v10881_v2  ;;  %v11222_v40 = vadd.f32 %v11066_v38, %v10887_v46  ;;  %v11226_v8 = vadd.f32 %v11066_v38, %v10893_v47  ;;  %v11230_v58 = vadd.f32 %v11066_v38, %v10899_v56 }
 0x770   :  { %v11234_v10 = vadd.f32 %v11066_v38, %v10905_v55  ;;  %v11238_v21 = vadd.f32 %v11066_v38, %v10911_v20  ;;  %v11242_v62 = vadd.f32 %v11066_v38, %v10917_v23  ;;  %v11246_v2 = vadd.f32 %v11066_v38, %v10923_v33 }
 0x771   :  { %v11250_v46 = vadd.f32 %v11066_v38, %v10929_v4  ;;  %v11254_v47 = vadd.f32 %v11066_v38, %v10935_v50  ;;  %v11258_v56 = vadd.f32 %v11066_v38, %v10941_v54  ;;  %v11262_v55 = vadd.f32 %v11066_v38, %v10947_v12 }
 0x772   :  { %v11266_v20 = vadd.f32 %v11066_v38, %v10953_v35  ;;  %v11270_v23 = vadd.f32 %v11066_v38, %v10959_v49  ;;  %v11274_v33 = vadd.f32 %v11066_v38, %v10965_v25  ;;  %v11278_v4 = vadd.f32 %v11066_v38, %v10971_v27  ;;  %v14323_v49 = vld [vmem:[#allocation7_spill] sm:$0xff]  ;;  %v14325_v27 = vld [vmem:[#allocation8_spill] sm:$0xff] }
 0x773   :  { %v11282_v50 = vadd.f32 %v11066_v38, %v10977_v45  ;;  %v11286_v54 = vadd.f32 %v11066_v38, %v10983_v34  ;;  %v11290_v12 = vadd.f32 %v11066_v38, %v10989_v1  ;;  %v11294_v35 = vadd.f32 %v11066_v38, %v10995_v51 }
 0x774   :  { %v11298_v25 = vadd.f32 %v11066_v38, %v14323_v49  ;;  %v11302_v45 = vadd.f32 %v11066_v38, %v14325_v27  ;;  %v11306_v34 = vadd.f32 %v11066_v38, %v14326_v36  ;;  %v11310_v1 = vadd.f32 %v11066_v38, %v14328_v29 }
 0x775   :  { %14321 = vst [vmem:[#allocation9_spill] sm:$0xff] %v11290_v12  ;;  %14322 = vst [vmem:[#allocation27_spill] sm:$0xff] %v11294_v35  ;;  %v14330_v12 = vld [vmem:[#allocation14_spill] sm:$0xff]  ;;  %v14332_v35 = vld [vmem:[#allocation16_spill] sm:$0xff]  ;;  %v11326_v36 = vadd.f32 %v11066_v38, %v11043_v28  ;;  %v11346_v28 = vadd.f32 %v11066_v38, %v11078_v43  ;;  %v11366_v43 = vadd.f32 %v11066_v38, %v11108_v44  ;;  %v4571_v44 = vmax.f32 %v11146_v53, 0.0 }
 0x776   :  { %14324 = vst [vmem:[#allocation28_spill] sm:$0xff] %v11298_v25  ;;  %14327 = vst [vmem:[#allocation38_spill] sm:$0xff] %v11306_v34  ;;  %v11314_v51 = vadd.f32 %v11066_v38, %v14330_v12  ;;  %v11318_v49 = vadd.f32 %v11066_v38, %v14332_v35  ;;  %v14333_v25 = vld [vmem:[#allocation17_spill] sm:$0xff]  ;;  %v14334_v34 = vld [vmem:[#allocation20_spill] sm:$0xff]  ;;  %v4581_v53 = vmax.f32 %v11186_v30, 0.0  ;;  %v4591_v30 = vmax.f32 %v11226_v8, 0.0 }
 0x777   :  { %14329 = vst [vmem:[#allocation47_spill] sm:$0xff] %v11310_v1  ;;  %v11322_v27 = vadd.f32 %v11066_v38, %v14333_v25  ;;  %v11330_v29 = vadd.f32 %v11066_v38, %v14334_v34  ;;  %v14335_v1 = vld [vmem:[#allocation21_spill] sm:$0xff]  ;;  %v11342_v25 = vadd.f32 %v11066_v38, %v11072_v63  ;;  %14338 = vst [vmem:[#allocation39_spill] sm:$0xff] %v11346_v28  ;;  %v4601_v8 = vmax.f32 %v11266_v20, 0.0 }
 0x778   :  { %14331 = vst [vmem:[#allocation33_spill] sm:$0xff] %v11314_v51  ;;  %v11334_v12 = vadd.f32 %v11066_v38, %v14335_v1  ;;  %v14336_v51 = vld [vmem:[#allocation23_spill] sm:$0xff]  ;;  %v11350_v34 = vadd.f32 %v11066_v38, %v11084_v7  ;;  %v11354_v1 = vadd.f32 %v11066_v38, %v11090_v57  ;;  %v11362_v63 = vadd.f32 %v11066_v38, %v11102_v0 }
 0x779   :  { %v11338_v35 = vadd.f32 %v11066_v38, %v14336_v51  ;;  %14337 = vst [vmem:[#allocation36_spill] sm:$0xff] %v11342_v25  ;;  %v11358_v51 = vadd.f32 %v11066_v38, %v11096_v13  ;;  %14343 = vst [vmem:[#allocation49_spill] sm:$0xff] %v11366_v43  ;;  %v11370_v7 = vadd.f32 %v11066_v38, %v11114_v14  ;;  %v4567_v13 = vmax.f32 %v11130_v24, 0.0 }
 0x77a   :  { %14339 = vst [vmem:[#allocation41_spill] sm:$0xff] %v11350_v34  ;;  %14340 = vst [vmem:[#allocation43_spill] sm:$0xff] %v11354_v1  ;;  %v4566_v1 = vmax.f32 %v11126_v3, 0.0  ;;  %v4569_v0 = vmax.f32 %v11138_v9, 0.0  ;;  %v4572_v43 = vmax.f32 %v11150_v59, 0.0  ;;  %v4573_v38 = vmax.f32 %v11154_v48, 0.0 }
 0x77b   :  { %14341 = vst [vmem:[#allocation45_spill] sm:$0xff] %v11358_v51  ;;  %14342 = vst [vmem:[#allocation48_spill] sm:$0xff] %v11362_v63  ;;  %v4568_v51 = vmax.f32 %v11134_v22, 0.0  ;;  %v4570_v63 = vmax.f32 %v11142_v42, 0.0  ;;  %v4574_v14 = vmax.f32 %v11158_v32, 0.0  ;;  %v4575_v57 = vmax.f32 %v11162_v11, 0.0 }
 0x77c   :  { %14344 = vst [vmem:[#allocation50_spill] sm:$0xff] %v11370_v7  ;;  %v4576_v3 = vmax.f32 %v11166_v15, 0.0  ;;  %v4577_v24 = vmax.f32 %v11170_v17, 0.0  ;;  %v4578_v22 = vmax.f32 %v11174_v18, 0.0  ;;  %v4579_v9 = vmax.f32 %v11178_v5, 0.0  ;;  %v14345_v34 = vld [vmem:[#allocation9_spill] sm:$0xff] }
 0x77d   :  { %v4580_v42 = vmax.f32 %v11182_v16, 0.0  ;;  %v4582_v59 = vmax.f32 %v11190_v37, 0.0  ;;  %v4583_v48 = vmax.f32 %v11194_v61, 0.0  ;;  %v4584_v32 = vmax.f32 %v11198_v19, 0.0  ;;  %v14346_v31 = vld [vmem:[#allocation27_spill] sm:$0xff]  ;;  %v14347_v52 = vld [vmem:[#allocation28_spill] sm:$0xff] }
 0x77e   :  { %v4585_v11 = vmax.f32 %v11202_v60, 0.0  ;;  %v4586_v15 = vmax.f32 %v11206_v26, 0.0  ;;  %v4587_v17 = vmax.f32 %v11210_v39, 0.0  ;;  %v4588_v18 = vmax.f32 %v11214_v41, 0.0  ;;  %v14348_v7 = vld [vmem:[#allocation38_spill] sm:$0xff]  ;;  %v14349_v28 = vld [vmem:[#allocation47_spill] sm:$0xff] }
 0x77f   :  { %v4589_v5 = vmax.f32 %v11218_v6, 0.0  ;;  %v4590_v16 = vmax.f32 %v11222_v40, 0.0  ;;  %v4592_v37 = vmax.f32 %v11230_v58, 0.0  ;;  %v4593_v61 = vmax.f32 %v11234_v10, 0.0  ;;  %v14350_v25 = vld [vmem:[#allocation33_spill] sm:$0xff] }
 0x780   :  { %v4594_v19 = vmax.f32 %v11238_v21, 0.0  ;;  %v4595_v60 = vmax.f32 %v11242_v62, 0.0  ;;  %v4596_v26 = vmax.f32 %v11246_v2, 0.0  ;;  %v4597_v39 = vmax.f32 %v11250_v46, 0.0 }
 0x781   :  { %v4598_v41 = vmax.f32 %v11254_v47, 0.0  ;;  %v4599_v6 = vmax.f32 %v11258_v56, 0.0  ;;  %v4600_v40 = vmax.f32 %v11262_v55, 0.0  ;;  %v4602_v58 = vmax.f32 %v11270_v23, 0.0 }
 0x782   :  { %v4603_v10 = vmax.f32 %v11274_v33, 0.0  ;;  %v4604_v21 = vmax.f32 %v11278_v4, 0.0  ;;  %v4605_v62 = vmax.f32 %v11282_v50, 0.0  ;;  %v4606_v2 = vmax.f32 %v11286_v54, 0.0 }
 0x783   :  { %v4607_v46 = vmax.f32 %v14345_v34, 0.0  ;;  %v4608_v47 = vmax.f32 %v14346_v31, 0.0  ;;  %v4609_v56 = vmax.f32 %v14347_v52, 0.0  ;;  %v4610_v55 = vmax.f32 %v11302_v45, 0.0  ;;  %v14351_v45 = vld [vmem:[#allocation36_spill] sm:$0xff] }
 0x784   :  { %v4611_v20 = vmax.f32 %v14348_v7, 0.0  ;;  %v4612_v23 = vmax.f32 %v14349_v28, 0.0  ;;  %v4613_v33 = vmax.f32 %v14350_v25, 0.0  ;;  %v4614_v4 = vmax.f32 %v11318_v49, 0.0  ;;  %v14352_v28 = vld [vmem:[#allocation39_spill] sm:$0xff]  ;;  %v14353_v49 = vld [vmem:[#allocation41_spill] sm:$0xff] }
 0x785   :  { %v4615_v50 = vmax.f32 %v11322_v27, 0.0  ;;  %v4616_v54 = vmax.f32 %v11326_v36, 0.0  ;;  %v4617_v34 = vmax.f32 %v11330_v29, 0.0  ;;  %v4618_v31 = vmax.f32 %v11334_v12, 0.0  ;;  %v14354_v36 = vld [vmem:[#allocation43_spill] sm:$0xff]  ;;  %v14355_v12 = vld [vmem:[#allocation45_spill] sm:$0xff] }
 0x786   :  { %v4619_v52 = vmax.f32 %v11338_v35, 0.0  ;;  %v4620_v7 = vmax.f32 %v14351_v45, 0.0  ;;  %v4621_v25 = vmax.f32 %v14352_v28, 0.0  ;;  %v4622_v27 = vmax.f32 %v14353_v49, 0.0  ;;  %v14356_v45 = vld [vmem:[#allocation48_spill] sm:$0xff]  ;;  %v14357_v49 = vld [vmem:[#allocation49_spill] sm:$0xff] }
 0x787   :  { %v4623_v29 = vmax.f32 %v14354_v36, 0.0  ;;  %v4624_v35 = vmax.f32 %v14355_v12, 0.0  ;;  %v4625_v28 = vmax.f32 %v14356_v45, 0.0  ;;  %v4626_v36 = vmax.f32 %v14357_v49, 0.0  ;;  %v14358_v12 = vld [vmem:[#allocation50_spill] sm:$0xff]  ;;  %v14359_v49 = vld [vmem:[#allocation24_spill] sm:$0xff] }
 0x788   :  { %v4627_v45 = vmax.f32 %v14358_v12, 0.0  ;;  %v14360_v12 = vmax.f32 %v14359_v49, 0.0 }
 0x78a   :  { %v4628_v49 = vmax.f32 %v14360_v12, %v4566_v1  ;;  %v14361_v1 = vld [vmem:[#allocation25_spill] sm:$0xff] }
 0x78b   :  { %v14362_v12 = vmax.f32 %v14361_v1, 0.0 }
 0x78d   :  { %v4629_v1 = vmax.f32 %v14362_v12, %v4567_v13  ;;  %v4630_v12 = vmax.f32 %v4568_v51, %v4570_v63  ;;  %v4631_v13 = vmax.f32 %v4569_v0, %v4571_v44  ;;  %v4632_v51 = vmax.f32 %v4572_v43, %v4574_v14 }
 0x78e   :  { %v4633_v63 = vmax.f32 %v4573_v38, %v4575_v57  ;;  %v4634_v0 = vmax.f32 %v4576_v3, %v4578_v22  ;;  %v11440_v44 = vmax.f32 %v4577_v24, %v4579_v9  ;;  %v11442_v14 = vmax.f32 %v4580_v42, %v4582_v59 }
 0x78f   :  { %v11444_v43 = vmax.f32 %v4581_v53, %v4583_v48  ;;  %v11446_v38 = vmax.f32 %v4584_v32, %v4586_v15  ;;  %v11448_v57 = vmax.f32 %v4585_v11, %v4587_v17  ;;  %v11450_v3 = vmax.f32 %v4588_v18, %v4590_v16 }
 0x790   :  { %14363 = vst [vmem:[#allocation13_spill] sm:$0xff] %v11440_v44  ;;  %v11452_v22 = vmax.f32 %v4589_v5, %v4591_v30  ;;  %v11454_v9 = vmax.f32 %v4592_v37, %v4594_v19  ;;  %v11456_v24 = vmax.f32 %v4593_v61, %v4595_v60  ;;  %v11458_v44 = vmax.f32 %v4596_v26, %v4598_v41  ;;  %v14364_v26 = vld [vmem:[#allocation6_spill] sm:$0xff] }
 0x791   :  { %v11460_v42 = vmax.f32 %v4597_v39, %v4599_v6  ;;  %v11462_v59 = vmax.f32 %v4600_v40, %v4602_v58  ;;  %v11464_v53 = vmax.f32 %v4601_v8, %v4603_v10  ;;  %v11466_v48 = vmax.f32 %v4604_v21, %v4606_v2 }
 0x792   :  { %v11468_v32 = vmax.f32 %v4605_v62, %v4607_v46  ;;  %v11470_v11 = vmax.f32 %v4608_v47, %v4610_v55  ;;  %v11472_v15 = vmax.f32 %v4609_v56, %v4611_v20  ;;  %v11474_v17 = vmax.f32 %v4612_v23, %v4614_v4 }
 0x793   :  { %v11476_v18 = vmax.f32 %v4613_v33, %v4615_v50  ;;  %v11478_v5 = vmax.f32 %v4616_v54, %v4618_v31  ;;  %v11480_v16 = vmax.f32 %v4617_v34, %v4619_v52  ;;  %v11482_v30 = vmax.f32 %v4620_v7, %v4622_v27 }
 0x794   :  { %v11484_v37 = vmax.f32 %v4621_v25, %v4623_v29  ;;  %v11486_v61 = vmax.f32 %v4624_v35, %v4626_v36  ;;  %v11488_v19 = vmax.f32 %v4625_v28, %v4627_v45  ;;  %v4692_v60 = vcombine.high %v4628_v49, %v4628_v49 }
 0x795   :  { %v11491_v39 = vrot.slane %v4628_v49, %v14364_v26  ;;  %v4709_v41 = vcombine.high %v4629_v1, %v4629_v1  ;;  %v11494_v6 = vrot.slane %v4629_v1, %v14364_v26  ;;  %v4726_v40 = vcombine.high %v4630_v12, %v4630_v12 }
 0x796   :  { %v11497_v8 = vrot.slane %v4630_v12, %v14364_v26  ;;  %v4743_v58 = vcombine.high %v4631_v13, %v4631_v13  ;;  %v11500_v10 = vrot.slane %v4631_v13, %v14364_v26  ;;  %v11503_v21 = vrot.slane %v4692_v60, %v14364_v26 }
 0x797   :  { %14365 = vst [vmem:[#allocation52_spill] sm:$0xff] %v11491_v39  ;;  %14366 = vst [vmem:[#allocation54_spill] sm:$0xff] %v11494_v6  ;;  %v11507_v62 = vcombine.high %v11491_v39, %v11491_v39  ;;  %v11510_v2 = vrot.slane %v4709_v41, %v14364_v26  ;;  %v11514_v46 = vcombine.high %v11494_v6, %v11494_v6  ;;  %v14374_v36 = vld [vmem:[#allocation13_spill] sm:$0xff] }
 0x798   :  { %14367 = vst [vmem:[#allocation56_spill] sm:$0xff] %v11503_v21  ;;  %v11517_v47 = vrot.slane %v4726_v40, %v14364_v26  ;;  %v11521_v56 = vcombine.high %v11497_v8, %v11497_v8  ;;  %v11524_v55 = vrot.slane %v4743_v58, %v14364_v26  ;;  %v11528_v20 = vcombine.high %v11500_v10, %v11500_v10 }
 0x799   :  { %14368 = vst [vmem:[#allocation57_spill] sm:$0xff] %v11507_v62  ;;  %v11532_v23 = vcombine.high %v11503_v21, %v11503_v21  ;;  %v11536_v33 = vcombine.high %v11510_v2, %v11510_v2  ;;  %v4760_v4 = vcombine.high %v4632_v51, %v4632_v51  ;;  %v11539_v50 = vrot.slane %v4632_v51, %v14364_v26 }
 0x79a   :  { %v11543_v54 = vcombine.high %v11517_v47, %v11517_v47  ;;  %v11547_v34 = vcombine.high %v11524_v55, %v11524_v55  ;;  %v4777_v31 = vcombine.high %v4633_v63, %v4633_v63  ;;  %v11550_v52 = vrot.slane %v4633_v63, %v14364_v26 }
 0x79b   :  { %14369 = vst [vmem:[#allocation15_spill] sm:$0xff] %v11532_v23  ;;  %v11553_v7 = vrot.slane %v4760_v4, %v14364_v26  ;;  %v11557_v25 = vcombine.high %v11539_v50, %v11539_v50  ;;  %v4794_v27 = vcombine.high %v4634_v0, %v4634_v0  ;;  %v11560_v29 = vrot.slane %v4634_v0, %v14364_v26 }
 0x79c   :  { %14370 = vst [vmem:[#allocation18_spill] sm:$0xff] %v11550_v52  ;;  %v11563_v35 = vrot.slane %v4777_v31, %v14364_v26  ;;  %v11567_v28 = vcombine.high %v11550_v52, %v11550_v52  ;;  %v4811_v45 = vcombine.high %v14374_v36, %v14374_v36  ;;  %v11573_v49 = vrot.slane %v14374_v36, %v14364_v26 }
 0x79d   :  { %14371 = vst [vmem:[#allocation55_spill] sm:$0xff] %v11560_v29  ;;  %v11577_v1 = vcombine.high %v11553_v7, %v11553_v7  ;;  %v11580_v12 = vrot.slane %v4794_v27, %v14364_v26  ;;  %v11584_v13 = vcombine.high %v11560_v29, %v11560_v29  ;;  %v4828_v51 = vcombine.high %v11442_v14, %v11442_v14 }
 0x79e   :  { %14372 = vst [vmem:[#allocation30_spill] sm:$0xff] %v11563_v35  ;;  %14373 = vst [vmem:[#allocation29_spill] sm:$0xff] %v11567_v28  ;;  %v11590_v63 = vcombine.high %v11563_v35, %v11563_v35  ;;  %v11593_v0 = vrot.slane %v4811_v45, %v14364_v26  ;;  %v11597_v60 = vcombine.high %v11573_v49, %v11573_v49 }
 0x79f   :  { %14375 = vst [vmem:[#allocation53_spill] sm:$0xff] %v11573_v49  ;;  %14376 = vst [vmem:[#allocation26_spill] sm:$0xff] %v11580_v12  ;;  %v11601_v41 = vrot.slane %v11442_v14, %v14364_v26  ;;  %v11605_v40 = vcombine.high %v11580_v12, %v11580_v12  ;;  %v11608_v58 = vrot.slane %v4828_v51, %v14364_v26 }
 0x7a0   :  { %14377 = vst [vmem:[#allocation4_spill] sm:$0xff] %v11584_v13  ;;  %14378 = vst [vmem:[#allocation34_spill] sm:$0xff] %v11593_v0  ;;  %v4845_v4 = vcombine.high %v11444_v43, %v11444_v43  ;;  %v11614_v31 = vrot.slane %v11444_v43, %v14364_v26  ;;  %v11618_v27 = vcombine.high %v11593_v0, %v11593_v0 }
 0x7a1   :  { %14379 = vst [vmem:[#allocation19_spill] sm:$0xff] %v11597_v60  ;;  %14380 = vst [vmem:[#allocation22_spill] sm:$0xff] %v11601_v41  ;;  %v11622_v14 = vcombine.high %v11601_v41, %v11601_v41  ;;  %v4862_v36 = vcombine.high %v11446_v38, %v11446_v38  ;;  %v11628_v45 = vrot.slane %v11446_v38, %v14364_v26 }
 0x7a2   :  { %14381 = vst [vmem:[#allocation59_spill] sm:$0xff] %v11605_v40  ;;  %14382 = vst [vmem:[#allocation58_spill] sm:$0xff] %v11608_v58  ;;  %v11632_v51 = vcombine.high %v11608_v58, %v11608_v58  ;;  %v11635_v43 = vrot.slane %v4845_v4, %v14364_v26  ;;  %v4896_v4 = vcombine.high %v11450_v3, %v11450_v3 }
 0x7a3   :  { %14383 = vst [vmem:[#allocation32_spill] sm:$0xff] %v11614_v31  ;;  %14384 = vst [vmem:[#allocation31_spill] sm:$0xff] %v11618_v27  ;;  %v11639_v27 = vcombine.high %v11614_v31, %v11614_v31  ;;  %v11644_v41 = vrot.slane %v4862_v36, %v14364_v26  ;;  %v11648_v38 = vcombine.high %v11628_v45, %v11628_v45 }
 0x7a4   :  { %14385 = vst [vmem:[#allocation37_spill] sm:$0xff] %v11622_v14  ;;  %14386 = vst [vmem:[#allocation35_spill] sm:$0xff] %v11628_v45  ;;  %v4879_v14 = vcombine.high %v11448_v57, %v11448_v57  ;;  %v11665_v36 = vrot.slane %v11450_v3, %v14364_v26 }
 0x7a5   :  { %14387 = vst [vmem:[#allocation42_spill] sm:$0xff] %v11632_v51  ;;  %14388 = vst [vmem:[#allocation40_spill] sm:$0xff] %v11635_v43  ;;  %v11652_v51 = vrot.slane %v11448_v57, %v14364_v26  ;;  %v11671_v57 = vcombine.high %v11644_v41, %v11644_v41 }
 0x7a6   :  { %14389 = vst [vmem:[#allocation46_spill] sm:$0xff] %v11639_v27  ;;  %14390 = vst [vmem:[#allocation44_spill] sm:$0xff] %v11644_v41  ;;  %v11658_v27 = vcombine.high %v11635_v43, %v11635_v43  ;;  %v11661_v31 = vrot.slane %v4879_v14, %v14364_v26  ;;  %v11682_v14 = vrot.slane %v11452_v22, %v14364_v26 }
 0x7a7   :  { %14391 = vst [vmem:[#allocation11_spill] sm:$0xff] %v11648_v38  ;;  %14392 = vst [vmem:[#allocation51_spill] sm:$0xff] %v11652_v51  ;;  %v4913_v38 = vcombine.high %v11452_v22, %v11452_v22  ;;  %v11675_v45 = vcombine.high %v11652_v51, %v11652_v51  ;;  %v11690_v43 = vcombine.high %v11665_v36, %v11665_v36 }
 0x7a8   :  { %14393 = vst [vmem:[#allocation7_spill] sm:$0xff] %v11658_v27  ;;  %14394 = vst [vmem:[#allocation8_spill] sm:$0xff] %v11661_v31  ;;  %v11678_v27 = vrot.slane %v4896_v4, %v14364_v26  ;;  %v11686_v3 = vcombine.high %v11661_v31, %v11661_v31  ;;  %v11703_v22 = vcombine.high %v11682_v14, %v11682_v14 }
 0x7a9   :  { %14395 = vst [vmem:[#allocation10_spill] sm:$0xff] %v11665_v36  ;;  %14396 = vst [vmem:[#allocation12_spill] sm:$0xff] %v11671_v57  ;;  %v11693_v57 = vrot.slane %v4913_v38, %v14364_v26 }
 0x7aa   :  { %14397 = vst [vmem:[#allocation14_spill] sm:$0xff] %v11675_v45  ;;  %14398 = vst [vmem:[#allocation16_spill] sm:$0xff] %v11678_v27  ;;  %v4930_v45 = vcombine.high %v11454_v9, %v11454_v9  ;;  %v11699_v4 = vcombine.high %v11678_v27, %v11678_v27  ;;  %v14471_v52 = vld [vmem:[#allocation31_spill] sm:$0xff] }
 0x7ab   :  { %14399 = vst [vmem:[#allocation17_spill] sm:$0xff] %v11682_v14  ;;  %14400 = vst [vmem:[#allocation20_spill] sm:$0xff] %v11686_v3  ;;  %v11707_v3 = vrot.slane %v11454_v9, %v14364_v26  ;;  %v11713_v38 = vcombine.high %v11693_v57, %v11693_v57  ;;  %v14473_v35 = vld [vmem:[#allocation37_spill] sm:$0xff] }
 0x7ac   :  { %14401 = vst [vmem:[#allocation21_spill] sm:$0xff] %v11690_v43  ;;  %14402 = vst [vmem:[#allocation23_spill] sm:$0xff] %v11693_v57  ;;  %v4947_v43 = vcombine.high %v11456_v24, %v11456_v24  ;;  %v11716_v36 = vrot.slane %v4930_v45, %v14364_v26  ;;  %v4981_v45 = vcombine.high %v11460_v42, %v11460_v42  ;;  %v14474_v29 = vld [vmem:[#allocation42_spill] sm:$0xff] }
 0x7ad   :  { %14403 = vst [vmem:[#allocation9_spill] sm:$0xff] %v11699_v4  ;;  %14404 = vst [vmem:[#allocation27_spill] sm:$0xff] %v11703_v22  ;;  %v11720_v4 = vrot.slane %v11456_v24, %v14364_v26  ;;  %v4964_v22 = vcombine.high %v11458_v44, %v11458_v44  ;;  %v11726_v9 = vcombine.high %v11707_v3, %v11707_v3 }
 0x7ae   :  { %14405 = vst [vmem:[#allocation28_spill] sm:$0xff] %v11707_v3  ;;  %14406 = vst [vmem:[#allocation38_spill] sm:$0xff] %v11713_v38  ;;  %v11729_v14 = vrot.slane %v4947_v43, %v14364_v26  ;;  %v11733_v38 = vrot.slane %v11458_v44, %v14364_v26  ;;  %v11739_v24 = vcombine.high %v11716_v36, %v11716_v36 }
 0x7af   :  { %14407 = vst [vmem:[#allocation47_spill] sm:$0xff] %v11716_v36  ;;  %14408 = vst [vmem:[#allocation33_spill] sm:$0xff] %v11720_v4  ;;  %v11743_v57 = vcombine.high %v11720_v4, %v11720_v4  ;;  %v11750_v43 = vrot.slane %v11460_v42, %v14364_v26  ;;  %v14478_v49 = vld [vmem:[#allocation7_spill] sm:$0xff] }
 0x7b0   :  { %14409 = vst [vmem:[#allocation36_spill] sm:$0xff] %v11726_v9  ;;  %14410 = vst [vmem:[#allocation39_spill] sm:$0xff] %v11729_v14  ;;  %v11746_v9 = vrot.slane %v4964_v22, %v14364_v26  ;;  %v11754_v44 = vcombine.high %v11729_v14, %v11729_v14  ;;  %v11758_v3 = vcombine.high %v11733_v38, %v11733_v38 }
 0x7b1   :  { %14411 = vst [vmem:[#allocation41_spill] sm:$0xff] %v11733_v38  ;;  %14412 = vst [vmem:[#allocation43_spill] sm:$0xff] %v11739_v24  ;;  %v11761_v24 = vrot.slane %v4981_v45, %v14364_v26  ;;  %v11771_v42 = vcombine.high %v11750_v43, %v11750_v43 }
 0x7b2   :  { %14413 = vst [vmem:[#allocation45_spill] sm:$0xff] %v11743_v57  ;;  %14414 = vst [vmem:[#allocation48_spill] sm:$0xff] %v11746_v9  ;;  %v4998_v57 = vcombine.high %v11462_v59, %v11462_v59  ;;  %v11767_v22 = vcombine.high %v11746_v9, %v11746_v9  ;;  %v14483_v13 = vld [vmem:[#allocation20_spill] sm:$0xff] }
 0x7b3   :  { %14415 = vst [vmem:[#allocation49_spill] sm:$0xff] %v11750_v43  ;;  %14416 = vst [vmem:[#allocation50_spill] sm:$0xff] %v11754_v44  ;;  %v11775_v44 = vrot.slane %v11462_v59, %v14364_v26  ;;  %v11781_v45 = vcombine.high %v11761_v24, %v11761_v24  ;;  %v14485_v40 = vld [vmem:[#allocation21_spill] sm:$0xff] }
 0x7b4   :  { %14417 = vst [vmem:[#allocation24_spill] sm:$0xff] %v11758_v3  ;;  %14418 = vst [vmem:[#allocation25_spill] sm:$0xff] %v11761_v24  ;;  %v5015_v3 = vcombine.high %v11464_v53, %v11464_v53  ;;  %v11784_v38 = vrot.slane %v4998_v57, %v14364_v26  ;;  %v5049_v57 = vcombine.high %v11468_v32, %v11468_v32  ;;  %v14486_v60 = vld [vmem:[#allocation9_spill] sm:$0xff] }
 0x7b5   :  { %14419 = vst [vmem:[#allocation6_spill] sm:$0xff] %v11767_v22  ;;  %14420 = vst [vmem:[#allocation13_spill] sm:$0xff] %v11771_v42  ;;  %v11788_v22 = vrot.slane %v11464_v53, %v14364_v26  ;;  %v5032_v42 = vcombine.high %v11466_v48, %v11466_v48  ;;  %v11794_v59 = vcombine.high %v11775_v44, %v11775_v44  ;;  %v14490_v51 = vld [vmem:[#allocation38_spill] sm:$0xff] }
 0x7b6   :  { %14421 = vst [vmem:[#allocation60_spill] sm:$0xff] %v11775_v44  ;;  %14422 = vst [vmem:[#allocation61_spill] sm:$0xff] %v11781_v45  ;;  %v11797_v43 = vrot.slane %v5015_v3, %v14364_v26  ;;  %v11801_v45 = vrot.slane %v11466_v48, %v14364_v26  ;;  %v11807_v53 = vcombine.high %v11784_v38, %v11784_v38 }
 0x7b7   :  { %14423 = vst [vmem:[#allocation62_spill] sm:$0xff] %v11784_v38  ;;  %14424 = vst [vmem:[#allocation63_spill] sm:$0xff] %v11788_v22  ;;  %v11811_v24 = vcombine.high %v11788_v22, %v11788_v22  ;;  %v11818_v3 = vrot.slane %v11468_v32, %v14364_v26 }
 0x7b8   :  { %14425 = vst [vmem:[#allocation64_spill] sm:$0xff] %v11794_v59  ;;  %14426 = vst [vmem:[#allocation65_spill] sm:$0xff] %v11797_v43  ;;  %v11814_v59 = vrot.slane %v5032_v42, %v14364_v26  ;;  %v11822_v48 = vcombine.high %v11797_v43, %v11797_v43  ;;  %v11826_v44 = vcombine.high %v11801_v45, %v11801_v45 }
 0x7b9   :  { %14427 = vst [vmem:[#allocation66_spill] sm:$0xff] %v11801_v45  ;;  %14428 = vst [vmem:[#allocation67_spill] sm:$0xff] %v11807_v53  ;;  %v11829_v53 = vrot.slane %v5049_v57, %v14364_v26  ;;  %v11839_v32 = vcombine.high %v11818_v3, %v11818_v3 }
 0x7ba   :  { %14429 = vst [vmem:[#allocation68_spill] sm:$0xff] %v11811_v24  ;;  %14430 = vst [vmem:[#allocation69_spill] sm:$0xff] %v11814_v59  ;;  %v5066_v24 = vcombine.high %v11470_v11, %v11470_v11  ;;  %v11835_v42 = vcombine.high %v11814_v59, %v11814_v59  ;;  %v14495_v0 = vld [vmem:[#allocation50_spill] sm:$0xff] }
 0x7bb   :  { %14431 = vst [vmem:[#allocation70_spill] sm:$0xff] %v11818_v3  ;;  %14432 = vst [vmem:[#allocation71_spill] sm:$0xff] %v11822_v48  ;;  %v11843_v48 = vrot.slane %v11470_v11, %v14364_v26  ;;  %v11849_v57 = vcombine.high %v11829_v53, %v11829_v53  ;;  %v14497_v28 = vld [vmem:[#allocation24_spill] sm:$0xff] }
 0x7bc   :  { %14433 = vst [vmem:[#allocation72_spill] sm:$0xff] %v11826_v44  ;;  %14434 = vst [vmem:[#allocation73_spill] sm:$0xff] %v11829_v53  ;;  %v5083_v44 = vcombine.high %v11472_v15, %v11472_v15  ;;  %v11852_v45 = vrot.slane %v5066_v24, %v14364_v26  ;;  %v5117_v24 = vcombine.high %v11476_v18, %v11476_v18  ;;  %v14498_v58 = vld [vmem:[#allocation6_spill] sm:$0xff] }
 0x7bd   :  { %14435 = vst [vmem:[#allocation74_spill] sm:$0xff] %v11835_v42  ;;  %14436 = vst [vmem:[#allocation75_spill] sm:$0xff] %v11839_v32  ;;  %v11856_v42 = vrot.slane %v11472_v15, %v14364_v26  ;;  %v5100_v32 = vcombine.high %v11474_v17, %v11474_v17  ;;  %v11862_v11 = vcombine.high %v11843_v48, %v11843_v48  ;;  %v14502_v4 = vld [vmem:[#allocation61_spill] sm:$0xff] }
 0x7be   :  { %14437 = vst [vmem:[#allocation76_spill] sm:$0xff] %v11843_v48  ;;  %14438 = vst [vmem:[#allocation77_spill] sm:$0xff] %v11849_v57  ;;  %v11865_v3 = vrot.slane %v5083_v44, %v14364_v26  ;;  %v11869_v57 = vrot.slane %v11474_v17, %v14364_v26  ;;  %v11875_v15 = vcombine.high %v11852_v45, %v11852_v45 }
 0x7bf   :  { %14439 = vst [vmem:[#allocation78_spill] sm:$0xff] %v11852_v45  ;;  %14440 = vst [vmem:[#allocation79_spill] sm:$0xff] %v11856_v42  ;;  %v11879_v53 = vcombine.high %v11856_v42, %v11856_v42  ;;  %v11886_v44 = vrot.slane %v11476_v18, %v14364_v26 }
 0x7c0   :  { %14441 = vst [vmem:[#allocation80_spill] sm:$0xff] %v11862_v11  ;;  %14442 = vst [vmem:[#allocation81_spill] sm:$0xff] %v11865_v3  ;;  %v11882_v11 = vrot.slane %v5100_v32, %v14364_v26  ;;  %v11890_v17 = vcombine.high %v11865_v3, %v11865_v3  ;;  %v11894_v48 = vcombine.high %v11869_v57, %v11869_v57 }
 0x7c1   :  { %14443 = vst [vmem:[#allocation82_spill] sm:$0xff] %v11869_v57  ;;  %14444 = vst [vmem:[#allocation83_spill] sm:$0xff] %v11875_v15  ;;  %v11897_v15 = vrot.slane %v5117_v24, %v14364_v26  ;;  %v11907_v18 = vcombine.high %v11886_v44, %v11886_v44 }
 0x7c2   :  { %14445 = vst [vmem:[#allocation84_spill] sm:$0xff] %v11879_v53  ;;  %14446 = vst [vmem:[#allocation85_spill] sm:$0xff] %v11882_v11  ;;  %v5134_v53 = vcombine.high %v11478_v5, %v11478_v5  ;;  %v11903_v32 = vcombine.high %v11882_v11, %v11882_v11  ;;  %v14507_v31 = vld [vmem:[#allocation71_spill] sm:$0xff] }
 0x7c3   :  { %14447 = vst [vmem:[#allocation86_spill] sm:$0xff] %v11886_v44  ;;  %14448 = vst [vmem:[#allocation87_spill] sm:$0xff] %v11890_v17  ;;  %v11911_v17 = vrot.slane %v11478_v5, %v14364_v26  ;;  %v11917_v24 = vcombine.high %v11897_v15, %v11897_v15  ;;  %v14509_v12 = vld [vmem:[#allocation72_spill] sm:$0xff] }
 0x7c4   :  { %14449 = vst [vmem:[#allocation88_spill] sm:$0xff] %v11894_v48  ;;  %14450 = vst [vmem:[#allocation89_spill] sm:$0xff] %v11897_v15  ;;  %v5151_v48 = vcombine.high %v11480_v16, %v11480_v16  ;;  %v11920_v57 = vrot.slane %v5134_v53, %v14364_v26  ;;  %v5185_v53 = vcombine.high %v11484_v37, %v11484_v37  ;;  %v14510_v27 = vld [vmem:[#allocation74_spill] sm:$0xff] }
 0x7c5   :  { %14451 = vst [vmem:[#allocation90_spill] sm:$0xff] %v11903_v32  ;;  %14452 = vst [vmem:[#allocation91_spill] sm:$0xff] %v11907_v18  ;;  %v11924_v32 = vrot.slane %v11480_v16, %v14364_v26  ;;  %v5168_v18 = vcombine.high %v11482_v30, %v11482_v30  ;;  %v11930_v5 = vcombine.high %v11911_v17, %v11911_v17  ;;  %v14514_v22 = vld [vmem:[#allocation77_spill] sm:$0xff] }
 0x7c6   :  { %14453 = vst [vmem:[#allocation92_spill] sm:$0xff] %v11911_v17  ;;  %14454 = vst [vmem:[#allocation93_spill] sm:$0xff] %v11917_v24  ;;  %v11933_v44 = vrot.slane %v5151_v48, %v14364_v26  ;;  %v11937_v24 = vrot.slane %v11482_v30, %v14364_v26  ;;  %v11943_v16 = vcombine.high %v11920_v57, %v11920_v57 }
 0x7c7   :  { %14455 = vst [vmem:[#allocation94_spill] sm:$0xff] %v11920_v57  ;;  %14456 = vst [vmem:[#allocation95_spill] sm:$0xff] %v11924_v32  ;;  %v11947_v15 = vcombine.high %v11924_v32, %v11924_v32  ;;  %v11954_v48 = vrot.slane %v11484_v37, %v14364_v26  ;;  %v14540_v57 = vmov %v11491_v39  ;;  %v14544_v39 = vld [vmem:[#allocation56_spill] sm:$0xff] }
 0x7c8   :  { %14457 = vst [vmem:[#allocation96_spill] sm:$0xff] %v11930_v5  ;;  %14458 = vst [vmem:[#allocation97_spill] sm:$0xff] %v11937_v24  ;;  %v11950_v5 = vrot.slane %v5168_v18, %v14364_v26  ;;  %v11958_v30 = vcombine.high %v11933_v44, %v11933_v44  ;;  %v11962_v17 = vcombine.high %v11937_v24, %v11937_v24  ;;  %v14541_v21 = vrot.slane %v14540_v57, 9 }
 0x7c9   :  { %14459 = vst [vmem:[#allocation98_spill] sm:$0xff] %v11943_v16  ;;  %14460 = vst [vmem:[#allocation99_spill] sm:$0xff] %v11947_v15  ;;  %v11965_v16 = vrot.slane %v5185_v53, %v14364_v26  ;;  %v5202_v15 = vcombine.high %v11486_v61, %v11486_v61  ;;  %v11975_v37 = vcombine.high %v11954_v48, %v11954_v48  ;;  %v14545_v6 = vrot.slane %v14544_v39, 9 }
 0x7ca   :  { %14461 = vst [vmem:[#allocation100_spill] sm:$0xff] %v11950_v5  ;;  %14462 = vst [vmem:[#allocation101_spill] sm:$0xff] %v11954_v48  ;;  %v11971_v18 = vcombine.high %v11950_v5, %v11950_v5  ;;  %v14519_v14 = vld [vmem:[#allocation87_spill] sm:$0xff]  ;;  %v12144_v62 = vmax.f32 %v14540_v57, %v14541_v21  ;;  %v14548_v5 = vld [vmem:[#allocation54_spill] sm:$0xff]  ;;  %v14550_v57 = vrot.slane %v11514_v46, 9 }
 0x7cb   :  { %14463 = vst [vmem:[#allocation102_spill] sm:$0xff] %v11958_v30  ;;  %14464 = vst [vmem:[#allocation103_spill] sm:$0xff] %v11962_v17  ;;  %v11979_v30 = vrot.slane %v11486_v61, %v14364_v26  ;;  %v5219_v17 = vcombine.high %v11488_v19, %v11488_v19  ;;  %v11985_v53 = vcombine.high %v11965_v16, %v11965_v16  ;;  %v14521_v41 = vld [vmem:[#allocation88_spill] sm:$0xff] }
 0x7cc   :  { %14465 = vst [vmem:[#allocation104_spill] sm:$0xff] %v11971_v18  ;;  %14466 = vst [vmem:[#allocation105_spill] sm:$0xff] %v11975_v37  ;;  %v11988_v24 = vrot.slane %v5202_v15, %v14364_v26  ;;  %v11992_v18 = vrot.slane %v11488_v19, %v14364_v26  ;;  %v14522_v9 = vld [vmem:[#allocation90_spill] sm:$0xff]  ;;  %v12154_v23 = vmax.f32 %v14544_v39, %v14545_v6  ;;  %v14554_v6 = vrot.slane %v11536_v33, 9 }
 0x7cd   :  { %14467 = vst [vmem:[#allocation106_spill] sm:$0xff] %v11979_v30  ;;  %14468 = vst [vmem:[#allocation107_spill] sm:$0xff] %v11985_v53  ;;  %v11997_v61 = vcombine.high %v11979_v30, %v11979_v30  ;;  %v12000_v48 = vrot.slane %v5219_v17, %v14364_v26  ;;  %v14538_v32 = vmov %v11985_v53  ;;  %v14546_v17 = vld [vmem:[#allocation15_spill] sm:$0xff] }
 0x7ce   :  { %v12006_v15 = vcombine.high %v11988_v24, %v11988_v24  ;;  %v12010_v19 = vcombine.high %v11992_v18, %v11992_v18  ;;  %v14547_v42 = vrot.slane %v14546_v17, 9 }
 0x7cf   :  { %v12016_v26 = vcombine.high %v12000_v48, %v12000_v48  ;;  %v14532_v45 = vld [vmem:[#allocation97_spill] sm:$0xff] }
 0x7d0   :  { %14469 = vst [vmem:[#allocation108_spill] sm:$0xff] %v12010_v19  ;;  %v14529_v38 = vld [vmem:[#allocation98_spill] sm:$0xff]  ;;  %v14530_v11 = vld [vmem:[#allocation99_spill] sm:$0xff]  ;;  %v14542_v19 = vld [vmem:[#allocation57_spill] sm:$0xff]  ;;  %v12159_v53 = vmax.f32 %v14546_v17, %v14547_v42  ;;  %v12179_v42 = vmax.f32 %v11536_v33, %v14554_v6  ;;  %v14556_v17 = vrot.slane %v11497_v8, 9  ;;  %v14561_v6 = vrot.slane %v11500_v10, 9 }
 0x7d1   :  { %14470 = vst [vmem:[#allocation109_spill] sm:$0xff] %v12016_v26  ;;  %v14536_v3 = vld [vmem:[#allocation101_spill] sm:$0xff]  ;;  %v14543_v30 = vrot.slane %v14542_v19, 9  ;;  %v14549_v26 = vrot.slane %v14548_v5, 9 }
 0x7d2   :  { %v14531_v43 = vld [vmem:[#allocation102_spill] sm:$0xff]  ;;  %v14533_v36 = vld [vmem:[#allocation103_spill] sm:$0xff]  ;;  %14555 = vst [vmem:[#allocation42_spill] sm:$0xff] %v12179_v42 }
 0x7d3   :  { %v14535_v59 = vld [vmem:[#allocation104_spill] sm:$0xff]  ;;  %v12149_v37 = vmax.f32 %v14542_v19, %v14543_v30  ;;  %v12164_v21 = vmax.f32 %v14548_v5, %v14549_v26  ;;  %v12169_v30 = vmax.f32 %v11514_v46, %v14550_v57  ;;  %v14552_v19 = vrot.slane %v11510_v2, 9 }
 0x7d4   :  { %v12184_v5 = vmax.f32 %v11497_v8, %v14556_v17  ;;  %v14557_v26 = vrot.slane %v11521_v56, 9  ;;  %v14558_v57 = vrot.slane %v11517_v47, 9  ;;  %v12204_v8 = vmax.f32 %v11500_v10, %v14561_v6 }
 0x7d5   :  { %14551 = vst [vmem:[#allocation31_spill] sm:$0xff] %v12169_v30  ;;  %v12174_v39 = vmax.f32 %v11510_v2, %v14552_v19  ;;  %v14559_v19 = vrot.slane %v11543_v54, 9  ;;  %v14563_v17 = vrot.slane %v11528_v20, 9  ;;  %v14571_v6 = vrot.slane %v11557_v25, 9 }
 0x7d6   :  { %v12189_v46 = vmax.f32 %v11521_v56, %v14557_v26  ;;  %v12194_v2 = vmax.f32 %v11517_v47, %v14558_v57  ;;  %14562 = vst [vmem:[#allocation20_spill] sm:$0xff] %v12204_v8  ;;  %v14565_v26 = vrot.slane %v11524_v55, 9  ;;  %v14567_v57 = vrot.slane %v11547_v34, 9 }
 0x7d7   :  { %14553 = vst [vmem:[#allocation37_spill] sm:$0xff] %v12174_v39  ;;  %v12199_v33 = vmax.f32 %v11543_v54, %v14559_v19  ;;  %v12209_v56 = vmax.f32 %v11528_v20, %v14563_v17  ;;  %v14569_v19 = vrot.slane %v11539_v50, 9  ;;  %v12229_v20 = vmax.f32 %v11557_v25, %v14571_v6  ;;  %v14582_v6 = vld [vmem:[#allocation30_spill] sm:$0xff] }
 0x7d8   :  { %v12214_v47 = vmax.f32 %v11524_v55, %v14565_v26  ;;  %v12219_v54 = vmax.f32 %v11547_v34, %v14567_v57  ;;  %v14573_v17 = vrot.slane %v11553_v7, 9  ;;  %v14574_v26 = vrot.slane %v11577_v1, 9  ;;  %v14576_v57 = vld [vmem:[#allocation18_spill] sm:$0xff] }
 0x7d9   :  { %14560 = vst [vmem:[#allocation7_spill] sm:$0xff] %v12199_v33  ;;  %14564 = vst [vmem:[#allocation21_spill] sm:$0xff] %v12209_v56  ;;  %v12224_v10 = vmax.f32 %v11539_v50, %v14569_v19  ;;  %v14579_v19 = vld [vmem:[#allocation29_spill] sm:$0xff] }
 0x7da   :  { %14566 = vst [vmem:[#allocation9_spill] sm:$0xff] %v12214_v47  ;;  %14568 = vst [vmem:[#allocation38_spill] sm:$0xff] %v12219_v54  ;;  %v12234_v55 = vmax.f32 %v11553_v7, %v14573_v17  ;;  %v12239_v34 = vmax.f32 %v11577_v1, %v14574_v26  ;;  %v14577_v54 = vrot.slane %v14576_v57, 9  ;;  %v14585_v17 = vrot.slane %v11590_v63, 9  ;;  %v14587_v26 = vld [vmem:[#allocation55_spill] sm:$0xff] }
 0x7db   :  { %14570 = vst [vmem:[#allocation50_spill] sm:$0xff] %v12224_v10  ;;  %14572 = vst [vmem:[#allocation24_spill] sm:$0xff] %v12229_v20  ;;  %v14580_v10 = vrot.slane %v14579_v19, 9  ;;  %v14583_v20 = vrot.slane %v14582_v6, 9 }
 0x7dc   :  { %14575 = vst [vmem:[#allocation6_spill] sm:$0xff] %v12239_v34  ;;  %v12244_v50 = vmax.f32 %v14576_v57, %v14577_v54  ;;  %v12259_v1 = vmax.f32 %v11590_v63, %v14585_v17  ;;  %v14588_v34 = vrot.slane %v14587_v26, 9  ;;  %v14590_v57 = vld [vmem:[#allocation4_spill] sm:$0xff]  ;;  %v14598_v17 = vld [vmem:[#allocation53_spill] sm:$0xff] }
 0x7dd   :  { %v12249_v25 = vmax.f32 %v14579_v19, %v14580_v10  ;;  %v12254_v7 = vmax.f32 %v14582_v6, %v14583_v20  ;;  %v14593_v19 = vld [vmem:[#allocation26_spill] sm:$0xff]  ;;  %v14595_v6 = vld [vmem:[#allocation59_spill] sm:$0xff] }
 0x7de   :  { %14578 = vst [vmem:[#allocation61_spill] sm:$0xff] %v12244_v50  ;;  %14586 = vst [vmem:[#allocation74_spill] sm:$0xff] %v12259_v1  ;;  %v12264_v54 = vmax.f32 %v14587_v26, %v14588_v34  ;;  %v14591_v50 = vrot.slane %v14590_v57, 9  ;;  %v14599_v1 = vrot.slane %v14598_v17, 9  ;;  %v14601_v26 = vld [vmem:[#allocation19_spill] sm:$0xff] }
 0x7df   :  { %14581 = vst [vmem:[#allocation71_spill] sm:$0xff] %v12249_v25  ;;  %14584 = vst [vmem:[#allocation72_spill] sm:$0xff] %v12254_v7  ;;  %v14594_v25 = vrot.slane %v14593_v19, 9  ;;  %v14596_v7 = vrot.slane %v14595_v6, 9 }
 0x7e0   :  { %14589 = vst [vmem:[#allocation77_spill] sm:$0xff] %v12264_v54  ;;  %v12269_v10 = vmax.f32 %v14590_v57, %v14591_v50  ;;  %v12284_v34 = vmax.f32 %v14598_v17, %v14599_v1  ;;  %v14602_v54 = vrot.slane %v14601_v26, 9  ;;  %v14604_v57 = vld [vmem:[#allocation34_spill] sm:$0xff]  ;;  %v14612_v17 = vrot.slane %v14473_v35, 9 }
 0x7e1   :  { %v12274_v20 = vmax.f32 %v14593_v19, %v14594_v25  ;;  %v12279_v63 = vmax.f32 %v14595_v6, %v14596_v7  ;;  %v14607_v19 = vrot.slane %v14471_v52, 9  ;;  %v14609_v6 = vld [vmem:[#allocation22_spill] sm:$0xff] }
 0x7e2   :  { %14592 = vst [vmem:[#allocation87_spill] sm:$0xff] %v12269_v10  ;;  %14600 = vst [vmem:[#allocation90_spill] sm:$0xff] %v12284_v34  ;;  %v12289_v50 = vmax.f32 %v14601_v26, %v14602_v54  ;;  %v14605_v10 = vrot.slane %v14604_v57, 9  ;;  %v12309_v54 = vmax.f32 %v14473_v35, %v14612_v17  ;;  %v14614_v26 = vld [vmem:[#allocation58_spill] sm:$0xff]  ;;  %v14625_v17 = vld [vmem:[#allocation40_spill] sm:$0xff] }
 0x7e3   :  { %14597 = vst [vmem:[#allocation88_spill] sm:$0xff] %v12279_v63  ;;  %v12299_v7 = vmax.f32 %v14471_v52, %v14607_v19  ;;  %v14610_v63 = vrot.slane %v14609_v6, 9  ;;  %v14619_v19 = vld [vmem:[#allocation32_spill] sm:$0xff] }
 0x7e4   :  { %14603 = vst [vmem:[#allocation98_spill] sm:$0xff] %v12289_v50  ;;  %v12294_v25 = vmax.f32 %v14604_v57, %v14605_v10  ;;  %14613 = vst [vmem:[#allocation103_spill] sm:$0xff] %v12309_v54  ;;  %v14615_v50 = vrot.slane %v14614_v26, 9  ;;  %v14617_v57 = vrot.slane %v14474_v29, 9  ;;  %v14626_v54 = vrot.slane %v14625_v17, 9 }
 0x7e5   :  { %14608 = vst [vmem:[#allocation102_spill] sm:$0xff] %v12299_v7  ;;  %v12304_v1 = vmax.f32 %v14609_v6, %v14610_v63  ;;  %v14620_v7 = vrot.slane %v14619_v19, 9  ;;  %v14622_v6 = vld [vmem:[#allocation46_spill] sm:$0xff] }
 0x7e6   :  { %14606 = vst [vmem:[#allocation99_spill] sm:$0xff] %v12294_v25  ;;  %v12314_v10 = vmax.f32 %v14614_v26, %v14615_v50  ;;  %v12319_v52 = vmax.f32 %v14474_v29, %v14617_v57  ;;  %v12334_v50 = vmax.f32 %v14625_v17, %v14626_v54  ;;  %v14628_v26 = vrot.slane %v14478_v49, 9  ;;  %v14630_v57 = vld [vmem:[#allocation35_spill] sm:$0xff]  ;;  %v14639_v17 = vld [vmem:[#allocation12_spill] sm:$0xff] }
 0x7e7   :  { %14611 = vst [vmem:[#allocation97_spill] sm:$0xff] %v12304_v1  ;;  %v12324_v63 = vmax.f32 %v14619_v19, %v14620_v7  ;;  %v14623_v1 = vrot.slane %v14622_v6, 9  ;;  %v14633_v19 = vld [vmem:[#allocation11_spill] sm:$0xff]  ;;  %v14856_v42 = vld [vmem:[#allocation77_spill] sm:$0xff] }
 0x7e8   :  { %14616 = vst [vmem:[#allocation104_spill] sm:$0xff] %v12314_v10  ;;  %14618 = vst [vmem:[#allocation101_spill] sm:$0xff] %v12319_v52  ;;  %v12339_v29 = vmax.f32 %v14478_v49, %v14628_v26  ;;  %v14631_v52 = vrot.slane %v14630_v57, 9  ;;  %v14642_v26 = vld [vmem:[#allocation51_spill] sm:$0xff] }
 0x7e9   :  { %14621 = vst [vmem:[#allocation107_spill] sm:$0xff] %v12324_v63  ;;  %v12329_v35 = vmax.f32 %v14622_v6, %v14623_v1  ;;  %14627 = vst [vmem:[#allocation57_spill] sm:$0xff] %v12334_v50  ;;  %v14634_v63 = vrot.slane %v14633_v19, 9  ;;  %v14636_v6 = vld [vmem:[#allocation44_spill] sm:$0xff]  ;;  %v14640_v50 = vrot.slane %v14639_v17, 9 }
 0x7ea   :  { %14629 = vst [vmem:[#allocation56_spill] sm:$0xff] %v12339_v29  ;;  %v12344_v7 = vmax.f32 %v14630_v57, %v14631_v52  ;;  %v14643_v29 = vrot.slane %v14642_v26, 9  ;;  %v14645_v57 = vld [vmem:[#allocation14_spill] sm:$0xff]  ;;  %v14858_v56 = vld [vmem:[#allocation88_spill] sm:$0xff] }
 0x7eb   :  { %14624 = vst [vmem:[#allocation52_spill] sm:$0xff] %v12329_v35  ;;  %v12349_v1 = vmax.f32 %v14633_v19, %v14634_v63  ;;  %v14637_v35 = vrot.slane %v14636_v6, 9  ;;  %v12359_v49 = vmax.f32 %v14639_v17, %v14640_v50  ;;  %v14648_v19 = vld [vmem:[#allocation8_spill] sm:$0xff]  ;;  %v14653_v17 = vld [vmem:[#allocation10_spill] sm:$0xff] }
 0x7ec   :  { %14632 = vst [vmem:[#allocation15_spill] sm:$0xff] %v12344_v7  ;;  %v12364_v52 = vmax.f32 %v14642_v26, %v14643_v29  ;;  %v14646_v7 = vrot.slane %v14645_v57, 9  ;;  %v14656_v26 = vrot.slane %v14485_v40, 9 }
 0x7ed   :  { %14635 = vst [vmem:[#allocation54_spill] sm:$0xff] %v12349_v1  ;;  %v12354_v54 = vmax.f32 %v14636_v6, %v14637_v35  ;;  %14641 = vst [vmem:[#allocation29_spill] sm:$0xff] %v12359_v49  ;;  %v14649_v1 = vrot.slane %v14648_v19, 9  ;;  %v14651_v6 = vrot.slane %v14483_v13, 9  ;;  %v14654_v49 = vrot.slane %v14653_v17, 9 }
 0x7ee   :  { %14644 = vst [vmem:[#allocation30_spill] sm:$0xff] %v12364_v52  ;;  %v12369_v63 = vmax.f32 %v14645_v57, %v14646_v7  ;;  %v12389_v7 = vmax.f32 %v14485_v40, %v14656_v26  ;;  %v14658_v57 = vld [vmem:[#allocation16_spill] sm:$0xff]  ;;  %v14669_v26 = vld [vmem:[#allocation23_spill] sm:$0xff] }
 0x7ef   :  { %14638 = vst [vmem:[#allocation18_spill] sm:$0xff] %v12354_v54  ;;  %v12374_v35 = vmax.f32 %v14648_v19, %v14649_v1  ;;  %v12379_v50 = vmax.f32 %v14483_v13, %v14651_v6  ;;  %v12384_v29 = vmax.f32 %v14653_v17, %v14654_v49  ;;  %v14661_v19 = vrot.slane %v14486_v60, 9  ;;  %v14663_v6 = vld [vmem:[#allocation17_spill] sm:$0xff]  ;;  %v14666_v17 = vld [vmem:[#allocation27_spill] sm:$0xff] }
 0x7f0   :  { %14647 = vst [vmem:[#allocation55_spill] sm:$0xff] %v12369_v63  ;;  %14657 = vst [vmem:[#allocation53_spill] sm:$0xff] %v12389_v7  ;;  %v14659_v63 = vrot.slane %v14658_v57, 9  ;;  %v14670_v7 = vrot.slane %v14669_v26, 9 }
 0x7f1   :  { %14650 = vst [vmem:[#allocation4_spill] sm:$0xff] %v12374_v35  ;;  %14652 = vst [vmem:[#allocation26_spill] sm:$0xff] %v12379_v50  ;;  %v12399_v13 = vmax.f32 %v14486_v60, %v14661_v19  ;;  %v14664_v50 = vrot.slane %v14663_v6, 9  ;;  %v14674_v19 = vld [vmem:[#allocation28_spill] sm:$0xff] }
 0x7f2   :  { %14655 = vst [vmem:[#allocation59_spill] sm:$0xff] %v12384_v29  ;;  %v12394_v1 = vmax.f32 %v14658_v57, %v14659_v63  ;;  %v14667_v29 = vrot.slane %v14666_v17, 9  ;;  %v12414_v63 = vmax.f32 %v14669_v26, %v14670_v7  ;;  %v14672_v57 = vrot.slane %v14490_v51, 9  ;;  %v14682_v26 = vld [vmem:[#allocation43_spill] sm:$0xff] }
 0x7f3   :  { %14662 = vst [vmem:[#allocation34_spill] sm:$0xff] %v12399_v13  ;;  %v12404_v49 = vmax.f32 %v14663_v6, %v14664_v50  ;;  %v14675_v13 = vrot.slane %v14674_v19, 9  ;;  %v14677_v6 = vld [vmem:[#allocation36_spill] sm:$0xff] }
 0x7f4   :  { %14660 = vst [vmem:[#allocation19_spill] sm:$0xff] %v12394_v1  ;;  %v12409_v40 = vmax.f32 %v14666_v17, %v14667_v29  ;;  %14671 = vst [vmem:[#allocation32_spill] sm:$0xff] %v12414_v63  ;;  %v12419_v60 = vmax.f32 %v14490_v51, %v14672_v57  ;;  %v14680_v17 = vld [vmem:[#allocation47_spill] sm:$0xff]  ;;  %v14683_v63 = vrot.slane %v14682_v26, 9  ;;  %v14685_v57 = vld [vmem:[#allocation33_spill] sm:$0xff] }
 0x7f5   :  { %14665 = vst [vmem:[#allocation22_spill] sm:$0xff] %v12404_v49  ;;  %v12424_v50 = vmax.f32 %v14674_v19, %v14675_v13  ;;  %v14678_v49 = vrot.slane %v14677_v6, 9  ;;  %v14688_v19 = vld [vmem:[#allocation45_spill] sm:$0xff] }
 0x7f6   :  { %14668 = vst [vmem:[#allocation58_spill] sm:$0xff] %v12409_v40  ;;  %14673 = vst [vmem:[#allocation46_spill] sm:$0xff] %v12419_v60  ;;  %v14681_v40 = vrot.slane %v14680_v17, 9  ;;  %v12439_v51 = vmax.f32 %v14682_v26, %v14683_v63  ;;  %v14686_v60 = vrot.slane %v14685_v57, 9  ;;  %v14696_v26 = vld [vmem:[#allocation41_spill] sm:$0xff] }
 0x7f7   :  { %14676 = vst [vmem:[#allocation40_spill] sm:$0xff] %v12424_v50  ;;  %v12429_v29 = vmax.f32 %v14677_v6, %v14678_v49  ;;  %v14689_v50 = vrot.slane %v14688_v19, 9  ;;  %v14691_v6 = vld [vmem:[#allocation39_spill] sm:$0xff]  ;;  %v14874_v34 = vld [vmem:[#allocation53_spill] sm:$0xff] }
 0x7f8   :  { %v12434_v7 = vmax.f32 %v14680_v17, %v14681_v40  ;;  %14684 = vst [vmem:[#allocation11_spill] sm:$0xff] %v12439_v51  ;;  %v12444_v13 = vmax.f32 %v14685_v57, %v14686_v60  ;;  %v14694_v17 = vrot.slane %v14495_v0, 9  ;;  %v14697_v51 = vrot.slane %v14696_v26, 9 }
 0x7f9   :  { %14679 = vst [vmem:[#allocation35_spill] sm:$0xff] %v12429_v29  ;;  %v12449_v49 = vmax.f32 %v14688_v19, %v14689_v50  ;;  %v14692_v29 = vrot.slane %v14691_v6, 9  ;;  %v14699_v57 = vrot.slane %v14497_v28, 9  ;;  %v14701_v19 = vld [vmem:[#allocation48_spill] sm:$0xff]  ;;  %v14873_v10 = vld [vmem:[#allocation59_spill] sm:$0xff] }
 0x7fa   :  { %14687 = vst [vmem:[#allocation44_spill] sm:$0xff] %v12444_v13  ;;  %v12459_v63 = vmax.f32 %v14495_v0, %v14694_v17  ;;  %v12464_v60 = vmax.f32 %v14696_v26, %v14697_v51  ;;  %v14706_v17 = vld [vmem:[#allocation49_spill] sm:$0xff] }
 0x7fb   :  { %14690 = vst [vmem:[#allocation12_spill] sm:$0xff] %v12449_v49  ;;  %v12454_v40 = vmax.f32 %v14691_v6, %v14692_v29  ;;  %v12469_v50 = vmax.f32 %v14497_v28, %v14699_v57  ;;  %v14702_v49 = vrot.slane %v14701_v19, 9  ;;  %v14704_v6 = vrot.slane %v14498_v58, 9  ;;  %v14709_v26 = vld [vmem:[#allocation13_spill] sm:$0xff] }
 0x7fc   :  { %14695 = vst [vmem:[#allocation14_spill] sm:$0xff] %v12459_v63  ;;  %14698 = vst [vmem:[#allocation8_spill] sm:$0xff] %v12464_v60  ;;  %v14707_v63 = vrot.slane %v14706_v17, 9  ;;  %v14710_v60 = vrot.slane %v14709_v26, 9  ;;  %v14712_v57 = vld [vmem:[#allocation25_spill] sm:$0xff] }
 0x7fd   :  { %14693 = vst [vmem:[#allocation51_spill] sm:$0xff] %v12454_v40  ;;  %14700 = vst [vmem:[#allocation10_spill] sm:$0xff] %v12469_v50  ;;  %v12474_v29 = vmax.f32 %v14701_v19, %v14702_v49  ;;  %v12479_v0 = vmax.f32 %v14498_v58, %v14704_v6  ;;  %v14713_v50 = vrot.slane %v14712_v57, 9  ;;  %v14715_v19 = vrot.slane %v14502_v4, 9  ;;  %v14717_v6 = vld [vmem:[#allocation60_spill] sm:$0xff] }
 0x7fe   :  { %v12484_v51 = vmax.f32 %v14706_v17, %v14707_v63  ;;  %v12489_v28 = vmax.f32 %v14709_v26, %v14710_v60  ;;  %v14720_v17 = vld [vmem:[#allocation64_spill] sm:$0xff]  ;;  %v14723_v26 = vld [vmem:[#allocation62_spill] sm:$0xff] }
 0x7ff   :  { %14703 = vst [vmem:[#allocation16_spill] sm:$0xff] %v12474_v29  ;;  %14705 = vst [vmem:[#allocation17_spill] sm:$0xff] %v12479_v0  ;;  %v12494_v49 = vmax.f32 %v14712_v57, %v14713_v50  ;;  %v12499_v58 = vmax.f32 %v14502_v4, %v14715_v19  ;;  %v14718_v0 = vrot.slane %v14717_v6, 9  ;;  %v14726_v57 = vld [vmem:[#allocation67_spill] sm:$0xff]  ;;  %v14880_v54 = vld [vmem:[#allocation40_spill] sm:$0xff] }
 0x800   :  { %14708 = vst [vmem:[#allocation27_spill] sm:$0xff] %v12484_v51  ;;  %14711 = vst [vmem:[#allocation23_spill] sm:$0xff] %v12489_v28  ;;  %v14721_v51 = vrot.slane %v14720_v17, 9  ;;  %v14724_v28 = vrot.slane %v14723_v26, 9  ;;  %v14729_v19 = vld [vmem:[#allocation63_spill] sm:$0xff] }
 0x801   :  { %14714 = vst [vmem:[#allocation28_spill] sm:$0xff] %v12494_v49  ;;  %14716 = vst [vmem:[#allocation36_spill] sm:$0xff] %v12499_v58  ;;  %v12504_v63 = vmax.f32 %v14717_v6, %v14718_v0  ;;  %v14727_v49 = vrot.slane %v14726_v57, 9  ;;  %v14730_v58 = vrot.slane %v14729_v19, 9  ;;  %v14732_v6 = vld [vmem:[#allocation68_spill] sm:$0xff]  ;;  %v14882_v30 = vld [vmem:[#allocation11_spill] sm:$0xff] }
 0x802   :  { %v12509_v60 = vmax.f32 %v14720_v17, %v14721_v51  ;;  %v12514_v50 = vmax.f32 %v14723_v26, %v14724_v28  ;;  %v14735_v17 = vld [vmem:[#allocation65_spill] sm:$0xff]  ;;  %v14738_v26 = vrot.slane %v14507_v31, 9 }
 0x803   :  { %14719 = vst [vmem:[#allocation47_spill] sm:$0xff] %v12504_v63  ;;  %v12519_v4 = vmax.f32 %v14726_v57, %v14727_v49  ;;  %v12524_v0 = vmax.f32 %v14729_v19, %v14730_v58  ;;  %v14733_v63 = vrot.slane %v14732_v6, 9  ;;  %v14740_v57 = vld [vmem:[#allocation66_spill] sm:$0xff]  ;;  %v14743_v19 = vrot.slane %v14509_v12, 9 }
 0x804   :  { %14722 = vst [vmem:[#allocation43_spill] sm:$0xff] %v12509_v60  ;;  %14725 = vst [vmem:[#allocation33_spill] sm:$0xff] %v12514_v50  ;;  %v14736_v60 = vrot.slane %v14735_v17, 9  ;;  %v12539_v49 = vmax.f32 %v14507_v31, %v14738_v26  ;;  %v14750_v26 = vld [vmem:[#allocation70_spill] sm:$0xff] }
 0x805   :  { %14728 = vst [vmem:[#allocation45_spill] sm:$0xff] %v12519_v4  ;;  %14731 = vst [vmem:[#allocation39_spill] sm:$0xff] %v12524_v0  ;;  %v12529_v51 = vmax.f32 %v14732_v6, %v14733_v63  ;;  %v14741_v4 = vrot.slane %v14740_v57, 9  ;;  %v12549_v63 = vmax.f32 %v14509_v12, %v14743_v19  ;;  %v14745_v6 = vld [vmem:[#allocation69_spill] sm:$0xff] }
 0x806   :  { %v12534_v28 = vmax.f32 %v14735_v17, %v14736_v60  ;;  %14739 = vst [vmem:[#allocation49_spill] sm:$0xff] %v12539_v49  ;;  %v14748_v17 = vrot.slane %v14510_v27, 9  ;;  %v14751_v49 = vrot.slane %v14750_v26, 9  ;;  %v14756_v19 = vld [vmem:[#allocation73_spill] sm:$0xff] }
 0x807   :  { %14734 = vst [vmem:[#allocation41_spill] sm:$0xff] %v12529_v51  ;;  %v12544_v58 = vmax.f32 %v14740_v57, %v14741_v4  ;;  %14744 = vst [vmem:[#allocation25_spill] sm:$0xff] %v12549_v63  ;;  %v14746_v51 = vrot.slane %v14745_v6, 9  ;;  %v14753_v57 = vld [vmem:[#allocation75_spill] sm:$0xff]  ;;  %v14757_v63 = vrot.slane %v14756_v19, 9 }
 0x808   :  { %14737 = vst [vmem:[#allocation48_spill] sm:$0xff] %v12534_v28  ;;  %v12559_v31 = vmax.f32 %v14510_v27, %v14748_v17  ;;  %v12564_v4 = vmax.f32 %v14750_v26, %v14751_v49  ;;  %v14761_v17 = vld [vmem:[#allocation76_spill] sm:$0xff] }
 0x809   :  { %14742 = vst [vmem:[#allocation13_spill] sm:$0xff] %v12544_v58  ;;  %v12554_v60 = vmax.f32 %v14745_v6, %v14746_v51  ;;  %v14754_v58 = vrot.slane %v14753_v57, 9  ;;  %v12574_v51 = vmax.f32 %v14756_v19, %v14757_v63  ;;  %v14759_v6 = vrot.slane %v14514_v22, 9  ;;  %v14764_v26 = vld [vmem:[#allocation80_spill] sm:$0xff]  ;;  %v14769_v19 = vld [vmem:[#allocation83_spill] sm:$0xff] }
 0x80a   :  { %14749 = vst [vmem:[#allocation64_spill] sm:$0xff] %v12559_v31  ;;  %14752 = vst [vmem:[#allocation62_spill] sm:$0xff] %v12564_v4  ;;  %v14762_v31 = vrot.slane %v14761_v17, 9  ;;  %v14765_v4 = vrot.slane %v14764_v26, 9  ;;  %v14892_v25 = vld [vmem:[#allocation47_spill] sm:$0xff] }
 0x80b   :  { %14747 = vst [vmem:[#allocation60_spill] sm:$0xff] %v12554_v60  ;;  %v12569_v12 = vmax.f32 %v14753_v57, %v14754_v58  ;;  %14758 = vst [vmem:[#allocation63_spill] sm:$0xff] %v12574_v51  ;;  %v12579_v27 = vmax.f32 %v14514_v22, %v14759_v6  ;;  %v14767_v57 = vld [vmem:[#allocation78_spill] sm:$0xff]  ;;  %v14770_v51 = vrot.slane %v14769_v19, 9  ;;  %v14772_v6 = vld [vmem:[#allocation79_spill] sm:$0xff] }
 0x80c   :  { %v12584_v49 = vmax.f32 %v14761_v17, %v14762_v31  ;;  %v12589_v58 = vmax.f32 %v14764_v26, %v14765_v4  ;;  %v14775_v17 = vld [vmem:[#allocation84_spill] sm:$0xff]  ;;  %v14778_v26 = vld [vmem:[#allocation81_spill] sm:$0xff] }
 0x80d   :  { %14755 = vst [vmem:[#allocation67_spill] sm:$0xff] %v12569_v12  ;;  %14760 = vst [vmem:[#allocation68_spill] sm:$0xff] %v12579_v27  ;;  %v14768_v12 = vrot.slane %v14767_v57, 9  ;;  %v12599_v22 = vmax.f32 %v14769_v19, %v14770_v51  ;;  %v14773_v27 = vrot.slane %v14772_v6, 9  ;;  %v14783_v19 = vld [vmem:[#allocation82_spill] sm:$0xff] }
 0x80e   :  { %14763 = vst [vmem:[#allocation65_spill] sm:$0xff] %v12584_v49  ;;  %14766 = vst [vmem:[#allocation66_spill] sm:$0xff] %v12589_v58  ;;  %v14776_v49 = vrot.slane %v14775_v17, 9  ;;  %v14779_v58 = vrot.slane %v14778_v26, 9  ;;  %v14898_v13 = vld [vmem:[#allocation25_spill] sm:$0xff] }
 0x80f   :  { %v12594_v63 = vmax.f32 %v14767_v57, %v14768_v12  ;;  %14771 = vst [vmem:[#allocation69_spill] sm:$0xff] %v12599_v22  ;;  %v12604_v31 = vmax.f32 %v14772_v6, %v14773_v27  ;;  %v14781_v57 = vrot.slane %v14519_v14, 9  ;;  %v14784_v22 = vrot.slane %v14783_v19, 9 }
 0x810   :  { %v12609_v4 = vmax.f32 %v14775_v17, %v14776_v49  ;;  %v12614_v12 = vmax.f32 %v14778_v26, %v14779_v58  ;;  %v14786_v6 = vrot.slane %v14521_v41, 9  ;;  %v14788_v17 = vld [vmem:[#allocation85_spill] sm:$0xff]  ;;  %v14791_v26 = vrot.slane %v14522_v9, 9 }
 0x811   :  { %14774 = vst [vmem:[#allocation70_spill] sm:$0xff] %v12604_v31  ;;  %v12619_v51 = vmax.f32 %v14519_v14, %v14781_v57  ;;  %v12624_v27 = vmax.f32 %v14783_v19, %v14784_v22  ;;  %v14793_v57 = vld [vmem:[#allocation86_spill] sm:$0xff]  ;;  %v14796_v19 = vld [vmem:[#allocation91_spill] sm:$0xff]  ;;  %v14897_v29 = vld [vmem:[#allocation13_spill] sm:$0xff] }
 0x812   :  { %14777 = vst [vmem:[#allocation75_spill] sm:$0xff] %v12609_v4  ;;  %14780 = vst [vmem:[#allocation73_spill] sm:$0xff] %v12614_v12  ;;  %v12629_v49 = vmax.f32 %v14521_v41, %v14786_v6  ;;  %v14789_v4 = vrot.slane %v14788_v17, 9  ;;  %v12639_v14 = vmax.f32 %v14522_v9, %v14791_v26  ;;  %v14799_v6 = vld [vmem:[#allocation89_spill] sm:$0xff]  ;;  %v14805_v26 = vld [vmem:[#allocation92_spill] sm:$0xff] }
 0x813   :  { %14782 = vst [vmem:[#allocation76_spill] sm:$0xff] %v12619_v51  ;;  %14785 = vst [vmem:[#allocation80_spill] sm:$0xff] %v12624_v27  ;;  %v14794_v51 = vrot.slane %v14793_v57, 9  ;;  %v14797_v27 = vrot.slane %v14796_v19, 9 }
 0x814   :  { %14787 = vst [vmem:[#allocation78_spill] sm:$0xff] %v12629_v49  ;;  %v12634_v58 = vmax.f32 %v14788_v17, %v14789_v4  ;;  %14792 = vst [vmem:[#allocation79_spill] sm:$0xff] %v12639_v14  ;;  %v14800_v49 = vrot.slane %v14799_v6, 9  ;;  %v14802_v17 = vld [vmem:[#allocation93_spill] sm:$0xff]  ;;  %v14806_v14 = vrot.slane %v14805_v26, 9 }
 0x815   :  { %v12644_v22 = vmax.f32 %v14793_v57, %v14794_v51  ;;  %v12649_v41 = vmax.f32 %v14796_v19, %v14797_v27  ;;  %v14807_v57 = vld [vmem:[#allocation96_spill] sm:$0xff]  ;;  %v14809_v19 = vld [vmem:[#allocation94_spill] sm:$0xff]  ;;  %v14904_v50 = vld [vmem:[#allocation65_spill] sm:$0xff] }
 0x816   :  { %14790 = vst [vmem:[#allocation83_spill] sm:$0xff] %v12634_v58  ;;  %v12654_v4 = vmax.f32 %v14799_v6, %v14800_v49  ;;  %v14803_v58 = vrot.slane %v14802_v17, 9  ;;  %v12664_v51 = vmax.f32 %v14805_v26, %v14806_v14  ;;  %v14811_v6 = vrot.slane %v14529_v38, 9 }
 0x817   :  { %14795 = vst [vmem:[#allocation84_spill] sm:$0xff] %v12644_v22  ;;  %14798 = vst [vmem:[#allocation81_spill] sm:$0xff] %v12649_v41  ;;  %v14808_v22 = vrot.slane %v14807_v57, 9  ;;  %v14810_v41 = vrot.slane %v14809_v19, 9  ;;  %v14815_v26 = vrot.slane %v14530_v11, 9 }
 0x818   :  { %14801 = vst [vmem:[#allocation82_spill] sm:$0xff] %v12654_v4  ;;  %v12659_v9 = vmax.f32 %v14802_v17, %v14803_v58  ;;  %v12679_v58 = vmax.f32 %v14529_v38, %v14811_v6  ;;  %v14812_v17 = vld [vmem:[#allocation95_spill] sm:$0xff]  ;;  %v14821_v6 = vrot.slane %v14532_v45, 9 }
 0x819   :  { %v12669_v27 = vmax.f32 %v14807_v57, %v14808_v22  ;;  %v12674_v49 = vmax.f32 %v14809_v19, %v14810_v41  ;;  %v12689_v22 = vmax.f32 %v14530_v11, %v14815_v26  ;;  %v14817_v57 = vrot.slane %v11933_v44, 9  ;;  %v14824_v26 = vld [vmem:[#allocation100_spill] sm:$0xff] }
 0x81a   :  { %14804 = vst [vmem:[#allocation85_spill] sm:$0xff] %v12659_v9  ;;  %v14813_v9 = vrot.slane %v14812_v17, 9  ;;  %v14819_v19 = vrot.slane %v14531_v43, 9  ;;  %v14908_v35 = vld [vmem:[#allocation76_spill] sm:$0xff] }
 0x81b   :  { %14816 = vst [vmem:[#allocation91_spill] sm:$0xff] %v12689_v22  ;;  %v12694_v41 = vmax.f32 %v11933_v44, %v14817_v57  ;;  %v14825_v22 = vrot.slane %v14824_v26, 9  ;;  %v14826_v57 = vrot.slane %v14535_v59, 9  ;;  %v14910_v0 = vld [vmem:[#allocation78_spill] sm:$0xff]  ;;  %v14912_v28 = vld [vmem:[#allocation79_spill] sm:$0xff] }
 0x81c   :  { %v12684_v14 = vmax.f32 %v14812_v17, %v14813_v9  ;;  %v12699_v38 = vmax.f32 %v14531_v43, %v14819_v19  ;;  %v12704_v9 = vmax.f32 %v14532_v45, %v14821_v6  ;;  %v14823_v17 = vrot.slane %v14533_v36, 9  ;;  %v14829_v6 = vld [vmem:[#allocation105_spill] sm:$0xff] }
 0x81d   :  { %14818 = vst [vmem:[#allocation89_spill] sm:$0xff] %v12694_v41  ;;  %v12714_v44 = vmax.f32 %v14824_v26, %v14825_v22  ;;  %v12719_v43 = vmax.f32 %v14535_v59, %v14826_v57  ;;  %v14828_v19 = vrot.slane %v14536_v3, 9  ;;  %v14832_v26 = vrot.slane %v14538_v32, 9  ;;  %v14833_v57 = vld [vmem:[#allocation106_spill] sm:$0xff]  ;;  %v14911_v8 = vld [vmem:[#allocation83_spill] sm:$0xff] }
 0x81e   :  { %14814 = vst [vmem:[#allocation86_spill] sm:$0xff] %v12684_v14  ;;  %14820 = vst [vmem:[#allocation93_spill] sm:$0xff] %v12699_v38  ;;  %v12709_v11 = vmax.f32 %v14533_v36, %v14823_v17  ;;  %v14831_v17 = vrot.slane %v11965_v16, 9  ;;  %v14913_v33 = vld [vmem:[#allocation84_spill] sm:$0xff]  ;;  %v14914_v39 = vld [vmem:[#allocation81_spill] sm:$0xff] }
 0x81f   :  { %14822 = vst [vmem:[#allocation92_spill] sm:$0xff] %v12704_v9  ;;  %14827 = vst [vmem:[#allocation96_spill] sm:$0xff] %v12719_v43  ;;  %v12724_v45 = vmax.f32 %v14536_v3, %v14828_v19  ;;  %v14830_v9 = vrot.slane %v14829_v6, 9  ;;  %v12739_v59 = vmax.f32 %v14538_v32, %v14832_v26  ;;  %v14834_v43 = vrot.slane %v14833_v57, 9 }
 0x820   :  { %v12734_v22 = vmax.f32 %v11965_v16, %v14831_v17  ;;  %v14836_v19 = vrot.slane %v11997_v61, 9  ;;  %v14839_v17 = vrot.slane %v12006_v15, 9  ;;  %v14841_v26 = vrot.slane %v11992_v18, 9 }
 0x821   :  { %v12729_v36 = vmax.f32 %v14829_v6, %v14830_v9  ;;  %v12744_v3 = vmax.f32 %v14833_v57, %v14834_v43  ;;  %v14837_v6 = vrot.slane %v11988_v24, 9  ;;  %v14842_v57 = vld [vmem:[#allocation108_spill] sm:$0xff] }
 0x822   :  { %v12749_v9 = vmax.f32 %v11997_v61, %v14836_v19  ;;  %v12759_v32 = vmax.f32 %v12006_v15, %v14839_v17  ;;  %v12764_v43 = vmax.f32 %v11992_v18, %v14841_v26  ;;  %v14844_v19 = vrot.slane %v12000_v48, 9  ;;  %v14847_v17 = vld [vmem:[#allocation5_spill] sm:$0xff]  ;;  %v14850_v26 = vld [vmem:[#allocation24_spill] sm:$0xff]  ;;  %v14881_v18 = vld [vmem:[#allocation35_spill] sm:$0xff] }
 0x823   :  { %14835 = vst [vmem:[#allocation94_spill] sm:$0xff] %v12744_v3  ;;  %v12754_v16 = vmax.f32 %v11988_v24, %v14837_v6  ;;  %v14843_v3 = vrot.slane %v14842_v57, 9  ;;  %v14845_v6 = vld [vmem:[#allocation109_spill] sm:$0xff]  ;;  %v14922_v41 = vrot.slane %v12144_v62, %v14847_v17  ;;  %v14924_v1 = vrot.slane %v12154_v23, %v14847_v17 }
 0x824   :  { %14840 = vst [vmem:[#allocation100_spill] sm:$0xff] %v12759_v32  ;;  %v12774_v24 = vmax.f32 %v12000_v48, %v14844_v19  ;;  %v14857_v48 = vld [vmem:[#allocation87_spill] sm:$0xff]  ;;  %v14905_v19 = vld [vmem:[#allocation66_spill] sm:$0xff]  ;;  %v14925_v40 = vrot.slane %v12184_v5, %v14847_v17  ;;  %v14926_v52 = vrot.slane %v12189_v46, %v14847_v17  ;;  %v14929_v23 = vrot.slane %v14856_v42, %v14847_v17 }
 0x825   :  { %14838 = vst [vmem:[#allocation95_spill] sm:$0xff] %v12754_v16  ;;  %v12769_v61 = vmax.f32 %v14842_v57, %v14843_v3  ;;  %v14846_v16 = vrot.slane %v14845_v6, 9  ;;  %v14849_v3 = vld [vmem:[#allocation50_spill] sm:$0xff]  ;;  %v14868_v57 = vld [vmem:[#allocation15_spill] sm:$0xff]  ;;  %v14931_v46 = vrot.slane %v12159_v53, %v14847_v17  ;;  %v14935_v53 = vrot.slane %v12164_v21, %v14847_v17 }
 0x826   :  { %v14893_v32 = vld [vmem:[#allocation43_spill] sm:$0xff]  ;;  %v14917_v47 = vld [vmem:[#allocation92_spill] sm:$0xff]  ;;  %v6530_v62 = vsel %vm6516_vm11, %v14926_v52, %v14925_v40  ;;  %v14932_v40 = vrot.slane %v12194_v2, %v14847_v17 }
 0x827   :  { %v12779_v15 = vmax.f32 %v14845_v6, %v14846_v16  ;;  %v14869_v16 = vld [vmem:[#allocation54_spill] sm:$0xff]  ;;  %v14918_v12 = vld [vmem:[#allocation96_spill] sm:$0xff]  ;;  %v14923_v6 = vrot.slane %v12149_v37, %v14847_v17  ;;  %v14927_v37 = vrot.slane %v14849_v3, %v14847_v17  ;;  %v14933_v3 = vrot.slane %v12234_v55, %v14847_v17 }
 0x829   :  { %v6517_v60 = vsel %vm6516_vm11, %v14923_v6, %v14922_v41  ;;  %v14928_v41 = vrot.slane %v14850_v26, %v14847_v17  ;;  %v14934_v26 = vrot.slane %v12274_v20, %v14847_v17  ;;  %v14940_v20 = vrot.slane %v14858_v56, %v14847_v17 }
 0x82a   :  { %v14919_v31 = vld [vmem:[#allocation94_spill] sm:$0xff]  ;;  %v6519_v38 = vsel %vm6518_vm12, %v14924_v1, %v6517_v60  ;;  %v14930_v1 = vrot.slane %v14857_v48, %v14847_v17  ;;  %v6531_v60 = vsel %vm6518_vm12, %v14932_v40, %v6530_v62 }
 0x82b   :  { %v14921_v4 = vld [vmem:[#allocation100_spill] sm:$0xff]  ;;  %v6537_v6 = vsel %vm6516_vm11, %v14928_v41, %v14927_v37  ;;  %v6521_v52 = vsel %vm6520_vm13, %v14931_v46, %v6519_v38  ;;  %v14936_v37 = vld [vmem:[#allocation7_spill] sm:$0xff]  ;;  %v14938_v41 = vld [vmem:[#allocation6_spill] sm:$0xff] }
 0x82c   :  { %v14920_v14 = vld [vmem:[#allocation95_spill] sm:$0xff]  ;;  %v6544_v5 = vsel %vm6516_vm11, %v14930_v1, %v14929_v23  ;;  %v6538_v42 = vsel %vm6518_vm12, %v14933_v3, %v6537_v6  ;;  %v6523_v38 = vsel %vm6522_vm14, %v14935_v53, %v6521_v52  ;;  %v14937_v2 = vrot.slane %v14936_v37, %v14847_v17  ;;  %v14943_v46 = vld [vmem:[#allocation20_spill] sm:$0xff]  ;;  %v14949_v53 = vld [vmem:[#allocation37_spill] sm:$0xff] }
 0x82d   :  { %v6545_v48 = vsel %vm6518_vm12, %v14934_v26, %v6544_v5  ;;  %v14939_v55 = vrot.slane %v14938_v41, %v14847_v17  ;;  %v14941_v1 = vld [vmem:[#allocation31_spill] sm:$0xff]  ;;  %v14944_v52 = vrot.slane %v14943_v46, %v14847_v17  ;;  %v14947_v26 = vld [vmem:[#allocation90_spill] sm:$0xff]  ;;  %v14950_v37 = vrot.slane %v14949_v53, %v14847_v17 }
 0x82e   :  { %v6532_v62 = vsel %vm6520_vm13, %v14937_v2, %v6531_v60  ;;  %v6546_v23 = vsel %vm6520_vm13, %v14940_v20, %v6545_v48  ;;  %v14942_v21 = vrot.slane %v14941_v1, %v14847_v17  ;;  %v14945_v60 = vld [vmem:[#allocation61_spill] sm:$0xff]  ;;  %v14948_v56 = vrot.slane %v14947_v26, %v14847_v17  ;;  %v14955_v1 = vld [vmem:[#allocation98_spill] sm:$0xff]  ;;  %v14961_v26 = vld [vmem:[#allocation72_spill] sm:$0xff] }
 0x82f   :  { %v6539_v6 = vsel %vm6520_vm13, %v14939_v55, %v6538_v42  ;;  %v6533_v40 = vsel %vm6522_vm14, %v14944_v52, %v6532_v62  ;;  %v14946_v3 = vrot.slane %v14945_v60, %v14847_v17  ;;  %v14951_v2 = vld [vmem:[#allocation21_spill] sm:$0xff]  ;;  %v14953_v55 = vld [vmem:[#allocation71_spill] sm:$0xff]  ;;  %v14957_v46 = vld [vmem:[#allocation42_spill] sm:$0xff] }
 0x830   :  { %v6525_v5 = vsel %vm6524_vm15, %v14942_v21, %v6523_v38  ;;  %v6547_v48 = vsel %vm6522_vm14, %v14948_v56, %v6546_v23  ;;  %v14952_v41 = vrot.slane %v14951_v2, %v14847_v17  ;;  %v14954_v20 = vrot.slane %v14953_v55, %v14847_v17  ;;  %v14959_v60 = vld [vmem:[#allocation9_spill] sm:$0xff]  ;;  %v14963_v53 = vld [vmem:[#allocation99_spill] sm:$0xff]  ;;  %v14965_v2 = vld [vmem:[#allocation38_spill] sm:$0xff] }
 0x831   :  { %v6540_v42 = vsel %vm6522_vm14, %v14946_v3, %v6539_v6  ;;  %v6527_v38 = vsel %vm6526_vm0, %v14950_v37, %v6525_v5  ;;  %v14956_v21 = vrot.slane %v14955_v1, %v14847_v17  ;;  %v14958_v52 = vrot.slane %v14957_v46, %v14847_v17  ;;  %v14967_v55 = vld [vmem:[#allocation74_spill] sm:$0xff]  ;;  %v14971_v46 = vld [vmem:[#allocation97_spill] sm:$0xff] }
 0x832   :  { %v6534_v62 = vsel %vm6524_vm15, %v14952_v41, %v6533_v40  ;;  %v6541_v6 = vsel %vm6524_vm15, %v14954_v20, %v6540_v42  ;;  %v14960_v3 = vrot.slane %v14959_v60, %v14847_v17  ;;  %v14962_v56 = vrot.slane %v14961_v26, %v14847_v17  ;;  %v14969_v1 = vld [vmem:[#allocation102_spill] sm:$0xff]  ;;  %v14973_v60 = vld [vmem:[#allocation103_spill] sm:$0xff] }
 0x833   :  { %v6548_v23 = vsel %vm6524_vm15, %v14956_v21, %v6547_v48  ;;  %v6529_v5 = vsel %vm6528_vm1, %v14958_v52, %v6527_v38  ;;  %v14964_v37 = vrot.slane %v14963_v53, %v14847_v17  ;;  %v14966_v41 = vrot.slane %v14965_v2, %v14847_v17 }
 0x834   :  { %v6535_v40 = vsel %vm6526_vm0, %v14960_v3, %v6534_v62  ;;  %v6542_v42 = vsel %vm6526_vm0, %v14962_v56, %v6541_v6  ;;  %v14968_v20 = vrot.slane %v14967_v55, %v14847_v17  ;;  %v14970_v21 = vrot.slane %v14969_v1, %v14847_v17  ;;  %6651 = vst.msk [vmem:[%s13601_s4] sm:$0xff] %vm4022_vm10, %v6529_v5 }
 0x835   :  { %v6549_v48 = vsel %vm6526_vm0, %v14964_v37, %v6548_v23  ;;  %v6536_v38 = vsel %vm6528_vm1, %v14966_v41, %v6535_v40  ;;  %v14972_v52 = vrot.slane %v14971_v46, %v14847_v17  ;;  %v14974_v23 = vrot.slane %v14973_v60, %v14847_v17  ;;  %v14975_v40 = vld [vmem:[#allocation104_spill] sm:$0xff]  ;;  %v14990_v46 = vld [vmem:[#allocation107_spill] sm:$0xff] }
 0x836   :  { %v6543_v62 = vsel %vm6528_vm1, %v14968_v20, %v6542_v42  ;;  %v6550_v6 = vsel %vm6528_vm1, %v14970_v21, %v6549_v48  ;;  %v14976_v26 = vrot.slane %v14975_v40, %v14847_v17  ;;  %v14977_v42 = vrot.slane %v14868_v57, %v14847_v17  ;;  %6652 = vst.msk [vmem:[%s13601_s4 + $0x8] sm:$0xff] %vm4022_vm10, %v6536_v38  ;;  %v14987_v20 = vld [vmem:[#allocation19_spill] sm:$0xff] }
 0x837   :  { %v6551_v3 = vsel %vm6516_vm11, %v14974_v23, %v14972_v52  ;;  %v14978_v53 = vrot.slane %v14869_v16, %v14847_v17  ;;  %v14979_v48 = vrot.slane %v14873_v10, %v14847_v17  ;;  %v14980_v2 = vrot.slane %v14874_v34, %v14847_v17  ;;  %6653 = vst.msk [vmem:[%s13601_s4 + $0x10] sm:$0xff] %vm4022_vm10, %v6543_v62  ;;  %v14983_v34 = vld [vmem:[#allocation101_spill] sm:$0xff] }
 0x838   :  { %v6552_v56 = vsel %vm6518_vm12, %v14976_v26, %v6551_v3  ;;  %v14981_v41 = vrot.slane %v14880_v54, %v14847_v17  ;;  %v14982_v55 = vrot.slane %v14881_v18, %v14847_v17  ;;  %6654 = vst.msk [vmem:[%s13601_s4 + $0x18] sm:$0xff] %vm4022_vm10, %v6550_v6  ;;  %v14984_v10 = vrot.slane %v14983_v34, %v14847_v17  ;;  %v14985_v18 = vld [vmem:[#allocation18_spill] sm:$0xff]  ;;  %v14992_v23 = vld [vmem:[#allocation29_spill] sm:$0xff] }
 0x839   :  { %v6558_v37 = vsel %vm6516_vm11, %v14978_v53, %v14977_v42  ;;  %v6565_v5 = vsel %vm6516_vm11, %v14980_v2, %v14979_v48  ;;  %v14986_v16 = vrot.slane %v14985_v18, %v14847_v17  ;;  %v14988_v1 = vrot.slane %v14987_v20, %v14847_v17  ;;  %v14994_v26 = vld [vmem:[#allocation34_spill] sm:$0xff] }
 0x83a   :  { %v6572_v57 = vsel %vm6516_vm11, %v14982_v55, %v14981_v41  ;;  %v6553_v54 = vsel %vm6520_vm13, %v14984_v10, %v6552_v56  ;;  %v14989_v21 = vrot.slane %v12434_v7, %v14847_v17  ;;  %v14991_v52 = vrot.slane %v14990_v46, %v14847_v17 }
 0x83b   :  { %v6559_v38 = vsel %vm6518_vm12, %v14986_v16, %v6558_v37  ;;  %v6566_v62 = vsel %vm6518_vm12, %v14988_v1, %v6565_v5  ;;  %v14993_v3 = vrot.slane %v14992_v23, %v14847_v17  ;;  %v14995_v56 = vrot.slane %v14994_v26, %v14847_v17  ;;  %v14997_v37 = vld [vmem:[#allocation52_spill] sm:$0xff]  ;;  %v14999_v5 = vld [vmem:[#allocation30_spill] sm:$0xff]  ;;  %v15005_v16 = vld [vmem:[#allocation57_spill] sm:$0xff] }
 0x83c   :  { %v6573_v6 = vsel %vm6518_vm12, %v14989_v21, %v6572_v57  ;;  %v6554_v60 = vsel %vm6522_vm14, %v14991_v52, %v6553_v54  ;;  %v14996_v7 = vrot.slane %v14882_v30, %v14847_v17  ;;  %v14998_v48 = vrot.slane %v14997_v37, %v14847_v17  ;;  %v15001_v57 = vld [vmem:[#allocation22_spill] sm:$0xff]  ;;  %v15003_v54 = vld [vmem:[#allocation44_spill] sm:$0xff]  ;;  %v15007_v1 = vld [vmem:[#allocation55_spill] sm:$0xff] }
 0x83d   :  { %v6560_v40 = vsel %vm6520_vm13, %v14993_v3, %v6559_v38  ;;  %v6567_v42 = vsel %vm6520_vm13, %v14995_v56, %v6566_v62  ;;  %v15000_v41 = vrot.slane %v14999_v5, %v14847_v17  ;;  %v15002_v34 = vrot.slane %v15001_v57, %v14847_v17  ;;  %v15017_v37 = vld [vmem:[#allocation32_spill] sm:$0xff]  ;;  %v15019_v5 = vld [vmem:[#allocation51_spill] sm:$0xff]  ;;  %v15021_v57 = vld [vmem:[#allocation26_spill] sm:$0xff] }
 0x83e   :  { %v6574_v53 = vsel %vm6520_vm13, %v14996_v7, %v6573_v6  ;;  %v6555_v2 = vsel %vm6524_vm15, %v14998_v48, %v6554_v60  ;;  %v15004_v30 = vrot.slane %v15003_v54, %v14847_v17  ;;  %v15006_v38 = vrot.slane %v15005_v16, %v14847_v17  ;;  %v15009_v6 = vld [vmem:[#allocation58_spill] sm:$0xff]  ;;  %v15011_v60 = vld [vmem:[#allocation12_spill] sm:$0xff] }
 0x83f   :  { %v6561_v55 = vsel %vm6522_vm14, %v15000_v41, %v6560_v40  ;;  %v6568_v10 = vsel %vm6522_vm14, %v15002_v34, %v6567_v42  ;;  %v15008_v62 = vrot.slane %v15007_v1, %v14847_v17  ;;  %v15010_v46 = vrot.slane %v15009_v6, %v14847_v17  ;;  %v15013_v40 = vld [vmem:[#allocation56_spill] sm:$0xff]  ;;  %v15023_v54 = vld [vmem:[#allocation46_spill] sm:$0xff] }
 0x840   :  { %v6575_v18 = vsel %vm6522_vm14, %v15004_v30, %v6574_v53  ;;  %v6556_v20 = vsel %vm6526_vm0, %v15006_v38, %v6555_v2  ;;  %v15012_v23 = vrot.slane %v15011_v60, %v14847_v17  ;;  %v15014_v26 = vrot.slane %v15013_v40, %v14847_v17  ;;  %v15015_v42 = vld [vmem:[#allocation4_spill] sm:$0xff]  ;;  %v15025_v16 = vld [vmem:[#allocation14_spill] sm:$0xff] }
 0x841   :  { %v6562_v21 = vsel %vm6524_vm15, %v15008_v62, %v6561_v55  ;;  %v6569_v52 = vsel %vm6524_vm15, %v15010_v46, %v6568_v10  ;;  %v15016_v7 = vrot.slane %v15015_v42, %v14847_v17  ;;  %v15018_v48 = vrot.slane %v15017_v37, %v14847_v17  ;;  %v15027_v1 = vld [vmem:[#allocation8_spill] sm:$0xff] }
 0x842   :  { %v6576_v3 = vsel %vm6524_vm15, %v15012_v23, %v6575_v18  ;;  %v6557_v56 = vsel %vm6528_vm1, %v15014_v26, %v6556_v20  ;;  %v15020_v41 = vrot.slane %v15019_v5, %v14847_v17  ;;  %v15022_v34 = vrot.slane %v15021_v57, %v14847_v17 }
 0x843   :  { %v6563_v53 = vsel %vm6526_vm0, %v15016_v7, %v6562_v21  ;;  %v6570_v2 = vsel %vm6526_vm0, %v15018_v48, %v6569_v52  ;;  %v15024_v30 = vrot.slane %v15023_v54, %v14847_v17  ;;  %v15026_v38 = vrot.slane %v15025_v16, %v14847_v17  ;;  %v15029_v21 = vld [vmem:[#allocation10_spill] sm:$0xff]  ;;  %6655 = vst.msk [vmem:[%s13601_s4 + $0x20] sm:$0xff] %vm4022_vm10, %v6557_v56  ;;  %v15031_v52 = vld [vmem:[#allocation16_spill] sm:$0xff] }
 0x844   :  { %v6577_v55 = vsel %vm6526_vm0, %v15020_v41, %v6576_v3  ;;  %v6564_v10 = vsel %vm6528_vm1, %v15022_v34, %v6563_v53  ;;  %v15028_v62 = vrot.slane %v15027_v1, %v14847_v17  ;;  %v15030_v6 = vrot.slane %v15029_v21, %v14847_v17  ;;  %v15046_v34 = vld [vmem:[#allocation27_spill] sm:$0xff] }
 0x845   :  { %v6571_v18 = vsel %vm6528_vm1, %v15024_v30, %v6570_v2  ;;  %v6578_v20 = vsel %vm6528_vm1, %v15026_v38, %v6577_v55  ;;  %v15032_v60 = vrot.slane %v15031_v52, %v14847_v17  ;;  %v15033_v3 = vrot.slane %v14892_v25, %v14847_v17  ;;  %6656 = vst.msk [vmem:[%s13601_s4 + $0x28] sm:$0xff] %vm4022_vm10, %v6564_v10  ;;  %v15043_v2 = vld [vmem:[#allocation60_spill] sm:$0xff]  ;;  %v15048_v30 = vld [vmem:[#allocation45_spill] sm:$0xff] }
 0x846   :  { %v6579_v46 = vsel %vm6516_vm11, %v15030_v6, %v15028_v62  ;;  %v15034_v40 = vrot.slane %v14893_v32, %v14847_v17  ;;  %v15035_v42 = vrot.slane %v14897_v29, %v14847_v17  ;;  %v15036_v7 = vrot.slane %v14898_v13, %v14847_v17  ;;  %6657 = vst.msk [vmem:[%s13601_s4 + $0x30] sm:$0xff] %vm4022_vm10, %v6571_v18  ;;  %v15039_v13 = vld [vmem:[#allocation17_spill] sm:$0xff]  ;;  %v15050_v38 = vld [vmem:[#allocation64_spill] sm:$0xff]  ;;  %v15054_v6 = vld [vmem:[#allocation23_spill] sm:$0xff] }
 0x847   :  { %v6580_v23 = vsel %vm6518_vm12, %v15032_v60, %v6579_v46  ;;  %v15037_v53 = vrot.slane %v14904_v50, %v14847_v17  ;;  %v15038_v37 = vrot.slane %v14905_v19, %v14847_v17  ;;  %6658 = vst.msk [vmem:[%s13601_s4 + $0x38] sm:$0xff] %vm4022_vm10, %v6578_v20  ;;  %v15040_v29 = vrot.slane %v15039_v13, %v14847_v17  ;;  %v15041_v32 = vld [vmem:[#allocation33_spill] sm:$0xff]  ;;  %v15056_v60 = vld [vmem:[#allocation39_spill] sm:$0xff] }
 0x848   :  { %v6586_v26 = vsel %vm6516_vm11, %v15034_v40, %v15033_v3  ;;  %v6593_v56 = vsel %vm6516_vm11, %v15036_v7, %v15035_v42  ;;  %v15042_v19 = vrot.slane %v15041_v32, %v14847_v17  ;;  %v15044_v5 = vrot.slane %v15043_v2, %v14847_v17  ;;  %v15052_v62 = vld [vmem:[#allocation69_spill] sm:$0xff]  ;;  %v15058_v40 = vld [vmem:[#allocation62_spill] sm:$0xff] }
 0x849   :  { %v6600_v25 = vsel %vm6516_vm11, %v15038_v37, %v15037_v53  ;;  %v6581_v50 = vsel %vm6520_vm13, %v15040_v29, %v6580_v23  ;;  %v15045_v55 = vrot.slane %v12594_v63, %v14847_v17  ;;  %v15047_v10 = vrot.slane %v15046_v34, %v14847_v17  ;;  %v15060_v7 = vld [vmem:[#allocation70_spill] sm:$0xff]  ;;  %v15062_v37 = vld [vmem:[#allocation28_spill] sm:$0xff]  ;;  %v15064_v29 = vld [vmem:[#allocation41_spill] sm:$0xff] }
 0x84a   :  { %v6587_v48 = vsel %vm6518_vm12, %v15042_v19, %v6586_v26  ;;  %v6594_v41 = vsel %vm6518_vm12, %v15044_v5, %v6593_v56  ;;  %v15049_v18 = vrot.slane %v15048_v30, %v14847_v17  ;;  %v15051_v20 = vrot.slane %v15050_v38, %v14847_v17  ;;  %v15066_v19 = vld [vmem:[#allocation67_spill] sm:$0xff] }
 0x84b   :  { %v6601_v57 = vsel %vm6518_vm12, %v15045_v55, %v6600_v25  ;;  %v6582_v54 = vsel %vm6522_vm14, %v15047_v10, %v6581_v50  ;;  %v15053_v63 = vrot.slane %v15052_v62, %v14847_v17  ;;  %v15055_v46 = vrot.slane %v15054_v6, %v14847_v17  ;;  %v15068_v5 = vld [vmem:[#allocation75_spill] sm:$0xff] }
 0x84c   :  { %v6588_v16 = vsel %vm6520_vm13, %v15049_v18, %v6587_v48  ;;  %v6595_v1 = vsel %vm6520_vm13, %v15051_v20, %v6594_v41  ;;  %v15057_v23 = vrot.slane %v15056_v60, %v14847_v17  ;;  %v15059_v26 = vrot.slane %v15058_v40, %v14847_v17 }
 0x84d   :  { %v6602_v21 = vsel %vm6520_vm13, %v15053_v63, %v6601_v57  ;;  %v6583_v52 = vsel %vm6524_vm15, %v15055_v46, %v6582_v54  ;;  %v15061_v56 = vrot.slane %v15060_v7, %v14847_v17  ;;  %v15063_v25 = vrot.slane %v15062_v37, %v14847_v17  ;;  %v15070_v57 = vld [vmem:[#allocation36_spill] sm:$0xff] }
 0x84e   :  { %v6589_v3 = vsel %vm6522_vm14, %v15057_v23, %v6588_v16  ;;  %v6596_v42 = vsel %vm6522_vm14, %v15059_v26, %v6595_v1  ;;  %v15065_v50 = vrot.slane %v15064_v29, %v14847_v17  ;;  %v15067_v48 = vrot.slane %v15066_v19, %v14847_v17  ;;  %v15072_v54 = vld [vmem:[#allocation48_spill] sm:$0xff]  ;;  %v15074_v16 = vld [vmem:[#allocation63_spill] sm:$0xff]  ;;  %v15076_v1 = vld [vmem:[#allocation73_spill] sm:$0xff] }
 0x84f   :  { %v6603_v53 = vsel %vm6522_vm14, %v15061_v56, %v6602_v21  ;;  %v6584_v13 = vsel %vm6526_vm0, %v15063_v25, %v6583_v52  ;;  %v15069_v41 = vrot.slane %v15068_v5, %v14847_v17  ;;  %v15071_v34 = vrot.slane %v15070_v57, %v14847_v17  ;;  %v15078_v21 = vld [vmem:[#allocation49_spill] sm:$0xff]  ;;  %v15080_v52 = vld [vmem:[#allocation68_spill] sm:$0xff] }
 0x850   :  { %v6590_v32 = vsel %vm6524_vm15, %v15065_v50, %v6589_v3  ;;  %v6597_v2 = vsel %vm6524_vm15, %v15067_v48, %v6596_v42  ;;  %v15073_v30 = vrot.slane %v15072_v54, %v14847_v17  ;;  %v15075_v38 = vrot.slane %v15074_v16, %v14847_v17  ;;  %v15083_v26 = vld [vmem:[#allocation80_spill] sm:$0xff]  ;;  %v15106_v16 = vld [vmem:[#allocation82_spill] sm:$0xff] }
 0x851   :  { %v6604_v55 = vsel %vm6524_vm15, %v15069_v41, %v6603_v53  ;;  %v6585_v10 = vsel %vm6528_vm1, %v15071_v34, %v6584_v13  ;;  %v15077_v62 = vrot.slane %v15076_v1, %v14847_v17  ;;  %v15079_v6 = vrot.slane %v15078_v21, %v14847_v17 }
 0x852   :  { %v6591_v18 = vsel %vm6526_vm0, %v15073_v30, %v6590_v32  ;;  %v6598_v20 = vsel %vm6526_vm0, %v15075_v38, %v6597_v2  ;;  %v15081_v60 = vrot.slane %v15080_v52, %v14847_v17  ;;  %v15082_v3 = vrot.slane %v14908_v35, %v14847_v17  ;;  %6659 = vst.msk [vmem:[%s13601_s4 + $0x40] sm:$0xff] %vm4022_vm10, %v6585_v10  ;;  %v15102_v10 = vld [vmem:[#allocation86_spill] sm:$0xff] }
 0x853   :  { %v6605_v63 = vsel %vm6526_vm0, %v15077_v62, %v6604_v55  ;;  %v6592_v46 = vsel %vm6528_vm1, %v15079_v6, %v6591_v18  ;;  %v15084_v42 = vrot.slane %v15083_v26, %v14847_v17  ;;  %v15085_v7 = vrot.slane %v14910_v0, %v14847_v17  ;;  %v15112_v6 = vld [vmem:[#allocation85_spill] sm:$0xff] }
 0x854   :  { %v6599_v23 = vsel %vm6528_vm1, %v15081_v60, %v6598_v20  ;;  %v6606_v40 = vsel %vm6528_vm1, %v15082_v3, %v6605_v63  ;;  %v15086_v53 = vrot.slane %v14911_v8, %v14847_v17  ;;  %v15087_v37 = vrot.slane %v12664_v51, %v14847_v17  ;;  %6660 = vst.msk [vmem:[%s13601_s4 + $0x48] sm:$0xff] %vm4022_vm10, %v6592_v46  ;;  %v15108_v20 = vld [vmem:[#allocation91_spill] sm:$0xff]  ;;  %v15114_v60 = vld [vmem:[#allocation89_spill] sm:$0xff] }
 0x855   :  { %v6607_v56 = vsel %vm6516_vm11, %v15085_v7, %v15084_v42  ;;  %v15088_v25 = vrot.slane %v12669_v27, %v14847_v17  ;;  %v15089_v13 = vrot.slane %v14917_v47, %v14847_v17  ;;  %v15090_v29 = vrot.slane %v12709_v11, %v14847_v17  ;;  %6661 = vst.msk [vmem:[%s13601_s4 + $0x50] sm:$0xff] %vm4022_vm10, %v6599_v23  ;;  %v15118_v42 = vld [vmem:[#allocation93_spill] sm:$0xff] }
 0x856   :  { %v6608_v35 = vsel %vm6518_vm12, %v15086_v53, %v6607_v56  ;;  %v15091_v8 = vrot.slane %v14919_v31, %v14847_v17  ;;  %v15092_v32 = vrot.slane %v12749_v9, %v14847_v17  ;;  %6662 = vst.msk [vmem:[%s13601_s4 + $0x58] sm:$0xff] %vm4022_vm10, %v6606_v40  ;;  %v15093_v47 = vrot.slane %v14912_v28, %v14847_v17 }
 0x857   :  { %v6614_v0 = vsel %vm6516_vm11, %v15088_v25, %v15087_v37  ;;  %v6621_v50 = vsel %vm6516_vm11, %v15090_v29, %v15089_v13  ;;  %v15094_v27 = vrot.slane %v12674_v49, %v14847_v17  ;;  %v15095_v9 = vrot.slane %v12714_v44, %v14847_v17 }
 0x858   :  { %v6628_v51 = vsel %vm6516_vm11, %v15092_v32, %v15091_v8  ;;  %v6609_v31 = vsel %vm6520_vm13, %v15093_v47, %v6608_v35  ;;  %v15096_v48 = vrot.slane %v14920_v14, %v14847_v17  ;;  %v15097_v28 = vrot.slane %v14913_v33, %v14847_v17 }
 0x859   :  { %v6615_v11 = vsel %vm6518_vm12, %v15094_v27, %v6614_v0  ;;  %v6622_v19 = vsel %vm6518_vm12, %v15095_v9, %v6621_v50  ;;  %v15098_v49 = vrot.slane %v12679_v58, %v14847_v17  ;;  %v15099_v44 = vrot.slane %v14918_v12, %v14847_v17 }
 0x85a   :  { %v6629_v2 = vsel %vm6518_vm12, %v15096_v48, %v6628_v51  ;;  %v6610_v5 = vsel %vm6522_vm14, %v15097_v28, %v6609_v31  ;;  %v15100_v14 = vrot.slane %v14921_v4, %v14847_v17  ;;  %v15101_v33 = vrot.slane %v14914_v39, %v14847_v17 }
 0x85b   :  { %v6616_v41 = vsel %vm6520_vm13, %v15098_v49, %v6615_v11  ;;  %v6623_v55 = vsel %vm6520_vm13, %v15099_v44, %v6622_v19  ;;  %v15103_v58 = vrot.slane %v15102_v10, %v14847_v17  ;;  %v15104_v12 = vrot.slane %v12724_v45, %v14847_v17 }
 0x85c   :  { %v6630_v57 = vsel %vm6520_vm13, %v15100_v14, %v6629_v2  ;;  %v6611_v34 = vsel %vm6524_vm15, %v15101_v33, %v6610_v5  ;;  %v15105_v4 = vrot.slane %v12764_v43, %v14847_v17  ;;  %v15107_v39 = vrot.slane %v15106_v16, %v14847_v17 }
 0x85d   :  { %v6617_v54 = vsel %vm6522_vm14, %v15103_v58, %v6616_v41  ;;  %v6624_v30 = vsel %vm6522_vm14, %v15104_v12, %v6623_v55  ;;  %v15109_v1 = vrot.slane %v15108_v20, %v14847_v17  ;;  %v15110_v45 = vrot.slane %v12729_v36, %v14847_v17 }
 0x85e   :  { %v6631_v18 = vsel %vm6522_vm14, %v15105_v4, %v6630_v57  ;;  %v6612_v38 = vsel %vm6526_vm0, %v15107_v39, %v6611_v34  ;;  %v15111_v43 = vrot.slane %v12769_v61, %v14847_v17  ;;  %v15113_v46 = vrot.slane %v15112_v6, %v14847_v17 }
 0x85f   :  { %v6618_v62 = vsel %vm6524_vm15, %v15109_v1, %v6617_v54  ;;  %v6625_v63 = vsel %vm6524_vm15, %v15110_v45, %v6624_v30  ;;  %v15115_v23 = vrot.slane %v15114_v60, %v14847_v17  ;;  %v15116_v36 = vrot.slane %v12734_v22, %v14847_v17 }
 0x860   :  { %v6632_v21 = vsel %vm6524_vm15, %v15111_v43, %v6631_v18  ;;  %v6613_v52 = vsel %vm6528_vm1, %v15113_v46, %v6612_v38  ;;  %v15117_v61 = vrot.slane %v12774_v24, %v14847_v17  ;;  %v15119_v7 = vrot.slane %v15118_v42, %v14847_v17 }
 0x861   :  { %v6619_v3 = vsel %vm6526_vm0, %v15115_v23, %v6618_v62  ;;  %v6626_v40 = vsel %vm6526_vm0, %v15116_v36, %v6625_v63  ;;  %v15120_v53 = vrot.slane %v12739_v59, %v14847_v17  ;;  %v15121_v22 = vrot.slane %v12779_v15, %v14847_v17  ;;  %6663 = vst.msk [vmem:[%s13601_s4 + $0x60] sm:$0xff] %vm4022_vm10, %v6613_v52 }
 0x862   :  { %v6633_v26 = vsel %vm6526_vm0, %v15117_v61, %v6632_v21  ;;  %v6620_v56 = vsel %vm6528_vm1, %v15119_v7, %v6619_v3 }
 0x863   :  { %v6627_v35 = vsel %vm6528_vm1, %v15120_v53, %v6626_v40  ;;  %v6634_v37 = vsel %vm6528_vm1, %v15121_v22, %v6633_v26  ;;  %6664 = vst.msk [vmem:[%s13601_s4 + $0x68] sm:$0xff] %vm4022_vm10, %v6620_v56 }
 0x864   :  { %6665 = vst.msk [vmem:[%s13601_s4 + $0x70] sm:$0xff] %vm4022_vm10, %v6627_v35  ;;  %6666 = vst.msk [vmem:[%s13601_s4 + $0x78] sm:$0xff] %vm4022_vm10, %v6634_v37 }

</bundles_post_ra>
